<compile_context>
chip_gen: v5e
topology: v5e:2x2
jax: 0.10.0
libtpu: 0.0.40
codegen_flags: <defaults>
</compile_context>

<pallas_src>
import functools

import jax
import jax.numpy as jnp
from jax import lax
from jax.experimental import pallas as pl
from jax.experimental.pallas import tpu as pltpu

EPS = 1e-5
C_IN = 200          # fixed by the module definition
C_PAD = 256         # lane-dense channel count (multiple of 128)
PAD_MAX = 3         # max H-padding over the three convs (7x1 conv -> pad 3)


def _l3_fused_kernel(x_ref, w1_ref, w2_ref, w3_ref,
                     g1_ref, b1_ref, g2_ref, b2_ref, g3_ref, b3_ref,
                     o_ref, buf_ref, *, H, R):
    """x_ref:   (H*R, Cp) f32, rows ordered h*R + (n*W + w), channels padded.
       w*_ref:  (K*Cp, Cp) conv weights, row = kh*Cp + cin, col = cout (MXU dtype).
       g/b*_ref:(1, Cp) f32 BN gamma / beta (zero in padded channels).
       buf_ref: (Hp*R, Cp) MXU-dtype VMEM scratch, H-padded activation buffer."""
    HR = H * R
    C = x_ref.shape[-1]
    ctr = PAD_MAX * R                       # first "valid" row in buf_ref

    def conv_bn(w_ref, g_ref, b_ref, K, pad):
        # K per-tap matmuls on sublane-aligned shifted slabs of the padded
        # buffer, accumulated in f32 (MRB-accumulated on v7x).
        acc = None
        for kh in range(K):                               # static K (7 or 3)
            start = (PAD_MAX - pad + kh) * R              # multiple of R
            t = jnp.dot(buf_ref[pl.ds(start, HR), :],
                        w_ref[pl.ds(kh * C, C), :],
                        preferred_element_type=jnp.float32)
            acc = t if acc is None else acc + t
        # Training-mode BatchNorm over all HR valid rows; shifted two-pass
        # variance (centered values are needed for the normalize anyway).
        # Conv bias dropped: a per-channel constant is cancelled exactly by
        # the batch-mean subtraction.
        m = jnp.mean(acc, axis=0, keepdims=True)
        d = acc - m
        v = jnp.mean(d * d, axis=0, keepdims=True)
        return d * lax.rsqrt(v + EPS) * g_ref[...] + b_ref[...]

    # Zero ONLY the pad rows (top / bottom PAD_MAX*R); center rows are
    # overwritten right away and on every stage.
    zpad = jnp.zeros((PAD_MAX * R, C), buf_ref.dtype)
    buf_ref[pl.ds(0, PAD_MAX * R), :] = zpad
    buf_ref[pl.ds(ctr + HR, PAD_MAX * R), :] = zpad
    buf_ref[pl.ds(ctr, HR), :] = x_ref[...].astype(buf_ref.dtype)

    # stage 1: conv 7x1 + BN + ReLU
    y = jnp.maximum(conv_bn(w1_ref, g1_ref, b1_ref, K=7, pad=3), 0.0)
    buf_ref[pl.ds(ctr, HR), :] = y.astype(buf_ref.dtype)
    # stage 2: conv 3x1 + BN + ReLU
    y = jnp.maximum(conv_bn(w2_ref, g2_ref, b2_ref, K=3, pad=1), 0.0)
    buf_ref[pl.ds(ctr, HR), :] = y.astype(buf_ref.dtype)
    # stage 3: conv 3x1 + BN, residual add (re-read x_ref, VMEM-resident),
    # final ReLU.
    y = conv_bn(w3_ref, g3_ref, b3_ref, K=3, pad=1)
    o_ref[...] = jnp.maximum(y + x_ref[...], 0.0).astype(o_ref.dtype)


def _prep_weight(w, mxu_dtype):
    """PyTorch OIHW (O, I, K, 1) -> padded per-tap layout (K*C_PAD, C_PAD)."""
    O, I, K, _ = w.shape
    wk = jnp.transpose(w[:, :, :, 0], (2, 1, 0))                  # (K, I, O)
    wk = jnp.pad(wk, ((0, 0), (0, C_PAD - I), (0, C_PAD - O)))
    return wk.reshape(K * C_PAD, C_PAD).astype(mxu_dtype)


def _prep_vec(v):
    """(C,) -> (1, C_PAD), zero-padded (padded channels produce zeros)."""
    return jnp.pad(v, (0, C_PAD - v.shape[0])).reshape(1, C_PAD).astype(jnp.float32)


def prepare_params(raw, mxu_dtype=jnp.bfloat16):
    """One-time parameter repack: pad channels, stack taps, drop conv biases.
    mxu_dtype=bf16 is the production default (f32 accumulate); pass f32 for
    bit-for-bit validation against the f32 reference."""
    p = {}
    for i in (1, 2, 3):
        p[f"w{i}"] = _prep_weight(raw[f"w{i}"], mxu_dtype)
        p[f"g{i}"] = _prep_vec(raw[f"g{i}"])
        p[f"bt{i}"] = _prep_vec(raw[f"bt{i}"])
        # raw[f"b{i}"] (conv bias) intentionally unused: train-mode BN
        # subtracts the batch mean, which cancels any per-channel constant.
    return p


def l3block_forward(x, p):
    """x: (N, C=200, H, W) float32, NCHW (PyTorch convention)."""
    N, C, H, W = x.shape
    assert C == C_IN
    R = N * W
    HR = H * R
    Hp = H + 2 * PAD_MAX
    mxu_dtype = p["w1"].dtype
    itemsize = jnp.dtype(mxu_dtype).itemsize
    sublane = 32 // itemsize          # 8 rows/sublane-tile for f32, 16 for bf16
    # Tap shifts are (PAD_MAX - pad + kh)*R; they are sublane-aligned slices
    # only when R is a multiple of the sublane count.
    assert R % sublane == 0, f"N*W={R} must be a multiple of {sublane}"

    # Layout glue: NCHW -> (H, N, W, C) -> (H*R, C) -> lane-dense (H*R, 256).
    # TODO(synk): for production, keep the surrounding network channels-last
    # (or fold this gather into a row-tiled BlockSpec index_map) so these two
    # HBM-side transposes disappear from the per-call path.
    xr = jnp.transpose(x, (2, 0, 3, 1)).reshape(HR, C)
    xr = jnp.pad(xr, ((0, 0), (0, C_PAD - C))).astype(jnp.float32)

    inputs = [xr, p["w1"], p["w2"], p["w3"],
              p["g1"], p["bt1"], p["g2"], p["bt2"], p["g3"], p["bt3"]]

    def full2d(shape):
        return pl.BlockSpec(shape, lambda i: (0, 0))

    kernel = functools.partial(_l3_fused_kernel, H=H, R=R)

    # Raise the scoped VMEM limit only when a single block needs it (v6e
    # default is 32 MiB, v5e 16 MiB); keep well under v7x's 64 MiB per core.
    est_vmem = (Hp * R * C_PAD * itemsize          # padded activation scratch
                + 2 * HR * C_PAD * 4               # x block + out block (f32)
                + 13 * C_PAD * C_PAD * itemsize    # stacked conv weights
                + 6 * C_PAD * 4)                   # BN gamma / beta
    cp_kwargs = dict(dimension_semantics=("arbitrary",))
    if est_vmem > (24 << 20):
        cp_kwargs["vmem_limit_bytes"] = min(int(est_vmem * 5 // 4), 96 << 20)

    # TODO(synk): for production-size N*W, restructure the activation as
    # (H, R, Cp), grid over R tiles (halo-free since the conv is along H only)
    # with a two-pass BN (pass 1: per-tile sum / sum-of-squares into a small
    # resident accumulator, pass 2: normalize), mark the R axis "parallel" for
    # v7x megacore and size tiles <= ~48 MiB of VMEM per core.
    out = pl.pallas_call(
        kernel,
        out_shape=jax.ShapeDtypeStruct((HR, C_PAD), jnp.float32),
        grid=(1,),
        in_specs=[full2d(a.shape) for a in inputs],
        out_specs=full2d((HR, C_PAD)),
        scratch_shapes=[
            pltpu.VMEM((Hp * R, C_PAD), mxu_dtype),   # padded activation buf
        ],
        compiler_params=pltpu.CompilerParams(**cp_kwargs),
    )(*inputs)

    out = out[:, :C].reshape(H, N, W, C)
    return jnp.transpose(out, (1, 3, 0, 2))             # back to NCHW


# ------------- pure-JAX reference (matches PyTorch training-mode forward) -----
def _bn_train_ref(y, gamma, beta):
    mean = jnp.mean(y, axis=(0, 2, 3), keepdims=True)
    var = jnp.mean((y - mean) ** 2, axis=(0, 2, 3), keepdims=True)
    return ((y - mean) * lax.rsqrt(var + EPS)
            * gamma[None, :, None, None] + beta[None, :, None, None])


def _conv_ref(y, w, b, pad, op_dtype=jnp.float32):
    # op_dtype models the MXU operand quantization point of the fused kernel
    # (conv inputs rounded to op_dtype, accumulation / BN / ReLU in f32).
    yq = y.astype(op_dtype).astype(jnp.float32)
    wq = w.astype(op_dtype).astype(jnp.float32)
    out = lax.conv_general_dilated(
        yq, wq, window_strides=(1, 1), padding=[(pad, pad), (0, 0)],
        dimension_numbers=("NCHW", "OIHW", "NCHW"))
    return out + b[None, :, None, None]


def l3block_reference(x, p, op_dtype=jnp.float32):
    h = jax.nn.relu(_bn_train_ref(_conv_ref(x, p["w1"], p["b1"], 3, op_dtype),
                                  p["g1"], p["bt1"]))
    h = jax.nn.relu(_bn_train_ref(_conv_ref(h, p["w2"], p["b2"], 1, op_dtype),
                                  p["g2"], p["bt2"]))
    h = _bn_train_ref(_conv_ref(h, p["w3"], p["b3"], 1, op_dtype),
                      p["g3"], p["bt3"])
    return jax.nn.relu(h + x)


if __name__ == "__main__":
    key = jax.random.PRNGKey(0)
    # C=200 is fixed by the module; N*W=16 keeps tap shifts sublane-aligned
    # for both f32 (8) and bf16 (16) activation slabs.
    N, C, H, W = 2, 200, 8, 8
    ks = jax.random.split(key, 13)

    x = jax.random.normal(ks[0], (N, C, H, W), jnp.float32)

    def make_stage(kw, kb, kg, kbt, K):
        w = 0.02 * jax.random.normal(kw, (C, C, K, 1), jnp.float32)   # OIHW
        b = 0.1 * jax.random.normal(kb, (C,), jnp.float32)
        g = 1.0 + 0.1 * jax.random.normal(kg, (C,), jnp.float32)
        bt = 0.1 * jax.random.normal(kbt, (C,), jnp.float32)
        return w, b, g, bt

    raw = {}
    raw["w1"], raw["b1"], raw["g1"], raw["bt1"] = make_stage(ks[1], ks[2], ks[3], ks[4], 7)
    raw["w2"], raw["b2"], raw["g2"], raw["bt2"] = make_stage(ks[5], ks[6], ks[7], ks[8], 3)
    raw["w3"], raw["b3"], raw["g3"], raw["bt3"] = make_stage(ks[9], ks[10], ks[11], ks[12], 3)

    fwd = jax.jit(l3block_forward)

    # 1) f32 MXU operands: exact-semantics check vs. the f32 PyTorch-style
    #    training-mode reference.
    params_f32 = prepare_params(raw, jnp.float32)
    out_f32 = jax.block_until_ready(fwd(x, params_f32))
    ref_f32 = jax.block_until_ready(l3block_reference(x, raw))
    assert out_f32.shape == x.shape and out_f32.dtype == jnp.float32
    err_f32 = float(jnp.max(jnp.abs(out_f32 - ref_f32)))
    assert jnp.allclose(out_f32, ref_f32, rtol=2e-3, atol=2e-3), err_f32

    # 2) bf16 MXU operands / f32 accumulation (production default): check vs.
    #    a reference quantized at the same operand points.
    params_bf16 = prepare_params(raw, jnp.bfloat16)
    out_bf16 = jax.block_until_ready(fwd(x, params_bf16))
    ref_bf16 = jax.block_until_ready(l3block_reference(x, raw, op_dtype=jnp.bfloat16))
    assert out_bf16.shape == x.shape and out_bf16.dtype == jnp.float32
    err_bf16 = float(jnp.max(jnp.abs(out_bf16 - ref_bf16)))
    assert jnp.allclose(out_bf16, ref_bf16, rtol=2e-3, atol=2e-3), err_bf16

    print("KERNEL_OK")
</pallas_src>

<mosaic_0001>
module attributes {stable_mosaic.version = 11 : i64} {
  func.func @_l3_fused_kernel(%arg0: i32, %arg1: memref<128x256xf32, #tpu.memory_space<vmem>>, %arg2: memref<1792x256xf32, #tpu.memory_space<vmem>>, %arg3: memref<768x256xf32, #tpu.memory_space<vmem>>, %arg4: memref<768x256xf32, #tpu.memory_space<vmem>>, %arg5: memref<1x256xf32, #tpu.memory_space<vmem>>, %arg6: memref<1x256xf32, #tpu.memory_space<vmem>>, %arg7: memref<1x256xf32, #tpu.memory_space<vmem>>, %arg8: memref<1x256xf32, #tpu.memory_space<vmem>>, %arg9: memref<1x256xf32, #tpu.memory_space<vmem>>, %arg10: memref<1x256xf32, #tpu.memory_space<vmem>>, %arg11: memref<128x256xf32, #tpu.memory_space<vmem>>, %arg12: memref<224x256xf32, #tpu.memory_space<vmem>>) attributes {dimension_semantics = [#tpu.dimension_semantics<arbitrary>], iteration_bounds = array<i64: 1>, scalar_prefetch = 0 : i64, scratch_operands = 1 : i64, tpu.core_type = #tpu.core_type<tc>, window_params = [{pipeline_mode = #tpu.pipeline_mode<synchronous>, transform_indices = @transform_0, window_bounds = array<i64: 128, 256>}, {pipeline_mode = #tpu.pipeline_mode<synchronous>, transform_indices = @transform_1, window_bounds = array<i64: 1792, 256>}, {pipeline_mode = #tpu.pipeline_mode<synchronous>, transform_indices = @transform_2, window_bounds = array<i64: 768, 256>}, {pipeline_mode = #tpu.pipeline_mode<synchronous>, transform_indices = @transform_3, window_bounds = array<i64: 768, 256>}, {pipeline_mode = #tpu.pipeline_mode<synchronous>, transform_indices = @transform_4, window_bounds = array<i64: 1, 256>}, {pipeline_mode = #tpu.pipeline_mode<synchronous>, transform_indices = @transform_5, window_bounds = array<i64: 1, 256>}, {pipeline_mode = #tpu.pipeline_mode<synchronous>, transform_indices = @transform_6, window_bounds = array<i64: 1, 256>}, {pipeline_mode = #tpu.pipeline_mode<synchronous>, transform_indices = @transform_7, window_bounds = array<i64: 1, 256>}, {pipeline_mode = #tpu.pipeline_mode<synchronous>, transform_indices = @transform_8, window_bounds = array<i64: 1, 256>}, {pipeline_mode = #tpu.pipeline_mode<synchronous>, transform_indices = @transform_9, window_bounds = array<i64: 1, 256>}, {pipeline_mode = #tpu.pipeline_mode<synchronous>, transform_indices = @transform_10, window_bounds = array<i64: 128, 256>}]} {
    %cst = arith.constant 0.000000e+00 : f32
    %0 = vector.broadcast %cst : f32 to vector<48x256xf32>
    %c0 = arith.constant 0 : index
    %c0_0 = arith.constant 0 : index
    %1 = vector.load %arg12[%c0, %c0_0] : memref<224x256xf32, #tpu.memory_space<vmem>>, vector<48x256xf32>
    tpu.vector_store %arg12[%c0, %c0_0], %0 {strides = array<i32>} : memref<224x256xf32, #tpu.memory_space<vmem>>, vector<48x256xf32>,
    %c176 = arith.constant 176 : index
    %c0_1 = arith.constant 0 : index
    %2 = vector.load %arg12[%c176, %c0_1] : memref<224x256xf32, #tpu.memory_space<vmem>>, vector<48x256xf32>
    tpu.vector_store %arg12[%c176, %c0_1], %0 {strides = array<i32>} : memref<224x256xf32, #tpu.memory_space<vmem>>, vector<48x256xf32>,
    %c0_2 = arith.constant 0 : index
    %c0_3 = arith.constant 0 : index
    %3 = vector.load %arg1[%c0_2, %c0_3] : memref<128x256xf32, #tpu.memory_space<vmem>>, vector<128x256xf32>
    %c48 = arith.constant 48 : index
    %c0_4 = arith.constant 0 : index
    %4 = vector.load %arg12[%c48, %c0_4] : memref<224x256xf32, #tpu.memory_space<vmem>>, vector<128x256xf32>
    tpu.vector_store %arg12[%c48, %c0_4], %3 {strides = array<i32>} : memref<224x256xf32, #tpu.memory_space<vmem>>, vector<128x256xf32>,
    %c0_5 = arith.constant 0 : index
    %c0_6 = arith.constant 0 : index
    %5 = vector.load %arg12[%c0_5, %c0_6] : memref<224x256xf32, #tpu.memory_space<vmem>>, vector<128x256xf32>
    %c0_7 = arith.constant 0 : index
    %c0_8 = arith.constant 0 : index
    %6 = vector.load %arg2[%c0_7, %c0_8] : memref<1792x256xf32, #tpu.memory_space<vmem>>, vector<256x256xf32>
    %cst_9 = arith.constant dense<0.000000e+00> : vector<128x256xf32>
    %7 = tpu.matmul %5, %6, %cst_9 {dimension_numbers = #tpu.dot_dimension_numbers<[1], [0], [0], [1], [0, 0, 1, 1], [], []>} : vector<128x256xf32>, vector<256x256xf32>, vector<128x256xf32> -> vector<128x256xf32>
    %c16 = arith.constant 16 : index
    %c0_10 = arith.constant 0 : index
    %8 = vector.load %arg12[%c16, %c0_10] : memref<224x256xf32, #tpu.memory_space<vmem>>, vector<128x256xf32>
    %c256 = arith.constant 256 : index
    %c0_11 = arith.constant 0 : index
    %9 = vector.load %arg2[%c256, %c0_11] : memref<1792x256xf32, #tpu.memory_space<vmem>>, vector<256x256xf32>
    %cst_12 = arith.constant dense<0.000000e+00> : vector<128x256xf32>
    %10 = tpu.matmul %8, %9, %cst_12 {dimension_numbers = #tpu.dot_dimension_numbers<[1], [0], [0], [1], [0, 0, 1, 1], [], []>} : vector<128x256xf32>, vector<256x256xf32>, vector<128x256xf32> -> vector<128x256xf32>
    %11 = arith.addf %7, %10 : vector<128x256xf32>
    %c32 = arith.constant 32 : index
    %c0_13 = arith.constant 0 : index
    %12 = vector.load %arg12[%c32, %c0_13] : memref<224x256xf32, #tpu.memory_space<vmem>>, vector<128x256xf32>
    %c512 = arith.constant 512 : index
    %c0_14 = arith.constant 0 : index
    %13 = vector.load %arg2[%c512, %c0_14] : memref<1792x256xf32, #tpu.memory_space<vmem>>, vector<256x256xf32>
    %cst_15 = arith.constant dense<0.000000e+00> : vector<128x256xf32>
    %14 = tpu.matmul %12, %13, %cst_15 {dimension_numbers = #tpu.dot_dimension_numbers<[1], [0], [0], [1], [0, 0, 1, 1], [], []>} : vector<128x256xf32>, vector<256x256xf32>, vector<128x256xf32> -> vector<128x256xf32>
    %15 = arith.addf %11, %14 : vector<128x256xf32>
    %c48_16 = arith.constant 48 : index
    %c0_17 = arith.constant 0 : index
    %16 = vector.load %arg12[%c48_16, %c0_17] : memref<224x256xf32, #tpu.memory_space<vmem>>, vector<128x256xf32>
    %c768 = arith.constant 768 : index
    %c0_18 = arith.constant 0 : index
    %17 = vector.load %arg2[%c768, %c0_18] : memref<1792x256xf32, #tpu.memory_space<vmem>>, vector<256x256xf32>
    %cst_19 = arith.constant dense<0.000000e+00> : vector<128x256xf32>
    %18 = tpu.matmul %16, %17, %cst_19 {dimension_numbers = #tpu.dot_dimension_numbers<[1], [0], [0], [1], [0, 0, 1, 1], [], []>} : vector<128x256xf32>, vector<256x256xf32>, vector<128x256xf32> -> vector<128x256xf32>
    %19 = arith.addf %15, %18 : vector<128x256xf32>
    %c64 = arith.constant 64 : index
    %c0_20 = arith.constant 0 : index
    %20 = vector.load %arg12[%c64, %c0_20] : memref<224x256xf32, #tpu.memory_space<vmem>>, vector<128x256xf32>
    %c1024 = arith.constant 1024 : index
    %c0_21 = arith.constant 0 : index
    %21 = vector.load %arg2[%c1024, %c0_21] : memref<1792x256xf32, #tpu.memory_space<vmem>>, vector<256x256xf32>
    %cst_22 = arith.constant dense<0.000000e+00> : vector<128x256xf32>
    %22 = tpu.matmul %20, %21, %cst_22 {dimension_numbers = #tpu.dot_dimension_numbers<[1], [0], [0], [1], [0, 0, 1, 1], [], []>} : vector<128x256xf32>, vector<256x256xf32>, vector<128x256xf32> -> vector<128x256xf32>
    %23 = arith.addf %19, %22 : vector<128x256xf32>
    %c80 = arith.constant 80 : index
    %c0_23 = arith.constant 0 : index
    %24 = vector.load %arg12[%c80, %c0_23] : memref<224x256xf32, #tpu.memory_space<vmem>>, vector<128x256xf32>
    %c1280 = arith.constant 1280 : index
    %c0_24 = arith.constant 0 : index
    %25 = vector.load %arg2[%c1280, %c0_24] : memref<1792x256xf32, #tpu.memory_space<vmem>>, vector<256x256xf32>
    %cst_25 = arith.constant dense<0.000000e+00> : vector<128x256xf32>
    %26 = tpu.matmul %24, %25, %cst_25 {dimension_numbers = #tpu.dot_dimension_numbers<[1], [0], [0], [1], [0, 0, 1, 1], [], []>} : vector<128x256xf32>, vector<256x256xf32>, vector<128x256xf32> -> vector<128x256xf32>
    %27 = arith.addf %23, %26 : vector<128x256xf32>
    %c96 = arith.constant 96 : index
    %c0_26 = arith.constant 0 : index
    %28 = vector.load %arg12[%c96, %c0_26] : memref<224x256xf32, #tpu.memory_space<vmem>>, vector<128x256xf32>
    %c1536 = arith.constant 1536 : index
    %c0_27 = arith.constant 0 : index
    %29 = vector.load %arg2[%c1536, %c0_27] : memref<1792x256xf32, #tpu.memory_space<vmem>>, vector<256x256xf32>
    %cst_28 = arith.constant dense<0.000000e+00> : vector<128x256xf32>
    %30 = tpu.matmul %28, %29, %cst_28 {dimension_numbers = #tpu.dot_dimension_numbers<[1], [0], [0], [1], [0, 0, 1, 1], [], []>} : vector<128x256xf32>, vector<256x256xf32>, vector<128x256xf32> -> vector<128x256xf32>
    %31 = arith.addf %27, %30 : vector<128x256xf32>
    %cst_29 = arith.constant dense<0.000000e+00> : vector<256xf32>
    %32 = vector.multi_reduction <add>, %31, %cst_29 [0] : vector<128x256xf32> to vector<256xf32>
    %33 = vector.shape_cast %32 : vector<256xf32> to vector<1x256xf32>
    %cst_30 = arith.constant 1.280000e+02 : f32
    %34 = vector.broadcast %cst_30 : f32 to vector<1x256xf32>
    %35 = arith.divf %33, %34 : vector<1x256xf32>
    %36 = vector.broadcast %35 : vector<1x256xf32> to vector<128x256xf32>
    %37 = arith.subf %31, %36 : vector<128x256xf32>
    %38 = arith.mulf %37, %37 : vector<128x256xf32>
    %cst_31 = arith.constant dense<0.000000e+00> : vector<256xf32>
    %39 = vector.multi_reduction <add>, %38, %cst_31 [0] : vector<128x256xf32> to vector<256xf32>
    %40 = vector.shape_cast %39 : vector<256xf32> to vector<1x256xf32>
    %cst_32 = arith.constant 1.280000e+02 : f32
    %41 = vector.broadcast %cst_32 : f32 to vector<1x256xf32>
    %42 = arith.divf %40, %41 : vector<1x256xf32>
    %cst_33 = arith.constant 9.99999974E-6 : f32
    %43 = vector.broadcast %cst_33 : f32 to vector<1x256xf32>
    %44 = arith.addf %42, %43 : vector<1x256xf32>
    %45 = math.rsqrt %44 : vector<1x256xf32>
    %46 = vector.broadcast %45 : vector<1x256xf32> to vector<128x256xf32>
    %47 = arith.mulf %37, %46 : vector<128x256xf32>
    %c0_34 = arith.constant 0 : index
    %c0_35 = arith.constant 0 : index
    %48 = vector.load %arg5[%c0_34, %c0_35] : memref<1x256xf32, #tpu.memory_space<vmem>>, vector<1x256xf32>
    %49 = vector.broadcast %48 : vector<1x256xf32> to vector<128x256xf32>
    %50 = arith.mulf %47, %49 : vector<128x256xf32>
    %c0_36 = arith.constant 0 : index
    %c0_37 = arith.constant 0 : index
    %51 = vector.load %arg6[%c0_36, %c0_37] : memref<1x256xf32, #tpu.memory_space<vmem>>, vector<1x256xf32>
    %52 = vector.broadcast %51 : vector<1x256xf32> to vector<128x256xf32>
    %53 = arith.addf %50, %52 : vector<128x256xf32>
    %cst_38 = arith.constant 0.000000e+00 : f32
    %54 = vector.broadcast %cst_38 : f32 to vector<128x256xf32>
    %55 = arith.maximumf %53, %54 : vector<128x256xf32>
    %c48_39 = arith.constant 48 : index
    %c0_40 = arith.constant 0 : index
    %56 = vector.load %arg12[%c48_39, %c0_40] : memref<224x256xf32, #tpu.memory_space<vmem>>, vector<128x256xf32>
    tpu.vector_store %arg12[%c48_39, %c0_40], %55 {strides = array<i32>} : memref<224x256xf32, #tpu.memory_space<vmem>>, vector<128x256xf32>,
    %c32_41 = arith.constant 32 : index
    %c0_42 = arith.constant 0 : index
    %57 = vector.load %arg12[%c32_41, %c0_42] : memref<224x256xf32, #tpu.memory_space<vmem>>, vector<128x256xf32>
    %c0_43 = arith.constant 0 : index
    %c0_44 = arith.constant 0 : index
    %58 = vector.load %arg3[%c0_43, %c0_44] : memref<768x256xf32, #tpu.memory_space<vmem>>, vector<256x256xf32>
    %cst_45 = arith.constant dense<0.000000e+00> : vector<128x256xf32>
    %59 = tpu.matmul %57, %58, %cst_45 {dimension_numbers = #tpu.dot_dimension_numbers<[1], [0], [0], [1], [0, 0, 1, 1], [], []>} : vector<128x256xf32>, vector<256x256xf32>, vector<128x256xf32> -> vector<128x256xf32>
    %c48_46 = arith.constant 48 : index
    %c0_47 = arith.constant 0 : index
    %60 = vector.load %arg12[%c48_46, %c0_47] : memref<224x256xf32, #tpu.memory_space<vmem>>, vector<128x256xf32>
    %c256_48 = arith.constant 256 : index
    %c0_49 = arith.constant 0 : index
    %61 = vector.load %arg3[%c256_48, %c0_49] : memref<768x256xf32, #tpu.memory_space<vmem>>, vector<256x256xf32>
    %cst_50 = arith.constant dense<0.000000e+00> : vector<128x256xf32>
    %62 = tpu.matmul %60, %61, %cst_50 {dimension_numbers = #tpu.dot_dimension_numbers<[1], [0], [0], [1], [0, 0, 1, 1], [], []>} : vector<128x256xf32>, vector<256x256xf32>, vector<128x256xf32> -> vector<128x256xf32>
    %63 = arith.addf %59, %62 : vector<128x256xf32>
    %c64_51 = arith.constant 64 : index
    %c0_52 = arith.constant 0 : index
    %64 = vector.load %arg12[%c64_51, %c0_52] : memref<224x256xf32, #tpu.memory_space<vmem>>, vector<128x256xf32>
    %c512_53 = arith.constant 512 : index
    %c0_54 = arith.constant 0 : index
    %65 = vector.load %arg3[%c512_53, %c0_54] : memref<768x256xf32, #tpu.memory_space<vmem>>, vector<256x256xf32>
    %cst_55 = arith.constant dense<0.000000e+00> : vector<128x256xf32>
    %66 = tpu.matmul %64, %65, %cst_55 {dimension_numbers = #tpu.dot_dimension_numbers<[1], [0], [0], [1], [0, 0, 1, 1], [], []>} : vector<128x256xf32>, vector<256x256xf32>, vector<128x256xf32> -> vector<128x256xf32>
    %67 = arith.addf %63, %66 : vector<128x256xf32>
    %cst_56 = arith.constant dense<0.000000e+00> : vector<256xf32>
    %68 = vector.multi_reduction <add>, %67, %cst_56 [0] : vector<128x256xf32> to vector<256xf32>
    %69 = vector.shape_cast %68 : vector<256xf32> to vector<1x256xf32>
    %cst_57 = arith.constant 1.280000e+02 : f32
    %70 = vector.broadcast %cst_57 : f32 to vector<1x256xf32>
    %71 = arith.divf %69, %70 : vector<1x256xf32>
    %72 = vector.broadcast %71 : vector<1x256xf32> to vector<128x256xf32>
    %73 = arith.subf %67, %72 : vector<128x256xf32>
    %74 = arith.mulf %73, %73 : vector<128x256xf32>
    %cst_58 = arith.constant dense<0.000000e+00> : vector<256xf32>
    %75 = vector.multi_reduction <add>, %74, %cst_58 [0] : vector<128x256xf32> to vector<256xf32>
    %76 = vector.shape_cast %75 : vector<256xf32> to vector<1x256xf32>
    %cst_59 = arith.constant 1.280000e+02 : f32
    %77 = vector.broadcast %cst_59 : f32 to vector<1x256xf32>
    %78 = arith.divf %76, %77 : vector<1x256xf32>
    %cst_60 = arith.constant 9.99999974E-6 : f32
    %79 = vector.broadcast %cst_60 : f32 to vector<1x256xf32>
    %80 = arith.addf %78, %79 : vector<1x256xf32>
    %81 = math.rsqrt %80 : vector<1x256xf32>
    %82 = vector.broadcast %81 : vector<1x256xf32> to vector<128x256xf32>
    %83 = arith.mulf %73, %82 : vector<128x256xf32>
    %c0_61 = arith.constant 0 : index
    %c0_62 = arith.constant 0 : index
    %84 = vector.load %arg7[%c0_61, %c0_62] : memref<1x256xf32, #tpu.memory_space<vmem>>, vector<1x256xf32>
    %85 = vector.broadcast %84 : vector<1x256xf32> to vector<128x256xf32>
    %86 = arith.mulf %83, %85 : vector<128x256xf32>
    %c0_63 = arith.constant 0 : index
    %c0_64 = arith.constant 0 : index
    %87 = vector.load %arg8[%c0_63, %c0_64] : memref<1x256xf32, #tpu.memory_space<vmem>>, vector<1x256xf32>
    %88 = vector.broadcast %87 : vector<1x256xf32> to vector<128x256xf32>
    %89 = arith.addf %86, %88 : vector<128x256xf32>
    %cst_65 = arith.constant 0.000000e+00 : f32
    %90 = vector.broadcast %cst_65 : f32 to vector<128x256xf32>
    %91 = arith.maximumf %89, %90 : vector<128x256xf32>
    %c48_66 = arith.constant 48 : index
    %c0_67 = arith.constant 0 : index
    %92 = vector.load %arg12[%c48_66, %c0_67] : memref<224x256xf32, #tpu.memory_space<vmem>>, vector<128x256xf32>
    tpu.vector_store %arg12[%c48_66, %c0_67], %91 {strides = array<i32>} : memref<224x256xf32, #tpu.memory_space<vmem>>, vector<128x256xf32>,
    %c32_68 = arith.constant 32 : index
    %c0_69 = arith.constant 0 : index
    %93 = vector.load %arg12[%c32_68, %c0_69] : memref<224x256xf32, #tpu.memory_space<vmem>>, vector<128x256xf32>
    %c0_70 = arith.constant 0 : index
    %c0_71 = arith.constant 0 : index
    %94 = vector.load %arg4[%c0_70, %c0_71] : memref<768x256xf32, #tpu.memory_space<vmem>>, vector<256x256xf32>
    %cst_72 = arith.constant dense<0.000000e+00> : vector<128x256xf32>
    %95 = tpu.matmul %93, %94, %cst_72 {dimension_numbers = #tpu.dot_dimension_numbers<[1], [0], [0], [1], [0, 0, 1, 1], [], []>} : vector<128x256xf32>, vector<256x256xf32>, vector<128x256xf32> -> vector<128x256xf32>
    %c48_73 = arith.constant 48 : index
    %c0_74 = arith.constant 0 : index
    %96 = vector.load %arg12[%c48_73, %c0_74] : memref<224x256xf32, #tpu.memory_space<vmem>>, vector<128x256xf32>
    %c256_75 = arith.constant 256 : index
    %c0_76 = arith.constant 0 : index
    %97 = vector.load %arg4[%c256_75, %c0_76] : memref<768x256xf32, #tpu.memory_space<vmem>>, vector<256x256xf32>
    %cst_77 = arith.constant dense<0.000000e+00> : vector<128x256xf32>
    %98 = tpu.matmul %96, %97, %cst_77 {dimension_numbers = #tpu.dot_dimension_numbers<[1], [0], [0], [1], [0, 0, 1, 1], [], []>} : vector<128x256xf32>, vector<256x256xf32>, vector<128x256xf32> -> vector<128x256xf32>
    %99 = arith.addf %95, %98 : vector<128x256xf32>
    %c64_78 = arith.constant 64 : index
    %c0_79 = arith.constant 0 : index
    %100 = vector.load %arg12[%c64_78, %c0_79] : memref<224x256xf32, #tpu.memory_space<vmem>>, vector<128x256xf32>
    %c512_80 = arith.constant 512 : index
    %c0_81 = arith.constant 0 : index
    %101 = vector.load %arg4[%c512_80, %c0_81] : memref<768x256xf32, #tpu.memory_space<vmem>>, vector<256x256xf32>
    %cst_82 = arith.constant dense<0.000000e+00> : vector<128x256xf32>
    %102 = tpu.matmul %100, %101, %cst_82 {dimension_numbers = #tpu.dot_dimension_numbers<[1], [0], [0], [1], [0, 0, 1, 1], [], []>} : vector<128x256xf32>, vector<256x256xf32>, vector<128x256xf32> -> vector<128x256xf32>
    %103 = arith.addf %99, %102 : vector<128x256xf32>
    %cst_83 = arith.constant dense<0.000000e+00> : vector<256xf32>
    %104 = vector.multi_reduction <add>, %103, %cst_83 [0] : vector<128x256xf32> to vector<256xf32>
    %105 = vector.shape_cast %104 : vector<256xf32> to vector<1x256xf32>
    %cst_84 = arith.constant 1.280000e+02 : f32
    %106 = vector.broadcast %cst_84 : f32 to vector<1x256xf32>
    %107 = arith.divf %105, %106 : vector<1x256xf32>
    %108 = vector.broadcast %107 : vector<1x256xf32> to vector<128x256xf32>
    %109 = arith.subf %103, %108 : vector<128x256xf32>
    %110 = arith.mulf %109, %109 : vector<128x256xf32>
    %cst_85 = arith.constant dense<0.000000e+00> : vector<256xf32>
    %111 = vector.multi_reduction <add>, %110, %cst_85 [0] : vector<128x256xf32> to vector<256xf32>
    %112 = vector.shape_cast %111 : vector<256xf32> to vector<1x256xf32>
    %cst_86 = arith.constant 1.280000e+02 : f32
    %113 = vector.broadcast %cst_86 : f32 to vector<1x256xf32>
    %114 = arith.divf %112, %113 : vector<1x256xf32>
    %cst_87 = arith.constant 9.99999974E-6 : f32
    %115 = vector.broadcast %cst_87 : f32 to vector<1x256xf32>
    %116 = arith.addf %114, %115 : vector<1x256xf32>
    %117 = math.rsqrt %116 : vector<1x256xf32>
    %118 = vector.broadcast %117 : vector<1x256xf32> to vector<128x256xf32>
    %119 = arith.mulf %109, %118 : vector<128x256xf32>
    %c0_88 = arith.constant 0 : index
    %c0_89 = arith.constant 0 : index
    %120 = vector.load %arg9[%c0_88, %c0_89] : memref<1x256xf32, #tpu.memory_space<vmem>>, vector<1x256xf32>
    %121 = vector.broadcast %120 : vector<1x256xf32> to vector<128x256xf32>
    %122 = arith.mulf %119, %121 : vector<128x256xf32>
    %c0_90 = arith.constant 0 : index
    %c0_91 = arith.constant 0 : index
    %123 = vector.load %arg10[%c0_90, %c0_91] : memref<1x256xf32, #tpu.memory_space<vmem>>, vector<1x256xf32>
    %124 = vector.broadcast %123 : vector<1x256xf32> to vector<128x256xf32>
    %125 = arith.addf %122, %124 : vector<128x256xf32>
    %c0_92 = arith.constant 0 : index
    %c0_93 = arith.constant 0 : index
    %126 = vector.load %arg1[%c0_92, %c0_93] : memref<128x256xf32, #tpu.memory_space<vmem>>, vector<128x256xf32>
    %127 = arith.addf %125, %126 : vector<128x256xf32>
    %cst_94 = arith.constant 0.000000e+00 : f32
    %128 = vector.broadcast %cst_94 : f32 to vector<128x256xf32>
    %129 = arith.maximumf %127, %128 : vector<128x256xf32>
    %c0_95 = arith.constant 0 : index
    %c0_96 = arith.constant 0 : index
    %130 = vector.load %arg11[%c0_95, %c0_96] : memref<128x256xf32, #tpu.memory_space<vmem>>, vector<128x256xf32>
    tpu.vector_store %arg11[%c0_95, %c0_96], %129 {strides = array<i32>} : memref<128x256xf32, #tpu.memory_space<vmem>>, vector<128x256xf32>,
    return
  }
  func.func @transform_0(%arg0: i32) -> (i32, i32) {
    %c0_i32 = arith.constant 0 : i32
    %c0_i32_0 = arith.constant 0 : i32
    %c0_i32_1 = arith.constant 0 : i32
    return %c0_i32, %c0_i32_0 : i32, i32
  }
  func.func @transform_1(%arg0: i32) -> (i32, i32) {
    %c0_i32 = arith.constant 0 : i32
    %c0_i32_0 = arith.constant 0 : i32
    %c0_i32_1 = arith.constant 0 : i32
    return %c0_i32, %c0_i32_0 : i32, i32
  }
  func.func @transform_2(%arg0: i32) -> (i32, i32) {
    %c0_i32 = arith.constant 0 : i32
    %c0_i32_0 = arith.constant 0 : i32
    %c0_i32_1 = arith.constant 0 : i32
    return %c0_i32, %c0_i32_0 : i32, i32
  }
  func.func @transform_3(%arg0: i32) -> (i32, i32) {
    %c0_i32 = arith.constant 0 : i32
    %c0_i32_0 = arith.constant 0 : i32
    %c0_i32_1 = arith.constant 0 : i32
    return %c0_i32, %c0_i32_0 : i32, i32
  }
  func.func @transform_4(%arg0: i32) -> (i32, i32) {
    %c0_i32 = arith.constant 0 : i32
    %c0_i32_0 = arith.constant 0 : i32
    %c0_i32_1 = arith.constant 0 : i32
    return %c0_i32, %c0_i32_0 : i32, i32
  }
  func.func @transform_5(%arg0: i32) -> (i32, i32) {
    %c0_i32 = arith.constant 0 : i32
    %c0_i32_0 = arith.constant 0 : i32
    %c0_i32_1 = arith.constant 0 : i32
    return %c0_i32, %c0_i32_0 : i32, i32
  }
  func.func @transform_6(%arg0: i32) -> (i32, i32) {
    %c0_i32 = arith.constant 0 : i32
    %c0_i32_0 = arith.constant 0 : i32
    %c0_i32_1 = arith.constant 0 : i32
    return %c0_i32, %c0_i32_0 : i32, i32
  }
  func.func @transform_7(%arg0: i32) -> (i32, i32) {
    %c0_i32 = arith.constant 0 : i32
    %c0_i32_0 = arith.constant 0 : i32
    %c0_i32_1 = arith.constant 0 : i32
    return %c0_i32, %c0_i32_0 : i32, i32
  }
  func.func @transform_8(%arg0: i32) -> (i32, i32) {
    %c0_i32 = arith.constant 0 : i32
    %c0_i32_0 = arith.constant 0 : i32
    %c0_i32_1 = arith.constant 0 : i32
    return %c0_i32, %c0_i32_0 : i32, i32
  }
  func.func @transform_9(%arg0: i32) -> (i32, i32) {
    %c0_i32 = arith.constant 0 : i32
    %c0_i32_0 = arith.constant 0 : i32
    %c0_i32_1 = arith.constant 0 : i32
    return %c0_i32, %c0_i32_0 : i32, i32
  }
  func.func @transform_10(%arg0: i32) -> (i32, i32) {
    %c0_i32 = arith.constant 0 : i32
    %c0_i32_0 = arith.constant 0 : i32
    %c0_i32_1 = arith.constant 0 : i32
    return %c0_i32, %c0_i32_0 : i32, i32
  }
}

</mosaic_0001>

<bundles_post_ra>
// kernel: l3block_forward.1
= control target key start
LH: loop header
LB: loop body
LE: loop exit
PB: predicated region body
PF: predicated region fallthrough
CT: control target
= control target key end

     0   :  { %15 = vsyncpa [#allocation4], 0  ;;  %s10771_s0 = inlined_call_operand.vmem [shape: f32[128,256], index: 0, kind: input, shape index: {}]   ;;  %s10772_s1 = inlined_call_operand.hbm [shape: f32[1792,256], index: 1, kind: input, shape index: {}]   ;;  %s10773_s2 = inlined_call_operand.hbm [shape: f32[768,256], index: 2, kind: input, shape index: {}]   ;;  %s10774_s3 = inlined_call_operand.hbm [shape: f32[768,256], index: 3, kind: input, shape index: {}]   ;;  %s10775_s4 = inlined_call_operand.hbm [shape: f32[1,256], index: 4, kind: input, shape index: {}]   ;;  %s10776_s5 = inlined_call_operand.hbm [shape: f32[1,256], index: 5, kind: input, shape index: {}]   ;;  %s10777_s6 = inlined_call_operand.hbm [shape: f32[1,256], index: 6, kind: input, shape index: {}]   ;;  %s10778_s7 = inlined_call_operand.hbm [shape: f32[1,256], index: 7, kind: input, shape index: {}]   ;;  %s10779_s8 = inlined_call_operand.hbm [shape: f32[1,256], index: 8, kind: input, shape index: {}]   ;;  %s10780_s9 = inlined_call_operand.hbm [shape: f32[1,256], index: 9, kind: input, shape index: {}]   ;;  %s10781_s10 = inlined_call_operand.vmem [shape: f32[128,256], index: 10, kind: output, shape index: {}]  }
   0x1   :  { %16 = vsyncpa [#allocation6], 0 }
   0x2   :  { %17 = vsyncpa [#allocation9], 0 }
   0x3   :  { %18 = vsyncpa [#allocation12], 0 }
   0x4   :  { %19 = vsyncpa [#allocation15], 0  ;;  %s39_s15 = sshll.u32 %s10773_s2, 4  ;;  %s6438_s16 = smov [#allocation5]   ;;  %s40_s15 = int_to_ptr.hbm [resolvable:$true] %s39_s15 }
   0x5   :  { %s41_s17 = sshll.u32 %s6438_s16, 4  ;;  %s66_s20 = sshll.u32 %s10775_s4, 4  ;;  %s42_s17 = int_to_ptr.vmem [resolvable:$true] %s41_s17  ;;  %s67_s20 = int_to_ptr.hbm [resolvable:$true] %s66_s20 }
   0x6   :  { %s6439_s21 = smov 256   ;;  %s6440_s22 = smov 16  }
   0x7   :  { %47 = dma.hbm_to_vmem [thread:$0]  %s40_s15, 24576, %s42_s17, [#allocation6], %s6439_s21, %s6439_s21, %s6440_s22  }
   0x8   :  { %s6441_s23 = smov [#allocation8]   ;;  %s88_s2 = sshll.u32 %s10777_s6, 4  ;;  %s89_s2 = int_to_ptr.hbm [resolvable:$true] %s88_s2 }
   0x9   :  { %s68_s24 = sshll.u32 %s6441_s23, 4  ;;  %s110_s4 = sshll.u32 %s10779_s8, 4  ;;  %s69_s24 = int_to_ptr.vmem [resolvable:$true] %s68_s24  ;;  %s111_s4 = int_to_ptr.hbm [resolvable:$true] %s110_s4 }
   0xa   :  { %71 = dma.hbm_to_vmem [thread:$0]  %s67_s20, 32, %s69_s24, [#allocation9]  }
   0xb   :  { %s6442_s29 = smov [#allocation11]   ;;  %s6443_s11 = smov [#allocation14]  }
   0xc   :  { %s90_s30 = sshll.u32 %s6442_s29, 4  ;;  %s112_s12 = sshll.u32 %s6443_s11, 4  ;;  %s91_s30 = int_to_ptr.vmem [resolvable:$true] %s90_s30  ;;  %s113_s12 = int_to_ptr.vmem [resolvable:$true] %s112_s12 }
   0xd   :  { %93 = dma.hbm_to_vmem [thread:$0]  %s89_s2, 32, %s91_s30, [#allocation12]  }
   0xe   :  { %s26_s15 = sshll.u32 %s10772_s1, 4  ;;  %s52_s17 = sshll.u32 %s10774_s3, 4  ;;  %s27_s15 = int_to_ptr.hbm [resolvable:$true] %s26_s15  ;;  %s53_s17 = int_to_ptr.hbm [resolvable:$true] %s52_s17 }
   0xf   :  { %115 = dma.hbm_to_vmem [thread:$0]  %s111_s4, 32, %s113_s12, [#allocation15]  }
  0x10   :  { %s6444_s18 = smov [#allocation3]   ;;  %s6445_s19 = smov [#allocation7]  }
  0x11   :  { %s28_s8 = sshll.u32 %s6444_s18, 4  ;;  %s54_s20 = sshll.u32 %s6445_s19, 4  ;;  %s29_s8 = int_to_ptr.vmem [resolvable:$true] %s28_s8  ;;  %s55_s20 = int_to_ptr.vmem [resolvable:$true] %s54_s20 }
  0x12   :  { %34 = dma.hbm_to_vmem [thread:$0]  %s27_s15, 57344, %s29_s8, [#allocation4], %s6439_s21, %s6439_s21, %s6440_s22  }
  0x13   :  { %s77_s1 = sshll.u32 %s10776_s5, 4  ;;  %s99_s26 = sshll.u32 %s10778_s7, 4  ;;  %s78_s1 = int_to_ptr.hbm [resolvable:$true] %s77_s1  ;;  %s100_s26 = int_to_ptr.hbm [resolvable:$true] %s99_s26 }
  0x14   :  { %60 = dma.hbm_to_vmem [thread:$0]  %s53_s17, 24576, %s55_s20, [#allocation6], %s6439_s21, %s6439_s21, %s6440_s22  }
  0x15   :  { %s6446_s2 = smov [#allocation10]   ;;  %s6447_s28 = smov [#allocation13]  }
  0x16   :  { %s79_s27 = sshll.u32 %s6446_s2, 4  ;;  %s101_s4 = sshll.u32 %s6447_s28, 4  ;;  %s80_s27 = int_to_ptr.vmem [resolvable:$true] %s79_s27  ;;  %s102_s4 = int_to_ptr.vmem [resolvable:$true] %s101_s4 }
  0x17   :  { %82 = dma.hbm_to_vmem [thread:$0]  %s78_s1, 32, %s80_s27, [#allocation9]  }
  0x18   :  { %s121_s5 = sshll.u32 %s10780_s9, 4  ;;  %s6448_s11 = smov [#allocation16]   ;;  %s122_s5 = int_to_ptr.hbm [resolvable:$true] %s121_s5 }
  0x19   :  { %104 = dma.hbm_to_vmem [thread:$0]  %s100_s26, 32, %s102_s4, [#allocation12]  }
  0x1a   :  { %s123_s21 = sshll.u32 %s6448_s11, 4  ;;  %s124_s21 = int_to_ptr.vmem [resolvable:$true] %s123_s21 }
  0x1b   :  { %126 = dma.hbm_to_vmem [thread:$0]  %s122_s5, 32, %s124_s21, [#allocation15]  }
  0x1c   :  { %6428 = dma.done.wait [#allocation4], 57344  }
  0x1d   :  { %6429 = vsyncadd [#allocation4], 4294909952 }
  0x1e   :  { %6430 = dma.done.wait [#allocation6], 49152  }
  0x1f   :  { %6431 = vsyncadd [#allocation6], 4294918144 }
  0x20   :  { %6432 = dma.done.wait [#allocation9], 64  }
  0x21   :  { %6433 = vsyncadd [#allocation9], 4294967232 }
  0x22   :  { %6434 = dma.done.wait [#allocation12], 64  }
  0x23   :  { %6435 = vsyncadd [#allocation12], 4294967232 }
  0x24   :  { %6436 = dma.done.wait [#allocation15], 64  }
  0x25   :  { %6437 = vsyncadd [#allocation15], 4294967232  ;;  %v381_v0 = vld [vmem:[#allocation3 + $0x2f0] sm:$0xff]  ;;  %v382_v2 = vld [vmem:[#allocation3 + $0x2f8] sm:$0xff] }
  0x26   :  { %v413_v1 = vld [vmem:[#allocation3 + $0x3f0] sm:$0xff]  ;;  %415 = vmatpush.msra.mxu0 %v381_v0  ;;  %v414_v3 = vld [vmem:[#allocation3 + $0x3f8] sm:$0xff]  ;;  %v379_v4 = vld [vmem:[#allocation3 + $0x2e0] sm:$0xff]  ;;  %545 = vmatpush.msra.mxu2 %v382_v2  ;;  %v10782_v2 = vmov 0.0  }
  0x27   :  { %480 = vmatpush.msra.mxu1 %v413_v1  ;;  %v411_v5 = vld [vmem:[#allocation3 + $0x3e0] sm:$0xff]  ;;  %610 = vmatpush.msra.mxu3 %v414_v3  ;;  %v380_v6 = vld [vmem:[#allocation3 + $0x2e8] sm:$0xff]  ;;  %v377_v8 = vld [vmem:[#allocation3 + $0x2d0] sm:$0xff] }
  0x28   :  { %v412_v7 = vld [vmem:[#allocation3 + $0x3e8] sm:$0xff]  ;;  %416 = vmatpush.msra.mxu0 %v379_v4  ;;  %v409_v9 = vld [vmem:[#allocation3 + $0x3d0] sm:$0xff]  ;;  %v378_v10 = vld [vmem:[#allocation3 + $0x2d8] sm:$0xff]  ;;  %546 = vmatpush.msra.mxu2 %v380_v6 }
  0x29   :  { %481 = vmatpush.msra.mxu1 %v411_v5  ;;  %v410_v11 = vld [vmem:[#allocation3 + $0x3d8] sm:$0xff]  ;;  %611 = vmatpush.msra.mxu3 %v412_v7  ;;  %v375_v12 = vld [vmem:[#allocation3 + $0x2c0] sm:$0xff]  ;;  %v376_v14 = vld [vmem:[#allocation3 + $0x2c8] sm:$0xff] }
  0x2a   :  { %v407_v13 = vld [vmem:[#allocation3 + $0x3c0] sm:$0xff]  ;;  %417 = vmatpush.msra.mxu0 %v377_v8  ;;  %v408_v15 = vld [vmem:[#allocation3 + $0x3c8] sm:$0xff]  ;;  %547 = vmatpush.msra.mxu2 %v378_v10  ;;  %v373_v16 = vld [vmem:[#allocation3 + $0x2b0] sm:$0xff] }
  0x2b   :  { %482 = vmatpush.msra.mxu1 %v409_v9  ;;  %612 = vmatpush.msra.mxu3 %v410_v11  ;;  %v405_v17 = vld [vmem:[#allocation3 + $0x3b0] sm:$0xff]  ;;  %v374_v18 = vld [vmem:[#allocation3 + $0x2b8] sm:$0xff]  ;;  %v371_v20 = vld [vmem:[#allocation3 + $0x2a0] sm:$0xff] }
  0x2c   :  { %418 = vmatpush.msra.mxu0 %v375_v12  ;;  %v406_v19 = vld [vmem:[#allocation3 + $0x3b8] sm:$0xff]  ;;  %548 = vmatpush.msra.mxu2 %v376_v14  ;;  %v403_v21 = vld [vmem:[#allocation3 + $0x3a0] sm:$0xff]  ;;  %v372_v22 = vld [vmem:[#allocation3 + $0x2a8] sm:$0xff] }
  0x2d   :  { %483 = vmatpush.msra.mxu1 %v407_v13  ;;  %613 = vmatpush.msra.mxu3 %v408_v15  ;;  %v404_v23 = vld [vmem:[#allocation3 + $0x3a8] sm:$0xff]  ;;  %v369_v24 = vld [vmem:[#allocation3 + $0x290] sm:$0xff]  ;;  %v370_v26 = vld [vmem:[#allocation3 + $0x298] sm:$0xff] }
  0x2e   :  { %419 = vmatpush.msra.mxu0 %v373_v16  ;;  %549 = vmatpush.msra.mxu2 %v374_v18  ;;  %v401_v25 = vld [vmem:[#allocation3 + $0x390] sm:$0xff]  ;;  %v402_v27 = vld [vmem:[#allocation3 + $0x398] sm:$0xff]  ;;  %v367_v28 = vld [vmem:[#allocation3 + $0x280] sm:$0xff] }
  0x2f   :  { %484 = vmatpush.msra.mxu1 %v405_v17  ;;  %614 = vmatpush.msra.mxu3 %v406_v19  ;;  %v399_v29 = vld [vmem:[#allocation3 + $0x380] sm:$0xff]  ;;  %v368_v30 = vld [vmem:[#allocation3 + $0x288] sm:$0xff]  ;;  %v365_v32 = vld [vmem:[#allocation3 + $0x270] sm:$0xff] }
  0x30   :  { %420 = vmatpush.msra.mxu0 %v371_v20  ;;  %550 = vmatpush.msra.mxu2 %v372_v22  ;;  %v400_v31 = vld [vmem:[#allocation3 + $0x388] sm:$0xff]  ;;  %v397_v33 = vld [vmem:[#allocation3 + $0x370] sm:$0xff]  ;;  %v366_v34 = vld [vmem:[#allocation3 + $0x278] sm:$0xff] }
  0x31   :  { %485 = vmatpush.msra.mxu1 %v403_v21  ;;  %615 = vmatpush.msra.mxu3 %v404_v23  ;;  %v398_v35 = vld [vmem:[#allocation3 + $0x378] sm:$0xff]  ;;  %v363_v36 = vld [vmem:[#allocation3 + $0x260] sm:$0xff]  ;;  %v364_v38 = vld [vmem:[#allocation3 + $0x268] sm:$0xff] }
  0x32   :  { %421 = vmatpush.msra.mxu0 %v369_v24  ;;  %551 = vmatpush.msra.mxu2 %v370_v26  ;;  %v395_v37 = vld [vmem:[#allocation3 + $0x360] sm:$0xff]  ;;  %v396_v39 = vld [vmem:[#allocation3 + $0x368] sm:$0xff]  ;;  %v361_v40 = vld [vmem:[#allocation3 + $0x250] sm:$0xff] }
  0x33   :  { %486 = vmatpush.msra.mxu1 %v401_v25  ;;  %616 = vmatpush.msra.mxu3 %v402_v27  ;;  %v393_v41 = vld [vmem:[#allocation3 + $0x350] sm:$0xff]  ;;  %v362_v42 = vld [vmem:[#allocation3 + $0x258] sm:$0xff]  ;;  %v359_v44 = vld [vmem:[#allocation3 + $0x240] sm:$0xff] }
  0x34   :  { %422 = vmatpush.msra.mxu0 %v367_v28  ;;  %552 = vmatpush.msra.mxu2 %v368_v30  ;;  %v394_v43 = vld [vmem:[#allocation3 + $0x358] sm:$0xff]  ;;  %v391_v45 = vld [vmem:[#allocation3 + $0x340] sm:$0xff]  ;;  %v360_v46 = vld [vmem:[#allocation3 + $0x248] sm:$0xff] }
  0x35   :  { %487 = vmatpush.msra.mxu1 %v399_v29  ;;  %617 = vmatpush.msra.mxu3 %v400_v31  ;;  %v392_v47 = vld [vmem:[#allocation3 + $0x348] sm:$0xff]  ;;  %v357_v48 = vld [vmem:[#allocation3 + $0x230] sm:$0xff]  ;;  %v358_v50 = vld [vmem:[#allocation3 + $0x238] sm:$0xff] }
  0x36   :  { %423 = vmatpush.msra.mxu0 %v365_v32  ;;  %553 = vmatpush.msra.mxu2 %v366_v34  ;;  %v389_v49 = vld [vmem:[#allocation3 + $0x330] sm:$0xff]  ;;  %v390_v51 = vld [vmem:[#allocation3 + $0x338] sm:$0xff]  ;;  %v355_v52 = vld [vmem:[#allocation3 + $0x220] sm:$0xff] }
  0x37   :  { %488 = vmatpush.msra.mxu1 %v397_v33  ;;  %618 = vmatpush.msra.mxu3 %v398_v35  ;;  %v387_v53 = vld [vmem:[#allocation3 + $0x320] sm:$0xff]  ;;  %v356_v54 = vld [vmem:[#allocation3 + $0x228] sm:$0xff]  ;;  %v353_v56 = vld [vmem:[#allocation3 + $0x210] sm:$0xff] }
  0x38   :  { %424 = vmatpush.msra.mxu0 %v363_v36  ;;  %554 = vmatpush.msra.mxu2 %v364_v38  ;;  %v388_v55 = vld [vmem:[#allocation3 + $0x328] sm:$0xff]  ;;  %v385_v57 = vld [vmem:[#allocation3 + $0x310] sm:$0xff]  ;;  %v354_v58 = vld [vmem:[#allocation3 + $0x218] sm:$0xff] }
  0x39   :  { %489 = vmatpush.msra.mxu1 %v395_v37  ;;  %619 = vmatpush.msra.mxu3 %v396_v39  ;;  %v386_v59 = vld [vmem:[#allocation3 + $0x318] sm:$0xff]  ;;  %v351_v60 = vld [vmem:[#allocation3 + $0x200] sm:$0xff]  ;;  %v352_v62 = vld [vmem:[#allocation3 + $0x208] sm:$0xff] }
  0x3a   :  { %425 = vmatpush.msra.mxu0 %v361_v40  ;;  %555 = vmatpush.msra.mxu2 %v362_v42  ;;  %v383_v61 = vld [vmem:[#allocation3 + $0x300] sm:$0xff]  ;;  %v384_v63 = vld [vmem:[#allocation3 + $0x308] sm:$0xff]  ;;  %v314_v0 = vld [vmem:[#allocation3 + $0xf8] sm:$0xff] }
  0x3b   :  { %490 = vmatpush.msra.mxu1 %v393_v41  ;;  %620 = vmatpush.msra.mxu3 %v394_v43  ;;  %v346_v1 = vld [vmem:[#allocation3 + $0x1f8] sm:$0xff]  ;;  %v313_v3 = vld [vmem:[#allocation3 + $0xf0] sm:$0xff]  ;;  %v312_v5 = vld [vmem:[#allocation3 + $0xe8] sm:$0xff] }
  0x3c   :  { %426 = vmatpush.msra.mxu0 %v359_v44  ;;  %556 = vmatpush.msra.mxu2 %v360_v46  ;;  %v345_v4 = vld [vmem:[#allocation3 + $0x1f0] sm:$0xff]  ;;  %v344_v6 = vld [vmem:[#allocation3 + $0x1e8] sm:$0xff]  ;;  %v311_v7 = vld [vmem:[#allocation3 + $0xe0] sm:$0xff] }
  0x3d   :  { %491 = vmatpush.msra.mxu1 %v391_v45  ;;  %621 = vmatpush.msra.mxu3 %v392_v47  ;;  %v343_v8 = vld [vmem:[#allocation3 + $0x1e0] sm:$0xff]  ;;  %v310_v9 = vld [vmem:[#allocation3 + $0xd8] sm:$0xff]  ;;  %v309_v11 = vld [vmem:[#allocation3 + $0xd0] sm:$0xff] }
  0x3e   :  { %427 = vmatpush.msra.mxu0 %v357_v48  ;;  %557 = vmatpush.msra.mxu2 %v358_v50  ;;  %v342_v10 = vld [vmem:[#allocation3 + $0x1d8] sm:$0xff]  ;;  %v341_v12 = vld [vmem:[#allocation3 + $0x1d0] sm:$0xff]  ;;  %v308_v13 = vld [vmem:[#allocation3 + $0xc8] sm:$0xff] }
  0x3f   :  { %492 = vmatpush.msra.mxu1 %v389_v49  ;;  %622 = vmatpush.msra.mxu3 %v390_v51  ;;  %v340_v14 = vld [vmem:[#allocation3 + $0x1c8] sm:$0xff]  ;;  %v307_v15 = vld [vmem:[#allocation3 + $0xc0] sm:$0xff]  ;;  %v306_v17 = vld [vmem:[#allocation3 + $0xb8] sm:$0xff] }
  0x40   :  { %428 = vmatpush.msra.mxu0 %v355_v52  ;;  %558 = vmatpush.msra.mxu2 %v356_v54  ;;  %v339_v16 = vld [vmem:[#allocation3 + $0x1c0] sm:$0xff]  ;;  %v338_v18 = vld [vmem:[#allocation3 + $0x1b8] sm:$0xff]  ;;  %v305_v19 = vld [vmem:[#allocation3 + $0xb0] sm:$0xff] }
  0x41   :  { %493 = vmatpush.msra.mxu1 %v387_v53  ;;  %623 = vmatpush.msra.mxu3 %v388_v55  ;;  %v337_v20 = vld [vmem:[#allocation3 + $0x1b0] sm:$0xff]  ;;  %v304_v21 = vld [vmem:[#allocation3 + $0xa8] sm:$0xff]  ;;  %v303_v23 = vld [vmem:[#allocation3 + $0xa0] sm:$0xff] }
  0x42   :  { %429 = vmatpush.msra.mxu0 %v353_v56  ;;  %559 = vmatpush.msra.mxu2 %v354_v58  ;;  %v336_v22 = vld [vmem:[#allocation3 + $0x1a8] sm:$0xff]  ;;  %v335_v24 = vld [vmem:[#allocation3 + $0x1a0] sm:$0xff]  ;;  %v302_v25 = vld [vmem:[#allocation3 + $0x98] sm:$0xff] }
  0x43   :  { %494 = vmatpush.msra.mxu1 %v385_v57  ;;  %624 = vmatpush.msra.mxu3 %v386_v59  ;;  %v334_v26 = vld [vmem:[#allocation3 + $0x198] sm:$0xff]  ;;  %v301_v27 = vld [vmem:[#allocation3 + $0x90] sm:$0xff]  ;;  %v300_v29 = vld [vmem:[#allocation3 + $0x88] sm:$0xff] }
  0x44   :  { %430 = vmatpush.msra.mxu0 %v351_v60  ;;  %560 = vmatpush.msra.mxu2 %v352_v62  ;;  %v333_v28 = vld [vmem:[#allocation3 + $0x190] sm:$0xff]  ;;  %v332_v30 = vld [vmem:[#allocation3 + $0x188] sm:$0xff]  ;;  %v299_v31 = vld [vmem:[#allocation3 + $0x80] sm:$0xff] }
  0x45   :  { %495 = vmatpush.msra.mxu1 %v383_v61  ;;  %625 = vmatpush.msra.mxu3 %v384_v63  ;;  %v331_v32 = vld [vmem:[#allocation3 + $0x180] sm:$0xff]  ;;  %v6566_v34 = vld [vmem:[%s10771_s0 + $0x8] sm:$0xff]  ;;  %v298_v35 = vld [vmem:[#allocation3 + $0x78] sm:$0xff] }
  0x46   :  { %431 = vmatmul.f32.vlgmr.msra.gmra.mxu0 %v10782_v2  ;;  %496 = vmatmul.f32.vlgmr.msra.gmra.mxu1 %v10782_v2  ;;  %v6561_v33 = vld [vmem:[%s10771_s0] sm:$0xff]  ;;  %v330_v36 = vld [vmem:[#allocation3 + $0x178] sm:$0xff]  ;;  %v297_v37 = vld [vmem:[#allocation3 + $0x70] sm:$0xff] }
  0x47   :  { %561 = vmatmul.f32.vlgmr.msra.gmra.mxu2 %v10782_v2  ;;  %626 = vmatmul.f32.vlgmr.msra.gmra.mxu3 %v10782_v2  ;;  %v329_v38 = vld [vmem:[#allocation3 + $0x170] sm:$0xff]  ;;  %v6580_v40 = vld [vmem:[%s10771_s0 + $0x18] sm:$0xff]  ;;  %v296_v41 = vld [vmem:[#allocation3 + $0x68] sm:$0xff] }
  0x48   :  { %805 = vmatpush.msrb.mxu2 %v314_v0  ;;  %870 = vmatpush.msrb.mxu3 %v346_v1  ;;  %v6575_v39 = vld [vmem:[%s10771_s0 + $0x10] sm:$0xff]  ;;  %v328_v42 = vld [vmem:[#allocation3 + $0x168] sm:$0xff]  ;;  %v295_v43 = vld [vmem:[#allocation3 + $0x60] sm:$0xff] }
  0x49   :  { %675 = vmatpush.msrb.mxu0 %v313_v3  ;;  %740 = vmatpush.msrb.mxu1 %v345_v4  ;;  %v327_v44 = vld [vmem:[#allocation3 + $0x160] sm:$0xff]  ;;  %v6594_v46 = vld [vmem:[%s10771_s0 + $0x28] sm:$0xff]  ;;  %v294_v47 = vld [vmem:[#allocation3 + $0x58] sm:$0xff] }
  0x4a   :  { %806 = vmatpush.msrb.mxu2 %v312_v5  ;;  %871 = vmatpush.msrb.mxu3 %v344_v6  ;;  %v6589_v45 = vld [vmem:[%s10771_s0 + $0x20] sm:$0xff]  ;;  %v326_v48 = vld [vmem:[#allocation3 + $0x158] sm:$0xff]  ;;  %v293_v49 = vld [vmem:[#allocation3 + $0x50] sm:$0xff] }
  0x4b   :  { %676 = vmatpush.msrb.mxu0 %v311_v7  ;;  %741 = vmatpush.msrb.mxu1 %v343_v8  ;;  %v325_v50 = vld [vmem:[#allocation3 + $0x150] sm:$0xff]  ;;  %v6608_v52 = vld [vmem:[%s10771_s0 + $0x38] sm:$0xff]  ;;  %v292_v53 = vld [vmem:[#allocation3 + $0x48] sm:$0xff] }
  0x4c   :  { %807 = vmatpush.msrb.mxu2 %v310_v9  ;;  %872 = vmatpush.msrb.mxu3 %v342_v10  ;;  %v6603_v51 = vld [vmem:[%s10771_s0 + $0x30] sm:$0xff]  ;;  %v324_v54 = vld [vmem:[#allocation3 + $0x148] sm:$0xff]  ;;  %v291_v55 = vld [vmem:[#allocation3 + $0x40] sm:$0xff] }
  0x4d   :  { %677 = vmatpush.msrb.mxu0 %v309_v11  ;;  %742 = vmatpush.msrb.mxu1 %v341_v12  ;;  %v323_v56 = vld [vmem:[#allocation3 + $0x140] sm:$0xff]  ;;  %v6622_v58 = vld [vmem:[%s10771_s0 + $0x48] sm:$0xff]  ;;  %v290_v59 = vld [vmem:[#allocation3 + $0x38] sm:$0xff] }
  0x4e   :  { %434 = vmatmul.f32.gmra.mxu0 %v10782_v2  ;;  %499 = vmatmul.f32.gmra.mxu1 %v10782_v2  ;;  %v6617_v57 = vld [vmem:[%s10771_s0 + $0x40] sm:$0xff]  ;;  %v322_v60 = vld [vmem:[#allocation3 + $0x138] sm:$0xff]  ;;  %v289_v61 = vld [vmem:[#allocation3 + $0x30] sm:$0xff] }
  0x4f   :  { %564 = vmatmul.f32.gmra.mxu2 %v10782_v2  ;;  %629 = vmatmul.f32.gmra.mxu3 %v10782_v2  ;;  %v321_v62 = vld [vmem:[#allocation3 + $0x130] sm:$0xff]  ;;  %v6636_v0 = vld [vmem:[%s10771_s0 + $0x58] sm:$0xff]  ;;  %v288_v1 = vld [vmem:[#allocation3 + $0x28] sm:$0xff] }
  0x50   :  { %808 = vmatpush.msrb.mxu2 %v308_v13  ;;  %873 = vmatpush.msrb.mxu3 %v340_v14  ;;  %v6631_v63 = vld [vmem:[%s10771_s0 + $0x50] sm:$0xff]  ;;  %v320_v3 = vld [vmem:[#allocation3 + $0x128] sm:$0xff]  ;;  %v287_v4 = vld [vmem:[#allocation3 + $0x20] sm:$0xff] }
  0x51   :  { %678 = vmatpush.msrb.mxu0 %v307_v15  ;;  %743 = vmatpush.msrb.mxu1 %v339_v16  ;;  %v319_v5 = vld [vmem:[#allocation3 + $0x120] sm:$0xff]  ;;  %v6650_v7 = vld [vmem:[%s10771_s0 + $0x68] sm:$0xff]  ;;  %v286_v8 = vld [vmem:[#allocation3 + $0x18] sm:$0xff] }
  0x52   :  { %809 = vmatpush.msrb.mxu2 %v306_v17  ;;  %874 = vmatpush.msrb.mxu3 %v338_v18  ;;  %v6645_v6 = vld [vmem:[%s10771_s0 + $0x60] sm:$0xff]  ;;  %v318_v9 = vld [vmem:[#allocation3 + $0x118] sm:$0xff]  ;;  %v285_v10 = vld [vmem:[#allocation3 + $0x10] sm:$0xff] }
  0x53   :  { %679 = vmatpush.msrb.mxu0 %v305_v19  ;;  %744 = vmatpush.msrb.mxu1 %v337_v20  ;;  %v317_v11 = vld [vmem:[#allocation3 + $0x110] sm:$0xff]  ;;  %v6664_v13 = vld [vmem:[%s10771_s0 + $0x78] sm:$0xff]  ;;  %v284_v14 = vld [vmem:[#allocation3 + $0x8] sm:$0xff] }
  0x54   :  { %810 = vmatpush.msrb.mxu2 %v304_v21  ;;  %875 = vmatpush.msrb.mxu3 %v336_v22  ;;  %v6659_v12 = vld [vmem:[%s10771_s0 + $0x70] sm:$0xff]  ;;  %v316_v15 = vld [vmem:[#allocation3 + $0x108] sm:$0xff]  ;;  %v6673_v16 = vld [vmem:[%s10771_s0 + $0x80] sm:$0xff] }
  0x55   :  { %680 = vmatpush.msrb.mxu0 %v303_v23  ;;  %745 = vmatpush.msrb.mxu1 %v335_v24  ;;  %v6678_v17 = vld [vmem:[%s10771_s0 + $0x88] sm:$0xff]  ;;  %v283_v18 = vld [vmem:[#allocation3] sm:$0xff]  ;;  %v998_v20 = vld [vmem:[#allocation3 + $0x4f8] sm:$0xff] }
  0x56   :  { %437 = vmatmul.f32.gmra.mxu0 %v10782_v2  ;;  %502 = vmatmul.f32.gmra.mxu1 %v10782_v2  ;;  %v315_v19 = vld [vmem:[#allocation3 + $0x100] sm:$0xff]  ;;  %v1030_v21 = vld [vmem:[#allocation3 + $0x5f8] sm:$0xff]  ;;  %v6687_v22 = vld [vmem:[%s10771_s0 + $0x90] sm:$0xff] }
  0x57   :  { %567 = vmatmul.f32.gmra.mxu2 %v10782_v2  ;;  %632 = vmatmul.f32.gmra.mxu3 %v10782_v2  ;;  %v6692_v23 = vld [vmem:[%s10771_s0 + $0x98] sm:$0xff]  ;;  %v997_v24 = vld [vmem:[#allocation3 + $0x4f0] sm:$0xff] }
  0x58   :  { %811 = vmatpush.msrb.mxu2 %v302_v25  ;;  %876 = vmatpush.msrb.mxu3 %v334_v26  ;;  %v1029_v25 = vld [vmem:[#allocation3 + $0x5f0] sm:$0xff]  ;;  %v996_v26 = vld [vmem:[#allocation3 + $0x4e8] sm:$0xff] }
  0x59   :  { %681 = vmatpush.msrb.mxu0 %v301_v27  ;;  %746 = vmatpush.msrb.mxu1 %v333_v28  ;;  %v1028_v27 = vld [vmem:[#allocation3 + $0x5e8] sm:$0xff]  ;;  %v207_v28 = vld [vmem:[%s10771_s0 + $0xa0] sm:$0xff] }
  0x5a   :  { %812 = vmatpush.msrb.mxu2 %v300_v29  ;;  %877 = vmatpush.msrb.mxu3 %v332_v30  ;;  %v208_v29 = vld [vmem:[%s10771_s0 + $0xa8] sm:$0xff]  ;;  %v995_v30 = vld [vmem:[#allocation3 + $0x4e0] sm:$0xff] }
  0x5b   :  { %682 = vmatpush.msrb.mxu0 %v299_v31  ;;  %747 = vmatpush.msrb.mxu1 %v331_v32  ;;  %v1027_v31 = vld [vmem:[#allocation3 + $0x5e0] sm:$0xff]  ;;  %v994_v32 = vld [vmem:[#allocation3 + $0x4d8] sm:$0xff] }
  0x5c   :  { %813 = vmatpush.msrb.mxu2 %v298_v35  ;;  %878 = vmatpush.msrb.mxu3 %v330_v36  ;;  %v1026_v35 = vld [vmem:[#allocation3 + $0x5d8] sm:$0xff]  ;;  %v209_v36 = vld [vmem:[%s10771_s0 + $0xb0] sm:$0xff] }
  0x5d   :  { %683 = vmatpush.msrb.mxu0 %v297_v37  ;;  %748 = vmatpush.msrb.mxu1 %v329_v38  ;;  %v210_v37 = vld [vmem:[%s10771_s0 + $0xb8] sm:$0xff]  ;;  %v993_v38 = vld [vmem:[#allocation3 + $0x4d0] sm:$0xff] }
  0x5e   :  { %440 = vmatmul.f32.gmra.mxu0 %v10782_v2  ;;  %505 = vmatmul.f32.gmra.mxu1 %v10782_v2 }
  0x5f   :  { %570 = vmatmul.f32.gmra.mxu2 %v10782_v2  ;;  %635 = vmatmul.f32.gmra.mxu3 %v10782_v2 }
  0x60   :  { %814 = vmatpush.msrb.mxu2 %v296_v41  ;;  %879 = vmatpush.msrb.mxu3 %v328_v42  ;;  %v1025_v41 = vld [vmem:[#allocation3 + $0x5d0] sm:$0xff]  ;;  %v992_v42 = vld [vmem:[#allocation3 + $0x4c8] sm:$0xff] }
  0x61   :  { %684 = vmatpush.msrb.mxu0 %v295_v43  ;;  %749 = vmatpush.msrb.mxu1 %v327_v44  ;;  %v1024_v43 = vld [vmem:[#allocation3 + $0x5c8] sm:$0xff] }
  0x62   :  { %815 = vmatpush.msrb.mxu2 %v294_v47  ;;  %880 = vmatpush.msrb.mxu3 %v326_v48  ;;  %v991_v48 = vld [vmem:[#allocation3 + $0x4c0] sm:$0xff] }
  0x63   :  { %685 = vmatpush.msrb.mxu0 %v293_v49  ;;  %750 = vmatpush.msrb.mxu1 %v325_v50  ;;  %v1023_v49 = vld [vmem:[#allocation3 + $0x5c0] sm:$0xff]  ;;  %v990_v50 = vld [vmem:[#allocation3 + $0x4b8] sm:$0xff] }
  0x64   :  { %816 = vmatpush.msrb.mxu2 %v292_v53  ;;  %881 = vmatpush.msrb.mxu3 %v324_v54  ;;  %v1022_v53 = vld [vmem:[#allocation3 + $0x5b8] sm:$0xff] }
  0x65   :  { %686 = vmatpush.msrb.mxu0 %v291_v55  ;;  %751 = vmatpush.msrb.mxu1 %v323_v56 }
  0x66   :  { %443 = vmatmul.f32.gmra.mxu0 %v6561_v33  ;;  %508 = vmatmul.f32.gmra.mxu1 %v6566_v34 }
  0x67   :  { %573 = vmatmul.f32.gmra.mxu2 %v6561_v33  ;;  %638 = vmatmul.f32.gmra.mxu3 %v6566_v34 }
  0x68   :  { %817 = vmatpush.msrb.mxu2 %v290_v59  ;;  %882 = vmatpush.msrb.mxu3 %v322_v60 }
  0x69   :  { %687 = vmatpush.msrb.mxu0 %v289_v61  ;;  %752 = vmatpush.msrb.mxu1 %v321_v62  ;;  %v989_v61 = vld [vmem:[#allocation3 + $0x4b0] sm:$0xff] }
  0x6a   :  { %818 = vmatpush.msrb.mxu2 %v288_v1  ;;  %883 = vmatpush.msrb.mxu3 %v320_v3  ;;  %v1021_v62 = vld [vmem:[#allocation3 + $0x5b0] sm:$0xff]  ;;  %v988_v1 = vld [vmem:[#allocation3 + $0x4a8] sm:$0xff] }
  0x6b   :  { %688 = vmatpush.msrb.mxu0 %v287_v4  ;;  %753 = vmatpush.msrb.mxu1 %v319_v5  ;;  %v1020_v3 = vld [vmem:[#allocation3 + $0x5a8] sm:$0xff] }
  0x6c   :  { %819 = vmatpush.msrb.mxu2 %v286_v8  ;;  %884 = vmatpush.msrb.mxu3 %v318_v9 }
  0x6d   :  { %689 = vmatpush.msrb.mxu0 %v285_v10  ;;  %754 = vmatpush.msrb.mxu1 %v317_v11  ;;  %v987_v11 = vld [vmem:[#allocation3 + $0x4a0] sm:$0xff] }
  0x6e   :  { %446 = vmatmul.f32.gmra.mxu0 %v6575_v39  ;;  %511 = vmatmul.f32.gmra.mxu1 %v6580_v40 }
  0x6f   :  { %576 = vmatmul.f32.gmra.mxu2 %v6575_v39  ;;  %641 = vmatmul.f32.gmra.mxu3 %v6580_v40 }
  0x70   :  { %820 = vmatpush.msrb.mxu2 %v284_v14  ;;  %885 = vmatpush.msrb.mxu3 %v316_v15  ;;  %v1019_v14 = vld [vmem:[#allocation3 + $0x5a0] sm:$0xff]  ;;  %v986_v15 = vld [vmem:[#allocation3 + $0x498] sm:$0xff] }
  0x71   :  { %690 = vmatpush.msrb.mxu0 %v283_v18  ;;  %755 = vmatpush.msrb.mxu1 %v315_v19  ;;  %v1018_v18 = vld [vmem:[#allocation3 + $0x598] sm:$0xff] }
  0x72   :  { %1161 = vmatpush.msra.mxu2 %v998_v20  ;;  %1226 = vmatpush.msra.mxu3 %v1030_v21 }
  0x73   :  { %1031 = vmatpush.msra.mxu0 %v997_v24  ;;  %1096 = vmatpush.msra.mxu1 %v1029_v25 }
  0x74   :  { %1162 = vmatpush.msra.mxu2 %v996_v26  ;;  %1227 = vmatpush.msra.mxu3 %v1028_v27  ;;  %v985_v26 = vld [vmem:[#allocation3 + $0x490] sm:$0xff] }
  0x75   :  { %1032 = vmatpush.msra.mxu0 %v995_v30  ;;  %1097 = vmatpush.msra.mxu1 %v1027_v31  ;;  %v1017_v27 = vld [vmem:[#allocation3 + $0x590] sm:$0xff] }
  0x76   :  { %449 = vmatmul.f32.gmra.mxu0 %v6589_v45  ;;  %514 = vmatmul.f32.gmra.mxu1 %v6594_v46 }
  0x77   :  { %579 = vmatmul.f32.gmra.mxu2 %v6589_v45  ;;  %644 = vmatmul.f32.gmra.mxu3 %v6594_v46 }
  0x78   :  { %1163 = vmatpush.msra.mxu2 %v994_v32  ;;  %1228 = vmatpush.msra.mxu3 %v1026_v35 }
  0x79   :  { %1033 = vmatpush.msra.mxu0 %v993_v38  ;;  %1098 = vmatpush.msra.mxu1 %v1025_v41  ;;  %v1015_v38 = vld [vmem:[#allocation3 + $0x580] sm:$0xff]  ;;  %v982_v41 = vld [vmem:[#allocation3 + $0x478] sm:$0xff] }
  0x7a   :  { %1164 = vmatpush.msra.mxu2 %v992_v42  ;;  %1229 = vmatpush.msra.mxu3 %v1024_v43  ;;  %v1014_v42 = vld [vmem:[#allocation3 + $0x578] sm:$0xff] }
  0x7b   :  { %1034 = vmatpush.msra.mxu0 %v991_v48  ;;  %1099 = vmatpush.msra.mxu1 %v1023_v49 }
  0x7c   :  { %1165 = vmatpush.msra.mxu2 %v990_v50  ;;  %1230 = vmatpush.msra.mxu3 %v1022_v53 }
  0x7d   :  { %1035 = vmatpush.msra.mxu0 %v989_v61  ;;  %1100 = vmatpush.msra.mxu1 %v1021_v62  ;;  %v980_v61 = vld [vmem:[#allocation3 + $0x468] sm:$0xff] }
  0x7e   :  { %452 = vmatmul.f32.gmra.mxu0 %v6603_v51  ;;  %517 = vmatmul.f32.gmra.mxu1 %v6608_v52  ;;  %v1012_v62 = vld [vmem:[#allocation3 + $0x568] sm:$0xff] }
  0x7f   :  { %582 = vmatmul.f32.gmra.mxu2 %v6603_v51  ;;  %647 = vmatmul.f32.gmra.mxu3 %v6608_v52 }
  0x80   :  { %1166 = vmatpush.msra.mxu2 %v988_v1  ;;  %1231 = vmatpush.msra.mxu3 %v1020_v3 }
  0x81   :  { %1036 = vmatpush.msra.mxu0 %v987_v11  ;;  %1101 = vmatpush.msra.mxu1 %v1019_v14  ;;  %v979_v14 = vld [vmem:[#allocation3 + $0x460] sm:$0xff] }
  0x82   :  { %1167 = vmatpush.msra.mxu2 %v986_v15  ;;  %1232 = vmatpush.msra.mxu3 %v1018_v18  ;;  %v1011_v15 = vld [vmem:[#allocation3 + $0x560] sm:$0xff]  ;;  %v978_v18 = vld [vmem:[#allocation3 + $0x458] sm:$0xff] }
  0x83   :  { %1037 = vmatpush.msra.mxu0 %v985_v26  ;;  %1102 = vmatpush.msra.mxu1 %v1017_v27 }
  0x85   :  { %1103 = vmatpush.msra.mxu1 %v1015_v38  ;;  %v1008_v38 = vld [vmem:[#allocation3 + $0x548] sm:$0xff] }
  0x86   :  { %455 = vmatmul.f32.gmra.mxu0 %v6617_v57  ;;  %520 = vmatmul.f32.gmra.mxu1 %v6622_v58 }
  0x87   :  { %585 = vmatmul.f32.gmra.mxu2 %v6617_v57  ;;  %650 = vmatmul.f32.gmra.mxu3 %v6622_v58 }
  0x8e   :  { %458 = vmatmul.f32.gmra.mxu0 %v6631_v63  ;;  %523 = vmatmul.f32.gmra.mxu1 %v6636_v0 }
  0x8f   :  { %588 = vmatmul.f32.gmra.mxu2 %v6631_v63  ;;  %653 = vmatmul.f32.gmra.mxu3 %v6636_v0 }
  0x96   :  { %461 = vmatmul.f32.gmra.mxu0 %v6645_v6  ;;  %526 = vmatmul.f32.gmra.mxu1 %v6650_v7 }
  0x97   :  { %591 = vmatmul.f32.gmra.mxu2 %v6645_v6  ;;  %656 = vmatmul.f32.gmra.mxu3 %v6650_v7 }
  0x9e   :  { %464 = vmatmul.f32.gmra.mxu0 %v6659_v12  ;;  %529 = vmatmul.f32.gmra.mxu1 %v6664_v13 }
  0x9f   :  { %594 = vmatmul.f32.gmra.mxu2 %v6659_v12  ;;  %659 = vmatmul.f32.gmra.mxu3 %v6664_v13 }
  0xa6   :  { %467 = vmatmul.f32.gmra.mxu0 %v6673_v16  ;;  %532 = vmatmul.f32.gmra.mxu1 %v6678_v17 }
  0xa7   :  { %597 = vmatmul.f32.gmra.mxu2 %v6673_v16  ;;  %662 = vmatmul.f32.gmra.mxu3 %v6678_v17 }
  0xae   :  { %470 = vmatmul.f32.gmra.mxu0 %v6687_v22  ;;  %535 = vmatmul.f32.gmra.mxu1 %v6692_v23 }
  0xaf   :  { %600 = vmatmul.f32.gmra.mxu2 %v6687_v22  ;;  %665 = vmatmul.f32.gmra.mxu3 %v6692_v23 }
  0xb6   :  { %473 = vmatmul.f32.gmra.mxu0 %v207_v28  ;;  %538 = vmatmul.f32.gmra.mxu1 %v208_v29 }
  0xb7   :  { %603 = vmatmul.f32.gmra.mxu2 %v207_v28  ;;  %668 = vmatmul.f32.gmra.mxu3 %v208_v29  ;;  %v984_v28 = vld [vmem:[#allocation3 + $0x488] sm:$0xff] }
  0xb8   :  { %v1016_v29 = vld [vmem:[#allocation3 + $0x588] sm:$0xff]  ;;  %1168 = vmatpush.msra.mxu2 %v984_v28 }
  0xb9   :  { %1233 = vmatpush.msra.mxu3 %v1016_v29 }
  0xba   :  { %1169 = vmatpush.msra.mxu2 %v982_v41 }
  0xbb   :  { %1234 = vmatpush.msra.mxu3 %v1014_v42 }
  0xbc   :  { %1170 = vmatpush.msra.mxu2 %v980_v61  ;;  %v1007_v61 = vld [vmem:[#allocation3 + $0x540] sm:$0xff] }
  0xbd   :  { %1235 = vmatpush.msra.mxu3 %v1012_v62  ;;  %v974_v62 = vld [vmem:[#allocation3 + $0x438] sm:$0xff] }
  0xbe   :  { %476 = vmatmul.f32.gmra.mxu0 %v209_v36  ;;  %541 = vmatmul.f32.gmra.mxu1 %v210_v37 }
  0xbf   :  { %606 = vmatmul.f32.gmra.mxu2 %v209_v36  ;;  %671 = vmatmul.f32.gmra.mxu3 %v210_v37  ;;  %v983_v37 = vld [vmem:[#allocation3 + $0x480] sm:$0xff] }
  0xc0   :  { %1038 = vmatpush.msra.mxu0 %v983_v37  ;;  %1171 = vmatpush.msra.mxu2 %v978_v18  ;;  %v976_v37 = vld [vmem:[#allocation3 + $0x448] sm:$0xff] }
  0xc2   :  { %1172 = vmatpush.msra.mxu2 %v976_v37 }
  0xc3   :  { %v6710_v44 = vpop.f32.mrf.mxu0  ;;  %v6712_v47 = vpop.f32.mrf.mxu1 }
  0xc4   :  { %1173 = vmatpush.msra.mxu2 %v974_v62  ;;  %v1003_v62 = vld [vmem:[#allocation3 + $0x520] sm:$0xff] }
  0xc6   :  { %691 = vmatmul.f32.vlgmr.msrb.gmra.mxu0 %v10782_v2  ;;  %756 = vmatmul.f32.vlgmr.msrb.gmra.mxu1 %v10782_v2 }
  0xc7   :  { %821 = vmatmul.f32.vlgmr.msrb.gmra.mxu2 %v10782_v2  ;;  %886 = vmatmul.f32.vlgmr.msrb.gmra.mxu3 %v10782_v2 }
  0xca   :  { %v562_v54 = vpop.f32.mrf.mxu2  ;;  %v627_v55 = vpop.f32.mrf.mxu3 }
  0xcb   :  { %v6718_v56 = vadd.f32 %v627_v55, %v562_v54  ;;  %v6720_v59 = vpop.f32.mrf.mxu0  ;;  %v6722_v60 = vpop.f32.mrf.mxu1  ;;  %v981_v54 = vld [vmem:[#allocation3 + $0x470] sm:$0xff] }
  0xcc   :  { %v1013_v55 = vld [vmem:[#allocation3 + $0x570] sm:$0xff]  ;;  %1039 = vmatpush.msra.mxu0 %v981_v54 }
  0xcd   :  { %1104 = vmatpush.msra.mxu1 %v1013_v55  ;;  %v975_v55 = vld [vmem:[#allocation3 + $0x440] sm:$0xff] }
  0xce   :  { %694 = vmatmul.f32.gmra.mxu0 %v10782_v2  ;;  %759 = vmatmul.f32.gmra.mxu1 %v10782_v2 }
  0xcf   :  { %824 = vmatmul.f32.gmra.mxu2 %v10782_v2  ;;  %889 = vmatmul.f32.gmra.mxu3 %v10782_v2 }
  0xd0   :  { %1040 = vmatpush.msra.mxu0 %v979_v14  ;;  %1105 = vmatpush.msra.mxu1 %v1011_v15 }
  0xd2   :  { %v565_v4 = vpop.f32.mrf.mxu2  ;;  %v630_v5 = vpop.f32.mrf.mxu3 }
  0xd3   :  { %v6728_v8 = vadd.f32 %v630_v5, %v565_v4  ;;  %v6730_v9 = vpop.f32.mrf.mxu0  ;;  %v6732_v10 = vpop.f32.mrf.mxu1 }
  0xd4   :  { %10792 = vst [vmem:[#allocation22_spill] sm:$0xff] %v6730_v9  ;;  %v1751_v9 = vld [vmem:[#allocation3 + $0x840] sm:$0xff] }
  0xd5   :  { %10793 = vst [vmem:[#allocation23_spill] sm:$0xff] %v6732_v10 }
  0xd6   :  { %697 = vmatmul.f32.gmra.mxu0 %v10782_v2  ;;  %762 = vmatmul.f32.gmra.mxu1 %v10782_v2 }
  0xd7   :  { %827 = vmatmul.f32.gmra.mxu2 %v10782_v2  ;;  %892 = vmatmul.f32.gmra.mxu3 %v10782_v2 }
  0xda   :  { %v568_v19 = vpop.f32.mrf.mxu2  ;;  %v633_v20 = vpop.f32.mrf.mxu3 }
  0xdb   :  { %v6738_v21 = vadd.f32 %v633_v20, %v568_v19  ;;  %v6740_v24 = vpop.f32.mrf.mxu0  ;;  %v6742_v25 = vpop.f32.mrf.mxu1  ;;  %v1010_v19 = vld [vmem:[#allocation3 + $0x558] sm:$0xff] }
  0xdc   :  { %10794 = vst [vmem:[#allocation24_spill] sm:$0xff] %v6740_v24  ;;  %1236 = vmatpush.msra.mxu3 %v1010_v19  ;;  %v7202_v24 = vld [vmem:[%s10771_s0 + $0x50] sm:$0xff] }
  0xdd   :  { %10795 = vst [vmem:[#allocation25_spill] sm:$0xff] %v6742_v25 }
  0xde   :  { %700 = vmatmul.f32.gmra.mxu0 %v10782_v2  ;;  %765 = vmatmul.f32.gmra.mxu1 %v10782_v2 }
  0xdf   :  { %830 = vmatmul.f32.gmra.mxu2 %v10782_v2  ;;  %895 = vmatmul.f32.gmra.mxu3 %v10782_v2 }
  0xe0   :  { %1237 = vmatpush.msra.mxu3 %v1008_v38 }
  0xe2   :  { %v571_v30 = vpop.f32.mrf.mxu2  ;;  %v636_v31 = vpop.f32.mrf.mxu3 }
  0xe3   :  { %v6748_v32 = vadd.f32 %v636_v31, %v571_v30  ;;  %v6750_v35 = vpop.f32.mrf.mxu0  ;;  %v6752_v36 = vpop.f32.mrf.mxu1  ;;  %v977_v30 = vld [vmem:[#allocation3 + $0x450] sm:$0xff] }
  0xe4   :  { %10796 = vst [vmem:[#allocation26_spill] sm:$0xff] %v6750_v35  ;;  %v1009_v31 = vld [vmem:[#allocation3 + $0x550] sm:$0xff]  ;;  %1041 = vmatpush.msra.mxu0 %v977_v30  ;;  %v972_v30 = vld [vmem:[#allocation3 + $0x428] sm:$0xff] }
  0xe5   :  { %10797 = vst [vmem:[#allocation27_spill] sm:$0xff] %v6752_v36  ;;  %1106 = vmatpush.msra.mxu1 %v1009_v31  ;;  %v1004_v31 = vld [vmem:[#allocation3 + $0x528] sm:$0xff]  ;;  %1174 = vmatpush.msra.mxu2 %v972_v30  ;;  %v7160_v35 = vld [vmem:[%s10771_s0 + $0x30] sm:$0xff] }
  0xe6   :  { %703 = vmatmul.f32.gmra.mxu0 %v10782_v2  ;;  %768 = vmatmul.f32.gmra.mxu1 %v10782_v2 }
  0xe7   :  { %833 = vmatmul.f32.gmra.mxu2 %v10782_v2  ;;  %898 = vmatmul.f32.gmra.mxu3 %v10782_v2 }
  0xe8   :  { %1042 = vmatpush.msra.mxu0 %v975_v55  ;;  %1107 = vmatpush.msra.mxu1 %v1007_v61  ;;  %v971_v61 = vld [vmem:[#allocation3 + $0x420] sm:$0xff] }
  0xea   :  { %v574_v43 = vpop.f32.mrf.mxu2  ;;  %v639_v48 = vpop.f32.mrf.mxu3 }
  0xeb   :  { %v6758_v49 = vadd.f32 %v639_v48, %v574_v43  ;;  %v6760_v50 = vpop.f32.mrf.mxu0  ;;  %v6762_v53 = vpop.f32.mrf.mxu1 }
  0xec   :  { %10798 = vst [vmem:[#allocation28_spill] sm:$0xff] %v6760_v50 }
  0xed   :  { %10799 = vst [vmem:[#allocation29_spill] sm:$0xff] %v6762_v53 }
  0xee   :  { %706 = vmatmul.f32.gmra.mxu0 %v10782_v2  ;;  %771 = vmatmul.f32.gmra.mxu1 %v10782_v2 }
  0xef   :  { %836 = vmatmul.f32.gmra.mxu2 %v10782_v2  ;;  %901 = vmatmul.f32.gmra.mxu3 %v10782_v2  ;;  %v999_v2 = vld [vmem:[#allocation3 + $0x500] sm:$0xff] }
  0xf2   :  { %v577_v1 = vpop.f32.mrf.mxu2  ;;  %v642_v3 = vpop.f32.mrf.mxu3 }
  0xf3   :  { %v6768_v4 = vadd.f32 %v642_v3, %v577_v1  ;;  %v6770_v5 = vpop.f32.mrf.mxu0  ;;  %v6772_v11 = vpop.f32.mrf.mxu1  ;;  %v1006_v1 = vld [vmem:[#allocation3 + $0x538] sm:$0xff] }
  0xf4   :  { %10800 = vst [vmem:[#allocation30_spill] sm:$0xff] %v6770_v5  ;;  %1238 = vmatpush.msra.mxu3 %v1006_v1  ;;  %v970_v1 = vld [vmem:[#allocation3 + $0x418] sm:$0xff]  ;;  %v6172_v5 = vld [vmem:[%s10771_s0] sm:$0xff] }
  0xf5   :  { %10801 = vst [vmem:[#allocation31_spill] sm:$0xff] %v6772_v11  ;;  %1175 = vmatpush.msra.mxu2 %v970_v1  ;;  %v1407_v11 = vld [vmem:[#allocation3 + $0x7a0] sm:$0xff] }
  0xf6   :  { %709 = vmatmul.f32.gmra.mxu0 %v6561_v33  ;;  %774 = vmatmul.f32.gmra.mxu1 %v6566_v34 }
  0xf7   :  { %839 = vmatmul.f32.gmra.mxu2 %v6561_v33  ;;  %904 = vmatmul.f32.gmra.mxu3 %v6566_v34 }
  0xf8   :  { %1239 = vmatpush.msra.mxu3 %v1004_v31 }
  0xfa   :  { %v580_v20 = vpop.f32.mrf.mxu2  ;;  %v645_v26 = vpop.f32.mrf.mxu3 }
  0xfb   :  { %v6778_v27 = vadd.f32 %v645_v26, %v580_v20  ;;  %v6780_v28 = vpop.f32.mrf.mxu0  ;;  %v6782_v29 = vpop.f32.mrf.mxu1  ;;  %v973_v20 = vld [vmem:[#allocation3 + $0x430] sm:$0xff] }
  0xfc   :  { %10802 = vst [vmem:[#allocation32_spill] sm:$0xff] %v6780_v28  ;;  %v1005_v26 = vld [vmem:[#allocation3 + $0x530] sm:$0xff]  ;;  %1043 = vmatpush.msra.mxu0 %v973_v20  ;;  %v1375_v28 = vld [vmem:[#allocation3 + $0x6a0] sm:$0xff] }
  0xfd   :  { %10803 = vst [vmem:[#allocation33_spill] sm:$0xff] %v6782_v29  ;;  %1108 = vmatpush.msra.mxu1 %v1005_v26  ;;  %v1409_v29 = vld [vmem:[#allocation3 + $0x7b0] sm:$0xff] }
  0xfe   :  { %712 = vmatmul.f32.gmra.mxu0 %v6575_v39  ;;  %777 = vmatmul.f32.gmra.mxu1 %v6580_v40 }
  0xff   :  { %842 = vmatmul.f32.gmra.mxu2 %v6575_v39  ;;  %907 = vmatmul.f32.gmra.mxu3 %v6580_v40 }
 0x100   :  { %1044 = vmatpush.msra.mxu0 %v971_v61  ;;  %1109 = vmatpush.msra.mxu1 %v1003_v62  ;;  %v968_v61 = vld [vmem:[#allocation3 + $0x408] sm:$0xff] }
 0x101   :  { %v1000_v62 = vld [vmem:[#allocation3 + $0x508] sm:$0xff]  ;;  %1176 = vmatpush.msra.mxu2 %v968_v61  ;;  %v1386_v61 = vld [vmem:[#allocation3 + $0x6f8] sm:$0xff] }
 0x102   :  { %v583_v41 = vpop.f32.mrf.mxu2  ;;  %v648_v42 = vpop.f32.mrf.mxu3 }
 0x103   :  { %v6788_v43 = vadd.f32 %v648_v42, %v583_v41  ;;  %v6790_v48 = vpop.f32.mrf.mxu0  ;;  %v6792_v54 = vpop.f32.mrf.mxu1  ;;  %1549 = vmatpush.msrb.mxu2 %v1386_v61 }
 0x104   :  { %10804 = vst [vmem:[#allocation34_spill] sm:$0xff] %v6790_v48  ;;  %v1377_v48 = vld [vmem:[#allocation3 + $0x6b0] sm:$0xff] }
 0x105   :  { %10805 = vst [vmem:[#allocation35_spill] sm:$0xff] %v6792_v54 }
 0x106   :  { %715 = vmatmul.f32.gmra.mxu0 %v6589_v45  ;;  %780 = vmatmul.f32.gmra.mxu1 %v6594_v46 }
 0x107   :  { %845 = vmatmul.f32.gmra.mxu2 %v6589_v45  ;;  %910 = vmatmul.f32.gmra.mxu3 %v6594_v46 }
 0x10a   :  { %v586_v3 = vpop.f32.mrf.mxu2  ;;  %v651_v14 = vpop.f32.mrf.mxu3 }
 0x10b   :  { %v6798_v15 = vadd.f32 %v651_v14, %v586_v3  ;;  %v6800_v18 = vpop.f32.mrf.mxu0  ;;  %v6802_v19 = vpop.f32.mrf.mxu1  ;;  %v1002_v3 = vld [vmem:[#allocation3 + $0x518] sm:$0xff] }
 0x10c   :  { %10806 = vst [vmem:[#allocation36_spill] sm:$0xff] %v6800_v18  ;;  %1240 = vmatpush.msra.mxu3 %v1002_v3 }
 0x10d   :  { %10807 = vst [vmem:[#allocation37_spill] sm:$0xff] %v6802_v19  ;;  %v1413_v19 = vld [vmem:[#allocation3 + $0x7d0] sm:$0xff] }
 0x10e   :  { %718 = vmatmul.f32.gmra.mxu0 %v6603_v51  ;;  %783 = vmatmul.f32.gmra.mxu1 %v6608_v52 }
 0x10f   :  { %848 = vmatmul.f32.gmra.mxu2 %v6603_v51  ;;  %913 = vmatmul.f32.gmra.mxu3 %v6608_v52 }
 0x110   :  { %1241 = vmatpush.msra.mxu3 %v1000_v62  ;;  %v1418_v62 = vld [vmem:[#allocation3 + $0x7f8] sm:$0xff] }
 0x112   :  { %v589_v37 = vpop.f32.mrf.mxu2  ;;  %v654_v38 = vpop.f32.mrf.mxu3  ;;  %1614 = vmatpush.msrb.mxu3 %v1418_v62 }
 0x113   :  { %v6808_v41 = vadd.f32 %v654_v38, %v589_v37  ;;  %v6810_v42 = vpop.f32.mrf.mxu0  ;;  %v6812_v55 = vpop.f32.mrf.mxu1  ;;  %v969_v37 = vld [vmem:[#allocation3 + $0x410] sm:$0xff] }
 0x114   :  { %10808 = vst [vmem:[#allocation38_spill] sm:$0xff] %v6810_v42  ;;  %v1001_v38 = vld [vmem:[#allocation3 + $0x510] sm:$0xff]  ;;  %1045 = vmatpush.msra.mxu0 %v969_v37  ;;  %v1415_v42 = vld [vmem:[#allocation3 + $0x7e0] sm:$0xff] }
 0x115   :  { %10809 = vst [vmem:[#allocation39_spill] sm:$0xff] %v6812_v55  ;;  %1110 = vmatpush.msra.mxu1 %v1001_v38  ;;  %v967_v38 = vld [vmem:[#allocation3 + $0x400] sm:$0xff]  ;;  %v1417_v55 = vld [vmem:[#allocation3 + $0x7f0] sm:$0xff] }
 0x116   :  { %721 = vmatmul.f32.gmra.mxu0 %v6617_v57  ;;  %786 = vmatmul.f32.gmra.mxu1 %v6622_v58 }
 0x117   :  { %851 = vmatmul.f32.gmra.mxu2 %v6617_v57  ;;  %916 = vmatmul.f32.gmra.mxu3 %v6622_v58 }
 0x118   :  { %1046 = vmatpush.msra.mxu0 %v967_v38  ;;  %1111 = vmatpush.msra.mxu1 %v999_v2  ;;  %v1384_v2 = vld [vmem:[#allocation3 + $0x6e8] sm:$0xff] }
 0x119   :  { %v1416_v38 = vld [vmem:[#allocation3 + $0x7e8] sm:$0xff]  ;;  %1550 = vmatpush.msrb.mxu2 %v1384_v2 }
 0x11a   :  { %v592_v14 = vpop.f32.mrf.mxu2  ;;  %v657_v20 = vpop.f32.mrf.mxu3  ;;  %1484 = vmatpush.msrb.mxu1 %v1417_v55  ;;  %1615 = vmatpush.msrb.mxu3 %v1416_v38  ;;  %v1382_v55 = vld [vmem:[#allocation3 + $0x6d8] sm:$0xff] }
 0x11b   :  { %v6818_v26 = vadd.f32 %v657_v20, %v592_v14  ;;  %v6820_v30 = vpop.f32.mrf.mxu0  ;;  %v6822_v31 = vpop.f32.mrf.mxu1  ;;  %1551 = vmatpush.msrb.mxu2 %v1382_v55 }
 0x11c   :  { %10810 = vst [vmem:[#allocation40_spill] sm:$0xff] %v6820_v30  ;;  %v1385_v30 = vld [vmem:[#allocation3 + $0x6f0] sm:$0xff]  ;;  %1485 = vmatpush.msrb.mxu1 %v1415_v42  ;;  %v1380_v42 = vld [vmem:[#allocation3 + $0x6c8] sm:$0xff] }
 0x11d   :  { %10811 = vst [vmem:[#allocation41_spill] sm:$0xff] %v6822_v31  ;;  %1419 = vmatpush.msrb.mxu0 %v1385_v30  ;;  %v1414_v30 = vld [vmem:[#allocation3 + $0x7d8] sm:$0xff]  ;;  %1552 = vmatpush.msrb.mxu2 %v1380_v42 }
 0x11e   :  { %724 = vmatmul.f32.gmra.mxu0 %v6631_v63  ;;  %789 = vmatmul.f32.gmra.mxu1 %v6636_v0 }
 0x11f   :  { %854 = vmatmul.f32.gmra.mxu2 %v6631_v63  ;;  %919 = vmatmul.f32.gmra.mxu3 %v6636_v0 }
 0x120   :  { %1616 = vmatpush.msrb.mxu3 %v1414_v30  ;;  %1486 = vmatpush.msrb.mxu1 %v1413_v19  ;;  %v1378_v19 = vld [vmem:[#allocation3 + $0x6b8] sm:$0xff] }
 0x121   :  { %1553 = vmatpush.msrb.mxu2 %v1378_v19 }
 0x122   :  { %v595_v1 = vpop.f32.mrf.mxu2  ;;  %v660_v3 = vpop.f32.mrf.mxu3 }
 0x123   :  { %v6828_v14 = vadd.f32 %v660_v3, %v595_v1  ;;  %v6830_v20 = vpop.f32.mrf.mxu0  ;;  %v6832_v37 = vpop.f32.mrf.mxu1 }
 0x124   :  { %10812 = vst [vmem:[#allocation42_spill] sm:$0xff] %v6830_v20 }
 0x125   :  { %10813 = vst [vmem:[#allocation43_spill] sm:$0xff] %v6832_v37 }
 0x126   :  { %727 = vmatmul.f32.gmra.mxu0 %v6645_v6  ;;  %792 = vmatmul.f32.gmra.mxu1 %v6650_v7 }
 0x127   :  { %857 = vmatmul.f32.gmra.mxu2 %v6645_v6  ;;  %922 = vmatmul.f32.gmra.mxu3 %v6650_v7 }
 0x12a   :  { %v598_v1 = vpop.f32.mrf.mxu2  ;;  %v663_v3 = vpop.f32.mrf.mxu3 }
 0x12b   :  { %v6838_v20 = vadd.f32 %v663_v3, %v598_v1  ;;  %v6840_v37 = vpop.f32.mrf.mxu0  ;;  %v6842_v31 = vpop.f32.mrf.mxu1 }
 0x12c   :  { %10814 = vst [vmem:[#allocation44_spill] sm:$0xff] %v6840_v37  ;;  %v1383_v37 = vld [vmem:[#allocation3 + $0x6e0] sm:$0xff] }
 0x12d   :  { %10815 = vst [vmem:[#allocation45_spill] sm:$0xff] %v6842_v31  ;;  %1420 = vmatpush.msrb.mxu0 %v1383_v37  ;;  %v1412_v37 = vld [vmem:[#allocation3 + $0x7c8] sm:$0xff] }
 0x12e   :  { %730 = vmatmul.f32.gmra.mxu0 %v6659_v12  ;;  %795 = vmatmul.f32.gmra.mxu1 %v6664_v13 }
 0x12f   :  { %860 = vmatmul.f32.gmra.mxu2 %v6659_v12  ;;  %925 = vmatmul.f32.gmra.mxu3 %v6664_v13 }
 0x130   :  { %1617 = vmatpush.msrb.mxu3 %v1412_v37 }
 0x132   :  { %v601_v61 = vpop.f32.mrf.mxu2  ;;  %v666_v62 = vpop.f32.mrf.mxu3 }
 0x133   :  { %v6848_v1 = vadd.f32 %v666_v62, %v601_v61  ;;  %v6850_v3 = vpop.f32.mrf.mxu0  ;;  %v6852_v31 = vpop.f32.mrf.mxu1 }
 0x134   :  { %10816 = vst [vmem:[#allocation46_spill] sm:$0xff] %v6850_v3  ;;  %v1381_v3 = vld [vmem:[#allocation3 + $0x6d0] sm:$0xff] }
 0x135   :  { %10817 = vst [vmem:[#allocation47_spill] sm:$0xff] %v6852_v31  ;;  %1421 = vmatpush.msrb.mxu0 %v1381_v3  ;;  %v1410_v3 = vld [vmem:[#allocation3 + $0x7b8] sm:$0xff] }
 0x136   :  { %733 = vmatmul.f32.gmra.mxu0 %v6673_v16  ;;  %798 = vmatmul.f32.gmra.mxu1 %v6678_v17 }
 0x137   :  { %863 = vmatmul.f32.gmra.mxu2 %v6673_v16  ;;  %928 = vmatmul.f32.gmra.mxu3 %v6678_v17 }
 0x138   :  { %1618 = vmatpush.msrb.mxu3 %v1410_v3 }
 0x13a   :  { %v604_v2 = vpop.f32.mrf.mxu2  ;;  %v669_v38 = vpop.f32.mrf.mxu3 }
 0x13b   :  { %v6858_v61 = vadd.f32 %v669_v38, %v604_v2  ;;  %v6860_v62 = vpop.f32.mrf.mxu0  ;;  %v6862_v31 = vpop.f32.mrf.mxu1 }
 0x13c   :  { %10818 = vst [vmem:[#allocation48_spill] sm:$0xff] %v6860_v62  ;;  %v10820_v62 = vmov 0.0  }
 0x13d   :  { %10819 = vst [vmem:[#allocation49_spill] sm:$0xff] %v6862_v31 }
 0x13e   :  { %736 = vmatmul.f32.gmra.mxu0 %v6687_v22  ;;  %801 = vmatmul.f32.gmra.mxu1 %v6692_v23 }
 0x13f   :  { %866 = vmatmul.f32.gmra.mxu2 %v6687_v22  ;;  %931 = vmatmul.f32.gmra.mxu3 %v6692_v23  ;;  %v1379_v22 = vld [vmem:[#allocation3 + $0x6c0] sm:$0xff] }
 0x140   :  { %v1411_v23 = vld [vmem:[#allocation3 + $0x7c0] sm:$0xff]  ;;  %1422 = vmatpush.msrb.mxu0 %v1379_v22  ;;  %v1376_v22 = vld [vmem:[#allocation3 + $0x6a8] sm:$0xff] }
 0x141   :  { %1487 = vmatpush.msrb.mxu1 %v1411_v23  ;;  %v1408_v23 = vld [vmem:[#allocation3 + $0x7a8] sm:$0xff]  ;;  %1554 = vmatpush.msrb.mxu2 %v1376_v22 }
 0x142   :  { %v607_v55 = vpop.f32.mrf.mxu2  ;;  %v672_v30 = vpop.f32.mrf.mxu3  ;;  %1423 = vmatpush.msrb.mxu0 %v1377_v48  ;;  %1619 = vmatpush.msrb.mxu3 %v1408_v23  ;;  %v1406_v48 = vld [vmem:[#allocation3 + $0x798] sm:$0xff] }
 0x143   :  { %v6868_v2 = vadd.f32 %v672_v30, %v607_v55  ;;  %v6870_v38 = vpop.f32.mrf.mxu0  ;;  %v6872_v31 = vpop.f32.mrf.mxu1  ;;  %1488 = vmatpush.msrb.mxu1 %v1409_v29  ;;  %v1374_v29 = vld [vmem:[#allocation3 + $0x698] sm:$0xff] }
 0x144   :  { %1424 = vmatpush.msrb.mxu0 %v1375_v28  ;;  %1555 = vmatpush.msrb.mxu2 %v1374_v29  ;;  %v1404_v28 = vld [vmem:[#allocation3 + $0x788] sm:$0xff] }
 0x145   :  { %1489 = vmatpush.msrb.mxu1 %v1407_v11  ;;  %1620 = vmatpush.msrb.mxu3 %v1406_v48  ;;  %v1372_v11 = vld [vmem:[#allocation3 + $0x688] sm:$0xff] }
 0x146   :  { %1047 = vmatmul.f32.vlgmr.msra.gmra.mxu0 %v10820_v62  ;;  %1112 = vmatmul.f32.vlgmr.msra.gmra.mxu1 %v10820_v62 }
 0x147   :  { %1177 = vmatmul.f32.vlgmr.msra.gmra.mxu2 %v10820_v62  ;;  %1242 = vmatmul.f32.vlgmr.msra.gmra.mxu3 %v10820_v62 }
 0x148   :  { %1556 = vmatpush.msrb.mxu2 %v1372_v11  ;;  %1621 = vmatpush.msrb.mxu3 %v1404_v28 }
 0x14a   :  { %v822_v42 = vpop.f32.mrf.mxu2  ;;  %v887_v37 = vpop.f32.mrf.mxu3 }
 0x14b   :  { %v823_v55 = vadd.f32 %v822_v42, %v6718_v56  ;;  %v6879_v30 = vpop.f32.mrf.mxu0  ;;  %v6881_v18 = vpop.f32.mrf.mxu1 }
 0x14c   :  { %10821 = vst [vmem:[#allocation50_spill] sm:$0xff] %v6881_v18  ;;  %v1783_v18 = vld [vmem:[#allocation3 + $0x940] sm:$0xff] }
 0x14d   :  { %v6883_v54 = vadd.f32 %v887_v37, %v823_v55 }
 0x14e   :  { %1050 = vmatmul.f32.gmra.mxu0 %v10820_v62  ;;  %1115 = vmatmul.f32.gmra.mxu1 %v10820_v62 }
 0x14f   :  { %1180 = vmatmul.f32.gmra.mxu2 %v10820_v62  ;;  %1245 = vmatmul.f32.gmra.mxu3 %v10820_v62 }
 0x152   :  { %v825_v56 = vpop.f32.mrf.mxu2  ;;  %v890_v19 = vpop.f32.mrf.mxu3 }
 0x153   :  { %v826_v3 = vadd.f32 %v825_v56, %v6728_v8  ;;  %v6890_v42 = vpop.f32.mrf.mxu0  ;;  %v6892_v37 = vpop.f32.mrf.mxu1 }
 0x154   :  { %10822 = vst [vmem:[#allocation51_spill] sm:$0xff] %v6890_v42  ;;  %v7244_v42 = vld [vmem:[%s10771_s0 + $0x70] sm:$0xff] }
 0x155   :  { %10823 = vst [vmem:[#allocation52_spill] sm:$0xff] %v6892_v37  ;;  %v6894_v55 = vadd.f32 %v890_v19, %v826_v3 }
 0x156   :  { %1053 = vmatmul.f32.gmra.mxu0 %v6561_v33  ;;  %1118 = vmatmul.f32.gmra.mxu1 %v6566_v34 }
 0x157   :  { %1183 = vmatmul.f32.gmra.mxu2 %v6561_v33  ;;  %1248 = vmatmul.f32.gmra.mxu3 %v6566_v34  ;;  %v1373_v33 = vld [vmem:[#allocation3 + $0x690] sm:$0xff] }
 0x158   :  { %v1405_v34 = vld [vmem:[#allocation3 + $0x790] sm:$0xff]  ;;  %1425 = vmatpush.msrb.mxu0 %v1373_v33  ;;  %v1370_v33 = vld [vmem:[#allocation3 + $0x678] sm:$0xff] }
 0x159   :  { %1490 = vmatpush.msrb.mxu1 %v1405_v34  ;;  %v1402_v34 = vld [vmem:[#allocation3 + $0x778] sm:$0xff]  ;;  %1557 = vmatpush.msrb.mxu2 %v1370_v33 }
 0x15a   :  { %v828_v8 = vpop.f32.mrf.mxu2  ;;  %v893_v22 = vpop.f32.mrf.mxu3  ;;  %1622 = vmatpush.msrb.mxu3 %v1402_v34 }
 0x15b   :  { %v829_v23 = vadd.f32 %v828_v8, %v6738_v21  ;;  %v6901_v56 = vpop.f32.mrf.mxu0  ;;  %v6903_v19 = vpop.f32.mrf.mxu1 }
 0x15c   :  { %10824 = vst [vmem:[#allocation53_spill] sm:$0xff] %v6901_v56  ;;  %v7181_v56 = vld [vmem:[%s10771_s0 + $0x40] sm:$0xff] }
 0x15d   :  { %10825 = vst [vmem:[#allocation54_spill] sm:$0xff] %v6903_v19  ;;  %v6905_v3 = vadd.f32 %v893_v22, %v829_v23 }
 0x15e   :  { %1056 = vmatmul.f32.gmra.mxu0 %v6575_v39  ;;  %1121 = vmatmul.f32.gmra.mxu1 %v6580_v40 }
 0x15f   :  { %1186 = vmatmul.f32.gmra.mxu2 %v6575_v39  ;;  %1251 = vmatmul.f32.gmra.mxu3 %v6580_v40  ;;  %v1371_v39 = vld [vmem:[#allocation3 + $0x680] sm:$0xff] }
 0x160   :  { %v1403_v40 = vld [vmem:[#allocation3 + $0x780] sm:$0xff]  ;;  %1426 = vmatpush.msrb.mxu0 %v1371_v39  ;;  %v1368_v39 = vld [vmem:[#allocation3 + $0x668] sm:$0xff] }
 0x161   :  { %1491 = vmatpush.msrb.mxu1 %v1403_v40  ;;  %v1400_v40 = vld [vmem:[#allocation3 + $0x768] sm:$0xff]  ;;  %1558 = vmatpush.msrb.mxu2 %v1368_v39 }
 0x162   :  { %v831_v21 = vpop.f32.mrf.mxu2  ;;  %v896_v29 = vpop.f32.mrf.mxu3  ;;  %1623 = vmatpush.msrb.mxu3 %v1400_v40 }
 0x163   :  { %v832_v48 = vadd.f32 %v831_v21, %v6748_v32  ;;  %v6912_v8 = vpop.f32.mrf.mxu0  ;;  %v6914_v22 = vpop.f32.mrf.mxu1 }
 0x164   :  { %10826 = vst [vmem:[#allocation55_spill] sm:$0xff] %v6912_v8 }
 0x165   :  { %10827 = vst [vmem:[#allocation56_spill] sm:$0xff] %v6914_v22  ;;  %v6916_v23 = vadd.f32 %v896_v29, %v832_v48 }
 0x166   :  { %1059 = vmatmul.f32.gmra.mxu0 %v6589_v45  ;;  %1124 = vmatmul.f32.gmra.mxu1 %v6594_v46 }
 0x167   :  { %1189 = vmatmul.f32.gmra.mxu2 %v6589_v45  ;;  %1254 = vmatmul.f32.gmra.mxu3 %v6594_v46  ;;  %v1369_v45 = vld [vmem:[#allocation3 + $0x670] sm:$0xff] }
 0x168   :  { %v1401_v46 = vld [vmem:[#allocation3 + $0x770] sm:$0xff]  ;;  %1427 = vmatpush.msrb.mxu0 %v1369_v45  ;;  %v1366_v45 = vld [vmem:[#allocation3 + $0x658] sm:$0xff] }
 0x169   :  { %1492 = vmatpush.msrb.mxu1 %v1401_v46  ;;  %v1398_v46 = vld [vmem:[#allocation3 + $0x758] sm:$0xff]  ;;  %1559 = vmatpush.msrb.mxu2 %v1366_v45 }
 0x16a   :  { %v834_v32 = vpop.f32.mrf.mxu2  ;;  %v899_v11 = vpop.f32.mrf.mxu3  ;;  %1624 = vmatpush.msrb.mxu3 %v1398_v46 }
 0x16b   :  { %v835_v28 = vadd.f32 %v834_v32, %v6758_v49  ;;  %v6923_v21 = vpop.f32.mrf.mxu0  ;;  %v6925_v29 = vpop.f32.mrf.mxu1 }
 0x16c   :  { %10828 = vst [vmem:[#allocation57_spill] sm:$0xff] %v6923_v21 }
 0x16d   :  { %10829 = vst [vmem:[#allocation58_spill] sm:$0xff] %v6925_v29  ;;  %v6927_v48 = vadd.f32 %v899_v11, %v835_v28 }
 0x16e   :  { %1062 = vmatmul.f32.gmra.mxu0 %v6603_v51  ;;  %1127 = vmatmul.f32.gmra.mxu1 %v6608_v52 }
 0x16f   :  { %1192 = vmatmul.f32.gmra.mxu2 %v6603_v51  ;;  %1257 = vmatmul.f32.gmra.mxu3 %v6608_v52  ;;  %v1367_v51 = vld [vmem:[#allocation3 + $0x660] sm:$0xff] }
 0x170   :  { %v1399_v52 = vld [vmem:[#allocation3 + $0x760] sm:$0xff]  ;;  %1428 = vmatpush.msrb.mxu0 %v1367_v51  ;;  %v1364_v51 = vld [vmem:[#allocation3 + $0x648] sm:$0xff] }
 0x171   :  { %1493 = vmatpush.msrb.mxu1 %v1399_v52  ;;  %v1396_v52 = vld [vmem:[#allocation3 + $0x748] sm:$0xff]  ;;  %1560 = vmatpush.msrb.mxu2 %v1364_v51 }
 0x172   :  { %v837_v49 = vpop.f32.mrf.mxu2  ;;  %v902_v33 = vpop.f32.mrf.mxu3  ;;  %1625 = vmatpush.msrb.mxu3 %v1396_v52 }
 0x173   :  { %v838_v34 = vadd.f32 %v837_v49, %v6768_v4  ;;  %v6934_v32 = vpop.f32.mrf.mxu0  ;;  %v6936_v11 = vpop.f32.mrf.mxu1 }
 0x174   :  { %10830 = vst [vmem:[#allocation59_spill] sm:$0xff] %v6934_v32 }
 0x175   :  { %10831 = vst [vmem:[#allocation60_spill] sm:$0xff] %v6936_v11  ;;  %v6938_v28 = vadd.f32 %v902_v33, %v838_v34 }
 0x176   :  { %1065 = vmatmul.f32.gmra.mxu0 %v6617_v57  ;;  %1130 = vmatmul.f32.gmra.mxu1 %v6622_v58 }
 0x177   :  { %1195 = vmatmul.f32.gmra.mxu2 %v6617_v57  ;;  %1260 = vmatmul.f32.gmra.mxu3 %v6622_v58  ;;  %v1365_v57 = vld [vmem:[#allocation3 + $0x650] sm:$0xff] }
 0x178   :  { %v1397_v58 = vld [vmem:[#allocation3 + $0x750] sm:$0xff]  ;;  %1429 = vmatpush.msrb.mxu0 %v1365_v57  ;;  %v1362_v57 = vld [vmem:[#allocation3 + $0x638] sm:$0xff] }
 0x179   :  { %1494 = vmatpush.msrb.mxu1 %v1397_v58  ;;  %v1394_v58 = vld [vmem:[#allocation3 + $0x738] sm:$0xff]  ;;  %1561 = vmatpush.msrb.mxu2 %v1362_v57 }
 0x17a   :  { %v840_v4 = vpop.f32.mrf.mxu2  ;;  %v905_v39 = vpop.f32.mrf.mxu3  ;;  %1626 = vmatpush.msrb.mxu3 %v1394_v58 }
 0x17b   :  { %v841_v40 = vadd.f32 %v840_v4, %v6778_v27  ;;  %v6945_v49 = vpop.f32.mrf.mxu0  ;;  %v6947_v33 = vpop.f32.mrf.mxu1 }
 0x17c   :  { %10832 = vst [vmem:[#allocation61_spill] sm:$0xff] %v6945_v49  ;;  %v7090_v49 = vld [vmem:[%s10771_s0 + $0xd0] sm:$0xff] }
 0x17d   :  { %10833 = vst [vmem:[#allocation62_spill] sm:$0xff] %v6947_v33  ;;  %v6949_v34 = vadd.f32 %v905_v39, %v841_v40 }
 0x17e   :  { %1068 = vmatmul.f32.gmra.mxu0 %v6631_v63  ;;  %1133 = vmatmul.f32.gmra.mxu1 %v6636_v0 }
 0x17f   :  { %1198 = vmatmul.f32.gmra.mxu2 %v6631_v63  ;;  %1263 = vmatmul.f32.gmra.mxu3 %v6636_v0  ;;  %v1363_v63 = vld [vmem:[#allocation3 + $0x640] sm:$0xff] }
 0x180   :  { %v1395_v0 = vld [vmem:[#allocation3 + $0x740] sm:$0xff]  ;;  %1430 = vmatpush.msrb.mxu0 %v1363_v63  ;;  %v1360_v63 = vld [vmem:[#allocation3 + $0x628] sm:$0xff] }
 0x181   :  { %1495 = vmatpush.msrb.mxu1 %v1395_v0  ;;  %v1392_v0 = vld [vmem:[#allocation3 + $0x728] sm:$0xff]  ;;  %1562 = vmatpush.msrb.mxu2 %v1360_v63 }
 0x182   :  { %v843_v27 = vpop.f32.mrf.mxu2  ;;  %v908_v45 = vpop.f32.mrf.mxu3  ;;  %1627 = vmatpush.msrb.mxu3 %v1392_v0 }
 0x183   :  { %v844_v46 = vadd.f32 %v843_v27, %v6788_v43  ;;  %v6956_v4 = vpop.f32.mrf.mxu0  ;;  %v6958_v39 = vpop.f32.mrf.mxu1 }
 0x184   :  { %10834 = vst [vmem:[#allocation63_spill] sm:$0xff] %v6956_v4  ;;  %v7069_v4 = vld [vmem:[%s10771_s0 + $0xc0] sm:$0xff] }
 0x185   :  { %10835 = vst [vmem:[#allocation64_spill] sm:$0xff] %v6958_v39  ;;  %v6960_v40 = vadd.f32 %v908_v45, %v844_v46  ;;  %v7029_v39 = vld [vmem:[%s10771_s0 + $0xa0] sm:$0xff] }
 0x186   :  { %1071 = vmatmul.f32.gmra.mxu0 %v6645_v6  ;;  %1136 = vmatmul.f32.gmra.mxu1 %v6650_v7 }
 0x187   :  { %1201 = vmatmul.f32.gmra.mxu2 %v6645_v6  ;;  %1266 = vmatmul.f32.gmra.mxu3 %v6650_v7  ;;  %v1361_v6 = vld [vmem:[#allocation3 + $0x630] sm:$0xff] }
 0x188   :  { %v1393_v7 = vld [vmem:[#allocation3 + $0x730] sm:$0xff]  ;;  %1431 = vmatpush.msrb.mxu0 %v1361_v6  ;;  %v6989_v6 = vld [vmem:[%s10771_s0 + $0x80] sm:$0xff] }
 0x189   :  { %1496 = vmatpush.msrb.mxu1 %v1393_v7  ;;  %v1358_v7 = vld [vmem:[#allocation3 + $0x618] sm:$0xff] }
 0x18a   :  { %v846_v43 = vpop.f32.mrf.mxu2  ;;  %v911_v51 = vpop.f32.mrf.mxu3  ;;  %1563 = vmatpush.msrb.mxu2 %v1358_v7  ;;  %v1356_v7 = vld [vmem:[#allocation3 + $0x608] sm:$0xff] }
 0x18b   :  { %v847_v52 = vadd.f32 %v846_v43, %v6798_v15  ;;  %v6967_v27 = vpop.f32.mrf.mxu0  ;;  %v6969_v45 = vpop.f32.mrf.mxu1 }
 0x18c   :  { %10836 = vst [vmem:[#allocation65_spill] sm:$0xff] %v6967_v27  ;;  %1564 = vmatpush.msrb.mxu2 %v1356_v7  ;;  %v1387_v27 = vld [vmem:[#allocation3 + $0x700] sm:$0xff] }
 0x18d   :  { %10837 = vst [vmem:[#allocation66_spill] sm:$0xff] %v6969_v45  ;;  %v6971_v46 = vadd.f32 %v911_v51, %v847_v52  ;;  %v1355_v45 = vld [vmem:[#allocation3 + $0x600] sm:$0xff] }
 0x18e   :  { %1074 = vmatmul.f32.gmra.mxu0 %v6659_v12  ;;  %1139 = vmatmul.f32.gmra.mxu1 %v6664_v13 }
 0x18f   :  { %1204 = vmatmul.f32.gmra.mxu2 %v6659_v12  ;;  %1269 = vmatmul.f32.gmra.mxu3 %v6664_v13  ;;  %v1359_v12 = vld [vmem:[#allocation3 + $0x620] sm:$0xff] }
 0x190   :  { %v1391_v13 = vld [vmem:[#allocation3 + $0x720] sm:$0xff]  ;;  %1432 = vmatpush.msrb.mxu0 %v1359_v12  ;;  %v7014_v12 = vld [vmem:[%s10771_s0 + $0x98] sm:$0xff] }
 0x191   :  { %1497 = vmatpush.msrb.mxu1 %v1391_v13  ;;  %v1389_v13 = vld [vmem:[#allocation3 + $0x710] sm:$0xff] }
 0x192   :  { %v849_v15 = vpop.f32.mrf.mxu2  ;;  %v914_v57 = vpop.f32.mrf.mxu3 }
 0x193   :  { %v850_v58 = vadd.f32 %v849_v15, %v6808_v41  ;;  %v6978_v43 = vpop.f32.mrf.mxu0  ;;  %v6980_v51 = vpop.f32.mrf.mxu1  ;;  %v6995_v41 = vld [vmem:[%s10771_s0 + $0x88] sm:$0xff]  ;;  %1498 = vmatpush.msrb.mxu1 %v1389_v13  ;;  %v1806_v13 = vld [vmem:[#allocation3 + $0x9f8] sm:$0xff] }
 0x194   :  { %10838 = vst [vmem:[#allocation67_spill] sm:$0xff] %v6978_v43 }
 0x195   :  { %10839 = vst [vmem:[#allocation68_spill] sm:$0xff] %v6980_v51  ;;  %v6982_v52 = vadd.f32 %v914_v57, %v850_v58  ;;  %v7008_v51 = vld [vmem:[%s10771_s0 + $0x90] sm:$0xff]  ;;  %1499 = vmatpush.msrb.mxu1 %v1387_v27  ;;  %v7056_v27 = vld [vmem:[%s10771_s0 + $0xb8] sm:$0xff] }
 0x196   :  { %1077 = vmatmul.f32.gmra.mxu0 %v6673_v16  ;;  %1142 = vmatmul.f32.gmra.mxu1 %v6678_v17  ;;  %v1390_v16 = vld [vmem:[#allocation3 + $0x718] sm:$0xff] }
 0x197   :  { %1207 = vmatmul.f32.gmra.mxu2 %v6989_v6  ;;  %1272 = vmatmul.f32.gmra.mxu3 %v6995_v41 }
 0x198   :  { %1628 = vmatpush.msrb.mxu3 %v1390_v16  ;;  %v1388_v16 = vld [vmem:[#allocation3 + $0x708] sm:$0xff] }
 0x19a   :  { %v852_v17 = vpop.f32.mrf.mxu2  ;;  %v917_v63 = vpop.f32.mrf.mxu3  ;;  %1629 = vmatpush.msrb.mxu3 %v1388_v16 }
 0x19b   :  { %v853_v0 = vadd.f32 %v852_v17, %v6818_v26  ;;  %v6999_v15 = vpop.f32.mrf.mxu0  ;;  %v7001_v57 = vpop.f32.mrf.mxu1  ;;  %v1357_v26 = vld [vmem:[#allocation3 + $0x610] sm:$0xff] }
 0x19c   :  { %10840 = vst [vmem:[#allocation69_spill] sm:$0xff] %v6999_v15  ;;  %1433 = vmatpush.msrb.mxu0 %v1357_v26  ;;  %v7035_v26 = vld [vmem:[%s10771_s0 + $0xa8] sm:$0xff]  ;;  %2002 = vmatpush.msra.mxu3 %v1806_v13 }
 0x19d   :  { %10841 = vst [vmem:[#allocation70_spill] sm:$0xff] %v7001_v57  ;;  %v7003_v58 = vadd.f32 %v917_v63, %v853_v0  ;;  %v1804_v13 = vld [vmem:[#allocation3 + $0x9e8] sm:$0xff] }
 0x19e   :  { %1080 = vmatmul.f32.gmra.mxu0 %v7008_v51  ;;  %1145 = vmatmul.f32.gmra.mxu1 %v7014_v12 }
 0x19f   :  { %1210 = vmatmul.f32.gmra.mxu2 %v7008_v51  ;;  %1275 = vmatmul.f32.gmra.mxu3 %v7014_v12 }
 0x1a0   :  { %1434 = vmatpush.msrb.mxu0 %v1355_v45  ;;  %v1805_v45 = vld [vmem:[#allocation3 + $0x9f0] sm:$0xff]  ;;  %2003 = vmatpush.msra.mxu3 %v1804_v13  ;;  %v1770_v13 = vld [vmem:[#allocation3 + $0x8d8] sm:$0xff] }
 0x1a1   :  { %1872 = vmatpush.msra.mxu1 %v1805_v45 }
 0x1a2   :  { %v855_v17 = vpop.f32.mrf.mxu2  ;;  %v920_v63 = vpop.f32.mrf.mxu3 }
 0x1a3   :  { %v856_v0 = vadd.f32 %v855_v17, %v6828_v14  ;;  %v7020_v57 = vpop.f32.mrf.mxu0  ;;  %v7022_v15 = vpop.f32.mrf.mxu1  ;;  %v1774_v14 = vld [vmem:[#allocation3 + $0x8f8] sm:$0xff] }
 0x1a4   :  { %10842 = vst [vmem:[#allocation71_spill] sm:$0xff] %v7020_v57  ;;  %1937 = vmatpush.msra.mxu2 %v1774_v14  ;;  %v7050_v57 = vld [vmem:[%s10771_s0 + $0xb0] sm:$0xff]  ;;  %v1772_v14 = vld [vmem:[#allocation3 + $0x8e8] sm:$0xff] }
 0x1a5   :  { %10843 = vst [vmem:[#allocation72_spill] sm:$0xff] %v7022_v15  ;;  %v7024_v43 = vadd.f32 %v920_v63, %v856_v0 }
 0x1a6   :  { %1083 = vmatmul.f32.gmra.mxu0 %v7029_v39  ;;  %1148 = vmatmul.f32.gmra.mxu1 %v7035_v26 }
 0x1a7   :  { %1213 = vmatmul.f32.gmra.mxu2 %v7029_v39  ;;  %1278 = vmatmul.f32.gmra.mxu3 %v7035_v26 }
 0x1a8   :  { %1938 = vmatpush.msra.mxu2 %v1772_v14  ;;  %v1803_v14 = vld [vmem:[#allocation3 + $0x9e0] sm:$0xff] }
 0x1a9   :  { %1873 = vmatpush.msra.mxu1 %v1803_v14 }
 0x1aa   :  { %v858_v7 = vpop.f32.mrf.mxu2  ;;  %v923_v16 = vpop.f32.mrf.mxu3  ;;  %1939 = vmatpush.msra.mxu2 %v1770_v13  ;;  %v1768_v13 = vld [vmem:[#allocation3 + $0x8c8] sm:$0xff] }
 0x1ab   :  { %v859_v17 = vadd.f32 %v858_v7, %v6838_v20  ;;  %v7041_v63 = vpop.f32.mrf.mxu0  ;;  %v7043_v0 = vpop.f32.mrf.mxu1  ;;  %v1773_v20 = vld [vmem:[#allocation3 + $0x8f0] sm:$0xff] }
 0x1ac   :  { %10844 = vst [vmem:[#allocation73_spill] sm:$0xff] %v7041_v63  ;;  %1807 = vmatpush.msra.mxu0 %v1773_v20  ;;  %v7074_v20 = vld [vmem:[%s10771_s0 + $0xc8] sm:$0xff]  ;;  %1940 = vmatpush.msra.mxu2 %v1768_v13  ;;  %v1799_v13 = vld [vmem:[#allocation3 + $0x9c0] sm:$0xff] }
 0x1ad   :  { %10845 = vst [vmem:[#allocation74_spill] sm:$0xff] %v7043_v0  ;;  %v7045_v15 = vadd.f32 %v923_v16, %v859_v17 }
 0x1ae   :  { %1086 = vmatmul.f32.gmra.mxu0 %v7050_v57  ;;  %1151 = vmatmul.f32.gmra.mxu1 %v7056_v27 }
 0x1af   :  { %1216 = vmatmul.f32.gmra.mxu2 %v7050_v57  ;;  %1281 = vmatmul.f32.gmra.mxu3 %v7056_v27 }
 0x1b2   :  { %v861_v7 = vpop.f32.mrf.mxu2  ;;  %v926_v16 = vpop.f32.mrf.mxu3 }
 0x1b3   :  { %v862_v17 = vadd.f32 %v861_v7, %v6848_v1  ;;  %v7062_v0 = vpop.f32.mrf.mxu0  ;;  %v7064_v63 = vpop.f32.mrf.mxu1  ;;  %v1771_v1 = vld [vmem:[#allocation3 + $0x8e0] sm:$0xff]  ;;  %v1802_v7 = vld [vmem:[#allocation3 + $0x9d8] sm:$0xff] }
 0x1b4   :  { %10846 = vst [vmem:[#allocation75_spill] sm:$0xff] %v7062_v0  ;;  %1808 = vmatpush.msra.mxu0 %v1771_v1  ;;  %2004 = vmatpush.msra.mxu3 %v1802_v7  ;;  %v7095_v1 = vld [vmem:[%s10771_s0 + $0xd8] sm:$0xff]  ;;  %v1800_v7 = vld [vmem:[#allocation3 + $0x9c8] sm:$0xff] }
 0x1b5   :  { %10847 = vst [vmem:[#allocation76_spill] sm:$0xff] %v7064_v63  ;;  %v7076_v45 = vadd.f32 %v926_v16, %v862_v17 }
 0x1b6   :  { %1089 = vmatmul.f32.gmra.mxu0 %v7069_v4  ;;  %1154 = vmatmul.f32.gmra.mxu1 %v7074_v20 }
 0x1b7   :  { %1219 = vmatmul.f32.gmra.mxu2 %v7069_v4  ;;  %1284 = vmatmul.f32.gmra.mxu3 %v7074_v20 }
 0x1b8   :  { %2005 = vmatpush.msra.mxu3 %v1800_v7 }
 0x1ba   :  { %v864_v63 = vpop.f32.mrf.mxu2  ;;  %v929_v0 = vpop.f32.mrf.mxu3 }
 0x1bb   :  { %v865_v16 = vadd.f32 %v864_v63, %v6858_v61  ;;  %v7083_v17 = vpop.f32.mrf.mxu0  ;;  %v7085_v33 = vpop.f32.mrf.mxu1  ;;  %v1769_v61 = vld [vmem:[#allocation3 + $0x8d0] sm:$0xff] }
 0x1bc   :  { %10848 = vst [vmem:[#allocation77_spill] sm:$0xff] %v7083_v17  ;;  %v1801_v63 = vld [vmem:[#allocation3 + $0x9d0] sm:$0xff]  ;;  %1809 = vmatpush.msra.mxu0 %v1769_v61  ;;  %v6173_v61 = vld [vmem:[%s10771_s0 + $0x8] sm:$0xff] }
 0x1bd   :  { %10849 = vst [vmem:[#allocation78_spill] sm:$0xff] %v7085_v33  ;;  %v7097_v14 = vadd.f32 %v929_v0, %v865_v16  ;;  %1874 = vmatpush.msra.mxu1 %v1801_v63  ;;  %v1767_v63 = vld [vmem:[#allocation3 + $0x8c0] sm:$0xff] }
 0x1be   :  { %1092 = vmatmul.f32.gmra.mxu0 %v7090_v49  ;;  %1157 = vmatmul.f32.gmra.mxu1 %v7095_v1 }
 0x1bf   :  { %1222 = vmatmul.f32.gmra.mxu2 %v7090_v49  ;;  %1287 = vmatmul.f32.gmra.mxu3 %v7095_v1 }
 0x1c0   :  { %1810 = vmatpush.msra.mxu0 %v1767_v63  ;;  %1875 = vmatpush.msra.mxu1 %v1799_v13  ;;  %v1765_v63 = vld [vmem:[#allocation3 + $0x8b0] sm:$0xff] }
 0x1c1   :  { %v1797_v13 = vld [vmem:[#allocation3 + $0x9b0] sm:$0xff] }
 0x1c2   :  { %v867_v33 = vpop.f32.mrf.mxu2  ;;  %v932_v17 = vpop.f32.mrf.mxu3  ;;  %1811 = vmatpush.msra.mxu0 %v1765_v63  ;;  %1876 = vmatpush.msra.mxu1 %v1797_v13  ;;  %v1763_v63 = vld [vmem:[#allocation3 + $0x8a0] sm:$0xff] }
 0x1c3   :  { %v868_v0 = vadd.f32 %v867_v33, %v6868_v2  ;;  %v7104_v16 = vpop.f32.mrf.mxu0  ;;  %v7106_v11 = vpop.f32.mrf.mxu1  ;;  %v1766_v2 = vld [vmem:[#allocation3 + $0x8b8] sm:$0xff]  ;;  %v1795_v13 = vld [vmem:[#allocation3 + $0x9a0] sm:$0xff] }
 0x1c4   :  { %v1798_v33 = vld [vmem:[#allocation3 + $0x9b8] sm:$0xff]  ;;  %1941 = vmatpush.msra.mxu2 %v1766_v2  ;;  %v1764_v2 = vld [vmem:[#allocation3 + $0x8a8] sm:$0xff]  ;;  %1812 = vmatpush.msra.mxu0 %v1763_v63 }
 0x1c5   :  { %v7108_v32 = vadd.f32 %v932_v17, %v868_v0  ;;  %2006 = vmatpush.msra.mxu3 %v1798_v33  ;;  %v1796_v33 = vld [vmem:[#allocation3 + $0x9a8] sm:$0xff]  ;;  %1877 = vmatpush.msra.mxu1 %v1795_v13  ;;  %v7166_v63 = vld [vmem:[%s10771_s0 + $0x38] sm:$0xff]  ;;  %v1761_v13 = vld [vmem:[#allocation3 + $0x890] sm:$0xff] }
 0x1c6   :  { %1435 = vmatmul.f32.vlgmr.msrb.gmra.mxu0 %v6172_v5  ;;  %1500 = vmatmul.f32.vlgmr.msrb.gmra.mxu1 %v6173_v61 }
 0x1c7   :  { %1565 = vmatmul.f32.vlgmr.msrb.gmra.mxu2 %v6172_v5  ;;  %1630 = vmatmul.f32.vlgmr.msrb.gmra.mxu3 %v6173_v61  ;;  %v6174_v5 = vld [vmem:[%s10771_s0 + $0x10] sm:$0xff]  ;;  %v6175_v61 = vld [vmem:[%s10771_s0 + $0x18] sm:$0xff] }
 0x1c8   :  { %1942 = vmatpush.msra.mxu2 %v1764_v2  ;;  %2007 = vmatpush.msra.mxu3 %v1796_v33  ;;  %v1794_v2 = vld [vmem:[#allocation3 + $0x998] sm:$0xff] }
 0x1c9   :  { %1813 = vmatpush.msra.mxu0 %v1761_v13  ;;  %v7187_v13 = vld [vmem:[%s10771_s0 + $0x48] sm:$0xff] }
 0x1ca   :  { %v1178_v17 = vpop.f32.mrf.mxu2  ;;  %v1243_v7 = vpop.f32.mrf.mxu3  ;;  %2008 = vmatpush.msra.mxu3 %v1794_v2  ;;  %v1792_v2 = vld [vmem:[#allocation3 + $0x988] sm:$0xff] }
 0x1cb   :  { %v1244_v0 = vadd.f32 %v1243_v7, %v1178_v17  ;;  %v7116_v29 = vpop.f32.mrf.mxu0  ;;  %v7118_v21 = vpop.f32.mrf.mxu1 }
 0x1cc   :  { %2009 = vmatpush.msra.mxu3 %v1792_v2  ;;  %v1790_v2 = vld [vmem:[#allocation3 + $0x978] sm:$0xff] }
 0x1cd   :  { %v7121_v53 = vadd.f32 %v1244_v0, %v6883_v54 }
 0x1ce   :  { %1438 = vmatmul.f32.gmra.mxu0 %v6174_v5  ;;  %1503 = vmatmul.f32.gmra.mxu1 %v6175_v61 }
 0x1cf   :  { %1568 = vmatmul.f32.gmra.mxu2 %v6174_v5  ;;  %1633 = vmatmul.f32.gmra.mxu3 %v6175_v61  ;;  %v7139_v5 = vld [vmem:[%s10771_s0 + $0x20] sm:$0xff]  ;;  %v7145_v61 = vld [vmem:[%s10771_s0 + $0x28] sm:$0xff] }
 0x1d0   :  { %2010 = vmatpush.msra.mxu3 %v1790_v2  ;;  %v1788_v2 = vld [vmem:[#allocation3 + $0x968] sm:$0xff] }
 0x1d2   :  { %v1181_v54 = vpop.f32.mrf.mxu2  ;;  %v1246_v17 = vpop.f32.mrf.mxu3  ;;  %2011 = vmatpush.msra.mxu3 %v1788_v2  ;;  %v1786_v2 = vld [vmem:[#allocation3 + $0x958] sm:$0xff] }
 0x1d3   :  { %v1247_v7 = vadd.f32 %v1246_v17, %v1181_v54  ;;  %v7129_v0 = vpop.f32.mrf.mxu0  ;;  %v7131_v50 = vpop.f32.mrf.mxu1 }
 0x1d4   :  { %10850 = vst [vmem:[#allocation79_spill] sm:$0xff] %v7129_v0  ;;  %2012 = vmatpush.msra.mxu3 %v1786_v2  ;;  %v1784_v2 = vld [vmem:[#allocation3 + $0x948] sm:$0xff] }
 0x1d5   :  { %10851 = vst [vmem:[#allocation80_spill] sm:$0xff] %v7131_v50  ;;  %v7134_v22 = vadd.f32 %v1247_v7, %v6894_v55  ;;  %v1762_v55 = vld [vmem:[#allocation3 + $0x898] sm:$0xff]  ;;  %v7223_v50 = vld [vmem:[%s10771_s0 + $0x60] sm:$0xff] }
 0x1d6   :  { %1441 = vmatmul.f32.gmra.mxu0 %v7139_v5  ;;  %1506 = vmatmul.f32.gmra.mxu1 %v7145_v61 }
 0x1d7   :  { %1571 = vmatmul.f32.gmra.mxu2 %v7139_v5  ;;  %1636 = vmatmul.f32.gmra.mxu3 %v7145_v61 }
 0x1d8   :  { %1943 = vmatpush.msra.mxu2 %v1762_v55  ;;  %v1793_v55 = vld [vmem:[#allocation3 + $0x990] sm:$0xff]  ;;  %2013 = vmatpush.msra.mxu3 %v1784_v2 }
 0x1d9   :  { %1878 = vmatpush.msra.mxu1 %v1793_v55  ;;  %v1759_v55 = vld [vmem:[#allocation3 + $0x880] sm:$0xff] }
 0x1da   :  { %v1184_v33 = vpop.f32.mrf.mxu2  ;;  %v1249_v54 = vpop.f32.mrf.mxu3  ;;  %1814 = vmatpush.msra.mxu0 %v1759_v55  ;;  %v7208_v55 = vld [vmem:[%s10771_s0 + $0x58] sm:$0xff] }
 0x1db   :  { %v1250_v17 = vadd.f32 %v1249_v54, %v1184_v33  ;;  %v7150_v7 = vpop.f32.mrf.mxu0  ;;  %v7152_v8 = vpop.f32.mrf.mxu1 }
 0x1dc   :  { %10852 = vst [vmem:[#allocation81_spill] sm:$0xff] %v7150_v7 }
 0x1dd   :  { %10853 = vst [vmem:[#allocation82_spill] sm:$0xff] %v7152_v8  ;;  %v7155_v36 = vadd.f32 %v1250_v17, %v6905_v3  ;;  %v1760_v3 = vld [vmem:[#allocation3 + $0x888] sm:$0xff] }
 0x1de   :  { %1444 = vmatmul.f32.gmra.mxu0 %v7160_v35  ;;  %1509 = vmatmul.f32.gmra.mxu1 %v7166_v63 }
 0x1df   :  { %1574 = vmatmul.f32.gmra.mxu2 %v7160_v35  ;;  %1639 = vmatmul.f32.gmra.mxu3 %v7166_v63 }
 0x1e0   :  { %1944 = vmatpush.msra.mxu2 %v1760_v3  ;;  %v1791_v3 = vld [vmem:[#allocation3 + $0x980] sm:$0xff] }
 0x1e1   :  { %1879 = vmatpush.msra.mxu1 %v1791_v3  ;;  %v1757_v3 = vld [vmem:[#allocation3 + $0x870] sm:$0xff] }
 0x1e2   :  { %v1187_v33 = vpop.f32.mrf.mxu2  ;;  %v1252_v54 = vpop.f32.mrf.mxu3  ;;  %1815 = vmatpush.msra.mxu0 %v1757_v3  ;;  %v7229_v3 = vld [vmem:[%s10771_s0 + $0x68] sm:$0xff] }
 0x1e3   :  { %v1253_v17 = vadd.f32 %v1252_v54, %v1187_v33  ;;  %v7171_v19 = vpop.f32.mrf.mxu0  ;;  %v7173_v8 = vpop.f32.mrf.mxu1 }
 0x1e4   :  { %10854 = vst [vmem:[#allocation83_spill] sm:$0xff] %v7171_v19 }
 0x1e5   :  { %10855 = vst [vmem:[#allocation84_spill] sm:$0xff] %v7173_v8  ;;  %v7176_v7 = vadd.f32 %v1253_v17, %v6916_v23  ;;  %v1758_v23 = vld [vmem:[#allocation3 + $0x878] sm:$0xff] }
 0x1e6   :  { %1447 = vmatmul.f32.gmra.mxu0 %v7181_v56  ;;  %1512 = vmatmul.f32.gmra.mxu1 %v7187_v13 }
 0x1e7   :  { %1577 = vmatmul.f32.gmra.mxu2 %v7181_v56  ;;  %1642 = vmatmul.f32.gmra.mxu3 %v7187_v13 }
 0x1e8   :  { %1945 = vmatpush.msra.mxu2 %v1758_v23  ;;  %v1789_v23 = vld [vmem:[#allocation3 + $0x970] sm:$0xff] }
 0x1e9   :  { %1880 = vmatpush.msra.mxu1 %v1789_v23  ;;  %v1755_v23 = vld [vmem:[#allocation3 + $0x860] sm:$0xff] }
 0x1ea   :  { %v1190_v33 = vpop.f32.mrf.mxu2  ;;  %v1255_v54 = vpop.f32.mrf.mxu3  ;;  %1816 = vmatpush.msra.mxu0 %v1755_v23  ;;  %v7250_v23 = vld [vmem:[%s10771_s0 + $0x78] sm:$0xff] }
 0x1eb   :  { %v1256_v17 = vadd.f32 %v1255_v54, %v1190_v33  ;;  %v7192_v8 = vpop.f32.mrf.mxu0  ;;  %v7194_v19 = vpop.f32.mrf.mxu1 }
 0x1ec   :  { %10856 = vst [vmem:[#allocation85_spill] sm:$0xff] %v7192_v8 }
 0x1ed   :  { %10857 = vst [vmem:[#allocation86_spill] sm:$0xff] %v7194_v19  ;;  %v7197_v25 = vadd.f32 %v1256_v17, %v6927_v48  ;;  %v1756_v48 = vld [vmem:[#allocation3 + $0x868] sm:$0xff] }
 0x1ee   :  { %1450 = vmatmul.f32.gmra.mxu0 %v7202_v24  ;;  %1515 = vmatmul.f32.gmra.mxu1 %v7208_v55 }
 0x1ef   :  { %1580 = vmatmul.f32.gmra.mxu2 %v7202_v24  ;;  %1645 = vmatmul.f32.gmra.mxu3 %v7208_v55 }
 0x1f0   :  { %1946 = vmatpush.msra.mxu2 %v1756_v48  ;;  %v1787_v48 = vld [vmem:[#allocation3 + $0x960] sm:$0xff] }
 0x1f1   :  { %1881 = vmatpush.msra.mxu1 %v1787_v48  ;;  %v1753_v48 = vld [vmem:[#allocation3 + $0x850] sm:$0xff] }
 0x1f2   :  { %v1193_v33 = vpop.f32.mrf.mxu2  ;;  %v1258_v54 = vpop.f32.mrf.mxu3  ;;  %1817 = vmatpush.msra.mxu0 %v1753_v48  ;;  %v1750_v48 = vld [vmem:[#allocation3 + $0x838] sm:$0xff] }
 0x1f3   :  { %v1259_v17 = vadd.f32 %v1258_v54, %v1193_v33  ;;  %v7213_v19 = vpop.f32.mrf.mxu0  ;;  %v7215_v8 = vpop.f32.mrf.mxu1 }
 0x1f4   :  { %10858 = vst [vmem:[#allocation87_spill] sm:$0xff] %v7213_v19  ;;  %1818 = vmatpush.msra.mxu0 %v1751_v9  ;;  %v1748_v9 = vld [vmem:[#allocation3 + $0x828] sm:$0xff] }
 0x1f5   :  { %10859 = vst [vmem:[#allocation88_spill] sm:$0xff] %v7215_v8  ;;  %v7218_v37 = vadd.f32 %v1259_v17, %v6938_v28  ;;  %v1754_v28 = vld [vmem:[#allocation3 + $0x858] sm:$0xff] }
 0x1f6   :  { %1453 = vmatmul.f32.gmra.mxu0 %v7223_v50  ;;  %1518 = vmatmul.f32.gmra.mxu1 %v7229_v3 }
 0x1f7   :  { %1583 = vmatmul.f32.gmra.mxu2 %v7223_v50  ;;  %1648 = vmatmul.f32.gmra.mxu3 %v7229_v3 }
 0x1f8   :  { %1947 = vmatpush.msra.mxu2 %v1754_v28  ;;  %v1785_v28 = vld [vmem:[#allocation3 + $0x950] sm:$0xff] }
 0x1f9   :  { %1882 = vmatpush.msra.mxu1 %v1785_v28  ;;  %v1782_v28 = vld [vmem:[#allocation3 + $0x938] sm:$0xff] }
 0x1fa   :  { %v1196_v33 = vpop.f32.mrf.mxu2  ;;  %v1261_v54 = vpop.f32.mrf.mxu3  ;;  %2014 = vmatpush.msra.mxu3 %v1782_v28 }
 0x1fb   :  { %v1262_v17 = vadd.f32 %v1261_v54, %v1196_v33  ;;  %v7234_v8 = vpop.f32.mrf.mxu0  ;;  %v7236_v19 = vpop.f32.mrf.mxu1  ;;  %1883 = vmatpush.msra.mxu1 %v1783_v18  ;;  %v1780_v18 = vld [vmem:[#allocation3 + $0x928] sm:$0xff] }
 0x1fc   :  { %10860 = vst [vmem:[#allocation89_spill] sm:$0xff] %v7234_v8  ;;  %2015 = vmatpush.msra.mxu3 %v1780_v18 }
 0x1fd   :  { %10861 = vst [vmem:[#allocation90_spill] sm:$0xff] %v7236_v19  ;;  %v7239_v0 = vadd.f32 %v1262_v17, %v6949_v34  ;;  %v1752_v34 = vld [vmem:[#allocation3 + $0x848] sm:$0xff] }
 0x1fe   :  { %1456 = vmatmul.f32.gmra.mxu0 %v7244_v42  ;;  %1521 = vmatmul.f32.gmra.mxu1 %v7250_v23 }
 0x1ff   :  { %1586 = vmatmul.f32.gmra.mxu2 %v7244_v42  ;;  %1651 = vmatmul.f32.gmra.mxu3 %v7250_v23 }
 0x200   :  { %1948 = vmatpush.msra.mxu2 %v1752_v34 }
 0x202   :  { %v1199_v33 = vpop.f32.mrf.mxu2  ;;  %v1264_v54 = vpop.f32.mrf.mxu3  ;;  %1949 = vmatpush.msra.mxu2 %v1750_v48 }
 0x203   :  { %v1265_v17 = vadd.f32 %v1264_v54, %v1199_v33  ;;  %v7255_v19 = vpop.f32.mrf.mxu0  ;;  %v7257_v8 = vpop.f32.mrf.mxu1 }
 0x204   :  { %10862 = vst [vmem:[#allocation91_spill] sm:$0xff] %v7255_v19  ;;  %v1781_v19 = vld [vmem:[#allocation3 + $0x930] sm:$0xff]  ;;  %1950 = vmatpush.msra.mxu2 %v1748_v9 }
 0x205   :  { %10863 = vst [vmem:[#allocation92_spill] sm:$0xff] %v7257_v8  ;;  %v7260_v10 = vadd.f32 %v1265_v17, %v6960_v40  ;;  %v1749_v8 = vld [vmem:[#allocation3 + $0x830] sm:$0xff]  ;;  %1884 = vmatpush.msra.mxu1 %v1781_v19  ;;  %v1746_v19 = vld [vmem:[#allocation3 + $0x818] sm:$0xff] }
 0x206   :  { %1459 = vmatmul.f32.gmra.mxu0 %v6989_v6  ;;  %1524 = vmatmul.f32.gmra.mxu1 %v6995_v41 }
 0x207   :  { %1589 = vmatmul.f32.gmra.mxu2 %v6989_v6  ;;  %1654 = vmatmul.f32.gmra.mxu3 %v6995_v41 }
 0x208   :  { %1819 = vmatpush.msra.mxu0 %v1749_v8  ;;  %v1778_v8 = vld [vmem:[#allocation3 + $0x918] sm:$0xff]  ;;  %1951 = vmatpush.msra.mxu2 %v1746_v19 }
 0x209   :  { %2016 = vmatpush.msra.mxu3 %v1778_v8 }
 0x20a   :  { %v1202_v34 = vpop.f32.mrf.mxu2  ;;  %v1267_v2 = vpop.f32.mrf.mxu3 }
 0x20b   :  { %v1268_v40 = vadd.f32 %v1267_v2, %v1202_v34  ;;  %v7266_v33 = vpop.f32.mrf.mxu0  ;;  %v7268_v54 = vpop.f32.mrf.mxu1 }
 0x20c   :  { %10864 = vst [vmem:[#allocation93_spill] sm:$0xff] %v7266_v33  ;;  %v2181_v33 = vld [vmem:[#allocation3 + $0xb90] sm:$0xff] }
 0x20d   :  { %10865 = vst [vmem:[#allocation94_spill] sm:$0xff] %v7268_v54  ;;  %v7271_v17 = vadd.f32 %v1268_v40, %v6971_v46  ;;  %v2149_v54 = vld [vmem:[#allocation3 + $0xa90] sm:$0xff] }
 0x20e   :  { %1462 = vmatmul.f32.gmra.mxu0 %v7008_v51  ;;  %1527 = vmatmul.f32.gmra.mxu1 %v7014_v12 }
 0x20f   :  { %1592 = vmatmul.f32.gmra.mxu2 %v7008_v51  ;;  %1657 = vmatmul.f32.gmra.mxu3 %v7014_v12  ;;  %v1747_v51 = vld [vmem:[#allocation3 + $0x820] sm:$0xff] }
 0x210   :  { %v1779_v12 = vld [vmem:[#allocation3 + $0x920] sm:$0xff]  ;;  %1820 = vmatpush.msra.mxu0 %v1747_v51  ;;  %v1744_v51 = vld [vmem:[#allocation3 + $0x808] sm:$0xff] }
 0x211   :  { %1885 = vmatpush.msra.mxu1 %v1779_v12  ;;  %v1776_v12 = vld [vmem:[#allocation3 + $0x908] sm:$0xff]  ;;  %1952 = vmatpush.msra.mxu2 %v1744_v51 }
 0x212   :  { %v1205_v48 = vpop.f32.mrf.mxu2  ;;  %v1270_v28 = vpop.f32.mrf.mxu3  ;;  %2017 = vmatpush.msra.mxu3 %v1776_v12 }
 0x213   :  { %v1271_v46 = vadd.f32 %v1270_v28, %v1205_v48  ;;  %v7277_v34 = vpop.f32.mrf.mxu0  ;;  %v7279_v2 = vpop.f32.mrf.mxu1 }
 0x214   :  { %10866 = vst [vmem:[#allocation95_spill] sm:$0xff] %v7277_v34  ;;  %v1777_v34 = vld [vmem:[#allocation3 + $0x910] sm:$0xff] }
 0x215   :  { %10867 = vst [vmem:[#allocation96_spill] sm:$0xff] %v7279_v2  ;;  %v7282_v40 = vadd.f32 %v1271_v46, %v6982_v52  ;;  %v1745_v2 = vld [vmem:[#allocation3 + $0x810] sm:$0xff]  ;;  %1886 = vmatpush.msra.mxu1 %v1777_v34  ;;  %v2194_v34 = vld [vmem:[#allocation3 + $0xbf8] sm:$0xff] }
 0x216   :  { %1465 = vmatmul.f32.gmra.mxu0 %v7029_v39  ;;  %1530 = vmatmul.f32.gmra.mxu1 %v7035_v26 }
 0x217   :  { %1595 = vmatmul.f32.gmra.mxu2 %v7029_v39  ;;  %1660 = vmatmul.f32.gmra.mxu3 %v7035_v26 }
 0x218   :  { %1821 = vmatpush.msra.mxu0 %v1745_v2  ;;  %2390 = vmatpush.msrb.mxu3 %v2194_v34 }
 0x21a   :  { %v1208_v9 = vpop.f32.mrf.mxu2  ;;  %v1273_v18 = vpop.f32.mrf.mxu3 }
 0x21b   :  { %v1274_v52 = vadd.f32 %v1273_v18, %v1208_v9  ;;  %v7288_v48 = vpop.f32.mrf.mxu0  ;;  %v7290_v28 = vpop.f32.mrf.mxu1 }
 0x21c   :  { %10868 = vst [vmem:[#allocation97_spill] sm:$0xff] %v7288_v48  ;;  %v2187_v48 = vld [vmem:[#allocation3 + $0xbc0] sm:$0xff] }
 0x21d   :  { %10869 = vst [vmem:[#allocation98_spill] sm:$0xff] %v7290_v28  ;;  %v7293_v46 = vadd.f32 %v1274_v52, %v7003_v58  ;;  %v1743_v28 = vld [vmem:[#allocation3 + $0x800] sm:$0xff] }
 0x21e   :  { %1468 = vmatmul.f32.gmra.mxu0 %v7050_v57  ;;  %1533 = vmatmul.f32.gmra.mxu1 %v7056_v27 }
 0x21f   :  { %1598 = vmatmul.f32.gmra.mxu2 %v7050_v57  ;;  %1663 = vmatmul.f32.gmra.mxu3 %v7056_v27  ;;  %v1775_v57 = vld [vmem:[#allocation3 + $0x900] sm:$0xff]  ;;  %v2162_v27 = vld [vmem:[#allocation3 + $0xaf8] sm:$0xff] }
 0x220   :  { %1822 = vmatpush.msra.mxu0 %v1743_v28  ;;  %1887 = vmatpush.msra.mxu1 %v1775_v57  ;;  %v2160_v28 = vld [vmem:[#allocation3 + $0xae8] sm:$0xff] }
 0x221   :  { %2325 = vmatpush.msrb.mxu2 %v2162_v27 }
 0x222   :  { %v1211_v19 = vpop.f32.mrf.mxu2  ;;  %v1276_v8 = vpop.f32.mrf.mxu3 }
 0x223   :  { %v1277_v58 = vadd.f32 %v1276_v8, %v1211_v19  ;;  %v7299_v9 = vpop.f32.mrf.mxu0  ;;  %v7301_v18 = vpop.f32.mrf.mxu1  ;;  %2326 = vmatpush.msrb.mxu2 %v2160_v28  ;;  %v2191_v28 = vld [vmem:[#allocation3 + $0xbe0] sm:$0xff] }
 0x224   :  { %10870 = vst [vmem:[#allocation99_spill] sm:$0xff] %v7299_v9  ;;  %v2155_v9 = vld [vmem:[#allocation3 + $0xac0] sm:$0xff] }
 0x225   :  { %10871 = vst [vmem:[#allocation100_spill] sm:$0xff] %v7301_v18  ;;  %v7304_v52 = vadd.f32 %v1277_v58, %v7024_v43  ;;  %v2192_v58 = vld [vmem:[#allocation3 + $0xbe8] sm:$0xff] }
 0x226   :  { %1471 = vmatmul.f32.gmra.mxu0 %v7069_v4  ;;  %1536 = vmatmul.f32.gmra.mxu1 %v7074_v20 }
 0x227   :  { %1601 = vmatmul.f32.gmra.mxu2 %v7069_v4  ;;  %1666 = vmatmul.f32.gmra.mxu3 %v7074_v20  ;;  %v2161_v4 = vld [vmem:[#allocation3 + $0xaf0] sm:$0xff] }
 0x228   :  { %v2193_v20 = vld [vmem:[#allocation3 + $0xbf0] sm:$0xff]  ;;  %2195 = vmatpush.msrb.mxu0 %v2161_v4  ;;  %2391 = vmatpush.msrb.mxu3 %v2192_v58  ;;  %v2158_v58 = vld [vmem:[#allocation3 + $0xad8] sm:$0xff] }
 0x229   :  { %2260 = vmatpush.msrb.mxu1 %v2193_v20  ;;  %v2159_v20 = vld [vmem:[#allocation3 + $0xae0] sm:$0xff]  ;;  %2327 = vmatpush.msrb.mxu2 %v2158_v58  ;;  %v2156_v58 = vld [vmem:[#allocation3 + $0xac8] sm:$0xff] }
 0x22a   :  { %v1214_v2 = vpop.f32.mrf.mxu2  ;;  %v1279_v51 = vpop.f32.mrf.mxu3  ;;  %2196 = vmatpush.msrb.mxu0 %v2159_v20 }
 0x22b   :  { %v1280_v43 = vadd.f32 %v1279_v51, %v1214_v2  ;;  %v7310_v12 = vpop.f32.mrf.mxu0  ;;  %v7312_v19 = vpop.f32.mrf.mxu1  ;;  %v7328_v51 = vld [vmem:[%s10771_s0 + $0xe0] sm:$0xff]  ;;  %2261 = vmatpush.msrb.mxu1 %v2191_v28  ;;  %v2189_v28 = vld [vmem:[#allocation3 + $0xbd0] sm:$0xff]  ;;  %2328 = vmatpush.msrb.mxu2 %v2156_v58 }
 0x22c   :  { %10872 = vst [vmem:[#allocation101_spill] sm:$0xff] %v7310_v12  ;;  %v7354_v12 = vld [vmem:[%s10771_s0 + $0xf8] sm:$0xff] }
 0x22d   :  { %10873 = vst [vmem:[#allocation102_spill] sm:$0xff] %v7312_v19  ;;  %v7315_v8 = vadd.f32 %v1280_v43, %v7045_v15  ;;  %v7333_v43 = vld [vmem:[%s10771_s0 + $0xe8] sm:$0xff]  ;;  %v7349_v19 = vld [vmem:[%s10771_s0 + $0xf0] sm:$0xff]  ;;  %2262 = vmatpush.msrb.mxu1 %v2189_v28  ;;  %v2186_v28 = vld [vmem:[#allocation3 + $0xbb8] sm:$0xff] }
 0x22e   :  { %1474 = vmatmul.f32.gmra.mxu0 %v7090_v49  ;;  %1539 = vmatmul.f32.gmra.mxu1 %v7095_v1 }
 0x22f   :  { %1604 = vmatmul.f32.gmra.mxu2 %v7090_v49  ;;  %1669 = vmatmul.f32.gmra.mxu3 %v7095_v1 }
 0x230   :  { %2263 = vmatpush.msrb.mxu1 %v2187_v48  ;;  %v2152_v48 = vld [vmem:[#allocation3 + $0xaa8] sm:$0xff] }
 0x232   :  { %v1217_v57 = vpop.f32.mrf.mxu2  ;;  %v1282_v27 = vpop.f32.mrf.mxu3 }
 0x233   :  { %v1283_v15 = vadd.f32 %v1282_v27, %v1217_v57  ;;  %v7321_v34 = vpop.f32.mrf.mxu0  ;;  %v7323_v2 = vpop.f32.mrf.mxu1  ;;  %v2190_v57 = vld [vmem:[#allocation3 + $0xbd8] sm:$0xff] }
 0x234   :  { %10874 = vst [vmem:[#allocation103_spill] sm:$0xff] %v7321_v34  ;;  %2392 = vmatpush.msrb.mxu3 %v2190_v57  ;;  %v2188_v57 = vld [vmem:[#allocation3 + $0xbc8] sm:$0xff] }
 0x235   :  { %10875 = vst [vmem:[#allocation104_spill] sm:$0xff] %v7323_v2  ;;  %v7336_v4 = vadd.f32 %v1283_v15, %v7076_v45 }
 0x236   :  { %1477 = vmatmul.f32.gmra.mxu0 %v7328_v51  ;;  %1542 = vmatmul.f32.gmra.mxu1 %v7333_v43 }
 0x237   :  { %1607 = vmatmul.f32.gmra.mxu2 %v7328_v51  ;;  %1672 = vmatmul.f32.gmra.mxu3 %v7333_v43 }
 0x238   :  { %2393 = vmatpush.msrb.mxu3 %v2188_v57 }
 0x23a   :  { %v1220_v27 = vpop.f32.mrf.mxu2  ;;  %v1285_v2 = vpop.f32.mrf.mxu3  ;;  %2394 = vmatpush.msrb.mxu3 %v2186_v28 }
 0x23b   :  { %v1286_v45 = vadd.f32 %v1285_v2, %v1220_v27  ;;  %v7342_v15 = vpop.f32.mrf.mxu0  ;;  %v7344_v34 = vpop.f32.mrf.mxu1  ;;  %v2157_v2 = vld [vmem:[#allocation3 + $0xad0] sm:$0xff] }
 0x23c   :  { %10876 = vst [vmem:[#allocation105_spill] sm:$0xff] %v7342_v15  ;;  %2197 = vmatpush.msrb.mxu0 %v2157_v2  ;;  %v2154_v2 = vld [vmem:[#allocation3 + $0xab8] sm:$0xff] }
 0x23d   :  { %10877 = vst [vmem:[#allocation106_spill] sm:$0xff] %v7344_v34  ;;  %v7357_v20 = vadd.f32 %v1286_v45, %v7097_v14  ;;  %2329 = vmatpush.msrb.mxu2 %v2154_v2 }
 0x23e   :  { %1480 = vmatmul.f32.gmra.mxu0 %v7349_v19  ;;  %1545 = vmatmul.f32.gmra.mxu1 %v7354_v12 }
 0x23f   :  { %1610 = vmatmul.f32.gmra.mxu2 %v7349_v19  ;;  %1675 = vmatmul.f32.gmra.mxu3 %v7354_v12 }
 0x240   :  { %2198 = vmatpush.msrb.mxu0 %v2155_v9  ;;  %v2184_v9 = vld [vmem:[#allocation3 + $0xba8] sm:$0xff]  ;;  %2330 = vmatpush.msrb.mxu2 %v2152_v48 }
 0x241   :  { %2395 = vmatpush.msrb.mxu3 %v2184_v9 }
 0x242   :  { %v1223_v27 = vpop.f32.mrf.mxu2  ;;  %v1288_v34 = vpop.f32.mrf.mxu3 }
 0x243   :  { %v1289_v14 = vadd.f32 %v1288_v34, %v1223_v27  ;;  %v7363_v45 = vpop.f32.mrf.mxu0  ;;  %v7365_v15 = vpop.f32.mrf.mxu1 }
 0x244   :  { %10878 = vst [vmem:[#allocation107_spill] sm:$0xff] %v7363_v45  ;;  %v2165_v45 = vld [vmem:[#allocation3 + $0xb10] sm:$0xff] }
 0x245   :  { %10879 = vst [vmem:[#allocation108_spill] sm:$0xff] %v7365_v15  ;;  %v7368_v18 = vadd.f32 %v1289_v14, %v7108_v32  ;;  %v2133_v15 = vld [vmem:[#allocation3 + $0xa10] sm:$0xff] }
 0x246   :  { %1823 = vmatmul.f32.vlgmr.msra.gmra.mxu0 %v7139_v5  ;;  %1888 = vmatmul.f32.vlgmr.msra.gmra.mxu1 %v7145_v61 }
 0x247   :  { %1953 = vmatmul.f32.vlgmr.msra.gmra.mxu2 %v7139_v5  ;;  %2018 = vmatmul.f32.vlgmr.msra.gmra.mxu3 %v7145_v61  ;;  %v2153_v5 = vld [vmem:[#allocation3 + $0xab0] sm:$0xff] }
 0x248   :  { %v2185_v61 = vld [vmem:[#allocation3 + $0xbb0] sm:$0xff]  ;;  %2199 = vmatpush.msrb.mxu0 %v2153_v5  ;;  %v2150_v5 = vld [vmem:[#allocation3 + $0xa98] sm:$0xff] }
 0x249   :  { %2264 = vmatpush.msrb.mxu1 %v2185_v61  ;;  %v2182_v61 = vld [vmem:[#allocation3 + $0xb98] sm:$0xff]  ;;  %2331 = vmatpush.msrb.mxu2 %v2150_v5 }
 0x24a   :  { %v1566_v34 = vpop.f32.mrf.mxu2  ;;  %v1631_v58 = vpop.f32.mrf.mxu3  ;;  %2396 = vmatpush.msrb.mxu3 %v2182_v61 }
 0x24b   :  { %v1632_v32 = vadd.f32 %v1631_v58, %v1566_v34  ;;  %v7374_v57 = vpop.f32.mrf.mxu0  ;;  %v7376_v27 = vpop.f32.mrf.mxu1 }
 0x24c   :  { %10880 = vst [vmem:[#allocation109_spill] sm:$0xff] %v7374_v57 }
 0x24d   :  { %10881 = vst [vmem:[#allocation110_spill] sm:$0xff] %v7376_v27  ;;  %v7379_v14 = vadd.f32 %v1632_v32, %v7121_v53  ;;  %v7523_v27 = vld [vmem:[%s10771_s0 + $0xc0] sm:$0xff] }
 0x24e   :  { %1826 = vmatmul.f32.gmra.mxu0 %v7160_v35  ;;  %1891 = vmatmul.f32.gmra.mxu1 %v7166_v63 }
 0x24f   :  { %1956 = vmatmul.f32.gmra.mxu2 %v7160_v35  ;;  %2021 = vmatmul.f32.gmra.mxu3 %v7166_v63  ;;  %v2151_v35 = vld [vmem:[#allocation3 + $0xaa0] sm:$0xff] }
 0x250   :  { %v2183_v63 = vld [vmem:[#allocation3 + $0xba0] sm:$0xff]  ;;  %2200 = vmatpush.msrb.mxu0 %v2151_v35  ;;  %v2148_v35 = vld [vmem:[#allocation3 + $0xa88] sm:$0xff] }
 0x251   :  { %2265 = vmatpush.msrb.mxu1 %v2183_v63  ;;  %v2180_v63 = vld [vmem:[#allocation3 + $0xb88] sm:$0xff]  ;;  %2332 = vmatpush.msrb.mxu2 %v2148_v35 }
 0x252   :  { %v1569_v2 = vpop.f32.mrf.mxu2  ;;  %v1634_v28 = vpop.f32.mrf.mxu3  ;;  %2201 = vmatpush.msrb.mxu0 %v2149_v54  ;;  %2397 = vmatpush.msrb.mxu3 %v2180_v63  ;;  %v2178_v54 = vld [vmem:[#allocation3 + $0xb78] sm:$0xff] }
 0x253   :  { %v1635_v53 = vadd.f32 %v1634_v28, %v1569_v2  ;;  %v7385_v34 = vpop.f32.mrf.mxu0  ;;  %v7387_v58 = vpop.f32.mrf.mxu1  ;;  %2266 = vmatpush.msrb.mxu1 %v2181_v33  ;;  %v2146_v33 = vld [vmem:[#allocation3 + $0xa78] sm:$0xff] }
 0x254   :  { %10882 = vst [vmem:[#allocation111_spill] sm:$0xff] %v7385_v34  ;;  %2333 = vmatpush.msrb.mxu2 %v2146_v33  ;;  %2398 = vmatpush.msrb.mxu3 %v2178_v54  ;;  %v2171_v34 = vld [vmem:[#allocation3 + $0xb40] sm:$0xff] }
 0x255   :  { %10883 = vst [vmem:[#allocation112_spill] sm:$0xff] %v7387_v58  ;;  %v7390_v32 = vadd.f32 %v1635_v53, %v7134_v22  ;;  %v2139_v58 = vld [vmem:[#allocation3 + $0xa40] sm:$0xff] }
 0x256   :  { %1829 = vmatmul.f32.gmra.mxu0 %v7181_v56  ;;  %1894 = vmatmul.f32.gmra.mxu1 %v7187_v13 }
 0x257   :  { %1959 = vmatmul.f32.gmra.mxu2 %v7181_v56  ;;  %2024 = vmatmul.f32.gmra.mxu3 %v7187_v13 }
 0x25a   :  { %v1572_v48 = vpop.f32.mrf.mxu2  ;;  %v1637_v9 = vpop.f32.mrf.mxu3 }
 0x25b   :  { %v1638_v22 = vadd.f32 %v1637_v9, %v1572_v48  ;;  %v7396_v2 = vpop.f32.mrf.mxu0  ;;  %v7398_v28 = vpop.f32.mrf.mxu1 }
 0x25c   :  { %10884 = vst [vmem:[#allocation113_spill] sm:$0xff] %v7396_v2  ;;  %v2179_v2 = vld [vmem:[#allocation3 + $0xb80] sm:$0xff] }
 0x25d   :  { %10885 = vst [vmem:[#allocation114_spill] sm:$0xff] %v7398_v28  ;;  %v7401_v53 = vadd.f32 %v1638_v22, %v7155_v36  ;;  %v2147_v28 = vld [vmem:[#allocation3 + $0xa80] sm:$0xff]  ;;  %2267 = vmatpush.msrb.mxu1 %v2179_v2  ;;  %v2144_v2 = vld [vmem:[#allocation3 + $0xa68] sm:$0xff] }
 0x25e   :  { %1832 = vmatmul.f32.gmra.mxu0 %v7202_v24  ;;  %1897 = vmatmul.f32.gmra.mxu1 %v7208_v55 }
 0x25f   :  { %1962 = vmatmul.f32.gmra.mxu2 %v7202_v24  ;;  %2027 = vmatmul.f32.gmra.mxu3 %v7208_v55 }
 0x260   :  { %2202 = vmatpush.msrb.mxu0 %v2147_v28  ;;  %v2176_v28 = vld [vmem:[#allocation3 + $0xb68] sm:$0xff]  ;;  %2334 = vmatpush.msrb.mxu2 %v2144_v2 }
 0x261   :  { %2399 = vmatpush.msrb.mxu3 %v2176_v28 }
 0x262   :  { %v1575_v5 = vpop.f32.mrf.mxu2  ;;  %v1640_v61 = vpop.f32.mrf.mxu3 }
 0x263   :  { %v1641_v36 = vadd.f32 %v1640_v61, %v1575_v5  ;;  %v7407_v48 = vpop.f32.mrf.mxu0  ;;  %v7409_v9 = vpop.f32.mrf.mxu1 }
 0x264   :  { %10886 = vst [vmem:[#allocation115_spill] sm:$0xff] %v7407_v48  ;;  %v2177_v48 = vld [vmem:[#allocation3 + $0xb70] sm:$0xff] }
 0x265   :  { %10887 = vst [vmem:[#allocation116_spill] sm:$0xff] %v7409_v9  ;;  %v7412_v22 = vadd.f32 %v1641_v36, %v7176_v7  ;;  %v2145_v9 = vld [vmem:[#allocation3 + $0xa70] sm:$0xff]  ;;  %2268 = vmatpush.msrb.mxu1 %v2177_v48  ;;  %v7441_v48 = vld [vmem:[%s10771_s0 + $0x80] sm:$0xff] }
 0x266   :  { %1835 = vmatmul.f32.gmra.mxu0 %v7223_v50  ;;  %1900 = vmatmul.f32.gmra.mxu1 %v7229_v3 }
 0x267   :  { %1965 = vmatmul.f32.gmra.mxu2 %v7223_v50  ;;  %2030 = vmatmul.f32.gmra.mxu3 %v7229_v3 }
 0x268   :  { %2203 = vmatpush.msrb.mxu0 %v2145_v9  ;;  %v7447_v9 = vld [vmem:[%s10771_s0 + $0x88] sm:$0xff] }
 0x26a   :  { %v1578_v35 = vpop.f32.mrf.mxu2  ;;  %v1643_v63 = vpop.f32.mrf.mxu3 }
 0x26b   :  { %v1644_v7 = vadd.f32 %v1643_v63, %v1578_v35  ;;  %v7418_v5 = vpop.f32.mrf.mxu0  ;;  %v7420_v61 = vpop.f32.mrf.mxu1 }
 0x26c   :  { %10888 = vst [vmem:[#allocation117_spill] sm:$0xff] %v7418_v5  ;;  %v2175_v5 = vld [vmem:[#allocation3 + $0xb60] sm:$0xff] }
 0x26d   :  { %10889 = vst [vmem:[#allocation118_spill] sm:$0xff] %v7420_v61  ;;  %v7423_v36 = vadd.f32 %v1644_v7, %v7197_v25  ;;  %v2143_v61 = vld [vmem:[#allocation3 + $0xa60] sm:$0xff]  ;;  %2269 = vmatpush.msrb.mxu1 %v2175_v5  ;;  %v7466_v5 = vld [vmem:[%s10771_s0 + $0x98] sm:$0xff] }
 0x26e   :  { %1838 = vmatmul.f32.gmra.mxu0 %v7244_v42  ;;  %1903 = vmatmul.f32.gmra.mxu1 %v7250_v23 }
 0x26f   :  { %1968 = vmatmul.f32.gmra.mxu2 %v7244_v42  ;;  %2033 = vmatmul.f32.gmra.mxu3 %v7250_v23 }
 0x270   :  { %2204 = vmatpush.msrb.mxu0 %v2143_v61  ;;  %v2141_v61 = vld [vmem:[#allocation3 + $0xa50] sm:$0xff] }
 0x272   :  { %v1581_v33 = vpop.f32.mrf.mxu2  ;;  %v1646_v54 = vpop.f32.mrf.mxu3  ;;  %2205 = vmatpush.msrb.mxu0 %v2141_v61  ;;  %v7483_v61 = vld [vmem:[%s10771_s0 + $0xa0] sm:$0xff] }
 0x273   :  { %v1647_v25 = vadd.f32 %v1646_v54, %v1581_v33  ;;  %v7429_v35 = vpop.f32.mrf.mxu0  ;;  %v7431_v63 = vpop.f32.mrf.mxu1 }
 0x274   :  { %10890 = vst [vmem:[#allocation119_spill] sm:$0xff] %v7429_v35  ;;  %2206 = vmatpush.msrb.mxu0 %v2139_v58  ;;  %v2137_v58 = vld [vmem:[#allocation3 + $0xa30] sm:$0xff] }
 0x275   :  { %10891 = vst [vmem:[#allocation120_spill] sm:$0xff] %v7431_v63  ;;  %v7434_v7 = vadd.f32 %v1647_v25, %v7218_v37  ;;  %v2142_v37 = vld [vmem:[#allocation3 + $0xa58] sm:$0xff]  ;;  %v7460_v63 = vld [vmem:[%s10771_s0 + $0x90] sm:$0xff] }
 0x276   :  { %1841 = vmatmul.f32.gmra.mxu0 %v6989_v6  ;;  %1906 = vmatmul.f32.gmra.mxu1 %v6995_v41  ;;  %v2174_v6 = vld [vmem:[#allocation3 + $0xb58] sm:$0xff] }
 0x277   :  { %1971 = vmatmul.f32.gmra.mxu2 %v7441_v48  ;;  %2036 = vmatmul.f32.gmra.mxu3 %v7447_v9 }
 0x278   :  { %2335 = vmatpush.msrb.mxu2 %v2142_v37  ;;  %2400 = vmatpush.msrb.mxu3 %v2174_v6  ;;  %v2173_v37 = vld [vmem:[#allocation3 + $0xb50] sm:$0xff]  ;;  %v2172_v6 = vld [vmem:[#allocation3 + $0xb48] sm:$0xff] }
 0x279   :  { %2270 = vmatpush.msrb.mxu1 %v2173_v37  ;;  %v7489_v37 = vld [vmem:[%s10771_s0 + $0xa8] sm:$0xff]  ;;  %2207 = vmatpush.msrb.mxu0 %v2137_v58 }
 0x27a   :  { %v1584_v41 = vpop.f32.mrf.mxu2  ;;  %v1649_v2 = vpop.f32.mrf.mxu3  ;;  %2401 = vmatpush.msrb.mxu3 %v2172_v6  ;;  %v7529_v58 = vld [vmem:[%s10771_s0 + $0xc8] sm:$0xff] }
 0x27b   :  { %v1650_v28 = vadd.f32 %v1649_v2, %v1584_v41  ;;  %v7450_v33 = vpop.f32.mrf.mxu0  ;;  %v7452_v54 = vpop.f32.mrf.mxu1  ;;  %2271 = vmatpush.msrb.mxu1 %v2171_v34  ;;  %v7508_v34 = vld [vmem:[%s10771_s0 + $0xb8] sm:$0xff] }
 0x27c   :  { %10892 = vst [vmem:[#allocation121_spill] sm:$0xff] %v7450_v33 }
 0x27d   :  { %10893 = vst [vmem:[#allocation122_spill] sm:$0xff] %v7452_v54  ;;  %v7455_v25 = vadd.f32 %v1650_v28, %v7239_v0  ;;  %v2140_v0 = vld [vmem:[#allocation3 + $0xa48] sm:$0xff] }
 0x27e   :  { %1844 = vmatmul.f32.gmra.mxu0 %v7460_v63  ;;  %1909 = vmatmul.f32.gmra.mxu1 %v7466_v5 }
 0x27f   :  { %1974 = vmatmul.f32.gmra.mxu2 %v7460_v63  ;;  %2039 = vmatmul.f32.gmra.mxu3 %v7466_v5 }
 0x280   :  { %2336 = vmatpush.msrb.mxu2 %v2140_v0 }
 0x282   :  { %v1587_v41 = vpop.f32.mrf.mxu2  ;;  %v1652_v2 = vpop.f32.mrf.mxu3 }
 0x283   :  { %v1653_v28 = vadd.f32 %v1652_v2, %v1587_v41  ;;  %v7471_v54 = vpop.f32.mrf.mxu0  ;;  %v7473_v33 = vpop.f32.mrf.mxu1 }
 0x284   :  { %10894 = vst [vmem:[#allocation123_spill] sm:$0xff] %v7471_v54 }
 0x285   :  { %10895 = vst [vmem:[#allocation124_spill] sm:$0xff] %v7473_v33  ;;  %v7476_v35 = vadd.f32 %v1653_v28, %v7260_v10  ;;  %v2138_v10 = vld [vmem:[#allocation3 + $0xa38] sm:$0xff]  ;;  %v7502_v33 = vld [vmem:[%s10771_s0 + $0xb0] sm:$0xff] }
 0x286   :  { %1847 = vmatmul.f32.gmra.mxu0 %v7029_v39  ;;  %1912 = vmatmul.f32.gmra.mxu1 %v7035_v26  ;;  %v2170_v39 = vld [vmem:[#allocation3 + $0xb38] sm:$0xff] }
 0x287   :  { %1977 = vmatmul.f32.gmra.mxu2 %v7483_v61  ;;  %2042 = vmatmul.f32.gmra.mxu3 %v7489_v37 }
 0x288   :  { %2337 = vmatpush.msrb.mxu2 %v2138_v10  ;;  %2402 = vmatpush.msrb.mxu3 %v2170_v39  ;;  %v2169_v10 = vld [vmem:[#allocation3 + $0xb30] sm:$0xff]  ;;  %v2168_v39 = vld [vmem:[#allocation3 + $0xb28] sm:$0xff] }
 0x289   :  { %2272 = vmatpush.msrb.mxu1 %v2169_v10  ;;  %v2135_v10 = vld [vmem:[#allocation3 + $0xa20] sm:$0xff] }
 0x28a   :  { %v1590_v26 = vpop.f32.mrf.mxu2  ;;  %v1655_v0 = vpop.f32.mrf.mxu3  ;;  %2403 = vmatpush.msrb.mxu3 %v2168_v39  ;;  %v2166_v39 = vld [vmem:[#allocation3 + $0xb18] sm:$0xff]  ;;  %2208 = vmatpush.msrb.mxu0 %v2135_v10  ;;  %v7546_v10 = vld [vmem:[%s10771_s0 + $0xd0] sm:$0xff] }
 0x28b   :  { %v1656_v6 = vadd.f32 %v1655_v0, %v1590_v26  ;;  %v7492_v41 = vpop.f32.mrf.mxu0  ;;  %v7494_v2 = vpop.f32.mrf.mxu1 }
 0x28c   :  { %10896 = vst [vmem:[#allocation125_spill] sm:$0xff] %v7492_v41  ;;  %2404 = vmatpush.msrb.mxu3 %v2166_v39  ;;  %2209 = vmatpush.msrb.mxu0 %v2133_v15  ;;  %v2550_v15 = vld [vmem:[#allocation3 + $0xcf8] sm:$0xff] }
 0x28d   :  { %10897 = vst [vmem:[#allocation126_spill] sm:$0xff] %v7494_v2  ;;  %v7497_v28 = vadd.f32 %v1656_v6, %v7271_v17  ;;  %v2136_v17 = vld [vmem:[#allocation3 + $0xa28] sm:$0xff] }
 0x28e   :  { %1850 = vmatmul.f32.gmra.mxu0 %v7502_v33  ;;  %1915 = vmatmul.f32.gmra.mxu1 %v7508_v34 }
 0x28f   :  { %1980 = vmatmul.f32.gmra.mxu2 %v7502_v33  ;;  %2045 = vmatmul.f32.gmra.mxu3 %v7508_v34 }
 0x290   :  { %2338 = vmatpush.msrb.mxu2 %v2136_v17  ;;  %v2167_v17 = vld [vmem:[#allocation3 + $0xb20] sm:$0xff] }
 0x291   :  { %2273 = vmatpush.msrb.mxu1 %v2167_v17  ;;  %v7552_v17 = vld [vmem:[%s10771_s0 + $0xd8] sm:$0xff] }
 0x292   :  { %v1593_v26 = vpop.f32.mrf.mxu2  ;;  %v1658_v0 = vpop.f32.mrf.mxu3 }
 0x293   :  { %v1659_v6 = vadd.f32 %v1658_v0, %v1593_v26  ;;  %v7513_v2 = vpop.f32.mrf.mxu0  ;;  %v7515_v41 = vpop.f32.mrf.mxu1  ;;  %2274 = vmatpush.msrb.mxu1 %v2165_v45  ;;  %v2582_v45 = vld [vmem:[#allocation3 + $0xdf8] sm:$0xff] }
 0x294   :  { %10898 = vst [vmem:[#allocation127_spill] sm:$0xff] %v7513_v2 }
 0x295   :  { %10899 = vst [vmem:[#allocation128_spill] sm:$0xff] %v7515_v41  ;;  %v7518_v54 = vadd.f32 %v1659_v6, %v7282_v40  ;;  %v2134_v40 = vld [vmem:[#allocation3 + $0xa18] sm:$0xff] }
 0x296   :  { %1853 = vmatmul.f32.gmra.mxu0 %v7523_v27  ;;  %1918 = vmatmul.f32.gmra.mxu1 %v7529_v58 }
 0x297   :  { %1983 = vmatmul.f32.gmra.mxu2 %v7523_v27  ;;  %2048 = vmatmul.f32.gmra.mxu3 %v7529_v58 }
 0x298   :  { %2339 = vmatpush.msrb.mxu2 %v2134_v40 }
 0x29a   :  { %v1596_v26 = vpop.f32.mrf.mxu2  ;;  %v1661_v0 = vpop.f32.mrf.mxu3 }
 0x29b   :  { %v1662_v6 = vadd.f32 %v1661_v0, %v1596_v26  ;;  %v7534_v41 = vpop.f32.mrf.mxu0  ;;  %v7536_v2 = vpop.f32.mrf.mxu1 }
 0x29c   :  { %10900 = vst [vmem:[#allocation129_spill] sm:$0xff] %v7534_v41  ;;  %v2163_v41 = vld [vmem:[#allocation3 + $0xb00] sm:$0xff] }
 0x29d   :  { %10901 = vst [vmem:[#allocation130_spill] sm:$0xff] %v7536_v2  ;;  %v7539_v57 = vadd.f32 %v1662_v6, %v7293_v46  ;;  %v2132_v46 = vld [vmem:[#allocation3 + $0xa08] sm:$0xff]  ;;  %v2131_v2 = vld [vmem:[#allocation3 + $0xa00] sm:$0xff]  ;;  %2275 = vmatpush.msrb.mxu1 %v2163_v41 }
 0x29e   :  { %1856 = vmatmul.f32.gmra.mxu0 %v7090_v49  ;;  %1921 = vmatmul.f32.gmra.mxu1 %v7095_v1  ;;  %v2164_v49 = vld [vmem:[#allocation3 + $0xb08] sm:$0xff] }
 0x29f   :  { %1986 = vmatmul.f32.gmra.mxu2 %v7546_v10  ;;  %2051 = vmatmul.f32.gmra.mxu3 %v7552_v17  ;;  %v2548_v41 = vld [vmem:[#allocation3 + $0xce8] sm:$0xff] }
 0x2a0   :  { %2340 = vmatpush.msrb.mxu2 %v2132_v46  ;;  %2405 = vmatpush.msrb.mxu3 %v2164_v49 }
 0x2a1   :  { %2210 = vmatpush.msrb.mxu0 %v2131_v2  ;;  %v2580_v2 = vld [vmem:[#allocation3 + $0xde8] sm:$0xff] }
 0x2a2   :  { %v1599_v1 = vpop.f32.mrf.mxu2  ;;  %v1664_v40 = vpop.f32.mrf.mxu3  ;;  %2713 = vmatpush.msra.mxu2 %v2550_v15  ;;  %2778 = vmatpush.msra.mxu3 %v2582_v45 }
 0x2a3   :  { %v1665_v39 = vadd.f32 %v1664_v40, %v1599_v1  ;;  %v7555_v26 = vpop.f32.mrf.mxu0  ;;  %v7557_v0 = vpop.f32.mrf.mxu1 }
 0x2a4   :  { %10902 = vst [vmem:[#allocation131_spill] sm:$0xff] %v7555_v26  ;;  %v2581_v26 = vld [vmem:[#allocation3 + $0xdf0] sm:$0xff]  ;;  %2714 = vmatpush.msra.mxu2 %v2548_v41  ;;  %2779 = vmatpush.msra.mxu3 %v2580_v2 }
 0x2a5   :  { %10903 = vst [vmem:[#allocation132_spill] sm:$0xff] %v7557_v0  ;;  %v7560_v6 = vadd.f32 %v1665_v39, %v7304_v52  ;;  %v2549_v0 = vld [vmem:[#allocation3 + $0xcf0] sm:$0xff]  ;;  %2648 = vmatpush.msra.mxu1 %v2581_v26  ;;  %v2546_v26 = vld [vmem:[#allocation3 + $0xcd8] sm:$0xff] }
 0x2a6   :  { %1859 = vmatmul.f32.gmra.mxu0 %v7328_v51  ;;  %1924 = vmatmul.f32.gmra.mxu1 %v7333_v43 }
 0x2a7   :  { %1989 = vmatmul.f32.gmra.mxu2 %v7328_v51  ;;  %2054 = vmatmul.f32.gmra.mxu3 %v7333_v43 }
 0x2a8   :  { %2583 = vmatpush.msra.mxu0 %v2549_v0  ;;  %v2578_v0 = vld [vmem:[#allocation3 + $0xdd8] sm:$0xff]  ;;  %2715 = vmatpush.msra.mxu2 %v2546_v26 }
 0x2a9   :  { %2780 = vmatpush.msra.mxu3 %v2578_v0 }
 0x2aa   :  { %v1602_v46 = vpop.f32.mrf.mxu2  ;;  %v1667_v49 = vpop.f32.mrf.mxu3 }
 0x2ab   :  { %v1668_v52 = vadd.f32 %v1667_v49, %v1602_v46  ;;  %v7566_v1 = vpop.f32.mrf.mxu0  ;;  %v7568_v40 = vpop.f32.mrf.mxu1 }
 0x2ac   :  { %10904 = vst [vmem:[#allocation133_spill] sm:$0xff] %v7566_v1  ;;  %v2579_v1 = vld [vmem:[#allocation3 + $0xde0] sm:$0xff] }
 0x2ad   :  { %10905 = vst [vmem:[#allocation134_spill] sm:$0xff] %v7568_v40  ;;  %v7571_v39 = vadd.f32 %v1668_v52, %v7315_v8  ;;  %v2547_v40 = vld [vmem:[#allocation3 + $0xce0] sm:$0xff]  ;;  %2649 = vmatpush.msra.mxu1 %v2579_v1  ;;  %v2544_v1 = vld [vmem:[#allocation3 + $0xcc8] sm:$0xff] }
 0x2ae   :  { %1862 = vmatmul.f32.gmra.mxu0 %v7349_v19  ;;  %1927 = vmatmul.f32.gmra.mxu1 %v7354_v12 }
 0x2af   :  { %1992 = vmatmul.f32.gmra.mxu2 %v7349_v19  ;;  %2057 = vmatmul.f32.gmra.mxu3 %v7354_v12 }
 0x2b0   :  { %2584 = vmatpush.msra.mxu0 %v2547_v40  ;;  %v2576_v40 = vld [vmem:[#allocation3 + $0xdc8] sm:$0xff]  ;;  %2716 = vmatpush.msra.mxu2 %v2544_v1  ;;  %v2542_v1 = vld [vmem:[#allocation3 + $0xcb8] sm:$0xff] }
 0x2b1   :  { %2781 = vmatpush.msra.mxu3 %v2576_v40  ;;  %v2574_v40 = vld [vmem:[#allocation3 + $0xdb8] sm:$0xff] }
 0x2b2   :  { %v1605_v15 = vpop.f32.mrf.mxu2  ;;  %v1670_v45 = vpop.f32.mrf.mxu3  ;;  %2717 = vmatpush.msra.mxu2 %v2542_v1  ;;  %v2540_v1 = vld [vmem:[#allocation3 + $0xca8] sm:$0xff] }
 0x2b3   :  { %v1671_v8 = vadd.f32 %v1670_v45, %v1605_v15  ;;  %v7577_v46 = vpop.f32.mrf.mxu0  ;;  %v7579_v49 = vpop.f32.mrf.mxu1  ;;  %2782 = vmatpush.msra.mxu3 %v2574_v40  ;;  %v2572_v40 = vld [vmem:[#allocation3 + $0xda8] sm:$0xff] }
 0x2b4   :  { %10906 = vst [vmem:[#allocation135_spill] sm:$0xff] %v7577_v46  ;;  %v2577_v46 = vld [vmem:[#allocation3 + $0xdd0] sm:$0xff]  ;;  %2718 = vmatpush.msra.mxu2 %v2540_v1 }
 0x2b5   :  { %10907 = vst [vmem:[#allocation136_spill] sm:$0xff] %v7579_v49  ;;  %v7582_v52 = vadd.f32 %v1671_v8, %v7336_v4  ;;  %v2545_v49 = vld [vmem:[#allocation3 + $0xcd0] sm:$0xff]  ;;  %2650 = vmatpush.msra.mxu1 %v2577_v46  ;;  %v6200_v46 = vld [vmem:[%s10771_s0 + $0x40] sm:$0xff]  ;;  %2783 = vmatpush.msra.mxu3 %v2572_v40 }
 0x2b6   :  { %1865 = vmatmul.f32.gmra.mxu0 %v10820_v62  ;;  %1930 = vmatmul.f32.gmra.mxu1 %v10820_v62 }
 0x2b7   :  { %1995 = vmatmul.f32.gmra.mxu2 %v10820_v62  ;;  %2060 = vmatmul.f32.gmra.mxu3 %v10820_v62 }
 0x2b8   :  { %2585 = vmatpush.msra.mxu0 %v2545_v49  ;;  %v6201_v49 = vld [vmem:[%s10771_s0 + $0x48] sm:$0xff] }
 0x2ba   :  { %v1608_v41 = vpop.f32.mrf.mxu2  ;;  %v1673_v2 = vpop.f32.mrf.mxu3 }
 0x2bb   :  { %v1674_v4 = vadd.f32 %v1673_v2, %v1608_v41  ;;  %v7588_v15 = vpop.f32.mrf.mxu0  ;;  %v7590_v45 = vpop.f32.mrf.mxu1 }
 0x2bc   :  { %10908 = vst [vmem:[#allocation137_spill] sm:$0xff] %v7588_v15  ;;  %v2575_v15 = vld [vmem:[#allocation3 + $0xdc0] sm:$0xff] }
 0x2bd   :  { %10909 = vst [vmem:[#allocation138_spill] sm:$0xff] %v7590_v45  ;;  %v7593_v8 = vadd.f32 %v1674_v4, %v7357_v20  ;;  %v2543_v45 = vld [vmem:[#allocation3 + $0xcc0] sm:$0xff]  ;;  %2651 = vmatpush.msra.mxu1 %v2575_v15  ;;  %v6202_v15 = vld [vmem:[%s10771_s0 + $0x50] sm:$0xff] }
 0x2be   :  { %1868 = vmatmul.f32.gmra.mxu0 %v10820_v62  ;;  %1933 = vmatmul.f32.gmra.mxu1 %v10820_v62 }
 0x2bf   :  { %1998 = vmatmul.f32.gmra.mxu2 %v10820_v62  ;;  %2063 = vmatmul.f32.gmra.mxu3 %v10820_v62 }
 0x2c0   :  { %2586 = vmatpush.msra.mxu0 %v2543_v45  ;;  %v6203_v45 = vld [vmem:[%s10771_s0 + $0x58] sm:$0xff] }
 0x2c2   :  { %v1611_v26 = vpop.f32.mrf.mxu2  ;;  %v1676_v0 = vpop.f32.mrf.mxu3 }
 0x2c3   :  { %v1677_v20 = vadd.f32 %v1676_v0, %v1611_v26  ;;  %v7599_v41 = vpop.f32.mrf.mxu0  ;;  %v7601_v2 = vpop.f32.mrf.mxu1 }
 0x2c5   :  { %v7604_v4 = vadd.f32 %v1677_v20, %v7368_v18 }
 0x2c6   :  { %2211 = vmatmul.f32.vlgmr.msrb.gmra.mxu0 %v7181_v56  ;;  %2276 = vmatmul.f32.vlgmr.msrb.gmra.mxu1 %v7187_v13 }
 0x2c7   :  { %2341 = vmatmul.f32.vlgmr.msrb.gmra.mxu2 %v6200_v46  ;;  %2406 = vmatmul.f32.vlgmr.msrb.gmra.mxu3 %v6201_v49  ;;  %v2541_v46 = vld [vmem:[#allocation3 + $0xcb0] sm:$0xff] }
 0x2c8   :  { %v2573_v49 = vld [vmem:[#allocation3 + $0xdb0] sm:$0xff]  ;;  %2587 = vmatpush.msra.mxu0 %v2541_v46  ;;  %v7641_v46 = vld [vmem:[%s10771_s0 + $0x60] sm:$0xff] }
 0x2c9   :  { %2652 = vmatpush.msra.mxu1 %v2573_v49  ;;  %v7647_v49 = vld [vmem:[%s10771_s0 + $0x68] sm:$0xff] }
 0x2ca   :  { %v1954_v56 = vpop.f32.mrf.mxu2  ;;  %v2019_v13 = vpop.f32.mrf.mxu3 }
 0x2cb   :  { %v2020_v18 = vadd.f32 %v2019_v13, %v1954_v56  ;;  %v7614_v26 = vpop.f32.mrf.mxu0  ;;  %v7616_v0 = vpop.f32.mrf.mxu1 }
 0x2cd   :  { %v7619_v20 = vadd.f32 %v2020_v18, %v7379_v14 }
 0x2ce   :  { %2214 = vmatmul.f32.gmra.mxu0 %v7202_v24  ;;  %2279 = vmatmul.f32.gmra.mxu1 %v7208_v55 }
 0x2cf   :  { %2344 = vmatmul.f32.gmra.mxu2 %v6202_v15  ;;  %2409 = vmatmul.f32.gmra.mxu3 %v6203_v45  ;;  %v2539_v15 = vld [vmem:[#allocation3 + $0xca0] sm:$0xff] }
 0x2d0   :  { %v2571_v45 = vld [vmem:[#allocation3 + $0xda0] sm:$0xff]  ;;  %2588 = vmatpush.msra.mxu0 %v2539_v15  ;;  %v7662_v15 = vld [vmem:[%s10771_s0 + $0x70] sm:$0xff] }
 0x2d1   :  { %2653 = vmatpush.msra.mxu1 %v2571_v45  ;;  %v7668_v45 = vld [vmem:[%s10771_s0 + $0x78] sm:$0xff] }
 0x2d2   :  { %v1957_v24 = vpop.f32.mrf.mxu2  ;;  %v2022_v55 = vpop.f32.mrf.mxu3 }
 0x2d3   :  { %v2023_v14 = vadd.f32 %v2022_v55, %v1957_v24  ;;  %v7629_v56 = vpop.f32.mrf.mxu0  ;;  %v7631_v13 = vpop.f32.mrf.mxu1 }
 0x2d4   :  { %10910 = vst [vmem:[#allocation139_spill] sm:$0xff] %v7629_v56  ;;  %v2569_v56 = vld [vmem:[#allocation3 + $0xd90] sm:$0xff] }
 0x2d5   :  { %10911 = vst [vmem:[#allocation140_spill] sm:$0xff] %v7631_v13  ;;  %v7634_v18 = vadd.f32 %v2023_v14, %v7390_v32  ;;  %v2538_v32 = vld [vmem:[#allocation3 + $0xc98] sm:$0xff]  ;;  %v2537_v13 = vld [vmem:[#allocation3 + $0xc90] sm:$0xff]  ;;  %2654 = vmatpush.msra.mxu1 %v2569_v56 }
 0x2d6   :  { %2217 = vmatmul.f32.gmra.mxu0 %v7223_v50  ;;  %2282 = vmatmul.f32.gmra.mxu1 %v7229_v3  ;;  %v2570_v50 = vld [vmem:[#allocation3 + $0xd98] sm:$0xff] }
 0x2d7   :  { %2347 = vmatmul.f32.gmra.mxu2 %v7641_v46  ;;  %2412 = vmatmul.f32.gmra.mxu3 %v7647_v49  ;;  %v2534_v56 = vld [vmem:[#allocation3 + $0xc78] sm:$0xff] }
 0x2d8   :  { %2719 = vmatpush.msra.mxu2 %v2538_v32  ;;  %2784 = vmatpush.msra.mxu3 %v2570_v50 }
 0x2d9   :  { %2589 = vmatpush.msra.mxu0 %v2537_v13  ;;  %v2566_v13 = vld [vmem:[#allocation3 + $0xd78] sm:$0xff] }
 0x2da   :  { %v1960_v3 = vpop.f32.mrf.mxu2  ;;  %v2025_v1 = vpop.f32.mrf.mxu3 }
 0x2db   :  { %v2026_v40 = vadd.f32 %v2025_v1, %v1960_v3  ;;  %v7650_v24 = vpop.f32.mrf.mxu0  ;;  %v7652_v55 = vpop.f32.mrf.mxu1 }
 0x2dc   :  { %10912 = vst [vmem:[#allocation141_spill] sm:$0xff] %v7650_v24  ;;  %v2567_v24 = vld [vmem:[#allocation3 + $0xd80] sm:$0xff] }
 0x2dd   :  { %10913 = vst [vmem:[#allocation142_spill] sm:$0xff] %v7652_v55  ;;  %v7655_v14 = vadd.f32 %v2026_v40, %v7401_v53  ;;  %v2536_v53 = vld [vmem:[#allocation3 + $0xc88] sm:$0xff]  ;;  %v2535_v55 = vld [vmem:[#allocation3 + $0xc80] sm:$0xff]  ;;  %2655 = vmatpush.msra.mxu1 %v2567_v24 }
 0x2de   :  { %2220 = vmatmul.f32.gmra.mxu0 %v7244_v42  ;;  %2285 = vmatmul.f32.gmra.mxu1 %v7250_v23  ;;  %v2568_v42 = vld [vmem:[#allocation3 + $0xd88] sm:$0xff] }
 0x2df   :  { %2350 = vmatmul.f32.gmra.mxu2 %v7662_v15  ;;  %2415 = vmatmul.f32.gmra.mxu3 %v7668_v45  ;;  %v2532_v24 = vld [vmem:[#allocation3 + $0xc68] sm:$0xff] }
 0x2e0   :  { %2720 = vmatpush.msra.mxu2 %v2536_v53  ;;  %2785 = vmatpush.msra.mxu3 %v2568_v42 }
 0x2e1   :  { %2590 = vmatpush.msra.mxu0 %v2535_v55  ;;  %v2564_v55 = vld [vmem:[#allocation3 + $0xd68] sm:$0xff] }
 0x2e2   :  { %v1963_v23 = vpop.f32.mrf.mxu2  ;;  %v2028_v32 = vpop.f32.mrf.mxu3  ;;  %2721 = vmatpush.msra.mxu2 %v2534_v56  ;;  %2786 = vmatpush.msra.mxu3 %v2566_v13 }
 0x2e3   :  { %v2029_v50 = vadd.f32 %v2028_v32, %v1963_v23  ;;  %v7671_v3 = vpop.f32.mrf.mxu0  ;;  %v7673_v1 = vpop.f32.mrf.mxu1 }
 0x2e4   :  { %10914 = vst [vmem:[#allocation143_spill] sm:$0xff] %v7671_v3  ;;  %v2565_v3 = vld [vmem:[#allocation3 + $0xd70] sm:$0xff]  ;;  %2722 = vmatpush.msra.mxu2 %v2532_v24  ;;  %2787 = vmatpush.msra.mxu3 %v2564_v55 }
 0x2e5   :  { %10915 = vst [vmem:[#allocation144_spill] sm:$0xff] %v7673_v1  ;;  %v7676_v40 = vadd.f32 %v2029_v50, %v7412_v22  ;;  %v2533_v1 = vld [vmem:[#allocation3 + $0xc70] sm:$0xff]  ;;  %2656 = vmatpush.msra.mxu1 %v2565_v3  ;;  %v2530_v3 = vld [vmem:[#allocation3 + $0xc58] sm:$0xff] }
 0x2e6   :  { %2223 = vmatmul.f32.gmra.mxu0 %v7441_v48  ;;  %2288 = vmatmul.f32.gmra.mxu1 %v7447_v9 }
 0x2e7   :  { %2353 = vmatmul.f32.gmra.mxu2 %v7441_v48  ;;  %2418 = vmatmul.f32.gmra.mxu3 %v7447_v9 }
 0x2e8   :  { %2591 = vmatpush.msra.mxu0 %v2533_v1  ;;  %v2562_v1 = vld [vmem:[#allocation3 + $0xd58] sm:$0xff]  ;;  %2723 = vmatpush.msra.mxu2 %v2530_v3 }
 0x2e9   :  { %2788 = vmatpush.msra.mxu3 %v2562_v1 }
 0x2ea   :  { %v1966_v53 = vpop.f32.mrf.mxu2  ;;  %v2031_v42 = vpop.f32.mrf.mxu3 }
 0x2eb   :  { %v2032_v22 = vadd.f32 %v2031_v42, %v1966_v53  ;;  %v7682_v23 = vpop.f32.mrf.mxu0  ;;  %v7684_v32 = vpop.f32.mrf.mxu1 }
 0x2ec   :  { %10916 = vst [vmem:[#allocation145_spill] sm:$0xff] %v7682_v23  ;;  %v2563_v23 = vld [vmem:[#allocation3 + $0xd60] sm:$0xff] }
 0x2ed   :  { %10917 = vst [vmem:[#allocation146_spill] sm:$0xff] %v7684_v32  ;;  %v7687_v50 = vadd.f32 %v2032_v22, %v7423_v36  ;;  %v2531_v32 = vld [vmem:[#allocation3 + $0xc60] sm:$0xff]  ;;  %2657 = vmatpush.msra.mxu1 %v2563_v23  ;;  %v2528_v23 = vld [vmem:[#allocation3 + $0xc48] sm:$0xff] }
 0x2ee   :  { %2226 = vmatmul.f32.gmra.mxu0 %v7460_v63  ;;  %2291 = vmatmul.f32.gmra.mxu1 %v7466_v5 }
 0x2ef   :  { %2356 = vmatmul.f32.gmra.mxu2 %v7460_v63  ;;  %2421 = vmatmul.f32.gmra.mxu3 %v7466_v5 }
 0x2f0   :  { %2592 = vmatpush.msra.mxu0 %v2531_v32  ;;  %v2560_v32 = vld [vmem:[#allocation3 + $0xd48] sm:$0xff]  ;;  %2724 = vmatpush.msra.mxu2 %v2528_v23 }
 0x2f1   :  { %2789 = vmatpush.msra.mxu3 %v2560_v32 }
 0x2f2   :  { %v1969_v56 = vpop.f32.mrf.mxu2  ;;  %v2034_v13 = vpop.f32.mrf.mxu3 }
 0x2f3   :  { %v2035_v36 = vadd.f32 %v2034_v13, %v1969_v56  ;;  %v7693_v53 = vpop.f32.mrf.mxu0  ;;  %v7695_v42 = vpop.f32.mrf.mxu1 }
 0x2f4   :  { %10918 = vst [vmem:[#allocation147_spill] sm:$0xff] %v7693_v53  ;;  %v2561_v53 = vld [vmem:[#allocation3 + $0xd50] sm:$0xff] }
 0x2f5   :  { %10919 = vst [vmem:[#allocation148_spill] sm:$0xff] %v7695_v42  ;;  %v7698_v22 = vadd.f32 %v2035_v36, %v7434_v7  ;;  %v2529_v42 = vld [vmem:[#allocation3 + $0xc50] sm:$0xff]  ;;  %2658 = vmatpush.msra.mxu1 %v2561_v53  ;;  %v2526_v53 = vld [vmem:[#allocation3 + $0xc38] sm:$0xff] }
 0x2f6   :  { %2229 = vmatmul.f32.gmra.mxu0 %v7483_v61  ;;  %2294 = vmatmul.f32.gmra.mxu1 %v7489_v37 }
 0x2f7   :  { %2359 = vmatmul.f32.gmra.mxu2 %v7483_v61  ;;  %2424 = vmatmul.f32.gmra.mxu3 %v7489_v37 }
 0x2f8   :  { %2593 = vmatpush.msra.mxu0 %v2529_v42  ;;  %v2558_v42 = vld [vmem:[#allocation3 + $0xd38] sm:$0xff]  ;;  %2725 = vmatpush.msra.mxu2 %v2526_v53 }
 0x2f9   :  { %2790 = vmatpush.msra.mxu3 %v2558_v42 }
 0x2fa   :  { %v1972_v24 = vpop.f32.mrf.mxu2  ;;  %v2037_v55 = vpop.f32.mrf.mxu3 }
 0x2fb   :  { %v2038_v7 = vadd.f32 %v2037_v55, %v1972_v24  ;;  %v7704_v56 = vpop.f32.mrf.mxu0  ;;  %v7706_v13 = vpop.f32.mrf.mxu1 }
 0x2fc   :  { %10920 = vst [vmem:[#allocation149_spill] sm:$0xff] %v7704_v56  ;;  %v2559_v56 = vld [vmem:[#allocation3 + $0xd40] sm:$0xff] }
 0x2fd   :  { %10921 = vst [vmem:[#allocation150_spill] sm:$0xff] %v7706_v13  ;;  %v7709_v36 = vadd.f32 %v2038_v7, %v7455_v25  ;;  %v2527_v13 = vld [vmem:[#allocation3 + $0xc40] sm:$0xff]  ;;  %2659 = vmatpush.msra.mxu1 %v2559_v56  ;;  %v2524_v56 = vld [vmem:[#allocation3 + $0xc28] sm:$0xff] }
 0x2fe   :  { %2232 = vmatmul.f32.gmra.mxu0 %v7502_v33  ;;  %2297 = vmatmul.f32.gmra.mxu1 %v7508_v34 }
 0x2ff   :  { %2362 = vmatmul.f32.gmra.mxu2 %v7502_v33  ;;  %2427 = vmatmul.f32.gmra.mxu3 %v7508_v34 }
 0x300   :  { %2594 = vmatpush.msra.mxu0 %v2527_v13  ;;  %v2556_v13 = vld [vmem:[#allocation3 + $0xd28] sm:$0xff]  ;;  %2726 = vmatpush.msra.mxu2 %v2524_v56 }
 0x301   :  { %2791 = vmatpush.msra.mxu3 %v2556_v13 }
 0x302   :  { %v1975_v3 = vpop.f32.mrf.mxu2  ;;  %v2040_v1 = vpop.f32.mrf.mxu3 }
 0x303   :  { %v2041_v25 = vadd.f32 %v2040_v1, %v1975_v3  ;;  %v7715_v24 = vpop.f32.mrf.mxu0  ;;  %v7717_v55 = vpop.f32.mrf.mxu1 }
 0x304   :  { %10922 = vst [vmem:[#allocation151_spill] sm:$0xff] %v7715_v24  ;;  %v2557_v24 = vld [vmem:[#allocation3 + $0xd30] sm:$0xff] }
 0x305   :  { %10923 = vst [vmem:[#allocation152_spill] sm:$0xff] %v7717_v55  ;;  %v7720_v7 = vadd.f32 %v2041_v25, %v7476_v35  ;;  %v2525_v55 = vld [vmem:[#allocation3 + $0xc30] sm:$0xff]  ;;  %2660 = vmatpush.msra.mxu1 %v2557_v24  ;;  %v7749_v24 = vld [vmem:[%s10771_s0 + $0xe0] sm:$0xff] }
 0x306   :  { %2235 = vmatmul.f32.gmra.mxu0 %v7523_v27  ;;  %2300 = vmatmul.f32.gmra.mxu1 %v7529_v58 }
 0x307   :  { %2365 = vmatmul.f32.gmra.mxu2 %v7523_v27  ;;  %2430 = vmatmul.f32.gmra.mxu3 %v7529_v58 }
 0x308   :  { %2595 = vmatpush.msra.mxu0 %v2525_v55  ;;  %v7755_v55 = vld [vmem:[%s10771_s0 + $0xe8] sm:$0xff] }
 0x30a   :  { %v1978_v23 = vpop.f32.mrf.mxu2  ;;  %v2043_v32 = vpop.f32.mrf.mxu3 }
 0x30b   :  { %v2044_v35 = vadd.f32 %v2043_v32, %v1978_v23  ;;  %v7726_v3 = vpop.f32.mrf.mxu0  ;;  %v7728_v1 = vpop.f32.mrf.mxu1 }
 0x30c   :  { %10924 = vst [vmem:[#allocation153_spill] sm:$0xff] %v7728_v1  ;;  %v2555_v1 = vld [vmem:[#allocation3 + $0xd20] sm:$0xff] }
 0x30d   :  { %v7731_v25 = vadd.f32 %v2044_v35, %v7497_v28  ;;  %2661 = vmatpush.msra.mxu1 %v2555_v1  ;;  %v2520_v1 = vld [vmem:[#allocation3 + $0xc08] sm:$0xff] }
 0x30e   :  { %2238 = vmatmul.f32.gmra.mxu0 %v7546_v10  ;;  %2303 = vmatmul.f32.gmra.mxu1 %v7552_v17 }
 0x30f   :  { %10925 = vst [vmem:[#allocation154_spill] sm:$0xff] %v7731_v25  ;;  %2368 = vmatmul.f32.gmra.mxu2 %v7546_v10  ;;  %2433 = vmatmul.f32.gmra.mxu3 %v7552_v17  ;;  %v2523_v25 = vld [vmem:[#allocation3 + $0xc20] sm:$0xff] }
 0x310   :  { %2596 = vmatpush.msra.mxu0 %v2523_v25  ;;  %v2552_v25 = vld [vmem:[#allocation3 + $0xd08] sm:$0xff] }
 0x312   :  { %v1981_v53 = vpop.f32.mrf.mxu2  ;;  %v2046_v42 = vpop.f32.mrf.mxu3 }
 0x313   :  { %v2047_v28 = vadd.f32 %v2046_v42, %v1981_v53  ;;  %v7737_v23 = vpop.f32.mrf.mxu0  ;;  %v7739_v32 = vpop.f32.mrf.mxu1 }
 0x314   :  { %10926 = vst [vmem:[#allocation155_spill] sm:$0xff] %v7739_v32  ;;  %v2553_v32 = vld [vmem:[#allocation3 + $0xd10] sm:$0xff] }
 0x315   :  { %v7742_v35 = vadd.f32 %v2047_v28, %v7518_v54  ;;  %v2522_v54 = vld [vmem:[#allocation3 + $0xc18] sm:$0xff]  ;;  %2662 = vmatpush.msra.mxu1 %v2553_v32 }
 0x316   :  { %2241 = vmatmul.f32.gmra.mxu0 %v7328_v51  ;;  %2306 = vmatmul.f32.gmra.mxu1 %v7333_v43  ;;  %v2554_v51 = vld [vmem:[#allocation3 + $0xd18] sm:$0xff] }
 0x317   :  { %10927 = vst [vmem:[#allocation156_spill] sm:$0xff] %v7742_v35  ;;  %2371 = vmatmul.f32.gmra.mxu2 %v7749_v24  ;;  %2436 = vmatmul.f32.gmra.mxu3 %v7755_v55  ;;  %v2521_v35 = vld [vmem:[#allocation3 + $0xc10] sm:$0xff] }
 0x318   :  { %2727 = vmatpush.msra.mxu2 %v2522_v54  ;;  %2792 = vmatpush.msra.mxu3 %v2554_v51 }
 0x319   :  { %2597 = vmatpush.msra.mxu0 %v2521_v35 }
 0x31a   :  { %v1984_v43 = vpop.f32.mrf.mxu2  ;;  %v2049_v56 = vpop.f32.mrf.mxu3  ;;  %2728 = vmatpush.msra.mxu2 %v2520_v1  ;;  %2793 = vmatpush.msra.mxu3 %v2552_v25 }
 0x31b   :  { %v2050_v13 = vadd.f32 %v2049_v56, %v1984_v43  ;;  %v7758_v53 = vpop.f32.mrf.mxu0  ;;  %v7760_v42 = vpop.f32.mrf.mxu1 }
 0x31c   :  { %10928 = vst [vmem:[#allocation157_spill] sm:$0xff] %v7760_v42 }
 0x31d   :  { %v7763_v28 = vadd.f32 %v2050_v13, %v7539_v57 }
 0x31e   :  { %2244 = vmatmul.f32.gmra.mxu0 %v7349_v19  ;;  %2309 = vmatmul.f32.gmra.mxu1 %v7354_v12 }
 0x31f   :  { %10929 = vst [vmem:[#allocation158_spill] sm:$0xff] %v7763_v28  ;;  %2374 = vmatmul.f32.gmra.mxu2 %v7349_v19  ;;  %2439 = vmatmul.f32.gmra.mxu3 %v7354_v12  ;;  %v2519_v28 = vld [vmem:[#allocation3 + $0xc00] sm:$0xff] }
 0x320   :  { %v2551_v19 = vld [vmem:[#allocation3 + $0xd00] sm:$0xff]  ;;  %2598 = vmatpush.msra.mxu0 %v2519_v28 }
 0x321   :  { %2663 = vmatpush.msra.mxu1 %v2551_v19 }
 0x322   :  { %v1987_v54 = vpop.f32.mrf.mxu2  ;;  %v2052_v51 = vpop.f32.mrf.mxu3 }
 0x323   :  { %v2053_v57 = vadd.f32 %v2052_v51, %v1987_v54  ;;  %v7769_v43 = vpop.f32.mrf.mxu0  ;;  %v7771_v56 = vpop.f32.mrf.mxu1 }
 0x324   :  { %10930 = vst [vmem:[#allocation159_spill] sm:$0xff] %v7769_v43 }
 0x325   :  { %10931 = vst [vmem:[#allocation160_spill] sm:$0xff] %v7771_v56  ;;  %v7774_v13 = vadd.f32 %v2053_v57, %v7560_v6 }
 0x326   :  { %2247 = vmatmul.f32.gmra.mxu0 %v10820_v62  ;;  %2312 = vmatmul.f32.gmra.mxu1 %v10820_v62 }
 0x327   :  { %10932 = vst [vmem:[#allocation161_spill] sm:$0xff] %v7774_v13  ;;  %2377 = vmatmul.f32.gmra.mxu2 %v10820_v62  ;;  %2442 = vmatmul.f32.gmra.mxu3 %v10820_v62 }
 0x32a   :  { %v1990_v12 = vpop.f32.mrf.mxu2  ;;  %v2055_v32 = vpop.f32.mrf.mxu3 }
 0x32b   :  { %v2056_v35 = vadd.f32 %v2055_v32, %v1990_v12  ;;  %v7780_v1 = vpop.f32.mrf.mxu0  ;;  %v7782_v25 = vpop.f32.mrf.mxu1 }
 0x32c   :  { %10933 = vst [vmem:[#allocation162_spill] sm:$0xff] %v7780_v1 }
 0x32d   :  { %10934 = vst [vmem:[#allocation163_spill] sm:$0xff] %v7782_v25  ;;  %v7785_v6 = vadd.f32 %v2056_v35, %v7571_v39 }
 0x32e   :  { %2250 = vmatmul.f32.gmra.mxu0 %v10820_v62  ;;  %2315 = vmatmul.f32.gmra.mxu1 %v10820_v62 }
 0x32f   :  { %10935 = vst [vmem:[#allocation164_spill] sm:$0xff] %v7785_v6  ;;  %2380 = vmatmul.f32.gmra.mxu2 %v10820_v62  ;;  %2445 = vmatmul.f32.gmra.mxu3 %v10820_v62 }
 0x332   :  { %v1993_v28 = vpop.f32.mrf.mxu2  ;;  %v2058_v54 = vpop.f32.mrf.mxu3 }
 0x333   :  { %v2059_v51 = vadd.f32 %v2058_v54, %v1993_v28  ;;  %v7791_v57 = vpop.f32.mrf.mxu0  ;;  %v7793_v19 = vpop.f32.mrf.mxu1 }
 0x334   :  { %10936 = vst [vmem:[#allocation165_spill] sm:$0xff] %v7791_v57 }
 0x335   :  { %10937 = vst [vmem:[#allocation166_spill] sm:$0xff] %v7793_v19  ;;  %v7796_v12 = vadd.f32 %v2059_v51, %v7582_v52 }
 0x336   :  { %2253 = vmatmul.f32.gmra.mxu0 %v10820_v62  ;;  %2318 = vmatmul.f32.gmra.mxu1 %v10820_v62 }
 0x337   :  { %10938 = vst [vmem:[#allocation167_spill] sm:$0xff] %v7796_v12  ;;  %2383 = vmatmul.f32.gmra.mxu2 %v10820_v62  ;;  %2448 = vmatmul.f32.gmra.mxu3 %v10820_v62 }
 0x33a   :  { %v1996_v39 = vpop.f32.mrf.mxu2  ;;  %v2061_v32 = vpop.f32.mrf.mxu3 }
 0x33b   :  { %v2062_v35 = vadd.f32 %v2061_v32, %v1996_v39  ;;  %v7802_v6 = vpop.f32.mrf.mxu0  ;;  %v7804_v28 = vpop.f32.mrf.mxu1 }
 0x33c   :  { %10939 = vst [vmem:[#allocation168_spill] sm:$0xff] %v7802_v6 }
 0x33d   :  { %10940 = vst [vmem:[#allocation169_spill] sm:$0xff] %v7804_v28  ;;  %v7807_v54 = vadd.f32 %v2062_v35, %v7593_v8 }
 0x33e   :  { %2256 = vmatmul.f32.gmra.mxu0 %v10820_v62  ;;  %2321 = vmatmul.f32.gmra.mxu1 %v10820_v62 }
 0x33f   :  { %10941 = vst [vmem:[#allocation170_spill] sm:$0xff] %v7807_v54  ;;  %2386 = vmatmul.f32.gmra.mxu2 %v10820_v62  ;;  %2451 = vmatmul.f32.gmra.mxu3 %v10820_v62 }
 0x342   :  { %v1999_v52 = vpop.f32.mrf.mxu2  ;;  %v2064_v51 = vpop.f32.mrf.mxu3 }
 0x343   :  { %v2065_v12 = vadd.f32 %v2064_v51, %v1999_v52  ;;  %v7813_v19 = vpop.f32.mrf.mxu0  ;;  %v7815_v39 = vpop.f32.mrf.mxu1 }
 0x345   :  { %v7818_v32 = vadd.f32 %v2065_v12, %v7604_v4 }
 0x346   :  { %2599 = vmatmul.f32.vlgmr.msra.gmra.mxu0 %v7641_v46  ;;  %2664 = vmatmul.f32.vlgmr.msra.gmra.mxu1 %v7647_v49 }
 0x347   :  { %10942 = vst [vmem:[#allocation171_spill] sm:$0xff] %v7818_v32  ;;  %2729 = vmatmul.f32.vlgmr.msra.gmra.mxu2 %v7641_v46  ;;  %2794 = vmatmul.f32.vlgmr.msra.gmra.mxu3 %v7647_v49 }
 0x34a   :  { %v2342_v8 = vpop.f32.mrf.mxu2  ;;  %v2407_v35 = vpop.f32.mrf.mxu3 }
 0x34b   :  { %v2408_v54 = vadd.f32 %v2407_v35, %v2342_v8  ;;  %v7824_v28 = vpop.f32.mrf.mxu0  ;;  %v7826_v52 = vpop.f32.mrf.mxu1 }
 0x34d   :  { %v7829_v51 = vadd.f32 %v2408_v54, %v7619_v20 }
 0x34e   :  { %2602 = vmatmul.f32.gmra.mxu0 %v7662_v15  ;;  %2667 = vmatmul.f32.gmra.mxu1 %v7668_v45 }
 0x34f   :  { %2732 = vmatmul.f32.gmra.mxu2 %v7662_v15  ;;  %2797 = vmatmul.f32.gmra.mxu3 %v7668_v45 }
 0x352   :  { %v2345_v4 = vpop.f32.mrf.mxu2  ;;  %v2410_v46 = vpop.f32.mrf.mxu3 }
 0x353   :  { %v2411_v49 = vadd.f32 %v2410_v46, %v2345_v4  ;;  %v7835_v12 = vpop.f32.mrf.mxu0  ;;  %v7837_v8 = vpop.f32.mrf.mxu1 }
 0x355   :  { %v7840_v35 = vadd.f32 %v2411_v49, %v7634_v18 }
 0x356   :  { %2605 = vmatmul.f32.gmra.mxu0 %v7441_v48  ;;  %2670 = vmatmul.f32.gmra.mxu1 %v7447_v9 }
 0x357   :  { %2735 = vmatmul.f32.gmra.mxu2 %v7441_v48  ;;  %2800 = vmatmul.f32.gmra.mxu3 %v7447_v9 }
 0x35a   :  { %v2348_v20 = vpop.f32.mrf.mxu2  ;;  %v2413_v15 = vpop.f32.mrf.mxu3 }
 0x35b   :  { %v2414_v45 = vadd.f32 %v2413_v15, %v2348_v20  ;;  %v7846_v54 = vpop.f32.mrf.mxu0  ;;  %v7848_v4 = vpop.f32.mrf.mxu1 }
 0x35d   :  { %v7851_v46 = vadd.f32 %v2414_v45, %v7655_v14 }
 0x35e   :  { %2608 = vmatmul.f32.gmra.mxu0 %v7460_v63  ;;  %2673 = vmatmul.f32.gmra.mxu1 %v7466_v5 }
 0x35f   :  { %2738 = vmatmul.f32.gmra.mxu2 %v7460_v63  ;;  %2803 = vmatmul.f32.gmra.mxu3 %v7466_v5 }
 0x362   :  { %v2351_v48 = vpop.f32.mrf.mxu2  ;;  %v2416_v9 = vpop.f32.mrf.mxu3 }
 0x363   :  { %v2417_v18 = vadd.f32 %v2416_v9, %v2351_v48  ;;  %v7857_v49 = vpop.f32.mrf.mxu0  ;;  %v7859_v20 = vpop.f32.mrf.mxu1 }
 0x365   :  { %v7862_v15 = vadd.f32 %v2417_v18, %v7676_v40 }
 0x366   :  { %2611 = vmatmul.f32.gmra.mxu0 %v7483_v61  ;;  %2676 = vmatmul.f32.gmra.mxu1 %v7489_v37 }
 0x367   :  { %2741 = vmatmul.f32.gmra.mxu2 %v7483_v61  ;;  %2806 = vmatmul.f32.gmra.mxu3 %v7489_v37 }
 0x36a   :  { %v2354_v63 = vpop.f32.mrf.mxu2  ;;  %v2419_v5 = vpop.f32.mrf.mxu3 }
 0x36b   :  { %v2420_v14 = vadd.f32 %v2419_v5, %v2354_v63  ;;  %v7868_v45 = vpop.f32.mrf.mxu0  ;;  %v7870_v48 = vpop.f32.mrf.mxu1 }
 0x36d   :  { %v7873_v9 = vadd.f32 %v2420_v14, %v7687_v50 }
 0x36e   :  { %2614 = vmatmul.f32.gmra.mxu0 %v7502_v33  ;;  %2679 = vmatmul.f32.gmra.mxu1 %v7508_v34 }
 0x36f   :  { %2744 = vmatmul.f32.gmra.mxu2 %v7502_v33  ;;  %2809 = vmatmul.f32.gmra.mxu3 %v7508_v34 }
 0x372   :  { %v2357_v61 = vpop.f32.mrf.mxu2  ;;  %v2422_v37 = vpop.f32.mrf.mxu3 }
 0x373   :  { %v2423_v40 = vadd.f32 %v2422_v37, %v2357_v61  ;;  %v7879_v18 = vpop.f32.mrf.mxu0  ;;  %v7881_v63 = vpop.f32.mrf.mxu1 }
 0x375   :  { %v7884_v5 = vadd.f32 %v2423_v40, %v7698_v22 }
 0x376   :  { %2617 = vmatmul.f32.gmra.mxu0 %v7523_v27  ;;  %2682 = vmatmul.f32.gmra.mxu1 %v7529_v58 }
 0x377   :  { %2747 = vmatmul.f32.gmra.mxu2 %v7523_v27  ;;  %2812 = vmatmul.f32.gmra.mxu3 %v7529_v58 }
 0x37a   :  { %v2360_v33 = vpop.f32.mrf.mxu2  ;;  %v2425_v34 = vpop.f32.mrf.mxu3 }
 0x37b   :  { %v2426_v50 = vadd.f32 %v2425_v34, %v2360_v33  ;;  %v7890_v14 = vpop.f32.mrf.mxu0  ;;  %v7892_v61 = vpop.f32.mrf.mxu1 }
 0x37d   :  { %v7895_v37 = vadd.f32 %v2426_v50, %v7709_v36 }
 0x37e   :  { %2620 = vmatmul.f32.gmra.mxu0 %v7546_v10  ;;  %2685 = vmatmul.f32.gmra.mxu1 %v7552_v17 }
 0x37f   :  { %2750 = vmatmul.f32.gmra.mxu2 %v7546_v10  ;;  %2815 = vmatmul.f32.gmra.mxu3 %v7552_v17 }
 0x382   :  { %v2363_v27 = vpop.f32.mrf.mxu2  ;;  %v2428_v58 = vpop.f32.mrf.mxu3 }
 0x383   :  { %v2429_v22 = vadd.f32 %v2428_v58, %v2363_v27  ;;  %v7901_v40 = vpop.f32.mrf.mxu0  ;;  %v7903_v33 = vpop.f32.mrf.mxu1  ;;  %v6211_v27 = vld [vmem:[%s10771_s0 + $0xf8] sm:$0xff] }
 0x385   :  { %v7906_v34 = vadd.f32 %v2429_v22, %v7720_v7  ;;  %v6210_v7 = vld [vmem:[%s10771_s0 + $0xf0] sm:$0xff] }
 0x386   :  { %2623 = vmatmul.f32.gmra.mxu0 %v7749_v24  ;;  %2688 = vmatmul.f32.gmra.mxu1 %v7755_v55 }
 0x387   :  { %2753 = vmatmul.f32.gmra.mxu2 %v7749_v24  ;;  %2818 = vmatmul.f32.gmra.mxu3 %v7755_v55 }
 0x38a   :  { %v7912_v10 = vpop.f32.mrf.mxu2  ;;  %v7914_v17 = vpop.f32.mrf.mxu3 }
 0x38b   :  { %v7916_v36 = vpop.f32.mrf.mxu0  ;;  %v7918_v50 = vpop.f32.mrf.mxu1 }
 0x38e   :  { %2626 = vmatmul.f32.gmra.mxu0 %v6210_v7  ;;  %2691 = vmatmul.f32.gmra.mxu1 %v6211_v27 }
 0x38f   :  { %2756 = vmatmul.f32.gmra.mxu2 %v6210_v7  ;;  %2821 = vmatmul.f32.gmra.mxu3 %v6211_v27 }
 0x392   :  { %v7926_v24 = vpop.f32.mrf.mxu2  ;;  %v7928_v55 = vpop.f32.mrf.mxu3 }
 0x393   :  { %v7930_v58 = vpop.f32.mrf.mxu0  ;;  %v7932_v22 = vpop.f32.mrf.mxu1 }
 0x396   :  { %2629 = vmatmul.f32.gmra.mxu0 %v10820_v62  ;;  %2694 = vmatmul.f32.gmra.mxu1 %v10820_v62 }
 0x397   :  { %2759 = vmatmul.f32.gmra.mxu2 %v10820_v62  ;;  %2824 = vmatmul.f32.gmra.mxu3 %v10820_v62 }
 0x39a   :  { %v7938_v32 = vpop.f32.mrf.mxu2  ;;  %v7940_v7 = vpop.f32.mrf.mxu3 }
 0x39b   :  { %10943 = vst [vmem:[#allocation172_spill] sm:$0xff] %v7938_v32  ;;  %v7942_v27 = vpop.f32.mrf.mxu0  ;;  %v7944_v6 = vpop.f32.mrf.mxu1 }
 0x39c   :  { %10944 = vst [vmem:[#allocation173_spill] sm:$0xff] %v7940_v7  ;;  %v10966_v7 = vld [vmem:[#allocation107_spill] sm:$0xff] }
 0x39d   :  { %10945 = vst [vmem:[#allocation174_spill] sm:$0xff] %v7942_v27  ;;  %v10965_v27 = vld [vmem:[#allocation50_spill] sm:$0xff] }
 0x39e   :  { %10946 = vst [vmem:[#allocation175_spill] sm:$0xff] %v7944_v6  ;;  %2632 = vmatmul.f32.gmra.mxu0 %v10820_v62  ;;  %2697 = vmatmul.f32.gmra.mxu1 %v10820_v62 }
 0x39f   :  { %2762 = vmatmul.f32.gmra.mxu2 %v10820_v62  ;;  %2827 = vmatmul.f32.gmra.mxu3 %v10820_v62 }
 0x3a2   :  { %v7950_v57 = vpop.f32.mrf.mxu2  ;;  %v7952_v25 = vpop.f32.mrf.mxu3 }
 0x3a3   :  { %10947 = vst [vmem:[#allocation176_spill] sm:$0xff] %v7950_v57  ;;  %v7954_v1 = vpop.f32.mrf.mxu0  ;;  %v7956_v13 = vpop.f32.mrf.mxu1 }
 0x3a4   :  { %10948 = vst [vmem:[#allocation177_spill] sm:$0xff] %v7952_v25 }
 0x3a5   :  { %10949 = vst [vmem:[#allocation178_spill] sm:$0xff] %v7954_v1 }
 0x3a6   :  { %10950 = vst [vmem:[#allocation179_spill] sm:$0xff] %v7956_v13  ;;  %2635 = vmatmul.f32.gmra.mxu0 %v10820_v62  ;;  %2700 = vmatmul.f32.gmra.mxu1 %v10820_v62 }
 0x3a7   :  { %2765 = vmatmul.f32.gmra.mxu2 %v10820_v62  ;;  %2830 = vmatmul.f32.gmra.mxu3 %v10820_v62 }
 0x3aa   :  { %v7962_v56 = vpop.f32.mrf.mxu2  ;;  %v7964_v43 = vpop.f32.mrf.mxu3 }
 0x3ab   :  { %10951 = vst [vmem:[#allocation180_spill] sm:$0xff] %v7962_v56  ;;  %v7966_v6 = vpop.f32.mrf.mxu0  ;;  %v7968_v57 = vpop.f32.mrf.mxu1 }
 0x3ac   :  { %10952 = vst [vmem:[#allocation181_spill] sm:$0xff] %v7964_v43 }
 0x3ad   :  { %10953 = vst [vmem:[#allocation182_spill] sm:$0xff] %v7966_v6 }
 0x3ae   :  { %10954 = vst [vmem:[#allocation183_spill] sm:$0xff] %v7968_v57  ;;  %2638 = vmatmul.f32.gmra.mxu0 %v10820_v62  ;;  %2703 = vmatmul.f32.gmra.mxu1 %v10820_v62 }
 0x3af   :  { %2768 = vmatmul.f32.gmra.mxu2 %v10820_v62  ;;  %2833 = vmatmul.f32.gmra.mxu3 %v10820_v62 }
 0x3b2   :  { %v7974_v13 = vpop.f32.mrf.mxu2  ;;  %v7976_v1 = vpop.f32.mrf.mxu3 }
 0x3b3   :  { %10955 = vst [vmem:[#allocation184_spill] sm:$0xff] %v7974_v13  ;;  %v7978_v25 = vpop.f32.mrf.mxu0  ;;  %v7980_v56 = vpop.f32.mrf.mxu1 }
 0x3b4   :  { %10956 = vst [vmem:[#allocation185_spill] sm:$0xff] %v7976_v1 }
 0x3b5   :  { %10957 = vst [vmem:[#allocation186_spill] sm:$0xff] %v7978_v25  ;;  %v498_v25 = vadd.f32 %v6712_v47, %v6710_v44  ;;  %v1117_v44 = vadd.f32 %v7118_v21, %v7116_v29 }
 0x3b6   :  { %10958 = vst [vmem:[#allocation187_spill] sm:$0xff] %v7980_v56  ;;  %2641 = vmatmul.f32.gmra.mxu0 %v10820_v62  ;;  %2706 = vmatmul.f32.gmra.mxu1 %v10820_v62  ;;  %v501_v56 = vadd.f32 %v6722_v60, %v6720_v59 }
 0x3b7   :  { %2771 = vmatmul.f32.gmra.mxu2 %v10820_v62  ;;  %2836 = vmatmul.f32.gmra.mxu3 %v10820_v62 }
 0x3ba   :  { %v7986_v57 = vpop.f32.mrf.mxu2  ;;  %v7988_v6 = vpop.f32.mrf.mxu3 }
 0x3bb   :  { %10959 = vst [vmem:[#allocation188_spill] sm:$0xff] %v7986_v57  ;;  %v7990_v43 = vpop.f32.mrf.mxu0  ;;  %v7992_v13 = vpop.f32.mrf.mxu1 }
 0x3bc   :  { %10960 = vst [vmem:[#allocation189_spill] sm:$0xff] %v7988_v6  ;;  %v693_v6 = vadd.f32 %v6870_v38, %v498_v25  ;;  %v10967_v38 = vld [vmem:[#allocation108_spill] sm:$0xff] }
 0x3bd   :  { %10961 = vst [vmem:[#allocation190_spill] sm:$0xff] %v7990_v43  ;;  %v696_v43 = vadd.f32 %v6879_v30, %v501_v56  ;;  %v1502_v25 = vadd.f32 %v10967_v38, %v10966_v7  ;;  %v10968_v30 = vld [vmem:[#allocation109_spill] sm:$0xff]  ;;  %v10969_v56 = vld [vmem:[#allocation110_spill] sm:$0xff]  ;;  %v2278_v7 = vadd.f32 %v7815_v39, %v7813_v19  ;;  %v2281_v38 = vadd.f32 %v7826_v52, %v7824_v28 }
 0x3be   :  { %10962 = vst [vmem:[#allocation191_spill] sm:$0xff] %v7992_v13  ;;  %2644 = vmatmul.f32.gmra.mxu0 %v10820_v62  ;;  %2709 = vmatmul.f32.gmra.mxu1 %v10820_v62  ;;  %v1114_v13 = vadd.f32 %v7106_v11, %v7104_v16  ;;  %v758_v1 = vadd.f32 %v6872_v31, %v693_v6  ;;  %v10970_v11 = vld [vmem:[#allocation22_spill] sm:$0xff]  ;;  %v10971_v16 = vld [vmem:[#allocation23_spill] sm:$0xff]  ;;  %v10979_v28 = vld [vmem:[#allocation25_spill] sm:$0xff] }
 0x3bf   :  { %2774 = vmatmul.f32.gmra.mxu2 %v10820_v62  ;;  %2839 = vmatmul.f32.gmra.mxu3 %v10820_v62  ;;  %v761_v62 = vadd.f32 %v10965_v27, %v696_v43  ;;  %v1505_v32 = vadd.f32 %v10969_v56, %v10968_v30  ;;  %v504_v42 = vadd.f32 %v10971_v16, %v10970_v11  ;;  %v10972_v31 = vld [vmem:[#allocation51_spill] sm:$0xff]  ;;  %v10974_v56 = vld [vmem:[#allocation80_spill] sm:$0xff] }
 0x3c0   :  { %v1291_v21 = vadd.f32 %v1114_v13, %v758_v1  ;;  %v10973_v30 = vld [vmem:[#allocation79_spill] sm:$0xff]  ;;  %v10975_v11 = vld [vmem:[#allocation52_spill] sm:$0xff] }
 0x3c1   :  { %v1293_v29 = vadd.f32 %v1117_v44, %v761_v62  ;;  %v699_v6 = vadd.f32 %v10972_v31, %v504_v42  ;;  %v1120_v13 = vadd.f32 %v10974_v56, %v10973_v30  ;;  %v10980_v30 = vld [vmem:[#allocation139_spill] sm:$0xff]  ;;  %v2284_v56 = vadd.f32 %v7837_v8, %v7835_v12 }
 0x3c2   :  { %v8008_v47 = vpop.f32.mrf.mxu2  ;;  %v8010_v59 = vpop.f32.mrf.mxu3  ;;  %v1679_v43 = vadd.f32 %v1502_v25, %v1291_v21  ;;  %v10976_v25 = vld [vmem:[#allocation111_spill] sm:$0xff] }
 0x3c3   :  { %10963 = vst [vmem:[#allocation192_spill] sm:$0xff] %v8008_v47  ;;  %v2600_v60 = vpop.f32.mrf.mxu0  ;;  %v2665_v57 = vpop.f32.mrf.mxu1  ;;  %v1893_v47 = vadd.f32 %v7616_v0, %v7614_v26  ;;  %v1681_v27 = vadd.f32 %v1505_v32, %v1293_v29  ;;  %v764_v26 = vadd.f32 %v10975_v11, %v699_v6  ;;  %v10977_v32 = vld [vmem:[#allocation112_spill] sm:$0xff]  ;;  %v10982_v6 = vld [vmem:[#allocation53_spill] sm:$0xff] }
 0x3c4   :  { %10964 = vst [vmem:[#allocation193_spill] sm:$0xff] %v8010_v59  ;;  %v1890_v59 = vadd.f32 %v7601_v2, %v7599_v41  ;;  %v2666_v44 = vadd.f32 %v2665_v57, %v2600_v60  ;;  %v1508_v16 = vadd.f32 %v10977_v32, %v10976_v25  ;;  %v10978_v29 = vld [vmem:[#allocation24_spill] sm:$0xff]  ;;  %v10985_v32 = vld [vmem:[#allocation54_spill] sm:$0xff] }
 0x3c5   :  { %v2069_v1 = vadd.f32 %v1893_v47, %v1681_v27  ;;  %v507_v52 = vadd.f32 %v10979_v28, %v10978_v29  ;;  %v1295_v31 = vadd.f32 %v1120_v13, %v764_v26  ;;  %v10989_v28 = vld [vmem:[#allocation27_spill] sm:$0xff] }
 0x3c6   :  { %v2067_v62 = vadd.f32 %v1890_v59, %v1679_v43  ;;  %v10981_v59 = vld [vmem:[#allocation140_spill] sm:$0xff] }
 0x3c7   :  { %v2457_v19 = vadd.f32 %v2281_v38, %v2069_v1  ;;  %v1896_v47 = vadd.f32 %v10981_v59, %v10980_v30  ;;  %v702_v43 = vadd.f32 %v10982_v6, %v507_v52  ;;  %v1683_v27 = vadd.f32 %v1508_v16, %v1295_v31  ;;  %v10984_v1 = vld [vmem:[#allocation82_spill] sm:$0xff]  ;;  %v10990_v30 = vld [vmem:[#allocation141_spill] sm:$0xff] }
 0x3c8   :  { %v2455_v21 = vadd.f32 %v2278_v7, %v2067_v62  ;;  %v10983_v62 = vld [vmem:[#allocation81_spill] sm:$0xff]  ;;  %v10987_v16 = vld [vmem:[#allocation114_spill] sm:$0xff] }
 0x3c9   :  { %v1123_v13 = vadd.f32 %v10984_v1, %v10983_v62  ;;  %v2071_v11 = vadd.f32 %v1896_v47, %v1683_v27  ;;  %v10991_v59 = vld [vmem:[#allocation142_spill] sm:$0xff]  ;;  %v10992_v27 = vld [vmem:[#allocation55_spill] sm:$0xff]  ;;  %v10994_v1 = vld [vmem:[#allocation84_spill] sm:$0xff] }
 0x3ca   :  { %v2730_v41 = vpop.f32.mrf.mxu2  ;;  %v2795_v2 = vpop.f32.mrf.mxu3  ;;  %v8038_v57 = vadd.f32 %v2666_v44, %v2455_v21  ;;  %v767_v21 = vadd.f32 %v10985_v32, %v702_v43  ;;  %v1899_v47 = vadd.f32 %v10991_v59, %v10990_v30  ;;  %v10995_v32 = vld [vmem:[#allocation56_spill] sm:$0xff] }
 0x3cb   :  { %v2603_v0 = vpop.f32.mrf.mxu0  ;;  %v2668_v42 = vpop.f32.mrf.mxu1  ;;  %v2796_v38 = vadd.f32 %v2795_v2, %v2730_v41  ;;  %v2459_v29 = vadd.f32 %v2284_v56, %v2071_v11  ;;  %v10988_v2 = vld [vmem:[#allocation26_spill] sm:$0xff] }
 0x3cc   :  { %v2669_v39 = vadd.f32 %v2668_v42, %v2603_v0  ;;  %v510_v52 = vadd.f32 %v10989_v28, %v10988_v2  ;;  %v1297_v31 = vadd.f32 %v1123_v13, %v767_v21 }
 0x3cd   :  { %v8053_v8 = vadd.f32 %v2796_v38, %v7829_v51  ;;  %v2287_v51 = vadd.f32 %v7848_v4, %v7846_v54  ;;  %v10993_v38 = vld [vmem:[#allocation83_spill] sm:$0xff]  ;;  %v10998_v4 = vld [vmem:[#allocation28_spill] sm:$0xff] }
 0x3ce   :  { %v8040_v60 = vadd.f32 %v2669_v39, %v2457_v19  ;;  %v10986_v19 = vld [vmem:[#allocation113_spill] sm:$0xff]  ;;  %v705_v56 = vadd.f32 %v10992_v27, %v510_v52  ;;  %v1126_v11 = vadd.f32 %v10994_v1, %v10993_v38  ;;  %v11000_v52 = vld [vmem:[#allocation143_spill] sm:$0xff]  ;;  %v11004_v1 = vld [vmem:[#allocation86_spill] sm:$0xff] }
 0x3cf   :  { %v1511_v39 = vadd.f32 %v10987_v16, %v10986_v19  ;;  %v10996_v19 = vld [vmem:[#allocation115_spill] sm:$0xff]  ;;  %v10997_v16 = vld [vmem:[#allocation116_spill] sm:$0xff]  ;;  %v11002_v27 = vld [vmem:[#allocation57_spill] sm:$0xff] }
 0x3d0   :  { %v2875_v7 = vadd.f32 %v8040_v60, %v8038_v57  ;;  %v770_v21 = vadd.f32 %v10995_v32, %v705_v56  ;;  %v11003_v38 = vld [vmem:[#allocation85_spill] sm:$0xff]  ;;  %v11005_v32 = vld [vmem:[#allocation58_spill] sm:$0xff] }
 0x3d1   :  { %v1685_v62 = vadd.f32 %v1511_v39, %v1297_v31  ;;  %v11001_v31 = vld [vmem:[#allocation144_spill] sm:$0xff] }
 0x3d2   :  { %v2733_v26 = vpop.f32.mrf.mxu2  ;;  %v2798_v0 = vpop.f32.mrf.mxu3  ;;  %v1299_v28 = vadd.f32 %v1126_v11, %v770_v21  ;;  %v1902_v30 = vadd.f32 %v11001_v31, %v11000_v52 }
 0x3d3   :  { %v2799_v44 = vadd.f32 %v2798_v0, %v2733_v26  ;;  %v2606_v42 = vpop.f32.mrf.mxu0  ;;  %v2671_v25 = vpop.f32.mrf.mxu1  ;;  %v2073_v13 = vadd.f32 %v1899_v47, %v1685_v62 }
 0x3d4   :  { %v2672_v12 = vadd.f32 %v2671_v25, %v2606_v42 }
 0x3d5   :  { %v8056_v41 = vadd.f32 %v2799_v44, %v7840_v35  ;;  %v2461_v39 = vadd.f32 %v2287_v51, %v2073_v13  ;;  %v2290_v51 = vadd.f32 %v7859_v20, %v7857_v49  ;;  %v1129_v13 = vadd.f32 %v11004_v1, %v11003_v38  ;;  %v11008_v20 = vld [vmem:[#allocation30_spill] sm:$0xff]  ;;  %v11014_v38 = vld [vmem:[#allocation88_spill] sm:$0xff] }
 0x3d6   :  { %v8062_v6 = vadd.f32 %v2672_v12, %v2459_v29  ;;  %v1514_v29 = vadd.f32 %v10997_v16, %v10996_v19  ;;  %v11007_v19 = vld [vmem:[#allocation118_spill] sm:$0xff] }
 0x3d7   :  { %v2896_v43 = vadd.f32 %v8056_v41, %v8053_v8 }
 0x3d8   :  { %v2876_v35 = vadd.f32 %v2875_v7, %v8062_v6  ;;  %v10999_v7 = vld [vmem:[#allocation29_spill] sm:$0xff]  ;;  %v1687_v62 = vadd.f32 %v1514_v29, %v1299_v28 }
 0x3d9   :  { %v513_v2 = vadd.f32 %v10999_v7, %v10998_v4  ;;  %v11010_v7 = vld [vmem:[#allocation145_spill] sm:$0xff] }
 0x3da   :  { %v2736_v26 = vpop.f32.mrf.mxu2  ;;  %v2801_v0 = vpop.f32.mrf.mxu3 }
 0x3db   :  { %v2802_v44 = vadd.f32 %v2801_v0, %v2736_v26  ;;  %v2609_v42 = vpop.f32.mrf.mxu0  ;;  %v2674_v25 = vpop.f32.mrf.mxu1  ;;  %v708_v56 = vadd.f32 %v11002_v27, %v513_v2  ;;  %v2075_v26 = vadd.f32 %v1902_v30, %v1687_v62  ;;  %v11011_v2 = vld [vmem:[#allocation146_spill] sm:$0xff]  ;;  %v11012_v30 = vld [vmem:[#allocation59_spill] sm:$0xff]  ;;  %v2293_v62 = vadd.f32 %v7870_v48, %v7868_v45  ;;  %v11018_v48 = vld [vmem:[#allocation32_spill] sm:$0xff] }
 0x3dc   :  { %v2675_v12 = vadd.f32 %v2674_v25, %v2609_v42  ;;  %v1905_v28 = vadd.f32 %v11011_v2, %v11010_v7  ;;  %v11022_v2 = vld [vmem:[#allocation61_spill] sm:$0xff] }
 0x3dd   :  { %v8076_v54 = vadd.f32 %v2802_v44, %v7851_v46  ;;  %v773_v21 = vadd.f32 %v11005_v32, %v708_v56  ;;  %v2463_v29 = vadd.f32 %v2290_v51, %v2075_v26  ;;  %v11013_v51 = vld [vmem:[#allocation87_spill] sm:$0xff] }
 0x3de   :  { %v8082_v59 = vadd.f32 %v2675_v12, %v2461_v39  ;;  %v1132_v1 = vadd.f32 %v11014_v38, %v11013_v51 }
 0x3df   :  { %v2897_v47 = vadd.f32 %v2896_v43, %v8076_v54  ;;  %v11006_v43 = vld [vmem:[#allocation117_spill] sm:$0xff]  ;;  %v1301_v4 = vadd.f32 %v1129_v13, %v773_v21  ;;  %v11017_v21 = vld [vmem:[#allocation120_spill] sm:$0xff] }
 0x3e0   :  { %v2877_v46 = vadd.f32 %v2876_v35, %v8082_v59  ;;  %v1517_v16 = vadd.f32 %v11007_v19, %v11006_v43  ;;  %v11009_v35 = vld [vmem:[#allocation31_spill] sm:$0xff] }
 0x3e1   :  { %v516_v12 = vadd.f32 %v11009_v35, %v11008_v20  ;;  %v11020_v20 = vld [vmem:[#allocation147_spill] sm:$0xff]  ;;  %v11021_v35 = vld [vmem:[#allocation148_spill] sm:$0xff] }
 0x3e2   :  { %v2739_v11 = vpop.f32.mrf.mxu2  ;;  %v2804_v0 = vpop.f32.mrf.mxu3  ;;  %v1689_v56 = vadd.f32 %v1517_v16, %v1301_v4 }
 0x3e3   :  { %v2805_v44 = vadd.f32 %v2804_v0, %v2739_v11  ;;  %v2612_v42 = vpop.f32.mrf.mxu0  ;;  %v2677_v25 = vpop.f32.mrf.mxu1  ;;  %v711_v27 = vadd.f32 %v11012_v30, %v516_v12  ;;  %v1908_v12 = vadd.f32 %v11021_v35, %v11020_v20  ;;  %v11032_v20 = vld [vmem:[#allocation63_spill] sm:$0xff] }
 0x3e4   :  { %v2678_v39 = vadd.f32 %v2677_v25, %v2612_v42  ;;  %v2077_v26 = vadd.f32 %v1905_v28, %v1689_v56  ;;  %v11015_v25 = vld [vmem:[#allocation60_spill] sm:$0xff]  ;;  %v11023_v56 = vld [vmem:[#allocation89_spill] sm:$0xff] }
 0x3e5   :  { %v8095_v49 = vadd.f32 %v2805_v44, %v7862_v15  ;;  %v776_v32 = vadd.f32 %v11015_v25, %v711_v27  ;;  %v2296_v27 = vadd.f32 %v7881_v63, %v7879_v18  ;;  %v11027_v25 = vld [vmem:[#allocation122_spill] sm:$0xff] }
 0x3e6   :  { %v8101_v52 = vadd.f32 %v2678_v39, %v2463_v29  ;;  %v2465_v19 = vadd.f32 %v2293_v62, %v2077_v26  ;;  %v11024_v62 = vld [vmem:[#allocation90_spill] sm:$0xff] }
 0x3e7   :  { %v2898_v31 = vadd.f32 %v2897_v47, %v8095_v49  ;;  %v11016_v47 = vld [vmem:[#allocation119_spill] sm:$0xff]  ;;  %v1303_v39 = vadd.f32 %v1132_v1, %v776_v32  ;;  %v1135_v51 = vadd.f32 %v11024_v62, %v11023_v56  ;;  %v11028_v63 = vld [vmem:[#allocation34_spill] sm:$0xff] }
 0x3e8   :  { %v2878_v15 = vadd.f32 %v2877_v46, %v8101_v52  ;;  %v1520_v43 = vadd.f32 %v11017_v21, %v11016_v47  ;;  %v11019_v46 = vld [vmem:[#allocation33_spill] sm:$0xff] }
 0x3e9   :  { %v519_v29 = vadd.f32 %v11019_v46, %v11018_v48  ;;  %v11031_v48 = vld [vmem:[#allocation150_spill] sm:$0xff] }
 0x3ea   :  { %v2742_v13 = vpop.f32.mrf.mxu2  ;;  %v2807_v11 = vpop.f32.mrf.mxu3  ;;  %v1691_v30 = vadd.f32 %v1520_v43, %v1303_v39 }
 0x3eb   :  { %v2808_v0 = vadd.f32 %v2807_v11, %v2742_v13  ;;  %v2615_v44 = vpop.f32.mrf.mxu0  ;;  %v2680_v42 = vpop.f32.mrf.mxu1  ;;  %v714_v28 = vadd.f32 %v11022_v2, %v519_v29  ;;  %v2299_v2 = vadd.f32 %v7892_v61, %v7890_v14  ;;  %v11038_v61 = vld [vmem:[#allocation36_spill] sm:$0xff] }
 0x3ec   :  { %v2681_v16 = vadd.f32 %v2680_v42, %v2615_v44  ;;  %v2079_v38 = vadd.f32 %v1908_v12, %v1691_v30  ;;  %v11025_v44 = vld [vmem:[#allocation62_spill] sm:$0xff]  ;;  %v11034_v30 = vld [vmem:[#allocation92_spill] sm:$0xff] }
 0x3ed   :  { %v8114_v45 = vadd.f32 %v2808_v0, %v7873_v9  ;;  %v779_v42 = vadd.f32 %v11025_v44, %v714_v28  ;;  %v11033_v28 = vld [vmem:[#allocation91_spill] sm:$0xff] }
 0x3ee   :  { %v8120_v4 = vadd.f32 %v2681_v16, %v2465_v19  ;;  %v2467_v47 = vadd.f32 %v2296_v27, %v2079_v38  ;;  %v11030_v16 = vld [vmem:[#allocation149_spill] sm:$0xff]  ;;  %v1138_v27 = vadd.f32 %v11034_v30, %v11033_v28 }
 0x3ef   :  { %v2899_v7 = vadd.f32 %v2898_v31, %v8114_v45  ;;  %v11026_v31 = vld [vmem:[#allocation121_spill] sm:$0xff]  ;;  %v1305_v19 = vadd.f32 %v1135_v51, %v779_v42  ;;  %v1911_v46 = vadd.f32 %v11031_v48, %v11030_v16 }
 0x3f0   :  { %v2879_v9 = vadd.f32 %v2878_v15, %v8120_v4  ;;  %v1523_v32 = vadd.f32 %v11027_v25, %v11026_v31  ;;  %v11029_v15 = vld [vmem:[#allocation35_spill] sm:$0xff] }
 0x3f1   :  { %v522_v43 = vadd.f32 %v11029_v15, %v11028_v63 }
 0x3f2   :  { %v2745_v1 = vpop.f32.mrf.mxu2  ;;  %v2810_v26 = vpop.f32.mrf.mxu3  ;;  %v1693_v12 = vadd.f32 %v1523_v32, %v1305_v19  ;;  %v11042_v19 = vld [vmem:[#allocation65_spill] sm:$0xff] }
 0x3f3   :  { %v2811_v13 = vadd.f32 %v2810_v26, %v2745_v1  ;;  %v2618_v11 = vpop.f32.mrf.mxu0  ;;  %v2683_v0 = vpop.f32.mrf.mxu1  ;;  %v717_v35 = vadd.f32 %v11032_v20, %v522_v43  ;;  %v11043_v20 = vld [vmem:[#allocation93_spill] sm:$0xff] }
 0x3f4   :  { %v2684_v21 = vadd.f32 %v2683_v0, %v2618_v11  ;;  %v2081_v56 = vadd.f32 %v1911_v46, %v1693_v12  ;;  %v11037_v0 = vld [vmem:[#allocation124_spill] sm:$0xff]  ;;  %v2302_v46 = vadd.f32 %v7903_v33, %v7901_v40  ;;  %v11049_v40 = vld [vmem:[#allocation39_spill] sm:$0xff] }
 0x3f5   :  { %v8133_v18 = vadd.f32 %v2811_v13, %v7884_v5  ;;  %v11035_v13 = vld [vmem:[#allocation64_spill] sm:$0xff] }
 0x3f6   :  { %v8139_v29 = vadd.f32 %v2684_v21, %v2467_v47  ;;  %v782_v11 = vadd.f32 %v11035_v13, %v717_v35  ;;  %v2469_v42 = vadd.f32 %v2299_v2, %v2081_v56  ;;  %v11040_v47 = vld [vmem:[#allocation151_spill] sm:$0xff]  ;;  %v11041_v21 = vld [vmem:[#allocation152_spill] sm:$0xff]  ;;  %v11044_v35 = vld [vmem:[#allocation94_spill] sm:$0xff] }
 0x3f7   :  { %v2900_v39 = vadd.f32 %v2899_v7, %v8133_v18  ;;  %v11036_v7 = vld [vmem:[#allocation123_spill] sm:$0xff]  ;;  %v1914_v63 = vadd.f32 %v11041_v21, %v11040_v47  ;;  %v1141_v12 = vadd.f32 %v11044_v35, %v11043_v20  ;;  %v11054_v35 = vld [vmem:[#allocation154_spill] sm:$0xff] }
 0x3f8   :  { %v2880_v5 = vadd.f32 %v2879_v9, %v8139_v29  ;;  %v1526_v44 = vadd.f32 %v11037_v0, %v11036_v7  ;;  %v11039_v9 = vld [vmem:[#allocation37_spill] sm:$0xff]  ;;  %v1307_v32 = vadd.f32 %v1138_v27, %v782_v11  ;;  %v11048_v7 = vld [vmem:[#allocation38_spill] sm:$0xff]  ;;  %v3359_v47 = vld [vmem:[#allocation5 + $0x2f8] sm:$0xff] }
 0x3f9   :  { %v525_v25 = vadd.f32 %v11039_v9, %v11038_v61  ;;  %v528_v33 = vadd.f32 %v11049_v40, %v11048_v7  ;;  %v11051_v61 = vld [vmem:[#allocation67_spill] sm:$0xff]  ;;  %3522 = vmatpush.msrb.mxu2 %v3359_v47  ;;  %v2308_v47 = vadd.f32 %v7932_v22, %v7930_v58  ;;  %v11065_v58 = vld [vmem:[#allocation70_spill] sm:$0xff] }
 0x3fa   :  { %v2748_v62 = vpop.f32.mrf.mxu2  ;;  %v2813_v51 = vpop.f32.mrf.mxu3  ;;  %v1695_v48 = vadd.f32 %v1526_v44, %v1307_v32  ;;  %v11050_v44 = vld [vmem:[#allocation153_spill] sm:$0xff]  ;;  %v3391_v21 = vld [vmem:[#allocation5 + $0x3f8] sm:$0xff] }
 0x3fb   :  { %v2814_v38 = vadd.f32 %v2813_v51, %v2748_v62  ;;  %v2621_v1 = vpop.f32.mrf.mxu0  ;;  %v2686_v26 = vpop.f32.mrf.mxu1  ;;  %v720_v16 = vadd.f32 %v11042_v19, %v525_v25  ;;  %v11045_v51 = vld [vmem:[#allocation66_spill] sm:$0xff]  ;;  %v723_v9 = vadd.f32 %v11051_v61, %v528_v33  ;;  %v2432_v25 = vadd.f32 %v7914_v17, %v7912_v10  ;;  %3587 = vmatpush.msrb.mxu3 %v3391_v21  ;;  %v11061_v33 = vld [vmem:[#allocation69_spill] sm:$0xff] }
 0x3fc   :  { %v2687_v31 = vadd.f32 %v2686_v26, %v2621_v1  ;;  %v2083_v2 = vadd.f32 %v1914_v63, %v1695_v48  ;;  %v11047_v1 = vld [vmem:[#allocation126_spill] sm:$0xff]  ;;  %v11052_v48 = vld [vmem:[#allocation95_spill] sm:$0xff] }
 0x3fd   :  { %v8152_v14 = vadd.f32 %v2814_v38, %v7895_v37  ;;  %v785_v38 = vadd.f32 %v11045_v51, %v720_v16  ;;  %v3390_v16 = vld [vmem:[#allocation5 + $0x3f0] sm:$0xff]  ;;  %v3357_v61 = vld [vmem:[#allocation5 + $0x2e8] sm:$0xff] }
 0x3fe   :  { %v8158_v15 = vadd.f32 %v2687_v31, %v2469_v42  ;;  %v2471_v13 = vadd.f32 %v2302_v46, %v2083_v2  ;;  %v1917_v42 = vadd.f32 %v11050_v44, %v7726_v3  ;;  %v3358_v3 = vld [vmem:[#allocation5 + $0x2f0] sm:$0xff]  ;;  %3457 = vmatpush.msrb.mxu1 %v3390_v16  ;;  %v11053_v46 = vld [vmem:[#allocation96_spill] sm:$0xff]  ;;  %v2435_v44 = vadd.f32 %v7928_v55, %v7926_v24 }
 0x3ff   :  { %v2901_v43 = vadd.f32 %v2900_v39, %v8152_v14  ;;  %v11046_v39 = vld [vmem:[#allocation125_spill] sm:$0xff]  ;;  %v1309_v0 = vadd.f32 %v1141_v12, %v785_v38  ;;  %3392 = vmatpush.msrb.mxu0 %v3358_v3  ;;  %v1144_v20 = vadd.f32 %v11053_v46, %v11052_v48  ;;  %v2472_v12 = vadd.f32 %v2432_v25, %v11054_v35  ;;  %v11058_v38 = vld [vmem:[#allocation40_spill] sm:$0xff]  ;;  %v11063_v3 = vld [vmem:[#allocation98_spill] sm:$0xff] }
 0x400   :  { %v2881_v37 = vadd.f32 %v2880_v5, %v8158_v15  ;;  %v1529_v26 = vadd.f32 %v11047_v1, %v11046_v39  ;;  %v11059_v39 = vld [vmem:[#allocation41_spill] sm:$0xff]  ;;  %3523 = vmatpush.msrb.mxu2 %v3357_v61  ;;  %v11064_v48 = vld [vmem:[#allocation156_spill] sm:$0xff]  ;;  %v11075_v61 = vld [vmem:[#allocation175_spill] sm:$0xff] }
 0x401   :  { %v531_v1 = vadd.f32 %v11059_v39, %v11058_v38  ;;  %v2474_v46 = vadd.f32 %v2435_v44, %v11064_v48  ;;  %v11072_v39 = vld [vmem:[#allocation172_spill] sm:$0xff]  ;;  %v11074_v44 = vld [vmem:[#allocation174_spill] sm:$0xff] }
 0x402   :  { %v2751_v28 = vpop.f32.mrf.mxu2  ;;  %v2816_v30 = vpop.f32.mrf.mxu3  ;;  %v1697_v63 = vadd.f32 %v1529_v26, %v1309_v0 }
 0x403   :  { %v2817_v27 = vadd.f32 %v2816_v30, %v2751_v28  ;;  %v2624_v56 = vpop.f32.mrf.mxu0  ;;  %v2689_v62 = vpop.f32.mrf.mxu1  ;;  %v726_v0 = vadd.f32 %v11061_v33, %v531_v1  ;;  %v11073_v1 = vld [vmem:[#allocation173_spill] sm:$0xff]  ;;  %v3387_v33 = vld [vmem:[#allocation5 + $0x3d8] sm:$0xff] }
 0x404   :  { %v2690_v11 = vadd.f32 %v2689_v62, %v2624_v56  ;;  %v2085_v10 = vadd.f32 %v1917_v42, %v1697_v63  ;;  %v3388_v63 = vld [vmem:[#allocation5 + $0x3e0] sm:$0xff] }
 0x405   :  { %v8173_v5 = vadd.f32 %v2817_v27, %v7906_v34  ;;  %v2305_v34 = vadd.f32 %v7918_v50, %v7916_v36  ;;  %v11055_v36 = vld [vmem:[#allocation68_spill] sm:$0xff]  ;;  %3458 = vmatpush.msrb.mxu1 %v3388_v63  ;;  %v791_v22 = vadd.f32 %v11065_v58, %v726_v0 }
 0x406   :  { %v8177_v31 = vadd.f32 %v2690_v11, %v2471_v13  ;;  %v788_v50 = vadd.f32 %v11055_v36, %v723_v9  ;;  %v11057_v27 = vld [vmem:[#allocation128_spill] sm:$0xff]  ;;  %v11060_v11 = vld [vmem:[#allocation155_spill] sm:$0xff]  ;;  %v3389_v9 = vld [vmem:[#allocation5 + $0x3e8] sm:$0xff] }
 0x407   :  { %v2902_v32 = vadd.f32 %v2901_v43, %v8173_v5  ;;  %v2473_v62 = vadd.f32 %v2305_v34, %v2085_v10  ;;  %v1920_v7 = vadd.f32 %v11060_v11, %v7737_v23  ;;  %3588 = vmatpush.msrb.mxu3 %v3389_v9  ;;  %v3356_v23 = vld [vmem:[#allocation5 + $0x2e0] sm:$0xff]  ;;  %v2311_v9 = vadd.f32 %v11075_v61, %v11074_v44  ;;  %v11089_v44 = vld [vmem:[#allocation178_spill] sm:$0xff]  ;;  %v11090_v61 = vld [vmem:[#allocation179_spill] sm:$0xff] }
 0x408   :  { %v2882_v19 = vadd.f32 %v2881_v37, %v8177_v31  ;;  %v11056_v37 = vld [vmem:[#allocation127_spill] sm:$0xff]  ;;  %v1311_v13 = vadd.f32 %v1144_v20, %v788_v50  ;;  %3393 = vmatpush.msrb.mxu0 %v3356_v23  ;;  %v11062_v34 = vld [vmem:[#allocation97_spill] sm:$0xff]  ;;  %v11077_v63 = vld [vmem:[#allocation100_spill] sm:$0xff] }
 0x409   :  { %v1532_v56 = vadd.f32 %v11057_v27, %v11056_v37  ;;  %v1147_v16 = vadd.f32 %v11063_v3, %v11062_v34  ;;  %v11070_v27 = vld [vmem:[#allocation157_spill] sm:$0xff]  ;;  %3589 = vmatpush.msrb.mxu3 %v3387_v33  ;;  %v11076_v23 = vld [vmem:[#allocation99_spill] sm:$0xff] }
 0x40a   :  { %v2754_v17 = vpop.f32.mrf.mxu2  ;;  %v2819_v43 = vpop.f32.mrf.mxu3  ;;  %v1150_v34 = vadd.f32 %v11077_v63, %v11076_v23  ;;  %v3385_v33 = vld [vmem:[#allocation5 + $0x3c8] sm:$0xff] }
 0x40b   :  { %v2820_v2 = vadd.f32 %v2819_v43, %v2754_v17  ;;  %v2627_v28 = vpop.f32.mrf.mxu0  ;;  %v2692_v30 = vpop.f32.mrf.mxu1  ;;  %v1699_v25 = vadd.f32 %v1532_v56, %v1311_v13  ;;  %v11067_v43 = vld [vmem:[#allocation130_spill] sm:$0xff]  ;;  %v1313_v37 = vadd.f32 %v1147_v16, %v791_v22  ;;  %v1923_v56 = vadd.f32 %v11070_v27, %v7758_v53  ;;  %3590 = vmatpush.msrb.mxu3 %v3385_v33 }
 0x40c   :  { %v2693_v51 = vadd.f32 %v2692_v30, %v2627_v28  ;;  %v11068_v28 = vld [vmem:[#allocation42_spill] sm:$0xff]  ;;  %v11069_v30 = vld [vmem:[#allocation43_spill] sm:$0xff]  ;;  %v2438_v13 = vadd.f32 %v11073_v1, %v11072_v39  ;;  %v11087_v39 = vld [vmem:[#allocation176_spill] sm:$0xff] }
 0x40d   :  { %v8194_v26 = vadd.f32 %v2820_v2, %v2472_v12  ;;  %v2087_v24 = vadd.f32 %v1920_v7, %v1699_v25  ;;  %v534_v36 = vadd.f32 %v11069_v30, %v11068_v28  ;;  %v3355_v7 = vld [vmem:[#allocation5 + $0x2d8] sm:$0xff]  ;;  %v3354_v53 = vld [vmem:[#allocation5 + $0x2d0] sm:$0xff] }
 0x40e   :  { %v8198_v40 = vadd.f32 %v2693_v51, %v2473_v62  ;;  %v11071_v51 = vld [vmem:[#allocation71_spill] sm:$0xff]  ;;  %3524 = vmatpush.msrb.mxu2 %v3355_v7  ;;  %3394 = vmatpush.msrb.mxu0 %v3354_v53  ;;  %v3353_v7 = vld [vmem:[#allocation5 + $0x2c8] sm:$0xff] }
 0x40f   :  { %v2903_v42 = vadd.f32 %v2902_v32, %v8194_v26  ;;  %v2475_v12 = vadd.f32 %v2308_v47, %v2087_v24  ;;  %v729_v38 = vadd.f32 %v11071_v51, %v534_v36  ;;  %v3386_v47 = vld [vmem:[#allocation5 + $0x3d0] sm:$0xff]  ;;  %v11085_v36 = vld [vmem:[#allocation160_spill] sm:$0xff] }
 0x410   :  { %v2883_v21 = vadd.f32 %v2882_v19, %v8198_v40  ;;  %v11066_v19 = vld [vmem:[#allocation129_spill] sm:$0xff]  ;;  %3459 = vmatpush.msrb.mxu1 %v3386_v47  ;;  %v11078_v24 = vld [vmem:[#allocation158_spill] sm:$0xff]  ;;  %v11084_v30 = vld [vmem:[#allocation159_spill] sm:$0xff]  ;;  %3525 = vmatpush.msrb.mxu2 %v3353_v7 }
 0x411   :  { %v1535_v35 = vadd.f32 %v11067_v43, %v11066_v19  ;;  %v11082_v43 = vld [vmem:[#allocation44_spill] sm:$0xff]  ;;  %v11091_v47 = vld [vmem:[#allocation101_spill] sm:$0xff]  ;;  %v11092_v23 = vld [vmem:[#allocation102_spill] sm:$0xff] }
 0x412   :  { %v2757_v55 = vpop.f32.mrf.mxu2  ;;  %v2822_v32 = vpop.f32.mrf.mxu3  ;;  %v1153_v63 = vadd.f32 %v11092_v23, %v11091_v47  ;;  %v11104_v33 = vld [vmem:[#allocation182_spill] sm:$0xff]  ;;  %v11107_v47 = vld [vmem:[#allocation104_spill] sm:$0xff] }
 0x413   :  { %v2823_v20 = vadd.f32 %v2822_v32, %v2757_v55  ;;  %v2630_v10 = vpop.f32.mrf.mxu0  ;;  %v2695_v17 = vpop.f32.mrf.mxu1  ;;  %v1701_v0 = vadd.f32 %v1535_v35, %v1313_v37  ;;  %v2476_v55 = vadd.f32 %v2438_v13, %v11078_v24  ;;  %v11083_v35 = vld [vmem:[#allocation45_spill] sm:$0xff]  ;;  %v1926_v37 = vadd.f32 %v11085_v36, %v11084_v30 }
 0x414   :  { %v2696_v2 = vadd.f32 %v2695_v17, %v2630_v10  ;;  %v11081_v17 = vld [vmem:[#allocation132_spill] sm:$0xff] }
 0x415   :  { %v8215_v50 = vadd.f32 %v2823_v20, %v2474_v46  ;;  %v2089_v3 = vadd.f32 %v1923_v56, %v1701_v0  ;;  %v11079_v20 = vld [vmem:[#allocation72_spill] sm:$0xff]  ;;  %v11086_v56 = vld [vmem:[#allocation73_spill] sm:$0xff] }
 0x416   :  { %v8219_v62 = vadd.f32 %v2696_v2, %v2475_v12  ;;  %v794_v10 = vadd.f32 %v11079_v20, %v729_v38  ;;  %v537_v12 = vadd.f32 %v11083_v35, %v11082_v43  ;;  %v11088_v38 = vld [vmem:[#allocation177_spill] sm:$0xff] }
 0x417   :  { %v2904_v11 = vadd.f32 %v2903_v42, %v8215_v50  ;;  %v2477_v22 = vadd.f32 %v2311_v9, %v2089_v3  ;;  %v2441_v1 = vadd.f32 %v11088_v38, %v11087_v39  ;;  %v2314_v9 = vadd.f32 %v11090_v61, %v11089_v44  ;;  %v11095_v20 = vld [vmem:[#allocation133_spill] sm:$0xff]  ;;  %v11103_v38 = vld [vmem:[#allocation75_spill] sm:$0xff] }
 0x418   :  { %v2884_v25 = vadd.f32 %v2883_v21, %v8219_v62  ;;  %v11080_v21 = vld [vmem:[#allocation131_spill] sm:$0xff]  ;;  %v1315_v28 = vadd.f32 %v1150_v34, %v794_v10  ;;  %v732_v51 = vadd.f32 %v11086_v56, %v537_v12  ;;  %v11096_v10 = vld [vmem:[#allocation134_spill] sm:$0xff]  ;;  %v11102_v56 = vld [vmem:[#allocation181_spill] sm:$0xff] }
 0x419   :  { %v1538_v58 = vadd.f32 %v11081_v17, %v11080_v21  ;;  %v1541_v21 = vadd.f32 %v11096_v10, %v11095_v20  ;;  %v11099_v12 = vld [vmem:[#allocation162_spill] sm:$0xff] }
 0x41a   :  { %v2760_v16 = vpop.f32.mrf.mxu2  ;;  %v2825_v42 = vpop.f32.mrf.mxu3 }
 0x41b   :  { %v2826_v32 = vadd.f32 %v2825_v42, %v2760_v16  ;;  %v2633_v48 = vpop.f32.mrf.mxu0  ;;  %v2698_v46 = vpop.f32.mrf.mxu1  ;;  %v1703_v0 = vadd.f32 %v1538_v58, %v1315_v28  ;;  %v11093_v42 = vld [vmem:[#allocation161_spill] sm:$0xff]  ;;  %v11100_v28 = vld [vmem:[#allocation163_spill] sm:$0xff] }
 0x41c   :  { %v2699_v19 = vadd.f32 %v2698_v46, %v2633_v48  ;;  %v2478_v24 = vadd.f32 %v2441_v1, %v11093_v42  ;;  %v11094_v48 = vld [vmem:[#allocation74_spill] sm:$0xff]  ;;  %v1929_v30 = vadd.f32 %v11100_v28, %v11099_v12 }
 0x41d   :  { %v8236_v2 = vadd.f32 %v2826_v32, %v2476_v55  ;;  %v2091_v34 = vadd.f32 %v1926_v37, %v1703_v0  ;;  %v797_v46 = vadd.f32 %v11094_v48, %v732_v51  ;;  %v11101_v37 = vld [vmem:[#allocation180_spill] sm:$0xff]  ;;  %v11105_v0 = vld [vmem:[#allocation183_spill] sm:$0xff] }
 0x41e   :  { %v8240_v27 = vadd.f32 %v2699_v19, %v2477_v22  ;;  %v11097_v22 = vld [vmem:[#allocation46_spill] sm:$0xff]  ;;  %v11098_v19 = vld [vmem:[#allocation47_spill] sm:$0xff]  ;;  %v2444_v39 = vadd.f32 %v11102_v56, %v11101_v37  ;;  %v2317_v44 = vadd.f32 %v11105_v0, %v11104_v33  ;;  %v11117_v37 = vld [vmem:[#allocation185_spill] sm:$0xff] }
 0x41f   :  { %v2905_v13 = vadd.f32 %v2904_v11, %v8236_v2  ;;  %v2479_v17 = vadd.f32 %v2314_v9, %v2091_v34  ;;  %v540_v43 = vadd.f32 %v11098_v19, %v11097_v22  ;;  %v1317_v35 = vadd.f32 %v1153_v63, %v797_v46  ;;  %v11106_v9 = vld [vmem:[#allocation103_spill] sm:$0xff]  ;;  %v11111_v46 = vld [vmem:[#allocation136_spill] sm:$0xff]  ;;  %v11119_v33 = vld [vmem:[#allocation186_spill] sm:$0xff] }
 0x420   :  { %v2885_v53 = vadd.f32 %v2884_v25, %v8240_v27  ;;  %v1156_v23 = vadd.f32 %v11107_v47, %v11106_v9  ;;  %v11110_v48 = vld [vmem:[#allocation135_spill] sm:$0xff]  ;;  %v11121_v47 = vld [vmem:[#allocation105_spill] sm:$0xff] }
 0x421   :  { %v735_v1 = vadd.f32 %v11103_v38, %v540_v43  ;;  %v1705_v7 = vadd.f32 %v1541_v21, %v1317_v35  ;;  %v1544_v20 = vadd.f32 %v11111_v46, %v11110_v48  ;;  %v11114_v43 = vld [vmem:[#allocation165_spill] sm:$0xff]  ;;  %v11115_v35 = vld [vmem:[#allocation166_spill] sm:$0xff]  ;;  %v11120_v0 = vld [vmem:[#allocation187_spill] sm:$0xff] }
 0x422   :  { %v2763_v3 = vpop.f32.mrf.mxu2  ;;  %v2828_v16 = vpop.f32.mrf.mxu3  ;;  %v1932_v12 = vadd.f32 %v11115_v35, %v11114_v43  ;;  %v11118_v38 = vld [vmem:[#allocation77_spill] sm:$0xff] }
 0x423   :  { %v2829_v55 = vadd.f32 %v2828_v16, %v2763_v3  ;;  %v2636_v11 = vpop.f32.mrf.mxu0  ;;  %v2701_v32 = vpop.f32.mrf.mxu1  ;;  %v2093_v63 = vadd.f32 %v1929_v30, %v1705_v7  ;;  %v11108_v16 = vld [vmem:[#allocation164_spill] sm:$0xff]  ;;  %v11125_v46 = vld [vmem:[#allocation137_spill] sm:$0xff] }
 0x424   :  { %v2702_v25 = vadd.f32 %v2701_v32, %v2636_v11  ;;  %v2480_v42 = vadd.f32 %v2444_v39, %v11108_v16  ;;  %v11116_v30 = vld [vmem:[#allocation184_spill] sm:$0xff] }
 0x425   :  { %v8255_v58 = vadd.f32 %v2829_v55, %v2478_v24  ;;  %v2481_v10 = vadd.f32 %v2317_v44, %v2093_v63  ;;  %v2447_v56 = vadd.f32 %v11117_v37, %v11116_v30  ;;  %v2320_v44 = vadd.f32 %v11120_v0, %v11119_v33  ;;  %v11130_v30 = vld [vmem:[#allocation189_spill] sm:$0xff]  ;;  %v11132_v33 = vld [vmem:[#allocation191_spill] sm:$0xff] }
 0x426   :  { %v8261_v36 = vadd.f32 %v2702_v25, %v2479_v17  ;;  %v11113_v25 = vld [vmem:[#allocation49_spill] sm:$0xff] }
 0x427   :  { %v2906_v51 = vadd.f32 %v2905_v13, %v8255_v58  ;;  %v11109_v13 = vld [vmem:[#allocation76_spill] sm:$0xff] }
 0x428   :  { %v2886_v61 = vadd.f32 %v2885_v53, %v8261_v36  ;;  %v800_v32 = vadd.f32 %v11109_v13, %v735_v1  ;;  %v11112_v53 = vld [vmem:[#allocation48_spill] sm:$0xff] }
 0x429   :  { %v543_v22 = vadd.f32 %v11113_v25, %v11112_v53 }
 0x42a   :  { %v2766_v34 = vpop.f32.mrf.mxu2  ;;  %v2831_v3 = vpop.f32.mrf.mxu3  ;;  %v1319_v19 = vadd.f32 %v1156_v23, %v800_v32  ;;  %v11122_v23 = vld [vmem:[#allocation106_spill] sm:$0xff] }
 0x42b   :  { %v2832_v24 = vadd.f32 %v2831_v3, %v2766_v34  ;;  %v2639_v55 = vpop.f32.mrf.mxu0  ;;  %v2704_v11 = vpop.f32.mrf.mxu1  ;;  %v738_v1 = vadd.f32 %v11118_v38, %v543_v22  ;;  %v1159_v63 = vadd.f32 %v11122_v23, %v11121_v47  ;;  %v11124_v32 = vld [vmem:[#allocation78_spill] sm:$0xff]  ;;  %v11127_v22 = vld [vmem:[#allocation168_spill] sm:$0xff] }
 0x42c   :  { %v2705_v21 = vadd.f32 %v2704_v11, %v2639_v55  ;;  %v1707_v7 = vadd.f32 %v1544_v20, %v1319_v19  ;;  %v11126_v20 = vld [vmem:[#allocation138_spill] sm:$0xff]  ;;  %v11128_v19 = vld [vmem:[#allocation169_spill] sm:$0xff] }
 0x42d   :  { %v8276_v17 = vadd.f32 %v2832_v24, %v2480_v42  ;;  %v6450_v42 = vmov 128.0   ;;  %v11123_v24 = vld [vmem:[#allocation167_spill] sm:$0xff]  ;;  %v803_v48 = vadd.f32 %v11124_v32, %v738_v1  ;;  %v1935_v43 = vadd.f32 %v11128_v19, %v11127_v22  ;;  %v11131_v1 = vld [vmem:[#allocation190_spill] sm:$0xff]  ;;  %v11134_v32 = vld [vmem:[#allocation192_spill] sm:$0xff] }
 0x42e   :  { %v8282_v28 = vadd.f32 %v2705_v21, %v2481_v10  ;;  %v2095_v34 = vadd.f32 %v1932_v12, %v1707_v7  ;;  %6150 = vrcp.f32 %v6450_v42  ;;  %v2482_v55 = vadd.f32 %v2447_v56, %v11123_v24  ;;  %v11129_v12 = vld [vmem:[#allocation188_spill] sm:$0xff]  ;;  %v11136_v22 = vld [vmem:[#allocation171_spill] sm:$0xff] }
 0x42f   :  { %v2907_v39 = vadd.f32 %v2906_v51, %v8276_v17  ;;  %v1547_v10 = vadd.f32 %v11126_v20, %v11125_v46  ;;  %v1321_v25 = vadd.f32 %v1159_v63, %v803_v48  ;;  %v2450_v37 = vadd.f32 %v11130_v30, %v11129_v12  ;;  %v11135_v48 = vld [vmem:[#allocation193_spill] sm:$0xff] }
 0x430   :  { %v2887_v9 = vadd.f32 %v2886_v61, %v8282_v28  ;;  %v2483_v21 = vadd.f32 %v2320_v44, %v2095_v34  ;;  %v2323_v0 = vadd.f32 %v11132_v33, %v11131_v1  ;;  %v2453_v46 = vadd.f32 %v11135_v48, %v11134_v32 }
 0x431   :  { %v1709_v7 = vadd.f32 %v1547_v10, %v1321_v25 }
 0x432   :  { %v2769_v3 = vpop.f32.mrf.mxu2  ;;  %v2834_v16 = vpop.f32.mrf.mxu3  ;;  %v2486_v19 = vadd.f32 %v2453_v46, %v11136_v22 }
 0x433   :  { %v2835_v11 = vadd.f32 %v2834_v16, %v2769_v3  ;;  %v2642_v51 = vpop.f32.mrf.mxu0  ;;  %v2707_v13 = vpop.f32.mrf.mxu1  ;;  %v2097_v44 = vadd.f32 %v1935_v43, %v1709_v7  ;;  %v11133_v3 = vld [vmem:[#allocation170_spill] sm:$0xff] }
 0x434   :  { %v2708_v61 = vadd.f32 %v2707_v13, %v2642_v51  ;;  %v6151_v38 = vpop.eup %6150  ;;  %v2484_v63 = vadd.f32 %v2450_v37, %v11133_v3 }
 0x435   :  { %v8297_v53 = vadd.f32 %v2835_v11, %v2482_v55  ;;  %v2918_v55 = vmul.f32 128.0, %v6151_v38  ;;  %v2485_v11 = vadd.f32 %v2323_v0, %v2097_v44  ;;  %vm2922_vm0 = vweird.f32 %v6151_v38 }
 0x436   :  { %v2871_v35 = vadd.f32 %v2708_v61, %v2483_v21 }
 0x437   :  { %v2908_v56 = vadd.f32 %v2907_v39, %v8297_v53 }
 0x438   :  { %v2888_v47 = vadd.f32 %v2887_v9, %v2871_v35  ;;  %v2919_v9 = vsub.f32 1.0, %v2918_v55 }
 0x43a   :  { %v2772_v23 = vpop.f32.mrf.mxu2  ;;  %v2837_v34 = vpop.f32.mrf.mxu3  ;;  %v2920_v43 = vmul.f32 %v6151_v38, %v2919_v9 }
 0x43b   :  { %v2838_v16 = vadd.f32 %v2837_v34, %v2772_v23  ;;  %v2645_v42 = vpop.f32.mrf.mxu0  ;;  %v2710_v24 = vpop.f32.mrf.mxu1 }
 0x43c   :  { %v2711_v51 = vadd.f32 %v2710_v24, %v2645_v42  ;;  %v2921_v1 = vadd.f32 %v6151_v38, %v2920_v43 }
 0x43d   :  { %v8307_v13 = vadd.f32 %v2838_v16, %v2484_v63 }
 0x43e   :  { %v2873_v39 = vadd.f32 %v2711_v51, %v2485_v11  ;;  %v8313_v34 = vsel %vm2922_vm0, %v6151_v38, %v2921_v1 }
 0x43f   :  { %v2909_v20 = vadd.f32 %v2908_v56, %v8307_v13  ;;  %11137 = vst [vmem:[#allocation50_spill] sm:$0xff] %v8313_v34 }
 0x440   :  { %v2889_v10 = vadd.f32 %v2888_v47, %v2873_v39 }
 0x442   :  { %v2890_v21 = vrot.slane %v2889_v10, 4  ;;  %v2775_v61 = vpop.f32.mrf.mxu2  ;;  %v2840_v25 = vpop.f32.mrf.mxu3 }
 0x443   :  { %v2841_v12 = vadd.f32 %v2840_v25, %v2775_v61 }
 0x444   :  { %v2891_v30 = vadd.f32 %v2890_v21, %v2889_v10 }
 0x445   :  { %v2874_v37 = vadd.f32 %v2841_v12, %v2486_v19 }
 0x446   :  { %v2892_v7 = vrot.slane %v2891_v30, 2 }
 0x447   :  { %v2910_v33 = vadd.f32 %v2909_v20, %v2874_v37 }
 0x448   :  { %v2893_v0 = vadd.f32 %v2892_v7, %v2891_v30 }
 0x449   :  { %v2911_v44 = vrot.slane %v2910_v33, 4 }
 0x44a   :  { %v2894_v23 = vrot.slane %v2893_v0, 1 }
 0x44b   :  { %v2912_v56 = vadd.f32 %v2911_v44, %v2910_v33 }
 0x44c   :  { %v2895_v47 = vadd.f32 %v2894_v23, %v2893_v0  ;;  %v3352_v23 = vld [vmem:[#allocation5 + $0x2c0] sm:$0xff] }
 0x44d   :  { %v2913_v63 = vrot.slane %v2912_v56, 2  ;;  %3395 = vmatpush.msrb.mxu0 %v3352_v23 }
 0x44e   :  { %v2924_v3 = vmul.f32 %v8313_v34, %v2895_v47 }
 0x450   :  { %v8317_v16 = vsub.f32 %v8038_v57, %v2924_v3  ;;  %v8320_v42 = vsub.f32 %v8040_v60, %v2924_v3  ;;  %v8323_v24 = vsub.f32 %v8062_v6, %v2924_v3  ;;  %v8326_v55 = vsub.f32 %v8082_v59, %v2924_v3 }
 0x451   :  { %v8329_v38 = vsub.f32 %v8101_v52, %v2924_v3  ;;  %v8332_v11 = vsub.f32 %v8120_v4, %v2924_v3  ;;  %v8335_v51 = vsub.f32 %v8139_v29, %v2924_v3  ;;  %v8338_v57 = vsub.f32 %v8158_v15, %v2924_v3 }
 0x452   :  { %v8341_v60 = vsub.f32 %v8177_v31, %v2924_v3  ;;  %v8344_v6 = vsub.f32 %v8198_v40, %v2924_v3  ;;  %v8347_v59 = vsub.f32 %v8219_v62, %v2924_v3  ;;  %v8350_v52 = vsub.f32 %v8240_v27, %v2924_v3 }
 0x453   :  { %v8353_v4 = vsub.f32 %v8261_v36, %v2924_v3  ;;  %v8356_v29 = vsub.f32 %v8282_v28, %v2924_v3  ;;  %v8358_v15 = vsub.f32 %v2871_v35, %v2924_v3  ;;  %v8360_v32 = vsub.f32 %v2873_v39, %v2924_v3 }
 0x454   :  { %v2958_v31 = vmul.f32 %v8317_v16, %v8317_v16  ;;  %v2960_v40 = vmul.f32 %v8320_v42, %v8320_v42  ;;  %v2914_v62 = vadd.f32 %v2913_v63, %v2912_v56  ;;  %v2962_v27 = vmul.f32 %v8323_v24, %v8323_v24 }
 0x455   :  { %v2964_v28 = vmul.f32 %v8326_v55, %v8326_v55  ;;  %v2966_v39 = vmul.f32 %v8329_v38, %v8329_v38  ;;  %v2968_v10 = vmul.f32 %v8332_v11, %v8332_v11  ;;  %v2970_v21 = vmul.f32 %v8335_v51, %v8335_v51 }
 0x456   :  { %v2990_v48 = vadd.f32 %v2960_v40, %v2958_v31  ;;  %v2915_v36 = vrot.slane %v2914_v62, 1  ;;  %v2976_v0 = vmul.f32 %v8344_v6, %v8344_v6  ;;  %v2978_v56 = vmul.f32 %v8347_v59, %v8347_v59 }
 0x457   :  { %v2980_v31 = vmul.f32 %v8350_v52, %v8350_v52 }
 0x458   :  { %v2991_v46 = vadd.f32 %v2990_v48, %v2962_v27  ;;  %v2916_v35 = vadd.f32 %v2915_v36, %v2914_v62  ;;  %v2982_v48 = vmul.f32 %v8353_v4, %v8353_v4 }
 0x45a   :  { %v2992_v20 = vadd.f32 %v2991_v46, %v2964_v28  ;;  %v2925_v9 = vmul.f32 %v8313_v34, %v2916_v35  ;;  %v3384_v28 = vld [vmem:[#allocation5 + $0x3c0] sm:$0xff] }
 0x45b   :  { %3460 = vmatpush.msrb.mxu1 %v3384_v28  ;;  %v3382_v28 = vld [vmem:[#allocation5 + $0x3b0] sm:$0xff] }
 0x45c   :  { %v2993_v61 = vadd.f32 %v2992_v20, %v2966_v39  ;;  %v8378_v25 = vsub.f32 %v8053_v8, %v2925_v9  ;;  %v8381_v22 = vsub.f32 %v8056_v41, %v2925_v9  ;;  %v8384_v19 = vsub.f32 %v8076_v54, %v2925_v9 }
 0x45d   :  { %v8387_v43 = vsub.f32 %v8095_v49, %v2925_v9  ;;  %v8390_v12 = vsub.f32 %v8114_v45, %v2925_v9  ;;  %v8393_v30 = vsub.f32 %v8133_v18, %v2925_v9  ;;  %v8396_v7 = vsub.f32 %v8152_v14, %v2925_v9  ;;  %3461 = vmatpush.msrb.mxu1 %v3382_v28  ;;  %v3336_v28 = vld [vmem:[#allocation5 + $0x240] sm:$0xff] }
 0x45e   :  { %v2994_v8 = vadd.f32 %v2993_v61, %v2968_v10  ;;  %v8399_v1 = vsub.f32 %v8173_v5, %v2925_v9  ;;  %v8402_v41 = vsub.f32 %v8194_v26, %v2925_v9  ;;  %v8405_v54 = vsub.f32 %v8215_v50, %v2925_v9 }
 0x45f   :  { %v8408_v49 = vsub.f32 %v8236_v2, %v2925_v9  ;;  %v8411_v45 = vsub.f32 %v8255_v58, %v2925_v9  ;;  %v8414_v18 = vsub.f32 %v8276_v17, %v2925_v9  ;;  %v8417_v14 = vsub.f32 %v8297_v53, %v2925_v9 }
 0x460   :  { %v2972_v5 = vmul.f32 %v8338_v57, %v8338_v57  ;;  %v2995_v26 = vadd.f32 %v2994_v8, %v2970_v21  ;;  %v8422_v33 = vsub.f32 %v8307_v13, %v2925_v9  ;;  %v8424_v50 = vsub.f32 %v2874_v37, %v2925_v9 }
 0x461   :  { %v2959_v2 = vmul.f32 %v8378_v25, %v8378_v25  ;;  %v2961_v58 = vmul.f32 %v8381_v22, %v8381_v22  ;;  %v2974_v17 = vmul.f32 %v8341_v60, %v8341_v60  ;;  %v2963_v13 = vmul.f32 %v8384_v19, %v8384_v19 }
 0x462   :  { %v2996_v53 = vadd.f32 %v2995_v26, %v2972_v5  ;;  %v2965_v3 = vmul.f32 %v8387_v43, %v8387_v43  ;;  %v2967_v62 = vmul.f32 %v8390_v12, %v8390_v12  ;;  %v2969_v46 = vmul.f32 %v8393_v30, %v8393_v30 }
 0x463   :  { %v3011_v37 = vadd.f32 %v2961_v58, %v2959_v2  ;;  %v2984_v39 = vmul.f32 %v8356_v29, %v8356_v29  ;;  %v2971_v9 = vmul.f32 %v8396_v7, %v8396_v7  ;;  %v2986_v21 = vmul.f32 %v8358_v15, %v8358_v15 }
 0x464   :  { %v2997_v44 = vadd.f32 %v2996_v53, %v2974_v17  ;;  %v2973_v8 = vmul.f32 %v8399_v1, %v8399_v1  ;;  %v2988_v26 = vmul.f32 %v8360_v32, %v8360_v32  ;;  %v2975_v58 = vmul.f32 %v8402_v41, %v8402_v41  ;;  %v3351_v53 = vld [vmem:[#allocation5 + $0x2b8] sm:$0xff] }
 0x465   :  { %v3012_v63 = vadd.f32 %v3011_v37, %v2963_v13  ;;  %3526 = vmatpush.msrb.mxu2 %v3351_v53  ;;  %v2977_v23 = vmul.f32 %v8405_v54, %v8405_v54  ;;  %v3349_v37 = vld [vmem:[#allocation5 + $0x2a8] sm:$0xff] }
 0x466   :  { %v2998_v47 = vadd.f32 %v2997_v44, %v2976_v0  ;;  %v3350_v0 = vld [vmem:[#allocation5 + $0x2b0] sm:$0xff]  ;;  %v3341_v53 = vld [vmem:[#allocation5 + $0x268] sm:$0xff] }
 0x467   :  { %v3013_v27 = vadd.f32 %v3012_v63, %v2965_v3  ;;  %3396 = vmatpush.msrb.mxu0 %v3350_v0  ;;  %3527 = vmatpush.msrb.mxu2 %v3349_v37  ;;  %v2979_v3 = vmul.f32 %v8408_v49, %v8408_v49  ;;  %v3377_v37 = vld [vmem:[#allocation5 + $0x388] sm:$0xff] }
 0x468   :  { %v2999_v40 = vadd.f32 %v2998_v47, %v2978_v56  ;;  %v3348_v56 = vld [vmem:[#allocation5 + $0x2a0] sm:$0xff] }
 0x469   :  { %v3014_v35 = vadd.f32 %v3013_v27, %v2967_v62  ;;  %3397 = vmatpush.msrb.mxu0 %v3348_v56  ;;  %v2981_v27 = vmul.f32 %v8411_v45, %v8411_v45  ;;  %v3376_v56 = vld [vmem:[#allocation5 + $0x380] sm:$0xff] }
 0x46a   :  { %v3000_v36 = vadd.f32 %v2999_v40, %v2980_v31  ;;  %v3347_v31 = vld [vmem:[#allocation5 + $0x298] sm:$0xff]  ;;  %v3346_v40 = vld [vmem:[#allocation5 + $0x290] sm:$0xff] }
 0x46b   :  { %v3015_v10 = vadd.f32 %v3014_v35, %v2969_v46  ;;  %3528 = vmatpush.msrb.mxu2 %v3347_v31  ;;  %3398 = vmatpush.msrb.mxu0 %v3346_v40  ;;  %v3345_v46 = vld [vmem:[#allocation5 + $0x288] sm:$0xff]  ;;  %v2989_v31 = vmul.f32 %v8424_v50, %v8424_v50 }
 0x46c   :  { %v3001_v20 = vadd.f32 %v3000_v36, %v2982_v48  ;;  %v3383_v36 = vld [vmem:[#allocation5 + $0x3b8] sm:$0xff] }
 0x46d   :  { %v3016_v5 = vadd.f32 %v3015_v10, %v2971_v9  ;;  %3591 = vmatpush.msrb.mxu3 %v3383_v36  ;;  %v3381_v10 = vld [vmem:[#allocation5 + $0x3a8] sm:$0xff]  ;;  %3529 = vmatpush.msrb.mxu2 %v3345_v46 }
 0x46e   :  { %v3002_v61 = vadd.f32 %v3001_v20, %v2984_v39  ;;  %v3344_v39 = vld [vmem:[#allocation5 + $0x280] sm:$0xff]  ;;  %v2983_v20 = vmul.f32 %v8414_v18, %v8414_v18 }
 0x46f   :  { %v3017_v17 = vadd.f32 %v3016_v5, %v2973_v8  ;;  %3399 = vmatpush.msrb.mxu0 %v3344_v39  ;;  %3592 = vmatpush.msrb.mxu3 %v3381_v10  ;;  %v3342_v5 = vld [vmem:[#allocation5 + $0x270] sm:$0xff]  ;;  %v3372_v39 = vld [vmem:[#allocation5 + $0x360] sm:$0xff] }
 0x470   :  { %v3003_v2 = vadd.f32 %v3002_v61, %v2986_v21  ;;  %v3380_v21 = vld [vmem:[#allocation5 + $0x3a0] sm:$0xff]  ;;  %v3343_v61 = vld [vmem:[#allocation5 + $0x278] sm:$0xff]  ;;  %v3334_v10 = vld [vmem:[#allocation5 + $0x230] sm:$0xff] }
 0x471   :  { %v3018_v13 = vadd.f32 %v3017_v17, %v2975_v58  ;;  %3462 = vmatpush.msrb.mxu1 %v3380_v21  ;;  %v3379_v58 = vld [vmem:[#allocation5 + $0x398] sm:$0xff]  ;;  %v3378_v17 = vld [vmem:[#allocation5 + $0x390] sm:$0xff]  ;;  %3530 = vmatpush.msrb.mxu2 %v3343_v61 }
 0x472   :  { %v3004_v44 = vadd.f32 %v3003_v2, %v2988_v26  ;;  %v2985_v26 = vmul.f32 %v8417_v14, %v8417_v14  ;;  %3400 = vmatpush.msrb.mxu0 %v3342_v5  ;;  %3593 = vmatpush.msrb.mxu3 %v3379_v58  ;;  %v3371_v61 = vld [vmem:[#allocation5 + $0x358] sm:$0xff]  ;;  %v3333_v5 = vld [vmem:[#allocation5 + $0x228] sm:$0xff] }
 0x473   :  { %v3019_v63 = vadd.f32 %v3018_v13, %v2977_v23  ;;  %3463 = vmatpush.msrb.mxu1 %v3378_v17  ;;  %v2987_v23 = vmul.f32 %v8422_v33, %v8422_v33  ;;  %3531 = vmatpush.msrb.mxu2 %v3341_v53  ;;  %v3369_v58 = vld [vmem:[#allocation5 + $0x348] sm:$0xff]  ;;  %v3368_v17 = vld [vmem:[#allocation5 + $0x340] sm:$0xff]  ;;  %v3331_v53 = vld [vmem:[#allocation5 + $0x218] sm:$0xff] }
 0x474   :  { %v3005_v47 = vrot.slane %v3004_v44, 4  ;;  %3594 = vmatpush.msrb.mxu3 %v3377_v37  ;;  %v3365_v37 = vld [vmem:[#allocation5 + $0x328] sm:$0xff] }
 0x475   :  { %v3020_v48 = vadd.f32 %v3019_v63, %v2979_v3  ;;  %3464 = vmatpush.msrb.mxu1 %v3376_v56  ;;  %v3338_v63 = vld [vmem:[#allocation5 + $0x250] sm:$0xff]  ;;  %v3364_v56 = vld [vmem:[#allocation5 + $0x320] sm:$0xff] }
 0x476   :  { %v3006_v62 = vadd.f32 %v3005_v47, %v3004_v44  ;;  %v3340_v44 = vld [vmem:[#allocation5 + $0x260] sm:$0xff]  ;;  %v3339_v47 = vld [vmem:[#allocation5 + $0x258] sm:$0xff] }
 0x477   :  { %v3021_v9 = vadd.f32 %v3020_v48, %v2981_v27  ;;  %3401 = vmatpush.msrb.mxu0 %v3340_v44  ;;  %v3374_v27 = vld [vmem:[#allocation5 + $0x370] sm:$0xff]  ;;  %3532 = vmatpush.msrb.mxu2 %v3339_v47  ;;  %v3337_v48 = vld [vmem:[#allocation5 + $0x248] sm:$0xff]  ;;  %v3363_v47 = vld [vmem:[#allocation5 + $0x318] sm:$0xff] }
 0x478   :  { %v3007_v35 = vrot.slane %v3006_v62, 2  ;;  %3465 = vmatpush.msrb.mxu1 %v3374_v27 }
 0x479   :  { %v3022_v2 = vadd.f32 %v3021_v9, %v2983_v20  ;;  %3402 = vmatpush.msrb.mxu0 %v3338_v63  ;;  %3533 = vmatpush.msrb.mxu2 %v3337_v48  ;;  %v3335_v20 = vld [vmem:[#allocation5 + $0x238] sm:$0xff]  ;;  %v3362_v63 = vld [vmem:[#allocation5 + $0x310] sm:$0xff] }
 0x47a   :  { %v3008_v8 = vadd.f32 %v3007_v35, %v3006_v62  ;;  %v3375_v62 = vld [vmem:[#allocation5 + $0x378] sm:$0xff]  ;;  %v3373_v35 = vld [vmem:[#allocation5 + $0x368] sm:$0xff]  ;;  %3466 = vmatpush.msrb.mxu1 %v3372_v39 }
 0x47b   :  { %v3023_v13 = vadd.f32 %v3022_v2, %v2985_v26  ;;  %3595 = vmatpush.msrb.mxu3 %v3375_v62  ;;  %3403 = vmatpush.msrb.mxu0 %v3336_v28  ;;  %v3332_v26 = vld [vmem:[#allocation5 + $0x220] sm:$0xff]  ;;  %v3291_v39 = vld [vmem:[#allocation5 + $0xf8] sm:$0xff] }
 0x47c   :  { %v3009_v0 = vrot.slane %v3008_v8, 1  ;;  %3534 = vmatpush.msrb.mxu2 %v3335_v20  ;;  %v3360_v28 = vld [vmem:[#allocation5 + $0x300] sm:$0xff]  ;;  %v3323_v20 = vld [vmem:[#allocation5 + $0x1f8] sm:$0xff] }
 0x47d   :  { %v3024_v40 = vadd.f32 %v3023_v13, %v2987_v23  ;;  %3596 = vmatpush.msrb.mxu3 %v3373_v35  ;;  %3404 = vmatpush.msrb.mxu0 %v3334_v10  ;;  %v3367_v23 = vld [vmem:[#allocation5 + $0x338] sm:$0xff]  ;;  %v3366_v13 = vld [vmem:[#allocation5 + $0x330] sm:$0xff] }
 0x47e   :  { %v3010_v3 = vadd.f32 %v3009_v0, %v3008_v8  ;;  %v3370_v8 = vld [vmem:[#allocation5 + $0x350] sm:$0xff]  ;;  %3535 = vmatpush.msrb.mxu2 %v3333_v5 }
 0x47f   :  { %v3025_v46 = vadd.f32 %v3024_v40, %v2989_v31  ;;  %3597 = vmatpush.msrb.mxu3 %v3371_v61  ;;  %3467 = vmatpush.msrb.mxu1 %v3370_v8  ;;  %v3330_v0 = vld [vmem:[#allocation5 + $0x210] sm:$0xff]  ;;  %v3329_v31 = vld [vmem:[#allocation5 + $0x208] sm:$0xff]  ;;  %v3328_v40 = vld [vmem:[#allocation5 + $0x200] sm:$0xff] }
 0x480   :  { %v3032_v36 = vmul.f32 %v3010_v3, %v8313_v34  ;;  %3405 = vmatpush.msrb.mxu0 %v3332_v26  ;;  %3536 = vmatpush.msrb.mxu2 %v3331_v53  ;;  %v3290_v10 = vld [vmem:[#allocation5 + $0xf0] sm:$0xff]  ;;  %v3088_v26 = vld [vmem:[#allocation8] sm:$0x3] }
 0x481   :  { %v3026_v21 = vrot.slane %v3025_v46, 4  ;;  %3598 = vmatpush.msrb.mxu3 %v3369_v58  ;;  %3468 = vmatpush.msrb.mxu1 %v3368_v17  ;;  %v8481_v17 = vld [vmem:[#allocation10] sm:$0x3]  ;;  %v8483_v53 = vperm.slane %v3088_v26, 0 }
 0x482   :  { %v8475_v9 = vadd.f32 1e-05, %v3032_v36  ;;  %3406 = vmatpush.msrb.mxu0 %v3330_v0  ;;  %3537 = vmatpush.msrb.mxu2 %v3329_v31  ;;  %v3361_v36 = vld [vmem:[#allocation5 + $0x308] sm:$0xff] }
 0x483   :  { %v3027_v2 = vadd.f32 %v3026_v21, %v3025_v46  ;;  %3599 = vmatpush.msrb.mxu3 %v3367_v23  ;;  %3469 = vmatpush.msrb.mxu1 %v3366_v13  ;;  %v3322_v21 = vld [vmem:[#allocation5 + $0x1f0] sm:$0xff]  ;;  %v3321_v23 = vld [vmem:[#allocation5 + $0x1e8] sm:$0xff]  ;;  %v3288_v13 = vld [vmem:[#allocation5 + $0xe0] sm:$0xff] }
 0x484   :  { %6152 = vrsqrt.f32 %v8475_v9  ;;  %3407 = vmatpush.msrb.mxu0 %v3328_v40  ;;  %3782 = vmatpush.msra.mxu2 %v3291_v39  ;;  %vm3042_vm2 = vweird.f32 %v8475_v9 }
 0x485   :  { %v3028_v44 = vrot.slane %v3027_v2, 2  ;;  %3600 = vmatpush.msrb.mxu3 %v3365_v37  ;;  %3470 = vmatpush.msrb.mxu1 %v3364_v56 }
 0x486   :  { %3652 = vmatpush.msra.mxu0 %v3290_v10 }
 0x487   :  { %v3029_v3 = vadd.f32 %v3028_v44, %v3027_v2  ;;  %3601 = vmatpush.msrb.mxu3 %v3363_v47  ;;  %3471 = vmatpush.msrb.mxu1 %v3362_v63  ;;  %v3289_v44 = vld [vmem:[#allocation5 + $0xe8] sm:$0xff]  ;;  %v8492_v47 = vperm.slane %v8481_v17, 0 }
 0x488   :  { %3783 = vmatpush.msra.mxu2 %v3289_v44  ;;  %3653 = vmatpush.msra.mxu0 %v3288_v13 }
 0x489   :  { %v3030_v48 = vrot.slane %v3029_v3, 1  ;;  %3602 = vmatpush.msrb.mxu3 %v3361_v36  ;;  %3472 = vmatpush.msrb.mxu1 %v3360_v28  ;;  %v3287_v28 = vld [vmem:[#allocation5 + $0xd8] sm:$0xff] }
 0x48a   :  { %v6153_v62 = vpop.eup %6152  ;;  %3784 = vmatpush.msra.mxu2 %v3287_v28  ;;  %v3284_v28 = vld [vmem:[#allocation5 + $0xc0] sm:$0xff] }
 0x48b   :  { %v3037_v27 = vmul.f32 %v6153_v62, %v8475_v9  ;;  %v3031_v35 = vadd.f32 %v3030_v48, %v3029_v3  ;;  %3847 = vmatpush.msra.mxu3 %v3323_v20  ;;  %3717 = vmatpush.msra.mxu1 %v3322_v21  ;;  %vm3043_vm1 = vweird.f32 %v6153_v62  ;;  %v3320_v9 = vld [vmem:[#allocation5 + $0x1e0] sm:$0xff]  ;;  %v8508_v20 = vperm.slane %v3088_v26, 1  ;;  %v3318_v21 = vld [vmem:[#allocation5 + $0x1d0] sm:$0xff] }
 0x48c   :  { %vm3044_vm3 = vmor %vm3042_vm2, %vm3043_vm1 }
 0x48d   :  { %v3038_v46 = vmul.f32 %v6153_v62, %v3037_v27  ;;  %v3033_v8 = vmul.f32 %v3031_v35, %v8313_v34  ;;  %3848 = vmatpush.msra.mxu3 %v3321_v23  ;;  %3718 = vmatpush.msra.mxu1 %v3320_v9  ;;  %v3286_v35 = vld [vmem:[#allocation5 + $0xd0] sm:$0xff]  ;;  %v3985_v34 = vld [vmem:[#allocation5 + $0x548] sm:$0xff] }
 0x48e   :  { %3654 = vmatpush.msra.mxu0 %v3286_v35 }
 0x48f   :  { %v3039_v61 = vmul.f32 0.5, %v3038_v46  ;;  %v3035_v2 = vadd.f32 1e-05, %v3033_v8  ;;  %v3319_v46 = vld [vmem:[#allocation5 + $0x1d8] sm:$0xff]  ;;  %3719 = vmatpush.msra.mxu1 %v3318_v21 }
 0x490   :  { %3849 = vmatpush.msra.mxu3 %v3319_v46  ;;  %v3316_v46 = vld [vmem:[#allocation5 + $0x1c0] sm:$0xff]  ;;  %3655 = vmatpush.msra.mxu0 %v3284_v28 }
 0x491   :  { %v3040_v5 = vsub.f32 1.5, %v3039_v61  ;;  %6154 = vrsqrt.f32 %v3035_v2  ;;  %vm3052_vm4 = vweird.f32 %v3035_v2  ;;  %3720 = vmatpush.msra.mxu1 %v3316_v46 }
 0x493   :  { %v3041_v58 = vmul.f32 %v6153_v62, %v3040_v5 }
 0x495   :  { %v8485_v0 = vsel %vm3044_vm3, %v6153_v62, %v3041_v58 }
 0x496   :  { %v3086_v37 = vmul.f32 %v8485_v0, %v8360_v32  ;;  %v3056_v56 = vmul.f32 %v8485_v0, %v8317_v16  ;;  %v3058_v31 = vmul.f32 %v8485_v0, %v8320_v42  ;;  %v3080_v36 = vmul.f32 %v8485_v0, %v8353_v4 }
 0x497   :  { %v6155_v32 = vpop.eup %6154  ;;  %v3082_v39 = vmul.f32 %v8485_v0, %v8356_v29  ;;  %v3060_v10 = vmul.f32 %v8485_v0, %v8323_v24  ;;  %v3072_v4 = vmul.f32 %v8485_v0, %v8341_v60  ;;  %v3074_v29 = vmul.f32 %v8485_v0, %v8344_v6 }
 0x498   :  { %v8495_v3 = vmul.f32 %v8483_v53, %v3086_v37  ;;  %v3094_v63 = vmul.f32 %v8483_v53, %v3056_v56  ;;  %v3047_v40 = vmul.f32 %v6155_v32, %v3035_v2  ;;  %v3096_v48 = vmul.f32 %v8483_v53, %v3058_v31 }
 0x499   :  { %v3076_v61 = vmul.f32 %v8485_v0, %v8347_v59  ;;  %vm3053_vm5 = vweird.f32 %v6155_v32  ;;  %v3078_v24 = vmul.f32 %v8485_v0, %v8350_v52  ;;  %v3110_v26 = vmul.f32 %v8483_v53, %v3072_v4 }
 0x49a   :  { %v3132_v16 = vadd.f32 %v8492_v47, %v3094_v63  ;;  %v3048_v62 = vmul.f32 %v6155_v32, %v3047_v40  ;;  %v3134_v5 = vadd.f32 %v8492_v47, %v3096_v48  ;;  %v3112_v58 = vmul.f32 %v8483_v53, %v3074_v29  ;;  %vm3054_vm6 = vmor %vm3052_vm4, %vm3053_vm5 }
 0x49b   :  { %v3114_v60 = vmul.f32 %v8483_v53, %v3076_v61  ;;  %v3118_v6 = vmul.f32 %v8483_v53, %v3080_v36  ;;  %v3098_v59 = vmul.f32 %v8483_v53, %v3060_v10  ;;  %v3116_v23 = vmul.f32 %v8483_v53, %v3078_v24  ;;  %v3285_v36 = vld [vmem:[#allocation5 + $0xc8] sm:$0xff]  ;;  %v3282_v24 = vld [vmem:[#allocation5 + $0xb0] sm:$0xff] }
 0x49c   :  { %v8501_v27 = vmax.f32 %v3132_v16, 0.0  ;;  %v3049_v42 = vmul.f32 0.5, %v3048_v62  ;;  %v3120_v13 = vmul.f32 %v8483_v53, %v3082_v39  ;;  %v8532_v37 = vadd.f32 %v8492_v47, %v3110_v26  ;;  %3785 = vmatpush.msra.mxu2 %v3285_v36  ;;  %3656 = vmatpush.msra.mxu0 %v3282_v24 }
 0x49d   :  { %v8535_v52 = vadd.f32 %v8492_v47, %v3112_v58  ;;  %v8538_v56 = vadd.f32 %v8492_v47, %v3114_v60  ;;  %v8541_v9 = vadd.f32 %v8492_v47, %v3118_v6  ;;  %v8545_v31 = vmax.f32 %v3134_v5, 0.0  ;;  %v3315_v5 = vld [vmem:[#allocation5 + $0x1b8] sm:$0xff] }
 0x49e   :  { %3408 = vmatmul.f32.vlgmr.msrb.gmra.mxu0 %v8501_v27  ;;  %3538 = vmatmul.f32.vlgmr.msrb.gmra.mxu2 %v8501_v27  ;;  %v3050_v8 = vsub.f32 1.5, %v3049_v42  ;;  %v8548_v40 = vadd.f32 %v8492_v47, %v3116_v23  ;;  %v8551_v2 = vadd.f32 %v8492_v47, %v3120_v13  ;;  %v8558_v48 = vperm.slane %v8481_v17, 1 }
 0x49f   :  { %v3062_v17 = vmul.f32 %v8485_v0, %v8326_v55  ;;  %v3084_v36 = vmul.f32 %v8485_v0, %v8358_v15 }
 0x4a0   :  { %v3051_v44 = vmul.f32 %v6155_v32, %v3050_v8  ;;  %v3283_v8 = vld [vmem:[#allocation5 + $0xb8] sm:$0xff] }
 0x4a1   :  { %v3100_v29 = vmul.f32 %v8483_v53, %v3062_v17  ;;  %3786 = vmatpush.msra.mxu2 %v3283_v8  ;;  %v3122_v15 = vmul.f32 %v8483_v53, %v3084_v36  ;;  %v3309_v36 = vld [vmem:[#allocation5 + $0x188] sm:$0xff] }
 0x4a2   :  { %v8543_v63 = vsel %vm3054_vm6, %v6155_v32, %v3051_v44  ;;  %v3317_v32 = vld [vmem:[#allocation5 + $0x1c8] sm:$0xff] }
 0x4a3   :  { %v3087_v16 = vmul.f32 %v8543_v63, %v8424_v50  ;;  %v3057_v62 = vmul.f32 %v8543_v63, %v8378_v25  ;;  %v3059_v50 = vmul.f32 %v8543_v63, %v8381_v22  ;;  %3850 = vmatpush.msra.mxu3 %v3317_v32  ;;  %v3136_v25 = vadd.f32 %v8492_v47, %v3098_v59 }
 0x4a4   :  { %v3064_v22 = vmul.f32 %v8485_v0, %v8329_v38  ;;  %v3081_v61 = vmul.f32 %v8543_v63, %v8414_v18  ;;  %v3061_v55 = vmul.f32 %v8543_v63, %v8384_v19  ;;  %v3073_v26 = vmul.f32 %v8543_v63, %v8402_v41  ;;  %v3314_v38 = vld [vmem:[#allocation5 + $0x1b0] sm:$0xff] }
 0x4a5   :  { %v8563_v35 = vmul.f32 %v8508_v20, %v3087_v16  ;;  %v3095_v39 = vmul.f32 %v8508_v20, %v3057_v62  ;;  %v3097_v21 = vmul.f32 %v8508_v20, %v3059_v50  ;;  %v8575_v4 = vmax.f32 %v3136_v25, 0.0  ;;  %3851 = vmatpush.msra.mxu3 %v3315_v5  ;;  %3721 = vmatpush.msra.mxu1 %v3314_v38 }
 0x4a6   :  { %3411 = vmatmul.f32.gmra.mxu0 %v8545_v31  ;;  %3541 = vmatmul.f32.gmra.mxu2 %v8545_v31  ;;  %v3083_v58 = vmul.f32 %v8543_v63, %v8417_v14  ;;  %v3075_v18 = vmul.f32 %v8543_v63, %v8405_v54  ;;  %v3077_v19 = vmul.f32 %v8543_v63, %v8408_v49 }
 0x4a7   :  { %v3133_v42 = vadd.f32 %v8558_v48, %v3095_v39  ;;  %v3135_v60 = vadd.f32 %v8558_v48, %v3097_v21  ;;  %v3111_v41 = vmul.f32 %v8508_v20, %v3073_v26  ;;  %v3079_v14 = vmul.f32 %v8543_v63, %v8411_v45  ;;  %v3313_v21 = vld [vmem:[#allocation5 + $0x1a8] sm:$0xff] }
 0x4a8   :  { %v3138_v6 = vadd.f32 %v8492_v47, %v3100_v29  ;;  %v3113_v44 = vmul.f32 %v8508_v20, %v3075_v18  ;;  %v3115_v54 = vmul.f32 %v8508_v20, %v3077_v19  ;;  %v3099_v59 = vmul.f32 %v8508_v20, %v3061_v55  ;;  %v3280_v29 = vld [vmem:[#allocation5 + $0xa0] sm:$0xff]  ;;  %3852 = vmatpush.msra.mxu3 %v3313_v21  ;;  %v3279_v19 = vld [vmem:[#allocation5 + $0x98] sm:$0xff] }
 0x4a9   :  { %v8572_v10 = vmax.f32 %v3133_v42, 0.0  ;;  %v8605_v49 = vadd.f32 %v8558_v48, %v3111_v41  ;;  %v3117_v23 = vmul.f32 %v8508_v20, %v3079_v14  ;;  %v3119_v13 = vmul.f32 %v8508_v20, %v3081_v61  ;;  %v3281_v42 = vld [vmem:[#allocation5 + $0xa8] sm:$0xff]  ;;  %3657 = vmatpush.msra.mxu0 %v3280_v29  ;;  %v3278_v41 = vld [vmem:[#allocation5 + $0x90] sm:$0xff] }
 0x4aa   :  { %v8610_v16 = vadd.f32 %v8558_v48, %v3113_v44  ;;  %v8613_v45 = vadd.f32 %v8558_v48, %v3115_v54  ;;  %v3121_v62 = vmul.f32 %v8508_v20, %v3083_v58  ;;  %v8618_v32 = vmax.f32 %v3135_v60, 0.0  ;;  %3787 = vmatpush.msra.mxu2 %v3281_v42  ;;  %v3311_v60 = vld [vmem:[#allocation5 + $0x198] sm:$0xff] }
 0x4ab   :  { %3473 = vmatmul.f32.vlgmr.msrb.gmra.mxu1 %v8572_v10  ;;  %3603 = vmatmul.f32.vlgmr.msrb.gmra.mxu3 %v8572_v10  ;;  %v8621_v28 = vadd.f32 %v8558_v48, %v3117_v23  ;;  %v8624_v46 = vadd.f32 %v8558_v48, %v3119_v13  ;;  %v3085_v39 = vmul.f32 %v8543_v63, %v8422_v33  ;;  %v8628_v50 = vmax.f32 %v3138_v6, 0.0 }
 0x4ac   :  { %v3102_v25 = vmul.f32 %v8483_v53, %v3064_v22  ;;  %v8632_v17 = vadd.f32 %v8558_v48, %v3121_v62  ;;  %v8640_v33 = vadd.f32 %v8492_v47, %v8495_v3  ;;  %v3312_v22 = vld [vmem:[#allocation5 + $0x1a0] sm:$0xff]  ;;  %v8645_v55 = vadd.f32 %v8492_v47, %v3122_v15  ;;  %3788 = vmatpush.msra.mxu2 %v3279_v19 }
 0x4ad   :  { %v3123_v61 = vmul.f32 %v8508_v20, %v3085_v39  ;;  %v8649_v8 = vadd.f32 %v8558_v48, %v8563_v35  ;;  %v3137_v5 = vadd.f32 %v8558_v48, %v3099_v59  ;;  %v3063_v24 = vmul.f32 %v8543_v63, %v8387_v43  ;;  %3722 = vmatpush.msra.mxu1 %v3312_v22  ;;  %v3276_v39 = vld [vmem:[#allocation5 + $0x80] sm:$0xff] }
 0x4ae   :  { %3414 = vmatmul.f32.gmra.mxu0 %v8575_v4  ;;  %3544 = vmatmul.f32.gmra.mxu2 %v8575_v4  ;;  %v3140_v26 = vadd.f32 %v8492_v47, %v3102_v25  ;;  %v3066_v58 = vmul.f32 %v8485_v0, %v8332_v11  ;;  %v3310_v11 = vld [vmem:[#allocation5 + $0x190] sm:$0xff]  ;;  %v3065_v6 = vmul.f32 %v8543_v63, %v8390_v12  ;;  %v3277_v12 = vld [vmem:[#allocation5 + $0x88] sm:$0xff] }
 0x4af   :  { %v8655_v3 = vadd.f32 %v8558_v48, %v3123_v61  ;;  %v8660_v38 = vmax.f32 %v3137_v5, 0.0  ;;  %v3101_v35 = vmul.f32 %v8508_v20, %v3063_v24  ;;  %3853 = vmatpush.msra.mxu3 %v3311_v60  ;;  %v3068_v54 = vmul.f32 %v8485_v0, %v8335_v51  ;;  %3658 = vmatpush.msra.mxu0 %v3278_v41  ;;  %v3308_v51 = vld [vmem:[#allocation5 + $0x180] sm:$0xff]  ;;  %v3307_v24 = vld [vmem:[#allocation5 + $0x178] sm:$0xff]  ;;  %v3273_v60 = vld [vmem:[#allocation5 + $0x68] sm:$0xff] }
 0x4b0   :  { %v8663_v18 = vmax.f32 %v3140_v26, 0.0  ;;  %v3104_v43 = vmul.f32 %v8483_v53, %v3066_v58  ;;  %3723 = vmatpush.msra.mxu1 %v3310_v11  ;;  %v3103_v23 = vmul.f32 %v8508_v20, %v3065_v6  ;;  %v3067_v15 = vmul.f32 %v8543_v63, %v8393_v30  ;;  %3789 = vmatpush.msra.mxu2 %v3277_v12  ;;  %v3275_v30 = vld [vmem:[#allocation5 + $0x78] sm:$0xff]  ;;  %v3274_v26 = vld [vmem:[#allocation5 + $0x70] sm:$0xff]  ;;  %v3305_v41 = vld [vmem:[#allocation5 + $0x168] sm:$0xff] }
 0x4b1   :  { %v3139_v14 = vadd.f32 %v8558_v48, %v3101_v35  ;;  %v3106_v62 = vmul.f32 %v8483_v53, %v3068_v54  ;;  %3854 = vmatpush.msra.mxu3 %v3309_v36  ;;  %v3070_v21 = vmul.f32 %v8485_v0, %v8338_v57  ;;  %3659 = vmatpush.msra.mxu0 %v3276_v39  ;;  %v3306_v57 = vld [vmem:[#allocation5 + $0x170] sm:$0xff]  ;;  %v3272_v11 = vld [vmem:[#allocation5 + $0x60] sm:$0xff]  ;;  %v8722_v54 = vmax.f32 %v8532_v37, 0.0  ;;  %v3269_v36 = vld [vmem:[#allocation5 + $0x48] sm:$0xff] }
 0x4b2   :  { %v3142_v44 = vadd.f32 %v8492_v47, %v3104_v43  ;;  %v3141_v25 = vadd.f32 %v8558_v48, %v3103_v23  ;;  %3724 = vmatpush.msra.mxu1 %v3308_v51  ;;  %v3105_v61 = vmul.f32 %v8508_v20, %v3067_v15  ;;  %v3069_v58 = vmul.f32 %v8543_v63, %v8396_v7  ;;  %v3304_v7 = vld [vmem:[#allocation5 + $0x160] sm:$0xff]  ;;  %v3271_v23 = vld [vmem:[#allocation5 + $0x58] sm:$0xff]  ;;  %v3270_v12 = vld [vmem:[#allocation5 + $0x50] sm:$0xff] }
 0x4b3   :  { %3476 = vmatmul.f32.gmra.mxu1 %v8618_v32  ;;  %3606 = vmatmul.f32.gmra.mxu3 %v8618_v32  ;;  %v8676_v59 = vmax.f32 %v3139_v14, 0.0  ;;  %v3144_v42 = vadd.f32 %v8492_v47, %v3106_v62  ;;  %v3108_v5 = vmul.f32 %v8483_v53, %v3070_v21  ;;  %v3071_v14 = vmul.f32 %v8543_v63, %v8399_v1  ;;  %v3303_v62 = vld [vmem:[#allocation5 + $0x158] sm:$0xff]  ;;  %v3302_v1 = vld [vmem:[#allocation5 + $0x150] sm:$0xff]  ;;  %v3301_v39 = vld [vmem:[#allocation5 + $0x148] sm:$0xff] }
 0x4b4   :  { %v8679_v13 = vmax.f32 %v3142_v44, 0.0  ;;  %v8692_v29 = vmax.f32 %v3141_v25, 0.0  ;;  %v3143_v0 = vadd.f32 %v8558_v48, %v3105_v61  ;;  %3790 = vmatpush.msra.mxu2 %v3275_v30  ;;  %3855 = vmatpush.msra.mxu3 %v3307_v24  ;;  %v3107_v43 = vmul.f32 %v8508_v20, %v3069_v58  ;;  %v3268_v51 = vld [vmem:[#allocation5 + $0x40] sm:$0xff]  ;;  %v3267_v15 = vld [vmem:[#allocation5 + $0x38] sm:$0xff]  ;;  %v3266_v21 = vld [vmem:[#allocation5 + $0x30] sm:$0xff] }
 0x4b5   :  { %v8695_v22 = vmax.f32 %v3144_v42, 0.0  ;;  %v3146_v53 = vadd.f32 %v8492_v47, %v3108_v5  ;;  %3660 = vmatpush.msra.mxu0 %v3274_v26  ;;  %3725 = vmatpush.msra.mxu1 %v3306_v57  ;;  %v3109_v44 = vmul.f32 %v8508_v20, %v3071_v14  ;;  %v8732_v37 = vmax.f32 %v8535_v52, 0.0  ;;  %v3299_v42 = vld [vmem:[#allocation5 + $0x138] sm:$0xff]  ;;  %v3298_v61 = vld [vmem:[#allocation5 + $0x130] sm:$0xff]  ;;  %v3265_v5 = vld [vmem:[#allocation5 + $0x28] sm:$0xff] }
 0x4b6   :  { %3417 = vmatmul.f32.gmra.mxu0 %v8628_v50  ;;  %3547 = vmatmul.f32.gmra.mxu2 %v8628_v50  ;;  %v8706_v35 = vmax.f32 %v3143_v0, 0.0  ;;  %v3145_v47 = vadd.f32 %v8558_v48, %v3107_v43  ;;  %v8739_v25 = vmax.f32 %v8605_v49, 0.0  ;;  %v8742_v52 = vmax.f32 %v8538_v56, 0.0  ;;  %v3297_v30 = vld [vmem:[#allocation5 + $0x128] sm:$0xff]  ;;  %v3264_v24 = vld [vmem:[#allocation5 + $0x20] sm:$0xff]  ;;  %v3263_v57 = vld [vmem:[#allocation5 + $0x18] sm:$0xff] }
 0x4b7   :  { %v8709_v19 = vmax.f32 %v3146_v53, 0.0  ;;  %3791 = vmatpush.msra.mxu2 %v3273_v60  ;;  %3856 = vmatpush.msra.mxu3 %v3305_v41  ;;  %v3147_v63 = vadd.f32 %v8558_v48, %v3109_v44  ;;  %v3300_v48 = vld [vmem:[#allocation5 + $0x140] sm:$0xff]  ;;  %v8749_v49 = vmax.f32 %v8610_v16, 0.0  ;;  %v8752_v56 = vmax.f32 %v8548_v40, 0.0  ;;  %v3295_v0 = vld [vmem:[#allocation5 + $0x118] sm:$0xff]  ;;  %v3262_v58 = vld [vmem:[#allocation5 + $0x10] sm:$0xff] }
 0x4b8   :  { %3661 = vmatpush.msra.mxu0 %v3272_v11  ;;  %3726 = vmatpush.msra.mxu1 %v3304_v7  ;;  %v8718_v6 = vmax.f32 %v3145_v47, 0.0  ;;  %v3296_v26 = vld [vmem:[#allocation5 + $0x120] sm:$0xff]  ;;  %v8759_v16 = vmax.f32 %v8613_v45, 0.0  ;;  %v8762_v40 = vmax.f32 %v8541_v9, 0.0  ;;  %v3294_v53 = vld [vmem:[#allocation5 + $0x110] sm:$0xff]  ;;  %v8769_v45 = vmax.f32 %v8621_v28, 0.0 }
 0x4b9   :  { %3792 = vmatpush.msra.mxu2 %v3271_v23  ;;  %3857 = vmatpush.msra.mxu3 %v3303_v62  ;;  %v8729_v20 = vmax.f32 %v3147_v63, 0.0  ;;  %v8772_v9 = vmax.f32 %v8551_v2, 0.0  ;;  %v3261_v43 = vld [vmem:[#allocation5 + $0x8] sm:$0xff]  ;;  %v3260_v41 = vld [vmem:[#allocation5] sm:$0xff]  ;;  %v8779_v28 = vmax.f32 %v8624_v46, 0.0  ;;  %v8782_v2 = vmax.f32 %v8645_v55, 0.0 }
 0x4ba   :  { %3662 = vmatpush.msra.mxu0 %v3270_v12  ;;  %3727 = vmatpush.msra.mxu1 %v3302_v1  ;;  %v3293_v60 = vld [vmem:[#allocation5 + $0x108] sm:$0xff]  ;;  %v3292_v11 = vld [vmem:[#allocation5 + $0x100] sm:$0xff]  ;;  %v3975_v7 = vld [vmem:[#allocation5 + $0x4f8] sm:$0xff]  ;;  %v8789_v46 = vmax.f32 %v8632_v17, 0.0  ;;  %v8792_v55 = vmax.f32 %v8640_v33, 0.0  ;;  %v8799_v17 = vmax.f32 %v8655_v3, 0.0 }
 0x4bb   :  { %3479 = vmatmul.f32.gmra.mxu1 %v8660_v38  ;;  %3609 = vmatmul.f32.gmra.mxu3 %v8660_v38  ;;  %v4007_v47 = vld [vmem:[#allocation5 + $0x5f8] sm:$0xff]  ;;  %v3974_v14 = vld [vmem:[#allocation5 + $0x4f0] sm:$0xff]  ;;  %v3973_v23 = vld [vmem:[#allocation5 + $0x4e8] sm:$0xff] }
 0x4bc   :  { %3793 = vmatpush.msra.mxu2 %v3269_v36  ;;  %3858 = vmatpush.msra.mxu3 %v3301_v39  ;;  %v4006_v44 = vld [vmem:[#allocation5 + $0x5f0] sm:$0xff]  ;;  %v4005_v62 = vld [vmem:[#allocation5 + $0x5e8] sm:$0xff]  ;;  %v3972_v33 = vld [vmem:[#allocation5 + $0x4e0] sm:$0xff]  ;;  %v11138_v39 = vmov 0.0  }
 0x4bd   :  { %3663 = vmatpush.msra.mxu0 %v3268_v51  ;;  %3728 = vmatpush.msra.mxu1 %v3300_v48  ;;  %v4004_v1 = vld [vmem:[#allocation5 + $0x5e0] sm:$0xff]  ;;  %v3971_v63 = vld [vmem:[#allocation5 + $0x4d8] sm:$0xff]  ;;  %v8808_v51 = vmax.f32 %v8649_v8, 0.0 }
 0x4be   :  { %3420 = vmatmul.f32.gmra.mxu0 %v8663_v18  ;;  %3550 = vmatmul.f32.gmra.mxu2 %v8663_v18  ;;  %v4003_v36 = vld [vmem:[#allocation5 + $0x5d8] sm:$0xff] }
 0x4bf   :  { %3794 = vmatpush.msra.mxu2 %v3267_v15  ;;  %3859 = vmatpush.msra.mxu3 %v3299_v42  ;;  %v3970_v15 = vld [vmem:[#allocation5 + $0x4d0] sm:$0xff] }
 0x4c0   :  { %3664 = vmatpush.msra.mxu0 %v3266_v21  ;;  %3729 = vmatpush.msra.mxu1 %v3298_v61  ;;  %v4002_v42 = vld [vmem:[#allocation5 + $0x5d0] sm:$0xff]  ;;  %v3969_v21 = vld [vmem:[#allocation5 + $0x4c8] sm:$0xff] }
 0x4c1   :  { %3795 = vmatpush.msra.mxu2 %v3265_v5  ;;  %3860 = vmatpush.msra.mxu3 %v3297_v30  ;;  %v4001_v61 = vld [vmem:[#allocation5 + $0x5c8] sm:$0xff] }
 0x4c2   :  { %3665 = vmatpush.msra.mxu0 %v3264_v24  ;;  %3730 = vmatpush.msra.mxu1 %v3296_v26  ;;  %v3968_v24 = vld [vmem:[#allocation5 + $0x4c0] sm:$0xff] }
 0x4c3   :  { %3482 = vmatmul.f32.gmra.mxu1 %v8676_v59  ;;  %3612 = vmatmul.f32.gmra.mxu3 %v8676_v59  ;;  %v4000_v26 = vld [vmem:[#allocation5 + $0x5c0] sm:$0xff] }
 0x4c4   :  { %3796 = vmatpush.msra.mxu2 %v3263_v57  ;;  %3861 = vmatpush.msra.mxu3 %v3295_v0  ;;  %v3967_v57 = vld [vmem:[#allocation5 + $0x4b8] sm:$0xff] }
 0x4c5   :  { %3666 = vmatpush.msra.mxu0 %v3262_v58  ;;  %3731 = vmatpush.msra.mxu1 %v3294_v53  ;;  %v3999_v0 = vld [vmem:[#allocation5 + $0x5b8] sm:$0xff] }
 0x4c6   :  { %3423 = vmatmul.f32.gmra.mxu0 %v8679_v13  ;;  %3553 = vmatmul.f32.gmra.mxu2 %v8679_v13 }
 0x4c7   :  { %3797 = vmatpush.msra.mxu2 %v3261_v43  ;;  %3862 = vmatpush.msra.mxu3 %v3293_v60 }
 0x4c8   :  { %3667 = vmatpush.msra.mxu0 %v3260_v41  ;;  %3732 = vmatpush.msra.mxu1 %v3292_v11  ;;  %v3966_v11 = vld [vmem:[#allocation5 + $0x4b0] sm:$0xff] }
 0x4c9   :  { %4138 = vmatpush.msrb.mxu2 %v3975_v7  ;;  %4203 = vmatpush.msrb.mxu3 %v4007_v47  ;;  %v3998_v7 = vld [vmem:[#allocation5 + $0x5b0] sm:$0xff]  ;;  %v3965_v47 = vld [vmem:[#allocation5 + $0x4a8] sm:$0xff] }
 0x4ca   :  { %4008 = vmatpush.msrb.mxu0 %v3974_v14  ;;  %4073 = vmatpush.msrb.mxu1 %v4006_v44 }
 0x4cb   :  { %3485 = vmatmul.f32.gmra.mxu1 %v8692_v29  ;;  %3615 = vmatmul.f32.gmra.mxu3 %v8692_v29 }
 0x4cc   :  { %4139 = vmatpush.msrb.mxu2 %v3973_v23  ;;  %4204 = vmatpush.msrb.mxu3 %v4005_v62 }
 0x4cd   :  { %4009 = vmatpush.msrb.mxu0 %v3972_v33  ;;  %4074 = vmatpush.msrb.mxu1 %v4004_v1  ;;  %v3964_v1 = vld [vmem:[#allocation5 + $0x4a0] sm:$0xff] }
 0x4ce   :  { %3426 = vmatmul.f32.gmra.mxu0 %v8695_v22  ;;  %3556 = vmatmul.f32.gmra.mxu2 %v8695_v22 }
 0x4cf   :  { %4140 = vmatpush.msrb.mxu2 %v3971_v63  ;;  %4205 = vmatpush.msrb.mxu3 %v4003_v36  ;;  %v3996_v63 = vld [vmem:[#allocation5 + $0x5a0] sm:$0xff]  ;;  %v3963_v36 = vld [vmem:[#allocation5 + $0x498] sm:$0xff] }
 0x4d0   :  { %4010 = vmatpush.msrb.mxu0 %v3970_v15  ;;  %4075 = vmatpush.msrb.mxu1 %v4002_v42 }
 0x4d1   :  { %4141 = vmatpush.msrb.mxu2 %v3969_v21  ;;  %4206 = vmatpush.msrb.mxu3 %v4001_v61 }
 0x4d2   :  { %4011 = vmatpush.msrb.mxu0 %v3968_v24  ;;  %4076 = vmatpush.msrb.mxu1 %v4000_v26  ;;  %v3994_v24 = vld [vmem:[#allocation5 + $0x590] sm:$0xff]  ;;  %v3993_v26 = vld [vmem:[#allocation5 + $0x588] sm:$0xff] }
 0x4d3   :  { %3488 = vmatmul.f32.gmra.mxu1 %v8706_v35  ;;  %3618 = vmatmul.f32.gmra.mxu3 %v8706_v35 }
 0x4d4   :  { %4142 = vmatpush.msrb.mxu2 %v3967_v57  ;;  %4207 = vmatpush.msrb.mxu3 %v3999_v0 }
 0x4d5   :  { %4012 = vmatpush.msrb.mxu0 %v3966_v11  ;;  %4077 = vmatpush.msrb.mxu1 %v3998_v7  ;;  %v3960_v7 = vld [vmem:[#allocation5 + $0x480] sm:$0xff] }
 0x4d6   :  { %3429 = vmatmul.f32.gmra.mxu0 %v8709_v19  ;;  %3559 = vmatmul.f32.gmra.mxu2 %v8709_v19 }
 0x4d7   :  { %4143 = vmatpush.msrb.mxu2 %v3965_v47  ;;  %4013 = vmatpush.msrb.mxu0 %v3964_v1  ;;  %v3992_v47 = vld [vmem:[#allocation5 + $0x580] sm:$0xff] }
 0x4d8   :  { %4078 = vmatpush.msrb.mxu1 %v3996_v63 }
 0x4d9   :  { %4144 = vmatpush.msrb.mxu2 %v3963_v36 }
 0x4da   :  { %4079 = vmatpush.msrb.mxu1 %v3994_v24  ;;  %v3989_v24 = vld [vmem:[#allocation5 + $0x568] sm:$0xff] }
 0x4db   :  { %3491 = vmatmul.f32.gmra.mxu1 %v8718_v6  ;;  %3621 = vmatmul.f32.gmra.mxu3 %v8718_v6 }
 0x4dc   :  { %4080 = vmatpush.msrb.mxu1 %v3992_v47  ;;  %v3956_v47 = vld [vmem:[#allocation5 + $0x460] sm:$0xff] }
 0x4de   :  { %3432 = vmatmul.f32.gmra.mxu0 %v8722_v54  ;;  %3562 = vmatmul.f32.gmra.mxu2 %v8722_v54 }
 0x4e3   :  { %3494 = vmatmul.f32.gmra.mxu1 %v8729_v20  ;;  %3624 = vmatmul.f32.gmra.mxu3 %v8729_v20 }
 0x4e6   :  { %3435 = vmatmul.f32.gmra.mxu0 %v8732_v37  ;;  %3565 = vmatmul.f32.gmra.mxu2 %v8732_v37 }
 0x4eb   :  { %3497 = vmatmul.f32.gmra.mxu1 %v8739_v25  ;;  %3627 = vmatmul.f32.gmra.mxu3 %v8739_v25 }
 0x4ee   :  { %3438 = vmatmul.f32.gmra.mxu0 %v8742_v52  ;;  %3568 = vmatmul.f32.gmra.mxu2 %v8742_v52 }
 0x4f3   :  { %3500 = vmatmul.f32.gmra.mxu1 %v8749_v49  ;;  %3630 = vmatmul.f32.gmra.mxu3 %v8749_v49 }
 0x4f6   :  { %3441 = vmatmul.f32.gmra.mxu0 %v8752_v56  ;;  %3571 = vmatmul.f32.gmra.mxu2 %v8752_v56 }
 0x4fb   :  { %3503 = vmatmul.f32.gmra.mxu1 %v8759_v16  ;;  %3633 = vmatmul.f32.gmra.mxu3 %v8759_v16 }
 0x4fe   :  { %3444 = vmatmul.f32.gmra.mxu0 %v8762_v40  ;;  %3574 = vmatmul.f32.gmra.mxu2 %v8762_v40 }
 0x503   :  { %3506 = vmatmul.f32.gmra.mxu1 %v8769_v45  ;;  %3636 = vmatmul.f32.gmra.mxu3 %v8769_v45 }
 0x506   :  { %3447 = vmatmul.f32.gmra.mxu0 %v8772_v9  ;;  %3577 = vmatmul.f32.gmra.mxu2 %v8772_v9 }
 0x50b   :  { %3509 = vmatmul.f32.gmra.mxu1 %v8779_v28  ;;  %3639 = vmatmul.f32.gmra.mxu3 %v8779_v28 }
 0x50e   :  { %3450 = vmatmul.f32.gmra.mxu0 %v8782_v2  ;;  %3580 = vmatmul.f32.gmra.mxu2 %v8782_v2 }
 0x513   :  { %3512 = vmatmul.f32.gmra.mxu1 %v8789_v46  ;;  %3642 = vmatmul.f32.gmra.mxu3 %v8789_v46 }
 0x516   :  { %3453 = vmatmul.f32.gmra.mxu0 %v8792_v55  ;;  %3583 = vmatmul.f32.gmra.mxu2 %v8792_v55 }
 0x51b   :  { %v8801_v12 = vpop.f32.mrf.mxu0  ;;  %3515 = vmatmul.f32.gmra.mxu1 %v8799_v17  ;;  %3645 = vmatmul.f32.gmra.mxu3 %v8799_v17 }
 0x51e   :  { %3668 = vmatmul.f32.vlgmr.msra.gmra.mxu0 %v11138_v39  ;;  %3798 = vmatmul.f32.vlgmr.msra.gmra.mxu2 %v11138_v39 }
 0x521   :  { %v3539_v3 = vpop.f32.mrf.mxu2 }
 0x523   :  { %v8810_v48 = vpop.f32.mrf.mxu0  ;;  %3518 = vmatmul.f32.gmra.mxu1 %v8808_v51  ;;  %3648 = vmatmul.f32.gmra.mxu3 %v8808_v51 }
 0x526   :  { %3671 = vmatmul.f32.gmra.mxu0 %v11138_v39  ;;  %3801 = vmatmul.f32.gmra.mxu2 %v11138_v39 }
 0x528   :  { %v8816_v5 = vpop.f32.mrf.mxu1 }
 0x529   :  { %v3542_v8 = vpop.f32.mrf.mxu2 }
 0x52b   :  { %v8818_v30 = vpop.f32.mrf.mxu0  ;;  %3733 = vmatmul.f32.vlgmr.msra.gmra.mxu1 %v11138_v39  ;;  %3863 = vmatmul.f32.vlgmr.msra.gmra.mxu3 %v11138_v39 }
 0x52e   :  { %3674 = vmatmul.f32.gmra.mxu0 %v8501_v27  ;;  %3804 = vmatmul.f32.gmra.mxu2 %v8501_v27  ;;  %v3604_v58 = vpop.f32.mrf.mxu3  ;;  %v3997_v27 = vld [vmem:[#allocation5 + $0x5a8] sm:$0xff] }
 0x52f   :  { %v8824_v53 = vadd.f32 %v3604_v58, %v3539_v3  ;;  %4208 = vmatpush.msrb.mxu3 %v3997_v27  ;;  %v3991_v27 = vld [vmem:[#allocation5 + $0x578] sm:$0xff] }
 0x530   :  { %v8826_v60 = vpop.f32.mrf.mxu1 }
 0x531   :  { %v3545_v43 = vpop.f32.mrf.mxu2 }
 0x533   :  { %v8828_v41 = vpop.f32.mrf.mxu0  ;;  %3736 = vmatmul.f32.gmra.mxu1 %v11138_v39  ;;  %3866 = vmatmul.f32.gmra.mxu3 %v11138_v39 }
 0x536   :  { %3677 = vmatmul.f32.gmra.mxu0 %v8545_v31  ;;  %3807 = vmatmul.f32.gmra.mxu2 %v8545_v31  ;;  %v3607_v14 = vpop.f32.mrf.mxu3  ;;  %v3995_v31 = vld [vmem:[#allocation5 + $0x598] sm:$0xff] }
 0x537   :  { %v8834_v44 = vadd.f32 %v3607_v14, %v3542_v8  ;;  %4209 = vmatpush.msrb.mxu3 %v3995_v31  ;;  %v3962_v8 = vld [vmem:[#allocation5 + $0x490] sm:$0xff] }
 0x538   :  { %v8836_v62 = vpop.f32.mrf.mxu1  ;;  %4014 = vmatpush.msrb.mxu0 %v3962_v8  ;;  %v3958_v31 = vld [vmem:[#allocation5 + $0x470] sm:$0xff]  ;;  %v3957_v8 = vld [vmem:[#allocation5 + $0x468] sm:$0xff] }
 0x539   :  { %v3548_v23 = vpop.f32.mrf.mxu2  ;;  %4210 = vmatpush.msrb.mxu3 %v3993_v26 }
 0x53a   :  { %4015 = vmatpush.msrb.mxu0 %v3960_v7 }
 0x53b   :  { %v8838_v33 = vpop.f32.mrf.mxu0  ;;  %3739 = vmatmul.f32.gmra.mxu1 %v8572_v10  ;;  %3869 = vmatmul.f32.gmra.mxu3 %v8572_v10  ;;  %v3961_v10 = vld [vmem:[#allocation5 + $0x488] sm:$0xff] }
 0x53c   :  { %4145 = vmatpush.msrb.mxu2 %v3961_v10  ;;  %4211 = vmatpush.msrb.mxu3 %v3991_v27  ;;  %v3955_v27 = vld [vmem:[#allocation5 + $0x458] sm:$0xff] }
 0x53d   :  { %4016 = vmatpush.msrb.mxu0 %v3958_v31 }
 0x53e   :  { %3680 = vmatmul.f32.gmra.mxu0 %v8575_v4  ;;  %3810 = vmatmul.f32.gmra.mxu2 %v8575_v4  ;;  %v3610_v3 = vpop.f32.mrf.mxu3 }
 0x53f   :  { %v8844_v15 = vadd.f32 %v3610_v3, %v3545_v43  ;;  %v3990_v3 = vld [vmem:[#allocation5 + $0x570] sm:$0xff]  ;;  %4212 = vmatpush.msrb.mxu3 %v3989_v24  ;;  %4017 = vmatpush.msrb.mxu0 %v3956_v47 }
 0x540   :  { %v8846_v21 = vpop.f32.mrf.mxu1  ;;  %4081 = vmatpush.msrb.mxu1 %v3990_v3  ;;  %v3986_v47 = vld [vmem:[#allocation5 + $0x550] sm:$0xff] }
 0x541   :  { %v3551_v42 = vpop.f32.mrf.mxu2 }
 0x543   :  { %v8848_v61 = vpop.f32.mrf.mxu0  ;;  %3742 = vmatmul.f32.gmra.mxu1 %v8618_v32  ;;  %3872 = vmatmul.f32.gmra.mxu3 %v8618_v32  ;;  %v3959_v32 = vld [vmem:[#allocation5 + $0x478] sm:$0xff] }
 0x544   :  { %4146 = vmatpush.msrb.mxu2 %v3959_v32  ;;  %v3988_v32 = vld [vmem:[#allocation5 + $0x560] sm:$0xff] }
 0x545   :  { %4082 = vmatpush.msrb.mxu1 %v3988_v32  ;;  %v3953_v32 = vld [vmem:[#allocation5 + $0x448] sm:$0xff] }
 0x546   :  { %3683 = vmatmul.f32.gmra.mxu0 %v8628_v50  ;;  %3813 = vmatmul.f32.gmra.mxu2 %v8628_v50  ;;  %v3613_v57 = vpop.f32.mrf.mxu3 }
 0x547   :  { %v8854_v0 = vadd.f32 %v3613_v57, %v3548_v23  ;;  %4147 = vmatpush.msrb.mxu2 %v3957_v8  ;;  %4083 = vmatpush.msrb.mxu1 %v3986_v47  ;;  %v3952_v47 = vld [vmem:[#allocation5 + $0x440] sm:$0xff] }
 0x548   :  { %v8856_v43 = vpop.f32.mrf.mxu1 }
 0x549   :  { %v3554_v58 = vpop.f32.mrf.mxu2  ;;  %4148 = vmatpush.msrb.mxu2 %v3955_v27 }
 0x54b   :  { %v8858_v11 = vpop.f32.mrf.mxu0  ;;  %3745 = vmatmul.f32.gmra.mxu1 %v8660_v38  ;;  %3875 = vmatmul.f32.gmra.mxu3 %v8660_v38 }
 0x54c   :  { %4149 = vmatpush.msrb.mxu2 %v3953_v32 }
 0x54e   :  { %3686 = vmatmul.f32.gmra.mxu0 %v8663_v18  ;;  %3816 = vmatmul.f32.gmra.mxu2 %v8663_v18  ;;  %v3616_v14 = vpop.f32.mrf.mxu3 }
 0x54f   :  { %v8864_v23 = vadd.f32 %v3616_v14, %v3551_v42  ;;  %v3987_v14 = vld [vmem:[#allocation5 + $0x558] sm:$0xff] }
 0x550   :  { %v8866_v63 = vpop.f32.mrf.mxu1  ;;  %4213 = vmatpush.msrb.mxu3 %v3987_v14 }
 0x551   :  { %v3557_v1 = vpop.f32.mrf.mxu2 }
 0x552   :  { %4214 = vmatpush.msrb.mxu3 %v3985_v34 }
 0x553   :  { %v8868_v36 = vpop.f32.mrf.mxu0  ;;  %3748 = vmatmul.f32.gmra.mxu1 %v8676_v59  ;;  %3878 = vmatmul.f32.gmra.mxu3 %v8676_v59 }
 0x554   :  { %11139 = vst [vmem:[#allocation107_spill] sm:$0xff] %v8868_v36  ;;  %v3981_v36 = vld [vmem:[#allocation5 + $0x528] sm:$0xff] }
 0x556   :  { %3689 = vmatmul.f32.gmra.mxu0 %v8679_v13  ;;  %3819 = vmatmul.f32.gmra.mxu2 %v8679_v13  ;;  %v3619_v42 = vpop.f32.mrf.mxu3 }
 0x557   :  { %v8874_v10 = vadd.f32 %v3619_v42, %v3554_v58  ;;  %v3954_v42 = vld [vmem:[#allocation5 + $0x450] sm:$0xff] }
 0x558   :  { %v8876_v57 = vpop.f32.mrf.mxu1  ;;  %4018 = vmatpush.msrb.mxu0 %v3954_v42 }
 0x559   :  { %v3560_v26 = vpop.f32.mrf.mxu2 }
 0x55a   :  { %4019 = vmatpush.msrb.mxu0 %v3952_v47 }
 0x55b   :  { %v8878_v7 = vpop.f32.mrf.mxu0  ;;  %3751 = vmatmul.f32.gmra.mxu1 %v8692_v29  ;;  %3881 = vmatmul.f32.gmra.mxu3 %v8692_v29 }
 0x55c   :  { %11140 = vst [vmem:[#allocation108_spill] sm:$0xff] %v8878_v7  ;;  %v3951_v7 = vld [vmem:[#allocation5 + $0x438] sm:$0xff] }
 0x55d   :  { %4150 = vmatpush.msrb.mxu2 %v3951_v7 }
 0x55e   :  { %3692 = vmatmul.f32.gmra.mxu0 %v8695_v22  ;;  %3822 = vmatmul.f32.gmra.mxu2 %v8695_v22  ;;  %v3622_v58 = vpop.f32.mrf.mxu3 }
 0x55f   :  { %v8884_v31 = vadd.f32 %v3622_v58, %v3557_v1 }
 0x560   :  { %v8886_v8 = vpop.f32.mrf.mxu1 }
 0x561   :  { %v3563_v3 = vpop.f32.mrf.mxu2  ;;  %11141 = vst [vmem:[#allocation109_spill] sm:$0xff] %v8886_v8  ;;  %v3983_v8 = vld [vmem:[#allocation5 + $0x538] sm:$0xff] }
 0x562   :  { %4215 = vmatpush.msrb.mxu3 %v3983_v8 }
 0x563   :  { %v8888_v24 = vpop.f32.mrf.mxu0  ;;  %3754 = vmatmul.f32.gmra.mxu1 %v8706_v35  ;;  %3884 = vmatmul.f32.gmra.mxu3 %v8706_v35 }
 0x564   :  { %11142 = vst [vmem:[#allocation110_spill] sm:$0xff] %v8888_v24  ;;  %v3984_v24 = vld [vmem:[#allocation5 + $0x540] sm:$0xff]  ;;  %4216 = vmatpush.msrb.mxu3 %v3981_v36 }
 0x565   :  { %4084 = vmatpush.msrb.mxu1 %v3984_v24  ;;  %v3950_v24 = vld [vmem:[#allocation5 + $0x430] sm:$0xff] }
 0x566   :  { %3695 = vmatmul.f32.gmra.mxu0 %v8709_v19  ;;  %3825 = vmatmul.f32.gmra.mxu2 %v8709_v19  ;;  %v3625_v1 = vpop.f32.mrf.mxu3 }
 0x567   :  { %v8894_v27 = vadd.f32 %v3625_v1, %v3560_v26  ;;  %4020 = vmatpush.msrb.mxu0 %v3950_v24 }
 0x568   :  { %v8896_v58 = vpop.f32.mrf.mxu1 }
 0x569   :  { %v3566_v14 = vpop.f32.mrf.mxu2  ;;  %11143 = vst [vmem:[#allocation22_spill] sm:$0xff] %v8896_v58  ;;  %v3949_v58 = vld [vmem:[#allocation5 + $0x428] sm:$0xff] }
 0x56a   :  { %4151 = vmatpush.msrb.mxu2 %v3949_v58 }
 0x56b   :  { %v8898_v42 = vpop.f32.mrf.mxu0  ;;  %3757 = vmatmul.f32.gmra.mxu1 %v8718_v6  ;;  %3887 = vmatmul.f32.gmra.mxu3 %v8718_v6 }
 0x56c   :  { %11144 = vst [vmem:[#allocation23_spill] sm:$0xff] %v8898_v42  ;;  %v3982_v42 = vld [vmem:[#allocation5 + $0x530] sm:$0xff] }
 0x56d   :  { %4085 = vmatpush.msrb.mxu1 %v3982_v42  ;;  %v3948_v42 = vld [vmem:[#allocation5 + $0x420] sm:$0xff] }
 0x56e   :  { %3698 = vmatmul.f32.gmra.mxu0 %v8722_v54  ;;  %3828 = vmatmul.f32.gmra.mxu2 %v8722_v54  ;;  %v3628_v34 = vpop.f32.mrf.mxu3 }
 0x56f   :  { %v8904_v26 = vadd.f32 %v3628_v34, %v3563_v3  ;;  %4021 = vmatpush.msrb.mxu0 %v3948_v42 }
 0x570   :  { %v8906_v1 = vpop.f32.mrf.mxu1 }
 0x571   :  { %11145 = vst [vmem:[#allocation51_spill] sm:$0xff] %v8904_v26  ;;  %v3569_v32 = vpop.f32.mrf.mxu2  ;;  %v3947_v26 = vld [vmem:[#allocation5 + $0x418] sm:$0xff] }
 0x572   :  { %11146 = vst [vmem:[#allocation79_spill] sm:$0xff] %v8906_v1  ;;  %v3979_v1 = vld [vmem:[#allocation5 + $0x518] sm:$0xff]  ;;  %4152 = vmatpush.msrb.mxu2 %v3947_v26  ;;  %v3944_v26 = vld [vmem:[#allocation5 + $0x400] sm:$0xff] }
 0x573   :  { %v8908_v47 = vpop.f32.mrf.mxu0  ;;  %3760 = vmatmul.f32.gmra.mxu1 %v8729_v20  ;;  %3890 = vmatmul.f32.gmra.mxu3 %v8729_v20 }
 0x574   :  { %11147 = vst [vmem:[#allocation80_spill] sm:$0xff] %v8908_v47  ;;  %v3980_v47 = vld [vmem:[#allocation5 + $0x520] sm:$0xff]  ;;  %4217 = vmatpush.msrb.mxu3 %v3979_v1 }
 0x575   :  { %4086 = vmatpush.msrb.mxu1 %v3980_v47  ;;  %v3946_v47 = vld [vmem:[#allocation5 + $0x410] sm:$0xff] }
 0x576   :  { %3701 = vmatmul.f32.gmra.mxu0 %v8732_v37  ;;  %3831 = vmatmul.f32.gmra.mxu2 %v8732_v37  ;;  %v3631_v7 = vpop.f32.mrf.mxu3 }
 0x577   :  { %v8914_v3 = vadd.f32 %v3631_v7, %v3566_v14  ;;  %4022 = vmatpush.msrb.mxu0 %v3946_v47 }
 0x578   :  { %v8916_v34 = vpop.f32.mrf.mxu1 }
 0x579   :  { %11148 = vst [vmem:[#allocation52_spill] sm:$0xff] %v8914_v3  ;;  %v3572_v8 = vpop.f32.mrf.mxu2  ;;  %v3945_v3 = vld [vmem:[#allocation5 + $0x408] sm:$0xff]  ;;  %4023 = vmatpush.msrb.mxu0 %v3944_v26 }
 0x57a   :  { %11149 = vst [vmem:[#allocation111_spill] sm:$0xff] %v8916_v34  ;;  %v3977_v34 = vld [vmem:[#allocation5 + $0x508] sm:$0xff]  ;;  %4153 = vmatpush.msrb.mxu2 %v3945_v3 }
 0x57b   :  { %v8918_v24 = vpop.f32.mrf.mxu0  ;;  %3763 = vmatmul.f32.gmra.mxu1 %v8739_v25  ;;  %3893 = vmatmul.f32.gmra.mxu3 %v8739_v25 }
 0x57c   :  { %11150 = vst [vmem:[#allocation112_spill] sm:$0xff] %v8918_v24  ;;  %v3978_v24 = vld [vmem:[#allocation5 + $0x510] sm:$0xff]  ;;  %4218 = vmatpush.msrb.mxu3 %v3977_v34 }
 0x57d   :  { %4087 = vmatpush.msrb.mxu1 %v3978_v24 }
 0x57e   :  { %3704 = vmatmul.f32.gmra.mxu0 %v8742_v52  ;;  %3834 = vmatmul.f32.gmra.mxu2 %v8742_v52  ;;  %v3634_v36 = vpop.f32.mrf.mxu3 }
 0x57f   :  { %v8924_v14 = vadd.f32 %v3634_v36, %v3569_v32 }
 0x580   :  { %v8926_v7 = vpop.f32.mrf.mxu1 }
 0x581   :  { %11151 = vst [vmem:[#allocation24_spill] sm:$0xff] %v8924_v14  ;;  %v3575_v58 = vpop.f32.mrf.mxu2 }
 0x582   :  { %11152 = vst [vmem:[#allocation25_spill] sm:$0xff] %v8926_v7 }
 0x583   :  { %v8928_v42 = vpop.f32.mrf.mxu0  ;;  %3766 = vmatmul.f32.gmra.mxu1 %v8749_v49  ;;  %3896 = vmatmul.f32.gmra.mxu3 %v8749_v49 }
 0x584   :  { %11153 = vst [vmem:[#allocation139_spill] sm:$0xff] %v8928_v42  ;;  %v3976_v42 = vld [vmem:[#allocation5 + $0x500] sm:$0xff] }
 0x585   :  { %4088 = vmatpush.msrb.mxu1 %v3976_v42 }
 0x586   :  { %3707 = vmatmul.f32.gmra.mxu0 %v8752_v56  ;;  %3837 = vmatmul.f32.gmra.mxu2 %v8752_v56  ;;  %v3637_v32 = vpop.f32.mrf.mxu3 }
 0x587   :  { %v8934_v1 = vadd.f32 %v3637_v32, %v3572_v8 }
 0x588   :  { %v8936_v47 = vpop.f32.mrf.mxu1 }
 0x589   :  { %11154 = vst [vmem:[#allocation140_spill] sm:$0xff] %v8934_v1  ;;  %v3578_v36 = vpop.f32.mrf.mxu2 }
 0x58a   :  { %11155 = vst [vmem:[#allocation53_spill] sm:$0xff] %v8936_v47 }
 0x58b   :  { %v8938_v24 = vpop.f32.mrf.mxu0  ;;  %3769 = vmatmul.f32.gmra.mxu1 %v8759_v16  ;;  %3899 = vmatmul.f32.gmra.mxu3 %v8759_v16 }
 0x58c   :  { %11156 = vst [vmem:[#allocation81_spill] sm:$0xff] %v8938_v24 }
 0x58e   :  { %3710 = vmatmul.f32.gmra.mxu0 %v8762_v40  ;;  %3840 = vmatmul.f32.gmra.mxu2 %v8762_v40  ;;  %v3640_v3 = vpop.f32.mrf.mxu3 }
 0x58f   :  { %v8944_v34 = vadd.f32 %v3640_v3, %v3575_v58 }
 0x590   :  { %v8946_v26 = vpop.f32.mrf.mxu1 }
 0x591   :  { %11157 = vst [vmem:[#allocation82_spill] sm:$0xff] %v8944_v34  ;;  %v3581_v8 = vpop.f32.mrf.mxu2 }
 0x592   :  { %11158 = vst [vmem:[#allocation54_spill] sm:$0xff] %v8946_v26 }
 0x593   :  { %v8948_v32 = vpop.f32.mrf.mxu0  ;;  %3772 = vmatmul.f32.gmra.mxu1 %v8769_v45  ;;  %3902 = vmatmul.f32.gmra.mxu3 %v8769_v45 }
 0x594   :  { %11159 = vst [vmem:[#allocation113_spill] sm:$0xff] %v8948_v32 }
 0x596   :  { %3713 = vmatmul.f32.gmra.mxu0 %v8772_v9  ;;  %3843 = vmatmul.f32.gmra.mxu2 %v8772_v9  ;;  %v3643_v42 = vpop.f32.mrf.mxu3 }
 0x597   :  { %v8954_v24 = vadd.f32 %v3643_v42, %v3578_v36 }
 0x598   :  { %v8956_v47 = vpop.f32.mrf.mxu1 }
 0x599   :  { %11160 = vst [vmem:[#allocation114_spill] sm:$0xff] %v8954_v24  ;;  %v3584_v1 = vpop.f32.mrf.mxu2 }
 0x59a   :  { %11161 = vst [vmem:[#allocation26_spill] sm:$0xff] %v8956_v47 }
 0x59b   :  { %v8958_v58 = vpop.f32.mrf.mxu0  ;;  %3775 = vmatmul.f32.gmra.mxu1 %v8779_v28  ;;  %3905 = vmatmul.f32.gmra.mxu3 %v8779_v28 }
 0x59e   :  { %4024 = vmatmul.f32.vlgmr.msrb.gmra.mxu0 %v8575_v4  ;;  %4154 = vmatmul.f32.vlgmr.msrb.gmra.mxu2 %v8575_v4  ;;  %v3646_v3 = vpop.f32.mrf.mxu3 }
 0x59f   :  { %v8964_v32 = vadd.f32 %v3646_v3, %v3581_v8 }
 0x5a0   :  { %v8966_v26 = vpop.f32.mrf.mxu1 }
 0x5a1   :  { %11162 = vst [vmem:[#allocation27_spill] sm:$0xff] %v8964_v32  ;;  %v3799_v34 = vpop.f32.mrf.mxu2 }
 0x5a2   :  { %11163 = vst [vmem:[#allocation141_spill] sm:$0xff] %v8966_v26  ;;  %v3800_v36 = vadd.f32 %v3799_v34, %v8824_v53 }
 0x5a3   :  { %v8969_v42 = vpop.f32.mrf.mxu0  ;;  %3778 = vmatmul.f32.gmra.mxu1 %v8789_v46  ;;  %3908 = vmatmul.f32.gmra.mxu3 %v8789_v46 }
 0x5a6   :  { %4027 = vmatmul.f32.gmra.mxu0 %v8628_v50  ;;  %4157 = vmatmul.f32.gmra.mxu2 %v8628_v50  ;;  %v3649_v24 = vpop.f32.mrf.mxu3 }
 0x5a7   :  { %v8975_v4 = vadd.f32 %v3649_v24, %v3584_v1 }
 0x5a8   :  { %v8977_v3 = vpop.f32.mrf.mxu1 }
 0x5a9   :  { %11164 = vst [vmem:[#allocation142_spill] sm:$0xff] %v8975_v4  ;;  %v3802_v8 = vpop.f32.mrf.mxu2 }
 0x5aa   :  { %v3803_v32 = vadd.f32 %v3802_v8, %v8834_v44 }
 0x5ab   :  { %v8980_v26 = vpop.f32.mrf.mxu0  ;;  %4089 = vmatmul.f32.vlgmr.msrb.gmra.mxu1 %v8660_v38  ;;  %4219 = vmatmul.f32.vlgmr.msrb.gmra.mxu3 %v8660_v38 }
 0x5ae   :  { %4030 = vmatmul.f32.gmra.mxu0 %v8663_v18  ;;  %4160 = vmatmul.f32.gmra.mxu2 %v8663_v18  ;;  %v3864_v53 = vpop.f32.mrf.mxu3 }
 0x5af   :  { %v8986_v50 = vadd.f32 %v3864_v53, %v3800_v36 }
 0x5b0   :  { %v8988_v24 = vpop.f32.mrf.mxu1 }
 0x5b1   :  { %v3805_v1 = vpop.f32.mrf.mxu2 }
 0x5b2   :  { %v3806_v34 = vadd.f32 %v3805_v1, %v8844_v15 }
 0x5b3   :  { %v8991_v4 = vpop.f32.mrf.mxu0  ;;  %4092 = vmatmul.f32.gmra.mxu1 %v8676_v59  ;;  %4222 = vmatmul.f32.gmra.mxu3 %v8676_v59 }
 0x5b6   :  { %4033 = vmatmul.f32.gmra.mxu0 %v8679_v13  ;;  %4163 = vmatmul.f32.gmra.mxu2 %v8679_v13  ;;  %v3867_v38 = vpop.f32.mrf.mxu3 }
 0x5b7   :  { %v8997_v18 = vadd.f32 %v3867_v38, %v3803_v32 }
 0x5b8   :  { %v8999_v36 = vpop.f32.mrf.mxu1 }
 0x5b9   :  { %v3808_v44 = vpop.f32.mrf.mxu2 }
 0x5ba   :  { %v3809_v8 = vadd.f32 %v3808_v44, %v8854_v0 }
 0x5bb   :  { %v9002_v53 = vpop.f32.mrf.mxu0  ;;  %4095 = vmatmul.f32.gmra.mxu1 %v8692_v29  ;;  %4225 = vmatmul.f32.gmra.mxu3 %v8692_v29 }
 0x5be   :  { %4036 = vmatmul.f32.gmra.mxu0 %v8695_v22  ;;  %4166 = vmatmul.f32.gmra.mxu2 %v8695_v22  ;;  %v3870_v59 = vpop.f32.mrf.mxu3 }
 0x5bf   :  { %v9008_v13 = vadd.f32 %v3870_v59, %v3806_v34 }
 0x5c0   :  { %v9010_v32 = vpop.f32.mrf.mxu1 }
 0x5c1   :  { %v3811_v15 = vpop.f32.mrf.mxu2 }
 0x5c2   :  { %v3812_v1 = vadd.f32 %v3811_v15, %v8864_v23 }
 0x5c3   :  { %v9013_v38 = vpop.f32.mrf.mxu0  ;;  %4098 = vmatmul.f32.gmra.mxu1 %v8706_v35  ;;  %4228 = vmatmul.f32.gmra.mxu3 %v8706_v35 }
 0x5c6   :  { %4039 = vmatmul.f32.gmra.mxu0 %v8709_v19  ;;  %4169 = vmatmul.f32.gmra.mxu2 %v8709_v19  ;;  %v3873_v29 = vpop.f32.mrf.mxu3 }
 0x5c7   :  { %v9019_v22 = vadd.f32 %v3873_v29, %v3809_v8 }
 0x5c8   :  { %v9021_v34 = vpop.f32.mrf.mxu1 }
 0x5c9   :  { %v3814_v0 = vpop.f32.mrf.mxu2 }
 0x5ca   :  { %v3815_v44 = vadd.f32 %v3814_v0, %v8874_v10 }
 0x5cb   :  { %v9024_v59 = vpop.f32.mrf.mxu0  ;;  %4101 = vmatmul.f32.gmra.mxu1 %v8718_v6  ;;  %4231 = vmatmul.f32.gmra.mxu3 %v8718_v6 }
 0x5ce   :  { %4042 = vmatmul.f32.gmra.mxu0 %v8722_v54  ;;  %4172 = vmatmul.f32.gmra.mxu2 %v8722_v54  ;;  %v3876_v35 = vpop.f32.mrf.mxu3 }
 0x5cf   :  { %v9030_v19 = vadd.f32 %v3876_v35, %v3812_v1 }
 0x5d0   :  { %v9032_v8 = vpop.f32.mrf.mxu1 }
 0x5d1   :  { %v3817_v23 = vpop.f32.mrf.mxu2 }
 0x5d2   :  { %v3818_v15 = vadd.f32 %v3817_v23, %v8884_v31 }
 0x5d3   :  { %v9035_v29 = vpop.f32.mrf.mxu0  ;;  %4104 = vmatmul.f32.gmra.mxu1 %v8729_v20  ;;  %4234 = vmatmul.f32.gmra.mxu3 %v8729_v20 }
 0x5d6   :  { %4045 = vmatmul.f32.gmra.mxu0 %v8732_v37  ;;  %4175 = vmatmul.f32.gmra.mxu2 %v8732_v37  ;;  %v3879_v6 = vpop.f32.mrf.mxu3 }
 0x5d7   :  { %v9041_v54 = vadd.f32 %v3879_v6, %v3815_v44 }
 0x5d8   :  { %v9043_v1 = vpop.f32.mrf.mxu1 }
 0x5d9   :  { %v3820_v10 = vpop.f32.mrf.mxu2 }
 0x5da   :  { %v3821_v0 = vadd.f32 %v3820_v10, %v8894_v27 }
 0x5db   :  { %v9046_v35 = vpop.f32.mrf.mxu0  ;;  %4107 = vmatmul.f32.gmra.mxu1 %v8739_v25  ;;  %4237 = vmatmul.f32.gmra.mxu3 %v8739_v25 }
 0x5de   :  { %4048 = vmatmul.f32.gmra.mxu0 %v8742_v52  ;;  %4178 = vmatmul.f32.gmra.mxu2 %v8742_v52  ;;  %v3882_v20 = vpop.f32.mrf.mxu3 }
 0x5df   :  { %v9052_v37 = vadd.f32 %v3882_v20, %v3818_v15 }
 0x5e0   :  { %v9056_v44 = vpop.f32.mrf.mxu1 }
 0x5e1   :  { %v9054_v31 = vpop.f32.mrf.mxu2 }
 0x5e3   :  { %v9058_v23 = vpop.f32.mrf.mxu0  ;;  %4110 = vmatmul.f32.gmra.mxu1 %v8749_v49  ;;  %4240 = vmatmul.f32.gmra.mxu3 %v8749_v49 }
 0x5e6   :  { %4051 = vmatmul.f32.gmra.mxu0 %v8752_v56  ;;  %4181 = vmatmul.f32.gmra.mxu2 %v8752_v56  ;;  %v3885_v25 = vpop.f32.mrf.mxu3 }
 0x5e7   :  { %v9064_v27 = vadd.f32 %v3885_v25, %v3821_v0 }
 0x5e8   :  { %v9068_v15 = vpop.f32.mrf.mxu1 }
 0x5e9   :  { %v9066_v52 = vpop.f32.mrf.mxu2 }
 0x5eb   :  { %v9070_v6 = vpop.f32.mrf.mxu0  ;;  %4113 = vmatmul.f32.gmra.mxu1 %v8759_v16  ;;  %4243 = vmatmul.f32.gmra.mxu3 %v8759_v16 }
 0x5ec   :  { %11165 = vst [vmem:[#allocation55_spill] sm:$0xff] %v9070_v6 }
 0x5ee   :  { %4054 = vmatmul.f32.gmra.mxu0 %v8762_v40  ;;  %4184 = vmatmul.f32.gmra.mxu2 %v8762_v40  ;;  %v9076_v49 = vpop.f32.mrf.mxu3 }
 0x5f0   :  { %v9080_v10 = vpop.f32.mrf.mxu1 }
 0x5f1   :  { %v9078_v56 = vpop.f32.mrf.mxu2 }
 0x5f2   :  { %11166 = vst [vmem:[#allocation83_spill] sm:$0xff] %v9078_v56 }
 0x5f3   :  { %v9082_v0 = vpop.f32.mrf.mxu0  ;;  %4116 = vmatmul.f32.gmra.mxu1 %v8769_v45  ;;  %4246 = vmatmul.f32.gmra.mxu3 %v8769_v45 }
 0x5f4   :  { %11167 = vst [vmem:[#allocation84_spill] sm:$0xff] %v9082_v0 }
 0x5f6   :  { %4057 = vmatmul.f32.gmra.mxu0 %v8772_v9  ;;  %4187 = vmatmul.f32.gmra.mxu2 %v8772_v9  ;;  %v9088_v16 = vpop.f32.mrf.mxu3 }
 0x5f7   :  { %11168 = vst [vmem:[#allocation56_spill] sm:$0xff] %v9088_v16 }
 0x5f8   :  { %v9092_v40 = vpop.f32.mrf.mxu1 }
 0x5f9   :  { %v9090_v20 = vpop.f32.mrf.mxu2  ;;  %11170 = vst [vmem:[#allocation116_spill] sm:$0xff] %v9092_v40 }
 0x5fa   :  { %11169 = vst [vmem:[#allocation115_spill] sm:$0xff] %v9090_v20 }
 0x5fb   :  { %v9094_v25 = vpop.f32.mrf.mxu0  ;;  %4119 = vmatmul.f32.gmra.mxu1 %v8779_v28  ;;  %4249 = vmatmul.f32.gmra.mxu3 %v8779_v28 }
 0x5fc   :  { %11171 = vst [vmem:[#allocation28_spill] sm:$0xff] %v9094_v25 }
 0x5fe   :  { %4060 = vmatmul.f32.gmra.mxu0 %v8782_v2  ;;  %4190 = vmatmul.f32.gmra.mxu2 %v8782_v2  ;;  %v9100_v45 = vpop.f32.mrf.mxu3 }
 0x5ff   :  { %11172 = vst [vmem:[#allocation29_spill] sm:$0xff] %v9100_v45 }
 0x600   :  { %v9104_v9 = vpop.f32.mrf.mxu1 }
 0x601   :  { %v9102_v47 = vpop.f32.mrf.mxu2  ;;  %11174 = vst [vmem:[#allocation144_spill] sm:$0xff] %v9104_v9  ;;  %v3478_v9 = vadd.f32 %v8826_v60, %v8810_v48  ;;  %v3481_v48 = vadd.f32 %v8836_v62, %v8818_v30 }
 0x602   :  { %11173 = vst [vmem:[#allocation143_spill] sm:$0xff] %v9102_v47 }
 0x603   :  { %v9106_v0 = vpop.f32.mrf.mxu0  ;;  %4122 = vmatmul.f32.gmra.mxu1 %v8789_v46  ;;  %4252 = vmatmul.f32.gmra.mxu3 %v8789_v46 }
 0x604   :  { %11175 = vst [vmem:[#allocation57_spill] sm:$0xff] %v9106_v0 }
 0x606   :  { %4063 = vmatmul.f32.gmra.mxu0 %v8792_v55  ;;  %4193 = vmatmul.f32.gmra.mxu2 %v8792_v55  ;;  %v9112_v28 = vpop.f32.mrf.mxu3 }
 0x607   :  { %11176 = vst [vmem:[#allocation85_spill] sm:$0xff] %v9112_v28  ;;  %v3475_v28 = vadd.f32 %v8816_v5, %v8801_v12 }
 0x608   :  { %v9116_v2 = vpop.f32.mrf.mxu1 }
 0x609   :  { %v9114_v25 = vpop.f32.mrf.mxu2  ;;  %11178 = vst [vmem:[#allocation58_spill] sm:$0xff] %v9116_v2  ;;  %v3670_v45 = vadd.f32 %v8958_v58, %v3475_v28 }
 0x60a   :  { %11177 = vst [vmem:[#allocation86_spill] sm:$0xff] %v9114_v25 }
 0x60b   :  { %v9118_v20 = vpop.f32.mrf.mxu0  ;;  %4125 = vmatmul.f32.gmra.mxu1 %v8799_v17  ;;  %4255 = vmatmul.f32.gmra.mxu3 %v8799_v17 }
 0x60c   :  { %11179 = vst [vmem:[#allocation117_spill] sm:$0xff] %v9118_v20 }
 0x60e   :  { %4066 = vmatmul.f32.gmra.mxu0 %v11138_v39  ;;  %4196 = vmatmul.f32.gmra.mxu2 %v11138_v39  ;;  %v9124_v46 = vpop.f32.mrf.mxu3 }
 0x60f   :  { %11180 = vst [vmem:[#allocation118_spill] sm:$0xff] %v9124_v46 }
 0x610   :  { %v9128_v55 = vpop.f32.mrf.mxu1 }
 0x611   :  { %v9126_v0 = vpop.f32.mrf.mxu2  ;;  %11182 = vst [vmem:[#allocation31_spill] sm:$0xff] %v9128_v55 }
 0x612   :  { %11181 = vst [vmem:[#allocation30_spill] sm:$0xff] %v9126_v0 }
 0x613   :  { %v9130_v47 = vpop.f32.mrf.mxu0  ;;  %4128 = vmatmul.f32.gmra.mxu1 %v8808_v51  ;;  %4258 = vmatmul.f32.gmra.mxu3 %v8808_v51 }
 0x614   :  { %11183 = vst [vmem:[#allocation145_spill] sm:$0xff] %v9130_v47 }
 0x616   :  { %4069 = vmatmul.f32.gmra.mxu0 %v11138_v39  ;;  %4199 = vmatmul.f32.gmra.mxu2 %v11138_v39  ;;  %v9136_v17 = vpop.f32.mrf.mxu3 }
 0x617   :  { %11184 = vst [vmem:[#allocation146_spill] sm:$0xff] %v9136_v17 }
 0x618   :  { %v9140_v25 = vpop.f32.mrf.mxu1 }
 0x619   :  { %v9138_v20 = vpop.f32.mrf.mxu2  ;;  %11186 = vst [vmem:[#allocation87_spill] sm:$0xff] %v9140_v25 }
 0x61a   :  { %11185 = vst [vmem:[#allocation59_spill] sm:$0xff] %v9138_v20 }
 0x61b   :  { %v4025_v46 = vpop.f32.mrf.mxu0  ;;  %4131 = vmatmul.f32.gmra.mxu1 %v11138_v39  ;;  %4261 = vmatmul.f32.gmra.mxu3 %v11138_v39 }
 0x61e   :  { %v9144_v47 = vpop.f32.mrf.mxu3 }
 0x61f   :  { %11187 = vst [vmem:[#allocation88_spill] sm:$0xff] %v9144_v47 }
 0x620   :  { %v9146_v55 = vpop.f32.mrf.mxu1 }
 0x621   :  { %v4155_v0 = vpop.f32.mrf.mxu2  ;;  %11188 = vst [vmem:[#allocation60_spill] sm:$0xff] %v9146_v55  ;;  %v3673_v55 = vadd.f32 %v8969_v42, %v3478_v9  ;;  %v3676_v42 = vadd.f32 %v8980_v26, %v3481_v48  ;;  %v3484_v26 = vadd.f32 %v8846_v21, %v8828_v41  ;;  %v3487_v41 = vadd.f32 %v8856_v43, %v8838_v33 }
 0x622   :  { %v3490_v33 = vadd.f32 %v8866_v63, %v8848_v61  ;;  %v3493_v61 = vadd.f32 %v8876_v57, %v8858_v11  ;;  %v11190_v11 = vld [vmem:[#allocation107_spill] sm:$0xff]  ;;  %v11191_v57 = vld [vmem:[#allocation109_spill] sm:$0xff] }
 0x623   :  { %v4028_v51 = vpop.f32.mrf.mxu0  ;;  %4134 = vmatmul.f32.gmra.mxu1 %v11138_v39  ;;  %4264 = vmatmul.f32.gmra.mxu3 %v11138_v39  ;;  %v3735_v39 = vadd.f32 %v8977_v3, %v3670_v45 }
 0x626   :  { %v9150_v17 = vpop.f32.mrf.mxu3 }
 0x627   :  { %11189 = vst [vmem:[#allocation119_spill] sm:$0xff] %v9150_v17  ;;  %v3738_v17 = vadd.f32 %v8988_v24, %v3673_v55 }
 0x628   :  { %v4090_v2 = vpop.f32.mrf.mxu1 }
 0x629   :  { %v4158_v20 = vpop.f32.mrf.mxu2  ;;  %v4091_v56 = vadd.f32 %v4090_v2, %v4025_v46 }
 0x62b   :  { %v4031_v25 = vpop.f32.mrf.mxu0  ;;  %v9160_v6 = vadd.f32 %v4091_v56, %v3735_v39 }
 0x62e   :  { %v4220_v47 = vpop.f32.mrf.mxu3 }
 0x62f   :  { %v4221_v5 = vadd.f32 %v4220_v47, %v4155_v0 }
 0x630   :  { %v4093_v7 = vpop.f32.mrf.mxu1 }
 0x631   :  { %v4161_v14 = vpop.f32.mrf.mxu2  ;;  %v4094_v40 = vadd.f32 %v4093_v7, %v4028_v51  ;;  %v3741_v7 = vadd.f32 %v8999_v36, %v3676_v42  ;;  %v9171_v39 = vadd.f32 %v4221_v5, %v8986_v50  ;;  %v3679_v36 = vadd.f32 %v8991_v4, %v3484_v26 }
 0x633   :  { %v4034_v16 = vpop.f32.mrf.mxu0  ;;  %v9162_v12 = vadd.f32 %v4094_v40, %v3738_v17 }
 0x635   :  { %v4300_v60 = vadd.f32 %v9162_v12, %v9160_v6 }
 0x636   :  { %v4223_v58 = vpop.f32.mrf.mxu3 }
 0x637   :  { %v4224_v9 = vadd.f32 %v4223_v58, %v4158_v20 }
 0x638   :  { %v4096_v45 = vpop.f32.mrf.mxu1 }
 0x639   :  { %v4164_v3 = vpop.f32.mrf.mxu2  ;;  %v9174_v24 = vadd.f32 %v4224_v9, %v8997_v18  ;;  %v4097_v56 = vadd.f32 %v4096_v45, %v4031_v25  ;;  %v3744_v18 = vadd.f32 %v9010_v32, %v3679_v36  ;;  %v3685_v9 = vadd.f32 %v9013_v38, %v3490_v33 }
 0x63b   :  { %v4037_v30 = vpop.f32.mrf.mxu0  ;;  %v4321_v62 = vadd.f32 %v9174_v24, %v9171_v39  ;;  %v9178_v47 = vadd.f32 %v4097_v56, %v3741_v7 }
 0x63d   :  { %v4301_v0 = vadd.f32 %v4300_v60, %v9178_v47 }
 0x63e   :  { %v4226_v20 = vpop.f32.mrf.mxu3 }
 0x63f   :  { %v4227_v50 = vadd.f32 %v4226_v20, %v4161_v14  ;;  %v3682_v14 = vadd.f32 %v9002_v53, %v3487_v41 }
 0x640   :  { %v4099_v28 = vpop.f32.mrf.mxu1 }
 0x641   :  { %v4167_v40 = vpop.f32.mrf.mxu2  ;;  %v9186_v25 = vadd.f32 %v4227_v50, %v9008_v13  ;;  %v4100_v2 = vadd.f32 %v4099_v28, %v4034_v16  ;;  %v3747_v13 = vadd.f32 %v9021_v34, %v3682_v14 }
 0x643   :  { %v4040_v46 = vpop.f32.mrf.mxu0  ;;  %v4322_v55 = vadd.f32 %v4321_v62, %v9186_v25  ;;  %v9189_v17 = vadd.f32 %v4100_v2, %v3744_v18 }
 0x645   :  { %v4302_v21 = vadd.f32 %v4301_v0, %v9189_v17  ;;  %v3688_v0 = vadd.f32 %v9024_v59, %v3493_v61  ;;  %v11195_v61 = vld [vmem:[#allocation79_spill] sm:$0xff] }
 0x646   :  { %v4229_v4 = vpop.f32.mrf.mxu3 }
 0x647   :  { %v4230_v51 = vadd.f32 %v4229_v4, %v4164_v3 }
 0x648   :  { %v4102_v32 = vpop.f32.mrf.mxu1 }
 0x649   :  { %v4170_v48 = vpop.f32.mrf.mxu2  ;;  %v9197_v16 = vadd.f32 %v4230_v51, %v9019_v22  ;;  %v4103_v5 = vadd.f32 %v4102_v32, %v4037_v30  ;;  %v3750_v22 = vadd.f32 %v9032_v8, %v3685_v9 }
 0x64b   :  { %v4043_v60 = vpop.f32.mrf.mxu0  ;;  %v4323_v58 = vadd.f32 %v4322_v55, %v9197_v16  ;;  %v9200_v42 = vadd.f32 %v4103_v5, %v3747_v13  ;;  %v11192_v5 = vld [vmem:[#allocation108_spill] sm:$0xff] }
 0x64d   :  { %v4303_v43 = vadd.f32 %v4302_v21, %v9200_v42 }
 0x64e   :  { %v4232_v53 = vpop.f32.mrf.mxu3 }
 0x64f   :  { %v4233_v3 = vadd.f32 %v4232_v53, %v4167_v40 }
 0x650   :  { %v4105_v34 = vpop.f32.mrf.mxu1 }
 0x651   :  { %v4173_v45 = vpop.f32.mrf.mxu2  ;;  %v9208_v7 = vadd.f32 %v4233_v3, %v9030_v19  ;;  %v4106_v56 = vadd.f32 %v4105_v34, %v4040_v46  ;;  %v3753_v19 = vadd.f32 %v9043_v1, %v3688_v0  ;;  %v3496_v46 = vadd.f32 %v11191_v57, %v11190_v11  ;;  %v4808_v0 = vld [vmem:[#allocation7 + $0x3f0] sm:$0xff] }
 0x652   :  { %4875 = vmatpush.msra.mxu1 %v4808_v0  ;;  %v4804_v0 = vld [vmem:[#allocation7 + $0x3d0] sm:$0xff] }
 0x653   :  { %v4046_v30 = vpop.f32.mrf.mxu0  ;;  %v4324_v62 = vadd.f32 %v4323_v58, %v9208_v7  ;;  %v9211_v26 = vadd.f32 %v4106_v56, %v3750_v22  ;;  %v3691_v41 = vadd.f32 %v9035_v29, %v3496_v46  ;;  %v4777_v56 = vld [vmem:[#allocation7 + $0x2f8] sm:$0xff] }
 0x654   :  { %4940 = vmatpush.msra.mxu2 %v4777_v56  ;;  %v4773_v56 = vld [vmem:[#allocation7 + $0x2d8] sm:$0xff] }
 0x655   :  { %v4304_v63 = vadd.f32 %v4303_v43, %v9211_v26 }
 0x656   :  { %v4235_v38 = vpop.f32.mrf.mxu3 }
 0x657   :  { %v4236_v20 = vadd.f32 %v4235_v38, %v4170_v48 }
 0x658   :  { %v4108_v8 = vpop.f32.mrf.mxu1 }
 0x659   :  { %v4176_v36 = vpop.f32.mrf.mxu2  ;;  %v9219_v50 = vadd.f32 %v4236_v20, %v9041_v54  ;;  %v4109_v40 = vadd.f32 %v4108_v8, %v4043_v60  ;;  %v3756_v54 = vadd.f32 %v9056_v44, %v3691_v41  ;;  %v11193_v60 = vld [vmem:[#allocation22_spill] sm:$0xff] }
 0x65a   :  { %v3499_v58 = vadd.f32 %v11193_v60, %v11192_v5  ;;  %v11201_v60 = vld [vmem:[#allocation56_spill] sm:$0xff] }
 0x65b   :  { %v4049_v28 = vpop.f32.mrf.mxu0  ;;  %v4325_v18 = vadd.f32 %v4324_v62, %v9219_v50  ;;  %v9222_v2 = vadd.f32 %v4109_v40, %v3753_v19  ;;  %v11194_v62 = vld [vmem:[#allocation110_spill] sm:$0xff] }
 0x65c   :  { %v3694_v43 = vadd.f32 %v9046_v35, %v3499_v58  ;;  %v3502_v35 = vadd.f32 %v11195_v61, %v11194_v62  ;;  %v11203_v62 = vld [vmem:[#allocation80_spill] sm:$0xff]  ;;  %v11204_v61 = vld [vmem:[#allocation25_spill] sm:$0xff] }
 0x65d   :  { %v4305_v55 = vadd.f32 %v4304_v63, %v9222_v2  ;;  %v11196_v63 = vld [vmem:[#allocation51_spill] sm:$0xff] }
 0x65e   :  { %v4238_v59 = vpop.f32.mrf.mxu3  ;;  %v3759_v44 = vadd.f32 %v9068_v15, %v3694_v43  ;;  %v3824_v38 = vadd.f32 %v9054_v31, %v11196_v63  ;;  %v3697_v8 = vadd.f32 %v9058_v23, %v3502_v35  ;;  %v11198_v23 = vld [vmem:[#allocation111_spill] sm:$0xff]  ;;  %v3508_v35 = vadd.f32 %v11204_v61, %v11203_v62  ;;  %v11205_v63 = vld [vmem:[#allocation24_spill] sm:$0xff] }
 0x65f   :  { %v4239_v21 = vadd.f32 %v4238_v59, %v4173_v45  ;;  %v4807_v59 = vld [vmem:[#allocation7 + $0x3e8] sm:$0xff] }
 0x660   :  { %v4111_v4 = vpop.f32.mrf.mxu1  ;;  %v3889_v19 = vadd.f32 %v9076_v49, %v3824_v38  ;;  %v11199_v49 = vld [vmem:[#allocation52_spill] sm:$0xff] }
 0x661   :  { %v4179_v1 = vpop.f32.mrf.mxu2  ;;  %v9230_v14 = vadd.f32 %v4239_v21, %v9052_v37  ;;  %v4112_v51 = vadd.f32 %v4111_v4, %v4046_v30  ;;  %v4809_v30 = vld [vmem:[#allocation7 + $0x3f8] sm:$0xff] }
 0x662   :  { %5005 = vmatpush.msra.mxu3 %v4809_v30  ;;  %v11197_v21 = vld [vmem:[#allocation23_spill] sm:$0xff] }
 0x663   :  { %v4326_v48 = vadd.f32 %v4325_v18, %v9230_v14  ;;  %v9233_v32 = vadd.f32 %v4112_v51, %v3756_v54  ;;  %v4052_v13 = vpop.f32.mrf.mxu0  ;;  %v3762_v18 = vadd.f32 %v9080_v10, %v3697_v8  ;;  %v3505_v4 = vadd.f32 %v11198_v23, %v11197_v21  ;;  %v4774_v54 = vld [vmem:[#allocation7 + $0x2e0] sm:$0xff]  ;;  %v4805_v30 = vld [vmem:[#allocation7 + $0x3d8] sm:$0xff] }
 0x664   :  { %5006 = vmatpush.msra.mxu3 %v4807_v59  ;;  %v4806_v51 = vld [vmem:[#allocation7 + $0x3e0] sm:$0xff] }
 0x665   :  { %v4306_v33 = vadd.f32 %v4305_v55, %v9233_v32  ;;  %v4775_v55 = vld [vmem:[#allocation7 + $0x2e8] sm:$0xff]  ;;  %4876 = vmatpush.msra.mxu1 %v4806_v51  ;;  %v11207_v8 = vld [vmem:[#allocation84_spill] sm:$0xff] }
 0x666   :  { %v4241_v29 = vpop.f32.mrf.mxu3  ;;  %4941 = vmatpush.msra.mxu2 %v4775_v55  ;;  %5007 = vmatpush.msra.mxu3 %v4805_v30  ;;  %v11211_v51 = vld [vmem:[#allocation53_spill] sm:$0xff] }
 0x667   :  { %v4242_v53 = vadd.f32 %v4241_v29, %v4176_v36  ;;  %4877 = vmatpush.msra.mxu1 %v4804_v0  ;;  %v11219_v0 = vld [vmem:[#allocation82_spill] sm:$0xff] }
 0x668   :  { %v4114_v9 = vpop.f32.mrf.mxu1  ;;  %4942 = vmatpush.msra.mxu2 %v4773_v56  ;;  %v11216_v56 = vld [vmem:[#allocation58_spill] sm:$0xff] }
 0x669   :  { %v9241_v37 = vadd.f32 %v4242_v53, %v9064_v27  ;;  %v4115_v3 = vadd.f32 %v4114_v9, %v4049_v28  ;;  %v4182_v45 = vpop.f32.mrf.mxu2  ;;  %v4776_v27 = vld [vmem:[#allocation7 + $0x2f0] sm:$0xff]  ;;  %v11202_v53 = vld [vmem:[#allocation116_spill] sm:$0xff] }
 0x66a   :  { %4810 = vmatpush.msra.mxu0 %v4776_v27  ;;  %v4772_v27 = vld [vmem:[#allocation7 + $0x2d0] sm:$0xff] }
 0x66b   :  { %v4327_v34 = vadd.f32 %v4326_v48, %v9241_v37  ;;  %v9244_v22 = vadd.f32 %v4115_v3, %v3759_v44  ;;  %v4055_v36 = vpop.f32.mrf.mxu0 }
 0x66c   :  { %4811 = vmatpush.msra.mxu0 %v4774_v54  ;;  %v11210_v54 = vld [vmem:[#allocation112_spill] sm:$0xff] }
 0x66d   :  { %v4307_v15 = vadd.f32 %v4306_v33, %v9244_v22 }
 0x66e   :  { %v4244_v20 = vpop.f32.mrf.mxu3  ;;  %4812 = vmatpush.msra.mxu0 %v4772_v27 }
 0x66f   :  { %v4245_v40 = vadd.f32 %v4244_v20, %v4179_v1  ;;  %v3827_v1 = vadd.f32 %v9066_v52, %v11199_v49 }
 0x670   :  { %v4117_v28 = vpop.f32.mrf.mxu1 }
 0x671   :  { %v9254_v11 = vadd.f32 %v4245_v40, %v3889_v19  ;;  %v4118_v57 = vadd.f32 %v4117_v28, %v4052_v13  ;;  %v4185_v41 = vpop.f32.mrf.mxu2  ;;  %v11200_v13 = vld [vmem:[#allocation55_spill] sm:$0xff]  ;;  %v3892_v58 = vadd.f32 %v11201_v60, %v3827_v1  ;;  %v3703_v19 = vadd.f32 %v11207_v8, %v3508_v35  ;;  %v11208_v40 = vld [vmem:[#allocation29_spill] sm:$0xff] }
 0x672   :  { %v3700_v5 = vadd.f32 %v11200_v13, %v3505_v4  ;;  %v4771_v1 = vld [vmem:[#allocation7 + $0x2c8] sm:$0xff]  ;;  %v11212_v13 = vld [vmem:[#allocation140_spill] sm:$0xff] }
 0x673   :  { %v4328_v31 = vadd.f32 %v4327_v34, %v9254_v11  ;;  %v9257_v46 = vadd.f32 %v4118_v57, %v3762_v18  ;;  %v4058_v43 = vpop.f32.mrf.mxu0  ;;  %4943 = vmatpush.msra.mxu2 %v4771_v1 }
 0x674   :  { %v3765_v9 = vadd.f32 %v11202_v53, %v3700_v5 }
 0x675   :  { %v4308_v10 = vadd.f32 %v4307_v15, %v9257_v46 }
 0x676   :  { %v4247_v48 = vpop.f32.mrf.mxu3 }
 0x677   :  { %v4248_v33 = vadd.f32 %v4247_v48, %v4182_v45  ;;  %v11206_v45 = vld [vmem:[#allocation83_spill] sm:$0xff]  ;;  %v3511_v48 = vadd.f32 %v11211_v51, %v11210_v54 }
 0x678   :  { %v4120_v29 = vpop.f32.mrf.mxu1  ;;  %v3830_v38 = vadd.f32 %v11206_v45, %v11205_v63 }
 0x679   :  { %v9267_v44 = vadd.f32 %v4248_v33, %v3892_v58  ;;  %v4121_v3 = vadd.f32 %v4120_v29, %v4055_v36  ;;  %v4188_v36 = vpop.f32.mrf.mxu2  ;;  %v11214_v33 = vld [vmem:[#allocation28_spill] sm:$0xff] }
 0x67a   :  { %v3895_v28 = vadd.f32 %v11208_v40, %v3830_v38  ;;  %v3706_v29 = vadd.f32 %v11214_v33, %v3511_v48  ;;  %v11217_v38 = vld [vmem:[#allocation139_spill] sm:$0xff]  ;;  %v11221_v40 = vld [vmem:[#allocation57_spill] sm:$0xff] }
 0x67b   :  { %v4329_v52 = vadd.f32 %v4328_v31, %v9267_v44  ;;  %v9270_v34 = vadd.f32 %v4121_v3, %v3765_v9  ;;  %v11209_v31 = vld [vmem:[#allocation144_spill] sm:$0xff]  ;;  %v4061_v23 = vpop.f32.mrf.mxu0 }
 0x67c   :  { %v3768_v55 = vadd.f32 %v11209_v31, %v3703_v19  ;;  %v3771_v30 = vadd.f32 %v11216_v56, %v3706_v29 }
 0x67d   :  { %v4309_v15 = vadd.f32 %v4308_v10, %v9270_v34  ;;  %v4803_v10 = vld [vmem:[#allocation7 + $0x3c8] sm:$0xff] }
 0x67e   :  { %v4250_v20 = vpop.f32.mrf.mxu3  ;;  %5008 = vmatpush.msra.mxu3 %v4803_v10 }
 0x67f   :  { %v4251_v18 = vadd.f32 %v4250_v20, %v4185_v41  ;;  %v11213_v41 = vld [vmem:[#allocation115_spill] sm:$0xff] }
 0x680   :  { %v4123_v57 = vpop.f32.mrf.mxu1  ;;  %v3833_v5 = vadd.f32 %v11213_v41, %v11212_v13  ;;  %v11220_v20 = vld [vmem:[#allocation143_spill] sm:$0xff]  ;;  %v11224_v13 = vld [vmem:[#allocation81_spill] sm:$0xff]  ;;  %v11225_v41 = vld [vmem:[#allocation26_spill] sm:$0xff] }
 0x681   :  { %v9280_v59 = vadd.f32 %v4251_v18, %v3895_v28  ;;  %v4124_v21 = vadd.f32 %v4123_v57, %v4058_v43  ;;  %v11215_v43 = vld [vmem:[#allocation85_spill] sm:$0xff]  ;;  %v3836_v8 = vadd.f32 %v11220_v20, %v11219_v0  ;;  %v11222_v18 = vld [vmem:[#allocation118_spill] sm:$0xff] }
 0x682   :  { %v3898_v53 = vadd.f32 %v11215_v43, %v3833_v5  ;;  %v3517_v5 = vadd.f32 %v11225_v41, %v11224_v13  ;;  %v11231_v20 = vld [vmem:[#allocation113_spill] sm:$0xff] }
 0x683   :  { %v4330_v4 = vadd.f32 %v4329_v52, %v9280_v59  ;;  %v9283_v49 = vadd.f32 %v4124_v21, %v3768_v55  ;;  %v4191_v52 = vpop.f32.mrf.mxu2  ;;  %v4064_v45 = vpop.f32.mrf.mxu0  ;;  %v3901_v57 = vadd.f32 %v11222_v18, %v3836_v8  ;;  %v11223_v21 = vld [vmem:[#allocation31_spill] sm:$0xff]  ;;  %v11232_v8 = vld [vmem:[#allocation141_spill] sm:$0xff] }
 0x685   :  { %v4310_v60 = vadd.f32 %v4309_v15, %v9283_v49  ;;  %v11218_v15 = vld [vmem:[#allocation54_spill] sm:$0xff] }
 0x686   :  { %v4253_v58 = vpop.f32.mrf.mxu3  ;;  %v3514_v27 = vadd.f32 %v11218_v15, %v11217_v38 }
 0x687   :  { %v4254_v9 = vadd.f32 %v4253_v58, %v4188_v36  ;;  %v11227_v58 = vld [vmem:[#allocation86_spill] sm:$0xff] }
 0x688   :  { %v4126_v3 = vpop.f32.mrf.mxu1  ;;  %v3709_v28 = vadd.f32 %v11221_v40, %v3514_v27  ;;  %v11234_v40 = vld [vmem:[#allocation30_spill] sm:$0xff] }
 0x689   :  { %v9293_v62 = vadd.f32 %v4254_v9, %v3898_v53  ;;  %v4127_v61 = vadd.f32 %v4126_v3, %v4061_v23  ;;  %v11228_v53 = vld [vmem:[#allocation117_spill] sm:$0xff]  ;;  %v11229_v3 = vld [vmem:[#allocation146_spill] sm:$0xff] }
 0x68a   :  { %v3774_v23 = vadd.f32 %v11223_v21, %v3709_v28  ;;  %v3712_v9 = vadd.f32 %v11228_v53, %v3517_v5  ;;  %v11239_v53 = vld [vmem:[#allocation59_spill] sm:$0xff] }
 0x68b   :  { %v4331_v35 = vadd.f32 %v4330_v4, %v9293_v62  ;;  %v9296_v63 = vadd.f32 %v4127_v61, %v3771_v30  ;;  %v4194_v10 = vpop.f32.mrf.mxu2  ;;  %v4067_v48 = vpop.f32.mrf.mxu0  ;;  %v11230_v61 = vld [vmem:[#allocation87_spill] sm:$0xff] }
 0x68d   :  { %v4311_v36 = vadd.f32 %v4310_v60, %v9296_v63  ;;  %v11226_v60 = vld [vmem:[#allocation114_spill] sm:$0xff] }
 0x68e   :  { %v4256_v19 = vpop.f32.mrf.mxu3  ;;  %v3839_v33 = vadd.f32 %v11227_v58, %v11226_v60 }
 0x68f   :  { %v4257_v31 = vadd.f32 %v4256_v19, %v4191_v52  ;;  %v3520_v19 = vadd.f32 %v11232_v8, %v11231_v20 }
 0x690   :  { %v4129_v55 = vpop.f32.mrf.mxu1  ;;  %v3904_v52 = vadd.f32 %v11229_v3, %v3839_v33 }
 0x691   :  { %v9306_v4 = vadd.f32 %v4257_v31, %v3901_v57  ;;  %v4130_v1 = vadd.f32 %v4129_v55, %v4064_v45  ;;  %v3777_v45 = vadd.f32 %v11230_v61, %v3712_v9  ;;  %v11235_v55 = vld [vmem:[#allocation145_spill] sm:$0xff] }
 0x692   :  { %v3715_v21 = vadd.f32 %v11235_v55, %v3520_v19 }
 0x693   :  { %v4332_v54 = vadd.f32 %v4331_v35, %v9306_v4  ;;  %v4294_v51 = vadd.f32 %v4130_v1, %v3774_v23  ;;  %v4197_v15 = vpop.f32.mrf.mxu2  ;;  %v4070_v31 = vpop.f32.mrf.mxu0  ;;  %v11236_v23 = vld [vmem:[#allocation88_spill] sm:$0xff] }
 0x695   :  { %v4312_v29 = vadd.f32 %v4311_v36, %v4294_v51  ;;  %v11233_v36 = vld [vmem:[#allocation27_spill] sm:$0xff] }
 0x696   :  { %v4259_v43 = vpop.f32.mrf.mxu3  ;;  %v3842_v28 = vadd.f32 %v11234_v40, %v11233_v36 }
 0x697   :  { %v4260_v56 = vadd.f32 %v4259_v43, %v4194_v10  ;;  %v11238_v43 = vld [vmem:[#allocation142_spill] sm:$0xff] }
 0x698   :  { %v4132_v30 = vpop.f32.mrf.mxu1  ;;  %v3907_v1 = vadd.f32 %v11236_v23, %v3842_v28  ;;  %v11241_v28 = vld [vmem:[#allocation50_spill] sm:$0xff] }
 0x699   :  { %v9316_v38 = vadd.f32 %v4260_v56, %v3904_v52  ;;  %v4133_v35 = vadd.f32 %v4132_v30, %v4067_v48  ;;  %v11237_v48 = vld [vmem:[#allocation60_spill] sm:$0xff]  ;;  %v11240_v52 = vld [vmem:[#allocation119_spill] sm:$0xff] }
 0x69a   :  { %v3780_v41 = vadd.f32 %v11237_v48, %v3715_v21 }
 0x69b   :  { %v4333_v27 = vadd.f32 %v4332_v54, %v9316_v38  ;;  %v4296_v0 = vadd.f32 %v4133_v35, %v3777_v45  ;;  %v4200_v33 = vpop.f32.mrf.mxu2 }
 0x69d   :  { %v4313_v18 = vadd.f32 %v4312_v29, %v4296_v0  ;;  %v3845_v29 = vadd.f32 %v11239_v53, %v11238_v43 }
 0x69e   :  { %v4262_v57 = vpop.f32.mrf.mxu3 }
 0x69f   :  { %v4263_v10 = vadd.f32 %v4262_v57, %v4197_v15  ;;  %v3910_v56 = vadd.f32 %v11240_v52, %v3845_v29 }
 0x6a0   :  { %v4135_v13 = vpop.f32.mrf.mxu1 }
 0x6a1   :  { %v9326_v5 = vadd.f32 %v4263_v10, %v3907_v1  ;;  %v4136_v54 = vadd.f32 %v4135_v13, %v4070_v31 }
 0x6a3   :  { %v4334_v60 = vadd.f32 %v4333_v27, %v9326_v5  ;;  %v4298_v58 = vadd.f32 %v4136_v54, %v3780_v41 }
 0x6a5   :  { %v4314_v9 = vadd.f32 %v4313_v18, %v4298_v58 }
 0x6a6   :  { %v4265_v3 = vpop.f32.mrf.mxu3 }
 0x6a7   :  { %v4315_v30 = vrot.slane %v4314_v9, 4  ;;  %v4266_v61 = vadd.f32 %v4265_v3, %v4200_v33 }
 0x6a9   :  { %v4316_v45 = vadd.f32 %v4315_v30, %v4314_v9  ;;  %v4299_v35 = vadd.f32 %v4266_v61, %v3910_v56 }
 0x6ab   :  { %v4317_v15 = vrot.slane %v4316_v45, 2  ;;  %v4335_v20 = vadd.f32 %v4334_v60, %v4299_v35 }
 0x6ad   :  { %v4318_v8 = vadd.f32 %v4317_v15, %v4316_v45  ;;  %v4336_v19 = vrot.slane %v4335_v20, 4 }
 0x6af   :  { %v4319_v36 = vrot.slane %v4318_v8, 1  ;;  %v4337_v40 = vadd.f32 %v4336_v19, %v4335_v20 }
 0x6b1   :  { %v4320_v27 = vadd.f32 %v4319_v36, %v4318_v8  ;;  %v4338_v31 = vrot.slane %v4337_v40, 2 }
 0x6b3   :  { %v4342_v57 = vmul.f32 %v4320_v27, %v11241_v28 }
 0x6b5   :  { %v9334_v55 = vsub.f32 %v9160_v6, %v4342_v57  ;;  %v9337_v18 = vsub.f32 %v9162_v12, %v4342_v57  ;;  %v9340_v21 = vsub.f32 %v9178_v47, %v4342_v57  ;;  %v9343_v23 = vsub.f32 %v9189_v17, %v4342_v57 }
 0x6b6   :  { %v9346_v1 = vsub.f32 %v9200_v42, %v4342_v57  ;;  %v9349_v10 = vsub.f32 %v9211_v26, %v4342_v57  ;;  %v9352_v13 = vsub.f32 %v9222_v2, %v4342_v57  ;;  %v9355_v6 = vsub.f32 %v9233_v32, %v4342_v57 }
 0x6b7   :  { %v9358_v12 = vsub.f32 %v9244_v22, %v4342_v57  ;;  %v9361_v47 = vsub.f32 %v9257_v46, %v4342_v57  ;;  %v9364_v17 = vsub.f32 %v9270_v34, %v4342_v57  ;;  %v9367_v42 = vsub.f32 %v9283_v49, %v4342_v57 }
 0x6b8   :  { %v9370_v26 = vsub.f32 %v9296_v63, %v4342_v57  ;;  %v9372_v2 = vsub.f32 %v4294_v51, %v4342_v57  ;;  %v9374_v48 = vsub.f32 %v4296_v0, %v4342_v57  ;;  %v9376_v32 = vsub.f32 %v4298_v58, %v4342_v57 }
 0x6b9   :  { %v4376_v22 = vmul.f32 %v9334_v55, %v9334_v55  ;;  %v4378_v46 = vmul.f32 %v9337_v18, %v9337_v18  ;;  %v4339_v34 = vadd.f32 %v4338_v31, %v4337_v40  ;;  %v4380_v49 = vmul.f32 %v9340_v21, %v9340_v21 }
 0x6ba   :  { %v4382_v63 = vmul.f32 %v9343_v23, %v9343_v23  ;;  %v4384_v60 = vmul.f32 %v9346_v1, %v9346_v1  ;;  %v4386_v43 = vmul.f32 %v9349_v10, %v9349_v10  ;;  %v4388_v53 = vmul.f32 %v9352_v13, %v9352_v13 }
 0x6bb   :  { %v4408_v41 = vadd.f32 %v4378_v46, %v4376_v22  ;;  %v4340_v54 = vrot.slane %v4339_v34, 1  ;;  %v4394_v8 = vmul.f32 %v9361_v47, %v9361_v47  ;;  %v4398_v31 = vmul.f32 %v9367_v42, %v9367_v42 }
 0x6bd   :  { %v4409_v51 = vadd.f32 %v4408_v41, %v4380_v49  ;;  %v4341_v0 = vadd.f32 %v4340_v54, %v4339_v34  ;;  %v4400_v49 = vmul.f32 %v9370_v26, %v9370_v26 }
 0x6bf   :  { %v4410_v58 = vadd.f32 %v4409_v51, %v4382_v63  ;;  %v4343_v33 = vmul.f32 %v4341_v0, %v11241_v28  ;;  %v4402_v51 = vmul.f32 %v9372_v2, %v9372_v2 }
 0x6c1   :  { %v4411_v29 = vadd.f32 %v4410_v58, %v4384_v60  ;;  %v9394_v9 = vsub.f32 %v9171_v39, %v4343_v33  ;;  %v9397_v3 = vsub.f32 %v9174_v24, %v4343_v33  ;;  %v9400_v52 = vsub.f32 %v9186_v25, %v4343_v33 }
 0x6c2   :  { %v9403_v56 = vsub.f32 %v9197_v16, %v4343_v33  ;;  %v9406_v30 = vsub.f32 %v9208_v7, %v4343_v33  ;;  %v9409_v61 = vsub.f32 %v9219_v50, %v4343_v33  ;;  %v9412_v45 = vsub.f32 %v9230_v14, %v4343_v33 }
 0x6c3   :  { %v4412_v39 = vadd.f32 %v4411_v29, %v4386_v43  ;;  %v9415_v15 = vsub.f32 %v9241_v37, %v4343_v33  ;;  %v9418_v24 = vsub.f32 %v9254_v11, %v4343_v33  ;;  %v9421_v25 = vsub.f32 %v9267_v44, %v4343_v33 }
 0x6c4   :  { %v9424_v16 = vsub.f32 %v9280_v59, %v4343_v33  ;;  %v9427_v7 = vsub.f32 %v9293_v62, %v4343_v33  ;;  %v9430_v50 = vsub.f32 %v9306_v4, %v4343_v33  ;;  %v9433_v14 = vsub.f32 %v9316_v38, %v4343_v33 }
 0x6c5   :  { %v4390_v37 = vmul.f32 %v9355_v6, %v9355_v6  ;;  %v4413_v11 = vadd.f32 %v4412_v39, %v4388_v53  ;;  %v9438_v20 = vsub.f32 %v9326_v5, %v4343_v33  ;;  %v9440_v44 = vsub.f32 %v4299_v35, %v4343_v33 }
 0x6c6   :  { %v4377_v59 = vmul.f32 %v9394_v9, %v9394_v9  ;;  %v4379_v62 = vmul.f32 %v9397_v3, %v9397_v3  ;;  %v4392_v4 = vmul.f32 %v9358_v12, %v9358_v12  ;;  %v4381_v5 = vmul.f32 %v9400_v52, %v9400_v52 }
 0x6c7   :  { %v4414_v38 = vadd.f32 %v4413_v11, %v4390_v37  ;;  %v4396_v35 = vmul.f32 %v9364_v17, %v9364_v17  ;;  %v4383_v27 = vmul.f32 %v9403_v56, %v9403_v56  ;;  %v4385_v46 = vmul.f32 %v9406_v30, %v9406_v30 }
 0x6c8   :  { %v4429_v36 = vadd.f32 %v4379_v62, %v4377_v59  ;;  %v4387_v54 = vmul.f32 %v9409_v61, %v9409_v61  ;;  %v4389_v60 = vmul.f32 %v9412_v45, %v9412_v45  ;;  %v4404_v33 = vmul.f32 %v9374_v48, %v9374_v48 }
 0x6c9   :  { %v4415_v19 = vadd.f32 %v4414_v38, %v4392_v4  ;;  %v4391_v53 = vmul.f32 %v9415_v15, %v9415_v15  ;;  %v4406_v39 = vmul.f32 %v9376_v32, %v9376_v32  ;;  %v4393_v11 = vmul.f32 %v9418_v24, %v9418_v24  ;;  %v4770_v4 = vld [vmem:[#allocation7 + $0x2c0] sm:$0xff] }
 0x6ca   :  { %v4430_v57 = vadd.f32 %v4429_v36, %v4381_v5  ;;  %v4395_v38 = vmul.f32 %v9421_v25, %v9421_v25  ;;  %4813 = vmatpush.msra.mxu0 %v4770_v4  ;;  %v4397_v5 = vmul.f32 %v9424_v16, %v9424_v16  ;;  %v4761_v4 = vld [vmem:[#allocation7 + $0x278] sm:$0xff] }
 0x6cb   :  { %v4416_v40 = vadd.f32 %v4415_v19, %v4394_v8 }
 0x6cc   :  { %v4431_v34 = vadd.f32 %v4430_v57, %v4383_v27  ;;  %v4399_v57 = vmul.f32 %v9427_v7, %v9427_v7 }
 0x6cd   :  { %v4417_v22 = vadd.f32 %v4416_v40, %v4396_v35  ;;  %v4769_v35 = vld [vmem:[#allocation7 + $0x2b8] sm:$0xff]  ;;  %v4768_v40 = vld [vmem:[#allocation7 + $0x2b0] sm:$0xff] }
 0x6ce   :  { %v4432_v63 = vadd.f32 %v4431_v34, %v4385_v46  ;;  %4944 = vmatpush.msra.mxu2 %v4769_v35  ;;  %4814 = vmatpush.msra.mxu0 %v4768_v40  ;;  %v4766_v46 = vld [vmem:[#allocation7 + $0x2a0] sm:$0xff]  ;;  %v4796_v35 = vld [vmem:[#allocation7 + $0x390] sm:$0xff]  ;;  %v4759_v40 = vld [vmem:[#allocation7 + $0x268] sm:$0xff] }
 0x6cf   :  { %v4418_v41 = vadd.f32 %v4417_v22, %v4398_v31  ;;  %v4767_v22 = vld [vmem:[#allocation7 + $0x2a8] sm:$0xff] }
 0x6d0   :  { %v4433_v58 = vadd.f32 %v4432_v63, %v4387_v54  ;;  %4945 = vmatpush.msra.mxu2 %v4767_v22  ;;  %4815 = vmatpush.msra.mxu0 %v4766_v46  ;;  %v4765_v63 = vld [vmem:[#allocation7 + $0x298] sm:$0xff]  ;;  %v4795_v22 = vld [vmem:[#allocation7 + $0x388] sm:$0xff]  ;;  %v4794_v46 = vld [vmem:[#allocation7 + $0x380] sm:$0xff] }
 0x6d1   :  { %v4419_v0 = vadd.f32 %v4418_v41, %v4400_v49  ;;  %v4802_v49 = vld [vmem:[#allocation7 + $0x3c0] sm:$0xff]  ;;  %v4401_v41 = vmul.f32 %v9430_v50, %v9430_v50 }
 0x6d2   :  { %v4434_v29 = vadd.f32 %v4433_v58, %v4389_v60  ;;  %4878 = vmatpush.msra.mxu1 %v4802_v49  ;;  %4946 = vmatpush.msra.mxu2 %v4765_v63  ;;  %v4403_v60 = vmul.f32 %v9433_v14, %v9433_v14  ;;  %v4793_v63 = vld [vmem:[#allocation7 + $0x378] sm:$0xff] }
 0x6d3   :  { %v4420_v43 = vadd.f32 %v4419_v0, %v4402_v51  ;;  %v4764_v51 = vld [vmem:[#allocation7 + $0x290] sm:$0xff] }
 0x6d4   :  { %v4435_v59 = vadd.f32 %v4434_v29, %v4391_v53  ;;  %4816 = vmatpush.msra.mxu0 %v4764_v51  ;;  %v4763_v53 = vld [vmem:[#allocation7 + $0x288] sm:$0xff]  ;;  %v4792_v51 = vld [vmem:[#allocation7 + $0x370] sm:$0xff] }
 0x6d5   :  { %v4421_v37 = vadd.f32 %v4420_v43, %v4404_v33  ;;  %v4801_v33 = vld [vmem:[#allocation7 + $0x3b8] sm:$0xff]  ;;  %v4800_v43 = vld [vmem:[#allocation7 + $0x3b0] sm:$0xff]  ;;  %4947 = vmatpush.msra.mxu2 %v4763_v53 }
 0x6d6   :  { %v4436_v8 = vadd.f32 %v4435_v59, %v4393_v11  ;;  %5009 = vmatpush.msra.mxu3 %v4801_v33  ;;  %4879 = vmatpush.msra.mxu1 %v4800_v43  ;;  %v4799_v59 = vld [vmem:[#allocation7 + $0x3a8] sm:$0xff]  ;;  %v4790_v43 = vld [vmem:[#allocation7 + $0x360] sm:$0xff]  ;;  %v4753_v53 = vld [vmem:[#allocation7 + $0x238] sm:$0xff] }
 0x6d7   :  { %v4422_v62 = vadd.f32 %v4421_v37, %v4406_v39  ;;  %v4762_v39 = vld [vmem:[#allocation7 + $0x280] sm:$0xff]  ;;  %v4405_v37 = vmul.f32 %v9438_v20, %v9438_v20  ;;  %4948 = vmatpush.msra.mxu2 %v4761_v4  ;;  %v4791_v33 = vld [vmem:[#allocation7 + $0x368] sm:$0xff]  ;;  %v4785_v4 = vld [vmem:[#allocation7 + $0x338] sm:$0xff] }
 0x6d8   :  { %v4437_v36 = vadd.f32 %v4436_v8, %v4395_v38  ;;  %4817 = vmatpush.msra.mxu0 %v4762_v39  ;;  %5010 = vmatpush.msra.mxu3 %v4799_v59  ;;  %v4760_v8 = vld [vmem:[#allocation7 + $0x270] sm:$0xff]  ;;  %v4787_v59 = vld [vmem:[#allocation7 + $0x348] sm:$0xff] }
 0x6d9   :  { %v4423_v19 = vrot.slane %v4422_v62, 4  ;;  %4949 = vmatpush.msra.mxu2 %v4759_v40 }
 0x6da   :  { %v4438_v31 = vadd.f32 %v4437_v36, %v4397_v5  ;;  %v4797_v36 = vld [vmem:[#allocation7 + $0x398] sm:$0xff]  ;;  %4818 = vmatpush.msra.mxu0 %v4760_v8  ;;  %v4784_v8 = vld [vmem:[#allocation7 + $0x330] sm:$0xff] }
 0x6db   :  { %v4424_v27 = vadd.f32 %v4423_v19, %v4422_v62  ;;  %v4798_v62 = vld [vmem:[#allocation7 + $0x3a0] sm:$0xff]  ;;  %v4407_v19 = vmul.f32 %v9440_v44, %v9440_v44  ;;  %5011 = vmatpush.msra.mxu3 %v4797_v36 }
 0x6dc   :  { %v4439_v54 = vadd.f32 %v4438_v31, %v4399_v57  ;;  %4880 = vmatpush.msra.mxu1 %v4798_v62  ;;  %v4758_v57 = vld [vmem:[#allocation7 + $0x260] sm:$0xff] }
 0x6dd   :  { %v4425_v34 = vrot.slane %v4424_v27, 2  ;;  %4819 = vmatpush.msra.mxu0 %v4758_v57  ;;  %5012 = vmatpush.msra.mxu3 %v4795_v22  ;;  %v4786_v62 = vld [vmem:[#allocation7 + $0x340] sm:$0xff]  ;;  %v4783_v57 = vld [vmem:[#allocation7 + $0x328] sm:$0xff]  ;;  %v4748_v22 = vld [vmem:[#allocation7 + $0x210] sm:$0xff] }
 0x6de   :  { %v4440_v58 = vadd.f32 %v4439_v54, %v4401_v41  ;;  %4881 = vmatpush.msra.mxu1 %v4796_v35  ;;  %v4756_v41 = vld [vmem:[#allocation7 + $0x250] sm:$0xff]  ;;  %v4749_v35 = vld [vmem:[#allocation7 + $0x218] sm:$0xff] }
 0x6df   :  { %v4426_v0 = vadd.f32 %v4425_v34, %v4424_v27  ;;  %v4757_v34 = vld [vmem:[#allocation7 + $0x258] sm:$0xff]  ;;  %4820 = vmatpush.msra.mxu0 %v4756_v41  ;;  %5013 = vmatpush.msra.mxu3 %v4793_v63 }
 0x6e0   :  { %v4441_v11 = vadd.f32 %v4440_v58, %v4403_v60  ;;  %4882 = vmatpush.msra.mxu1 %v4794_v46  ;;  %4950 = vmatpush.msra.mxu2 %v4757_v34  ;;  %v4754_v60 = vld [vmem:[#allocation7 + $0x240] sm:$0xff]  ;;  %v4747_v46 = vld [vmem:[#allocation7 + $0x208] sm:$0xff]  ;;  %v4781_v63 = vld [vmem:[#allocation7 + $0x318] sm:$0xff] }
 0x6e1   :  { %v4427_v29 = vrot.slane %v4426_v0, 1  ;;  %4821 = vmatpush.msra.mxu0 %v4754_v60  ;;  %5014 = vmatpush.msra.mxu3 %v4791_v33  ;;  %v4746_v34 = vld [vmem:[#allocation7 + $0x200] sm:$0xff]  ;;  %v4708_v60 = vld [vmem:[#allocation7 + $0xf0] sm:$0xff] }
 0x6e2   :  { %v4442_v5 = vadd.f32 %v4441_v11, %v4405_v37  ;;  %4883 = vmatpush.msra.mxu1 %v4792_v51  ;;  %v4789_v37 = vld [vmem:[#allocation7 + $0x358] sm:$0xff]  ;;  %v4788_v11 = vld [vmem:[#allocation7 + $0x350] sm:$0xff] }
 0x6e3   :  { %v4428_v38 = vadd.f32 %v4427_v29, %v4426_v0  ;;  %v4755_v0 = vld [vmem:[#allocation7 + $0x248] sm:$0xff]  ;;  %v4752_v29 = vld [vmem:[#allocation7 + $0x230] sm:$0xff]  ;;  %5015 = vmatpush.msra.mxu3 %v4789_v37 }
 0x6e4   :  { %v4443_v31 = vadd.f32 %v4442_v5, %v4407_v19  ;;  %4951 = vmatpush.msra.mxu2 %v4755_v0  ;;  %4884 = vmatpush.msra.mxu1 %v4790_v43  ;;  %v4751_v19 = vld [vmem:[#allocation7 + $0x228] sm:$0xff]  ;;  %v4750_v5 = vld [vmem:[#allocation7 + $0x220] sm:$0xff]  ;;  %v4780_v51 = vld [vmem:[#allocation7 + $0x310] sm:$0xff] }
 0x6e5   :  { %v4450_v27 = vmul.f32 %v4428_v38, %v11241_v28  ;;  %4822 = vmatpush.msra.mxu0 %v4752_v29  ;;  %5016 = vmatpush.msra.mxu3 %v4787_v59  ;;  %v4709_v0 = vld [vmem:[#allocation7 + $0xf8] sm:$0xff]  ;;  %v4779_v43 = vld [vmem:[#allocation7 + $0x308] sm:$0xff] }
 0x6e6   :  { %v4444_v54 = vrot.slane %v4443_v31, 4  ;;  %4952 = vmatpush.msra.mxu2 %v4753_v53  ;;  %4885 = vmatpush.msra.mxu1 %v4788_v11  ;;  %v4778_v53 = vld [vmem:[#allocation7 + $0x300] sm:$0xff]  ;;  %v4741_v29 = vld [vmem:[#allocation7 + $0x1f8] sm:$0xff] }
 0x6e7   :  { %v9491_v49 = vadd.f32 1e-05, %v4450_v27  ;;  %4823 = vmatpush.msra.mxu0 %v4750_v5  ;;  %5017 = vmatpush.msra.mxu3 %v4785_v4  ;;  %v4506_v11 = vld [vmem:[#allocation11] sm:$0x3]  ;;  %v9500_v4 = vld [vmem:[#allocation13] sm:$0x3] }
 0x6e8   :  { %v4445_v58 = vadd.f32 %v4444_v54, %v4443_v31  ;;  %4886 = vmatpush.msra.mxu1 %v4786_v62  ;;  %4953 = vmatpush.msra.mxu2 %v4751_v19  ;;  %v4782_v31 = vld [vmem:[#allocation7 + $0x320] sm:$0xff]  ;;  %v4707_v19 = vld [vmem:[#allocation7 + $0xe8] sm:$0xff] }
 0x6e9   :  { %6156 = vrsqrt.f32 %v9491_v49  ;;  %4824 = vmatpush.msra.mxu0 %v4748_v22  ;;  %5018 = vmatpush.msra.mxu3 %v4783_v57  ;;  %vm4460_vm8 = vweird.f32 %v9491_v49  ;;  %v4739_v5 = vld [vmem:[#allocation7 + $0x1e8] sm:$0xff]  ;;  %v4738_v57 = vld [vmem:[#allocation7 + $0x1e0] sm:$0xff] }
 0x6ea   :  { %v4446_v39 = vrot.slane %v4445_v58, 2  ;;  %4887 = vmatpush.msra.mxu1 %v4784_v8  ;;  %4954 = vmatpush.msra.mxu2 %v4749_v35  ;;  %v4706_v35 = vld [vmem:[#allocation7 + $0xe0] sm:$0xff] }
 0x6eb   :  { %4825 = vmatpush.msra.mxu0 %v4746_v34  ;;  %5019 = vmatpush.msra.mxu3 %v4781_v63 }
 0x6ec   :  { %v4447_v38 = vadd.f32 %v4446_v39, %v4445_v58  ;;  %4888 = vmatpush.msra.mxu1 %v4782_v31  ;;  %4955 = vmatpush.msra.mxu2 %v4747_v46  ;;  %v4740_v39 = vld [vmem:[#allocation7 + $0x1f0] sm:$0xff] }
 0x6ed   :  { %5070 = vmatpush.msrb.mxu0 %v4708_v60  ;;  %5020 = vmatpush.msra.mxu3 %v4779_v43  ;;  %v4704_v60 = vld [vmem:[#allocation7 + $0xd0] sm:$0xff] }
 0x6ee   :  { %v4448_v27 = vrot.slane %v4447_v38, 1  ;;  %4889 = vmatpush.msra.mxu1 %v4780_v51  ;;  %5200 = vmatpush.msrb.mxu2 %v4709_v0  ;;  %v4705_v51 = vld [vmem:[#allocation7 + $0xd8] sm:$0xff] }
 0x6ef   :  { %v6157_v36 = vpop.eup %6156  ;;  %5265 = vmatpush.msrb.mxu3 %v4741_v29  ;;  %5071 = vmatpush.msrb.mxu0 %v4706_v35  ;;  %v4737_v0 = vld [vmem:[#allocation7 + $0x1d8] sm:$0xff] }
 0x6f0   :  { %v4455_v40 = vmul.f32 %v6157_v36, %v9491_v49  ;;  %v4449_v54 = vadd.f32 %v4448_v27, %v4447_v38  ;;  %vm4461_vm7 = vweird.f32 %v6157_v36  ;;  %4890 = vmatpush.msra.mxu1 %v4778_v53  ;;  %v9502_v38 = vperm.slane %v4506_v11, 0  ;;  %5201 = vmatpush.msrb.mxu2 %v4707_v19  ;;  %v4736_v53 = vld [vmem:[#allocation7 + $0x1d0] sm:$0xff] }
 0x6f1   :  { %vm4462_vm9 = vmor %vm4460_vm8, %vm4461_vm7  ;;  %v9511_v27 = vperm.slane %v9500_v4, 0  ;;  %5266 = vmatpush.msrb.mxu3 %v4739_v5  ;;  %5072 = vmatpush.msrb.mxu0 %v4704_v60 }
 0x6f2   :  { %v4456_v41 = vmul.f32 %v6157_v36, %v4455_v40  ;;  %v4451_v33 = vmul.f32 %v4449_v54, %v11241_v28  ;;  %5135 = vmatpush.msrb.mxu1 %v4740_v39  ;;  %5202 = vmatpush.msrb.mxu2 %v4705_v51  ;;  %v4702_v51 = vld [vmem:[#allocation7 + $0xc0] sm:$0xff]  ;;  %v5403_v28 = vld [vmem:[#allocation7 + $0x548] sm:$0xff] }
 0x6f3   :  { %5267 = vmatpush.msrb.mxu3 %v4737_v0  ;;  %v4734_v0 = vld [vmem:[#allocation7 + $0x1c0] sm:$0xff]  ;;  %5073 = vmatpush.msrb.mxu0 %v4702_v51 }
 0x6f4   :  { %v4457_v58 = vmul.f32 0.5, %v4456_v41  ;;  %v9496_v59 = vadd.f32 1e-05, %v4451_v33  ;;  %5136 = vmatpush.msrb.mxu1 %v4738_v57  ;;  %v9528_v33 = vperm.slane %v4506_v11, 1 }
 0x6f6   :  { %v4458_v37 = vsub.f32 1.5, %v4457_v58  ;;  %6158 = vrsqrt.f32 %v9496_v59  ;;  %vm4470_vm10 = vweird.f32 %v9496_v59  ;;  %5137 = vmatpush.msrb.mxu1 %v4736_v53 }
 0x6f8   :  { %v4459_v62 = vmul.f32 %v6157_v36, %v4458_v37  ;;  %5138 = vmatpush.msrb.mxu1 %v4734_v0 }
 0x6fa   :  { %v9504_v8 = vsel %vm4462_vm9, %v6157_v36, %v4459_v62 }
 0x6fb   :  { %v4504_v40 = vmul.f32 %v9504_v8, %v9376_v32  ;;  %v4474_v49 = vmul.f32 %v9504_v8, %v9334_v55  ;;  %v4476_v22 = vmul.f32 %v9504_v8, %v9337_v18  ;;  %v4498_v63 = vmul.f32 %v9504_v8, %v9370_v26 }
 0x6fc   :  { %v6159_v32 = vpop.eup %6158  ;;  %v4500_v18 = vmul.f32 %v9504_v8, %v9372_v2  ;;  %v4478_v43 = vmul.f32 %v9504_v8, %v9340_v21  ;;  %v4490_v26 = vmul.f32 %v9504_v8, %v9358_v12  ;;  %v4492_v2 = vmul.f32 %v9504_v8, %v9361_v47 }
 0x6fd   :  { %v9514_v31 = vmul.f32 %v9502_v38, %v4504_v40  ;;  %v4512_v36 = vmul.f32 %v9502_v38, %v4474_v49  ;;  %v4465_v46 = vmul.f32 %v6159_v32, %v9496_v59  ;;  %v4514_v54 = vmul.f32 %v9502_v38, %v4476_v22 }
 0x6fe   :  { %v4494_v29 = vmul.f32 %v9504_v8, %v9364_v17  ;;  %vm4471_vm11 = vweird.f32 %v6159_v32  ;;  %v4496_v21 = vmul.f32 %v9504_v8, %v9367_v42  ;;  %v4528_v11 = vmul.f32 %v9502_v38, %v4490_v26 }
 0x6ff   :  { %v4550_v55 = vadd.f32 %v9511_v27, %v4512_v36  ;;  %v4466_v34 = vmul.f32 %v6159_v32, %v4465_v46  ;;  %v4552_v37 = vadd.f32 %v9511_v27, %v4514_v54  ;;  %v4530_v62 = vmul.f32 %v9502_v38, %v4492_v2  ;;  %vm4472_vm12 = vmor %vm4470_vm10, %vm4471_vm11 }
 0x700   :  { %v4532_v12 = vmul.f32 %v9502_v38, %v4494_v29  ;;  %v4536_v47 = vmul.f32 %v9502_v38, %v4498_v63  ;;  %v4516_v17 = vmul.f32 %v9502_v38, %v4478_v43  ;;  %v4534_v5 = vmul.f32 %v9502_v38, %v4496_v21  ;;  %v4703_v63 = vld [vmem:[#allocation7 + $0xc8] sm:$0xff]  ;;  %v4700_v21 = vld [vmem:[#allocation7 + $0xb0] sm:$0xff] }
 0x701   :  { %v9521_v41 = vmax.f32 %v4550_v55, 0.0  ;;  %v4467_v58 = vmul.f32 0.5, %v4466_v34  ;;  %v4538_v35 = vmul.f32 %v9502_v38, %v4500_v18  ;;  %v9554_v42 = vadd.f32 %v9511_v27, %v4528_v11  ;;  %5203 = vmatpush.msrb.mxu2 %v4703_v63  ;;  %5074 = vmatpush.msrb.mxu0 %v4700_v21 }
 0x702   :  { %v9557_v40 = vadd.f32 %v9511_v27, %v4530_v62  ;;  %v9560_v49 = vadd.f32 %v9511_v27, %v4532_v12  ;;  %v9563_v57 = vadd.f32 %v9511_v27, %v4536_v47  ;;  %v9567_v22 = vmax.f32 %v4552_v37, 0.0  ;;  %v4733_v37 = vld [vmem:[#allocation7 + $0x1b8] sm:$0xff] }
 0x703   :  { %4826 = vmatmul.f32.vlgmr.msra.gmra.mxu0 %v9521_v41  ;;  %4956 = vmatmul.f32.vlgmr.msra.gmra.mxu2 %v9521_v41  ;;  %v4468_v39 = vsub.f32 1.5, %v4467_v58  ;;  %v9570_v46 = vadd.f32 %v9511_v27, %v4534_v5  ;;  %v9573_v59 = vadd.f32 %v9511_v27, %v4538_v35  ;;  %v9580_v54 = vperm.slane %v9500_v4, 1 }
 0x704   :  { %v4480_v4 = vmul.f32 %v9504_v8, %v9343_v23  ;;  %v4502_v63 = vmul.f32 %v9504_v8, %v9374_v48 }
 0x705   :  { %v4469_v19 = vmul.f32 %v6159_v32, %v4468_v39  ;;  %v4701_v39 = vld [vmem:[#allocation7 + $0xb8] sm:$0xff] }
 0x706   :  { %v4518_v2 = vmul.f32 %v9502_v38, %v4480_v4  ;;  %5204 = vmatpush.msrb.mxu2 %v4701_v39  ;;  %v4540_v48 = vmul.f32 %v9502_v38, %v4502_v63  ;;  %v4727_v63 = vld [vmem:[#allocation7 + $0x188] sm:$0xff] }
 0x707   :  { %v9565_v36 = vsel %vm4472_vm12, %v6159_v32, %v4469_v19  ;;  %v4735_v32 = vld [vmem:[#allocation7 + $0x1c8] sm:$0xff] }
 0x708   :  { %v4505_v55 = vmul.f32 %v9565_v36, %v9440_v44  ;;  %v4475_v34 = vmul.f32 %v9565_v36, %v9394_v9  ;;  %v4477_v44 = vmul.f32 %v9565_v36, %v9397_v3  ;;  %5268 = vmatpush.msrb.mxu3 %v4735_v32  ;;  %v4554_v9 = vadd.f32 %v9511_v27, %v4516_v17 }
 0x709   :  { %v4482_v3 = vmul.f32 %v9504_v8, %v9346_v1  ;;  %v4499_v29 = vmul.f32 %v9565_v36, %v9430_v50  ;;  %v4479_v23 = vmul.f32 %v9565_v36, %v9400_v52  ;;  %v4491_v11 = vmul.f32 %v9565_v36, %v9418_v24  ;;  %v4732_v1 = vld [vmem:[#allocation7 + $0x1b0] sm:$0xff] }
 0x70a   :  { %v9585_v60 = vmul.f32 %v9528_v33, %v4505_v55  ;;  %v4513_v18 = vmul.f32 %v9528_v33, %v4475_v34  ;;  %v4515_v53 = vmul.f32 %v9528_v33, %v4477_v44  ;;  %v9597_v26 = vmax.f32 %v4554_v9, 0.0  ;;  %5269 = vmatpush.msrb.mxu3 %v4733_v37  ;;  %5139 = vmatpush.msrb.mxu1 %v4732_v1 }
 0x70b   :  { %4829 = vmatmul.f32.gmra.mxu0 %v9567_v22  ;;  %4959 = vmatmul.f32.gmra.mxu2 %v9567_v22  ;;  %v4501_v62 = vmul.f32 %v9565_v36, %v9433_v14  ;;  %v4493_v50 = vmul.f32 %v9565_v36, %v9421_v25  ;;  %v4495_v52 = vmul.f32 %v9565_v36, %v9424_v16 }
 0x70c   :  { %v4551_v58 = vadd.f32 %v9580_v54, %v4513_v18  ;;  %v4553_v12 = vadd.f32 %v9580_v54, %v4515_v53  ;;  %v4529_v24 = vmul.f32 %v9528_v33, %v4491_v11  ;;  %v4497_v14 = vmul.f32 %v9565_v36, %v9427_v7  ;;  %v4731_v53 = vld [vmem:[#allocation7 + $0x1a8] sm:$0xff] }
 0x70d   :  { %v4556_v47 = vadd.f32 %v9511_v27, %v4518_v2  ;;  %v4531_v19 = vmul.f32 %v9528_v33, %v4493_v50  ;;  %v4533_v25 = vmul.f32 %v9528_v33, %v4495_v52  ;;  %v4517_v17 = vmul.f32 %v9528_v33, %v4479_v23  ;;  %v4698_v2 = vld [vmem:[#allocation7 + $0xa0] sm:$0xff]  ;;  %5270 = vmatpush.msrb.mxu3 %v4731_v53  ;;  %v4697_v52 = vld [vmem:[#allocation7 + $0x98] sm:$0xff] }
 0x70e   :  { %v9594_v43 = vmax.f32 %v4551_v58, 0.0  ;;  %v9627_v16 = vadd.f32 %v9580_v54, %v4529_v24  ;;  %v4535_v5 = vmul.f32 %v9528_v33, %v4497_v14  ;;  %v4537_v35 = vmul.f32 %v9528_v33, %v4499_v29  ;;  %v4699_v58 = vld [vmem:[#allocation7 + $0xa8] sm:$0xff]  ;;  %5075 = vmatpush.msrb.mxu0 %v4698_v2  ;;  %v4696_v24 = vld [vmem:[#allocation7 + $0x90] sm:$0xff] }
 0x70f   :  { %v9632_v55 = vadd.f32 %v9580_v54, %v4531_v19  ;;  %v9635_v7 = vadd.f32 %v9580_v54, %v4533_v25  ;;  %v4539_v34 = vmul.f32 %v9528_v33, %v4501_v62  ;;  %v9640_v32 = vmax.f32 %v4553_v12, 0.0  ;;  %5205 = vmatpush.msrb.mxu2 %v4699_v58  ;;  %v4729_v12 = vld [vmem:[#allocation7 + $0x198] sm:$0xff] }
 0x710   :  { %4891 = vmatmul.f32.vlgmr.msra.gmra.mxu1 %v9594_v43  ;;  %5021 = vmatmul.f32.vlgmr.msra.gmra.mxu3 %v9594_v43  ;;  %v9643_v51 = vadd.f32 %v9580_v54, %v4535_v5  ;;  %v9646_v0 = vadd.f32 %v9580_v54, %v4537_v35  ;;  %v4503_v18 = vmul.f32 %v9565_v36, %v9438_v20  ;;  %v9650_v44 = vmax.f32 %v4556_v47, 0.0 }
 0x711   :  { %v4520_v9 = vmul.f32 %v9502_v38, %v4482_v3  ;;  %v9654_v4 = vadd.f32 %v9580_v54, %v4539_v34  ;;  %v9662_v20 = vadd.f32 %v9511_v27, %v9514_v31  ;;  %v4730_v3 = vld [vmem:[#allocation7 + $0x1a0] sm:$0xff]  ;;  %v9667_v23 = vadd.f32 %v9511_v27, %v4540_v48  ;;  %5206 = vmatpush.msrb.mxu2 %v4697_v52 }
 0x712   :  { %v4541_v29 = vmul.f32 %v9528_v33, %v4503_v18  ;;  %v9671_v39 = vadd.f32 %v9580_v54, %v9585_v60  ;;  %v4555_v37 = vadd.f32 %v9580_v54, %v4517_v17  ;;  %v4481_v21 = vmul.f32 %v9565_v36, %v9403_v56  ;;  %5140 = vmatpush.msrb.mxu1 %v4730_v3  ;;  %v4694_v18 = vld [vmem:[#allocation7 + $0x80] sm:$0xff] }
 0x713   :  { %4832 = vmatmul.f32.gmra.mxu0 %v9597_v26  ;;  %4962 = vmatmul.f32.gmra.mxu2 %v9597_v26  ;;  %v4558_v11 = vadd.f32 %v9511_v27, %v4520_v9  ;;  %v4484_v62 = vmul.f32 %v9504_v8, %v9349_v10  ;;  %v4728_v10 = vld [vmem:[#allocation7 + $0x190] sm:$0xff]  ;;  %v4483_v47 = vmul.f32 %v9565_v36, %v9406_v30  ;;  %v4695_v30 = vld [vmem:[#allocation7 + $0x88] sm:$0xff] }
 0x714   :  { %v9677_v31 = vadd.f32 %v9580_v54, %v4541_v29  ;;  %v9682_v1 = vmax.f32 %v4555_v37, 0.0  ;;  %v4519_v60 = vmul.f32 %v9528_v33, %v4481_v21  ;;  %5271 = vmatpush.msrb.mxu3 %v4729_v12  ;;  %v4486_v25 = vmul.f32 %v9504_v8, %v9352_v13  ;;  %5076 = vmatpush.msrb.mxu0 %v4696_v24  ;;  %v4726_v13 = vld [vmem:[#allocation7 + $0x180] sm:$0xff]  ;;  %v4725_v21 = vld [vmem:[#allocation7 + $0x178] sm:$0xff]  ;;  %v4691_v12 = vld [vmem:[#allocation7 + $0x68] sm:$0xff] }
 0x715   :  { %v9685_v50 = vmax.f32 %v4558_v11, 0.0  ;;  %v4522_v56 = vmul.f32 %v9502_v38, %v4484_v62  ;;  %5141 = vmatpush.msrb.mxu1 %v4728_v10  ;;  %v4521_v5 = vmul.f32 %v9528_v33, %v4483_v47  ;;  %v4485_v48 = vmul.f32 %v9565_v36, %v9409_v61  ;;  %5207 = vmatpush.msrb.mxu2 %v4695_v30  ;;  %v4693_v61 = vld [vmem:[#allocation7 + $0x78] sm:$0xff]  ;;  %v4692_v11 = vld [vmem:[#allocation7 + $0x70] sm:$0xff]  ;;  %v4723_v24 = vld [vmem:[#allocation7 + $0x168] sm:$0xff] }
 0x716   :  { %v4557_v14 = vadd.f32 %v9580_v54, %v4519_v60  ;;  %v4524_v34 = vmul.f32 %v9502_v38, %v4486_v25  ;;  %5272 = vmatpush.msrb.mxu3 %v4727_v63  ;;  %v4488_v53 = vmul.f32 %v9504_v8, %v9355_v6  ;;  %5077 = vmatpush.msrb.mxu0 %v4694_v18  ;;  %v4724_v6 = vld [vmem:[#allocation7 + $0x170] sm:$0xff]  ;;  %v4690_v10 = vld [vmem:[#allocation7 + $0x60] sm:$0xff]  ;;  %v9744_v25 = vmax.f32 %v9554_v42, 0.0  ;;  %v4687_v63 = vld [vmem:[#allocation7 + $0x48] sm:$0xff] }
 0x717   :  { %v4560_v19 = vadd.f32 %v9511_v27, %v4522_v56  ;;  %v4559_v9 = vadd.f32 %v9580_v54, %v4521_v5  ;;  %5142 = vmatpush.msrb.mxu1 %v4726_v13  ;;  %v4523_v29 = vmul.f32 %v9528_v33, %v4485_v48  ;;  %v4487_v62 = vmul.f32 %v9565_v36, %v9412_v45  ;;  %v4722_v45 = vld [vmem:[#allocation7 + $0x160] sm:$0xff]  ;;  %v4689_v5 = vld [vmem:[#allocation7 + $0x58] sm:$0xff]  ;;  %v4688_v30 = vld [vmem:[#allocation7 + $0x50] sm:$0xff] }
 0x718   :  { %4894 = vmatmul.f32.gmra.mxu1 %v9640_v32  ;;  %5024 = vmatmul.f32.gmra.mxu3 %v9640_v32  ;;  %v9698_v17 = vmax.f32 %v4557_v14, 0.0  ;;  %v4562_v58 = vadd.f32 %v9511_v27, %v4524_v34  ;;  %v4526_v37 = vmul.f32 %v9502_v38, %v4488_v53  ;;  %v4489_v14 = vmul.f32 %v9565_v36, %v9415_v15  ;;  %v4721_v34 = vld [vmem:[#allocation7 + $0x158] sm:$0xff]  ;;  %v4720_v15 = vld [vmem:[#allocation7 + $0x150] sm:$0xff]  ;;  %v4719_v18 = vld [vmem:[#allocation7 + $0x148] sm:$0xff] }
 0x719   :  { %v9701_v35 = vmax.f32 %v4560_v19, 0.0  ;;  %v9714_v2 = vmax.f32 %v4559_v9, 0.0  ;;  %v4561_v8 = vadd.f32 %v9580_v54, %v4523_v29  ;;  %5208 = vmatpush.msrb.mxu2 %v4693_v61  ;;  %5273 = vmatpush.msrb.mxu3 %v4725_v21  ;;  %v4525_v56 = vmul.f32 %v9528_v33, %v4487_v62  ;;  %v4686_v13 = vld [vmem:[#allocation7 + $0x40] sm:$0xff]  ;;  %v4685_v48 = vld [vmem:[#allocation7 + $0x38] sm:$0xff]  ;;  %v4684_v53 = vld [vmem:[#allocation7 + $0x30] sm:$0xff] }
 0x71a   :  { %v9717_v3 = vmax.f32 %v4562_v58, 0.0  ;;  %v4564_v38 = vadd.f32 %v9511_v27, %v4526_v37  ;;  %5078 = vmatpush.msrb.mxu0 %v4692_v11  ;;  %5143 = vmatpush.msrb.mxu1 %v4724_v6  ;;  %v4527_v19 = vmul.f32 %v9528_v33, %v4489_v14  ;;  %v9754_v42 = vmax.f32 %v9557_v40, 0.0  ;;  %v4717_v58 = vld [vmem:[#allocation7 + $0x138] sm:$0xff]  ;;  %v4716_v29 = vld [vmem:[#allocation7 + $0x130] sm:$0xff]  ;;  %v4683_v37 = vld [vmem:[#allocation7 + $0x28] sm:$0xff] }
 0x71b   :  { %4835 = vmatmul.f32.gmra.mxu0 %v9650_v44  ;;  %4965 = vmatmul.f32.gmra.mxu2 %v9650_v44  ;;  %v9728_v60 = vmax.f32 %v4561_v8, 0.0  ;;  %v4563_v27 = vadd.f32 %v9580_v54, %v4525_v56  ;;  %v9761_v9 = vmax.f32 %v9627_v16, 0.0  ;;  %v9764_v40 = vmax.f32 %v9560_v49, 0.0  ;;  %v4715_v61 = vld [vmem:[#allocation7 + $0x128] sm:$0xff]  ;;  %v4682_v21 = vld [vmem:[#allocation7 + $0x20] sm:$0xff]  ;;  %v4681_v6 = vld [vmem:[#allocation7 + $0x18] sm:$0xff] }
 0x71c   :  { %v9731_v52 = vmax.f32 %v4564_v38, 0.0  ;;  %5209 = vmatpush.msrb.mxu2 %v4691_v12  ;;  %5274 = vmatpush.msrb.mxu3 %v4723_v24  ;;  %v4565_v36 = vadd.f32 %v9580_v54, %v4527_v19  ;;  %v4718_v54 = vld [vmem:[#allocation7 + $0x140] sm:$0xff]  ;;  %v9771_v16 = vmax.f32 %v9632_v55, 0.0  ;;  %v9774_v49 = vmax.f32 %v9570_v46, 0.0  ;;  %v4713_v8 = vld [vmem:[#allocation7 + $0x118] sm:$0xff]  ;;  %v4680_v62 = vld [vmem:[#allocation7 + $0x10] sm:$0xff] }
 0x71d   :  { %5079 = vmatpush.msrb.mxu0 %v4690_v10  ;;  %5144 = vmatpush.msrb.mxu1 %v4722_v45  ;;  %v9740_v47 = vmax.f32 %v4563_v27, 0.0  ;;  %v4714_v11 = vld [vmem:[#allocation7 + $0x120] sm:$0xff]  ;;  %v9781_v55 = vmax.f32 %v9635_v7, 0.0  ;;  %v9784_v46 = vmax.f32 %v9563_v57, 0.0  ;;  %v4712_v38 = vld [vmem:[#allocation7 + $0x110] sm:$0xff]  ;;  %v9791_v7 = vmax.f32 %v9643_v51, 0.0 }
 0x71e   :  { %5210 = vmatpush.msrb.mxu2 %v4689_v5  ;;  %5275 = vmatpush.msrb.mxu3 %v4721_v34  ;;  %v9751_v33 = vmax.f32 %v4565_v36, 0.0  ;;  %v9794_v57 = vmax.f32 %v9573_v59, 0.0  ;;  %v4679_v56 = vld [vmem:[#allocation7 + $0x8] sm:$0xff]  ;;  %v4678_v24 = vld [vmem:[#allocation7] sm:$0xff]  ;;  %v9801_v51 = vmax.f32 %v9646_v0, 0.0  ;;  %v9804_v59 = vmax.f32 %v9667_v23, 0.0 }
 0x71f   :  { %5080 = vmatpush.msrb.mxu0 %v4688_v30  ;;  %5145 = vmatpush.msrb.mxu1 %v4720_v15  ;;  %v4711_v12 = vld [vmem:[#allocation7 + $0x108] sm:$0xff]  ;;  %v4710_v10 = vld [vmem:[#allocation7 + $0x100] sm:$0xff]  ;;  %v5393_v45 = vld [vmem:[#allocation7 + $0x4f8] sm:$0xff]  ;;  %v9811_v0 = vmax.f32 %v9654_v4, 0.0  ;;  %v9814_v23 = vmax.f32 %v9662_v20, 0.0  ;;  %v9821_v4 = vmax.f32 %v9677_v31, 0.0 }
 0x720   :  { %4897 = vmatmul.f32.gmra.mxu1 %v9682_v1  ;;  %5027 = vmatmul.f32.gmra.mxu3 %v9682_v1  ;;  %v5425_v27 = vld [vmem:[#allocation7 + $0x5f8] sm:$0xff]  ;;  %v5392_v14 = vld [vmem:[#allocation7 + $0x4f0] sm:$0xff]  ;;  %v5391_v5 = vld [vmem:[#allocation7 + $0x4e8] sm:$0xff] }
 0x721   :  { %5211 = vmatpush.msrb.mxu2 %v4687_v63  ;;  %5276 = vmatpush.msrb.mxu3 %v4719_v18  ;;  %v5424_v19 = vld [vmem:[#allocation7 + $0x5f0] sm:$0xff]  ;;  %v5423_v34 = vld [vmem:[#allocation7 + $0x5e8] sm:$0xff]  ;;  %v5390_v20 = vld [vmem:[#allocation7 + $0x4e0] sm:$0xff]  ;;  %v11243_v18 = vmov 0.0  }
 0x722   :  { %5081 = vmatpush.msrb.mxu0 %v4686_v13  ;;  %5146 = vmatpush.msrb.mxu1 %v4718_v54  ;;  %v5422_v15 = vld [vmem:[#allocation7 + $0x5e0] sm:$0xff]  ;;  %v5389_v36 = vld [vmem:[#allocation7 + $0x4d8] sm:$0xff]  ;;  %v9830_v13 = vmax.f32 %v9671_v39, 0.0 }
 0x723   :  { %4838 = vmatmul.f32.gmra.mxu0 %v9685_v50  ;;  %4968 = vmatmul.f32.gmra.mxu2 %v9685_v50  ;;  %v5421_v63 = vld [vmem:[#allocation7 + $0x5d8] sm:$0xff] }
 0x724   :  { %5212 = vmatpush.msrb.mxu2 %v4685_v48  ;;  %5277 = vmatpush.msrb.mxu3 %v4717_v58  ;;  %11244 = vst [vmem:[#allocation32_spill] sm:$0xff] %v9830_v13  ;;  %v5388_v48 = vld [vmem:[#allocation7 + $0x4d0] sm:$0xff] }
 0x725   :  { %5082 = vmatpush.msrb.mxu0 %v4684_v53  ;;  %5147 = vmatpush.msrb.mxu1 %v4716_v29  ;;  %v5420_v58 = vld [vmem:[#allocation7 + $0x5d0] sm:$0xff]  ;;  %v5387_v53 = vld [vmem:[#allocation7 + $0x4c8] sm:$0xff] }
 0x726   :  { %5213 = vmatpush.msrb.mxu2 %v4683_v37  ;;  %5278 = vmatpush.msrb.mxu3 %v4715_v61  ;;  %v5419_v29 = vld [vmem:[#allocation7 + $0x5c8] sm:$0xff] }
 0x727   :  { %5083 = vmatpush.msrb.mxu0 %v4682_v21  ;;  %5148 = vmatpush.msrb.mxu1 %v4714_v11  ;;  %v5386_v21 = vld [vmem:[#allocation7 + $0x4c0] sm:$0xff] }
 0x728   :  { %4900 = vmatmul.f32.gmra.mxu1 %v9698_v17  ;;  %5030 = vmatmul.f32.gmra.mxu3 %v9698_v17  ;;  %v5418_v11 = vld [vmem:[#allocation7 + $0x5c0] sm:$0xff] }
 0x729   :  { %5214 = vmatpush.msrb.mxu2 %v4681_v6  ;;  %5279 = vmatpush.msrb.mxu3 %v4713_v8  ;;  %v5385_v6 = vld [vmem:[#allocation7 + $0x4b8] sm:$0xff] }
 0x72a   :  { %5084 = vmatpush.msrb.mxu0 %v4680_v62  ;;  %5149 = vmatpush.msrb.mxu1 %v4712_v38  ;;  %v5417_v8 = vld [vmem:[#allocation7 + $0x5b8] sm:$0xff] }
 0x72b   :  { %4841 = vmatmul.f32.gmra.mxu0 %v9701_v35  ;;  %4971 = vmatmul.f32.gmra.mxu2 %v9701_v35 }
 0x72c   :  { %5215 = vmatpush.msrb.mxu2 %v4679_v56  ;;  %5280 = vmatpush.msrb.mxu3 %v4711_v12 }
 0x72d   :  { %5085 = vmatpush.msrb.mxu0 %v4678_v24  ;;  %5150 = vmatpush.msrb.mxu1 %v4710_v10  ;;  %v5384_v10 = vld [vmem:[#allocation7 + $0x4b0] sm:$0xff] }
 0x72e   :  { %5556 = vmatpush.msra.mxu2 %v5393_v45  ;;  %5621 = vmatpush.msra.mxu3 %v5425_v27  ;;  %v5416_v45 = vld [vmem:[#allocation7 + $0x5b0] sm:$0xff]  ;;  %v5383_v27 = vld [vmem:[#allocation7 + $0x4a8] sm:$0xff] }
 0x72f   :  { %5426 = vmatpush.msra.mxu0 %v5392_v14  ;;  %5491 = vmatpush.msra.mxu1 %v5424_v19 }
 0x730   :  { %4903 = vmatmul.f32.gmra.mxu1 %v9714_v2  ;;  %5033 = vmatmul.f32.gmra.mxu3 %v9714_v2 }
 0x731   :  { %5557 = vmatpush.msra.mxu2 %v5391_v5  ;;  %5622 = vmatpush.msra.mxu3 %v5423_v34 }
 0x732   :  { %5427 = vmatpush.msra.mxu0 %v5390_v20  ;;  %5492 = vmatpush.msra.mxu1 %v5422_v15  ;;  %v5382_v15 = vld [vmem:[#allocation7 + $0x4a0] sm:$0xff] }
 0x733   :  { %4844 = vmatmul.f32.gmra.mxu0 %v9717_v3  ;;  %4974 = vmatmul.f32.gmra.mxu2 %v9717_v3 }
 0x734   :  { %5558 = vmatpush.msra.mxu2 %v5389_v36  ;;  %5623 = vmatpush.msra.mxu3 %v5421_v63  ;;  %v5414_v36 = vld [vmem:[#allocation7 + $0x5a0] sm:$0xff]  ;;  %v5381_v63 = vld [vmem:[#allocation7 + $0x498] sm:$0xff] }
 0x735   :  { %5428 = vmatpush.msra.mxu0 %v5388_v48  ;;  %5493 = vmatpush.msra.mxu1 %v5420_v58 }
 0x736   :  { %5559 = vmatpush.msra.mxu2 %v5387_v53  ;;  %5624 = vmatpush.msra.mxu3 %v5419_v29 }
 0x737   :  { %5429 = vmatpush.msra.mxu0 %v5386_v21  ;;  %5494 = vmatpush.msra.mxu1 %v5418_v11  ;;  %v5412_v21 = vld [vmem:[#allocation7 + $0x590] sm:$0xff]  ;;  %v5411_v11 = vld [vmem:[#allocation7 + $0x588] sm:$0xff] }
 0x738   :  { %4906 = vmatmul.f32.gmra.mxu1 %v9728_v60  ;;  %5036 = vmatmul.f32.gmra.mxu3 %v9728_v60 }
 0x739   :  { %5560 = vmatpush.msra.mxu2 %v5385_v6  ;;  %5625 = vmatpush.msra.mxu3 %v5417_v8 }
 0x73a   :  { %5430 = vmatpush.msra.mxu0 %v5384_v10  ;;  %5495 = vmatpush.msra.mxu1 %v5416_v45  ;;  %v5378_v45 = vld [vmem:[#allocation7 + $0x480] sm:$0xff] }
 0x73b   :  { %4847 = vmatmul.f32.gmra.mxu0 %v9731_v52  ;;  %4977 = vmatmul.f32.gmra.mxu2 %v9731_v52 }
 0x73c   :  { %5561 = vmatpush.msra.mxu2 %v5383_v27  ;;  %5431 = vmatpush.msra.mxu0 %v5382_v15  ;;  %v5410_v27 = vld [vmem:[#allocation7 + $0x580] sm:$0xff] }
 0x73d   :  { %5496 = vmatpush.msra.mxu1 %v5414_v36 }
 0x73e   :  { %5562 = vmatpush.msra.mxu2 %v5381_v63 }
 0x73f   :  { %5497 = vmatpush.msra.mxu1 %v5412_v21  ;;  %v5407_v21 = vld [vmem:[#allocation7 + $0x568] sm:$0xff] }
 0x740   :  { %4909 = vmatmul.f32.gmra.mxu1 %v9740_v47  ;;  %5039 = vmatmul.f32.gmra.mxu3 %v9740_v47 }
 0x741   :  { %5498 = vmatpush.msra.mxu1 %v5410_v27  ;;  %v5374_v27 = vld [vmem:[#allocation7 + $0x460] sm:$0xff] }
 0x743   :  { %4850 = vmatmul.f32.gmra.mxu0 %v9744_v25  ;;  %4980 = vmatmul.f32.gmra.mxu2 %v9744_v25 }
 0x748   :  { %4912 = vmatmul.f32.gmra.mxu1 %v9751_v33  ;;  %5042 = vmatmul.f32.gmra.mxu3 %v9751_v33 }
 0x74b   :  { %4853 = vmatmul.f32.gmra.mxu0 %v9754_v42  ;;  %4983 = vmatmul.f32.gmra.mxu2 %v9754_v42 }
 0x750   :  { %4915 = vmatmul.f32.gmra.mxu1 %v9761_v9  ;;  %5045 = vmatmul.f32.gmra.mxu3 %v9761_v9 }
 0x753   :  { %4856 = vmatmul.f32.gmra.mxu0 %v9764_v40  ;;  %4986 = vmatmul.f32.gmra.mxu2 %v9764_v40 }
 0x758   :  { %4918 = vmatmul.f32.gmra.mxu1 %v9771_v16  ;;  %5048 = vmatmul.f32.gmra.mxu3 %v9771_v16 }
 0x75b   :  { %4859 = vmatmul.f32.gmra.mxu0 %v9774_v49  ;;  %4989 = vmatmul.f32.gmra.mxu2 %v9774_v49 }
 0x760   :  { %4921 = vmatmul.f32.gmra.mxu1 %v9781_v55  ;;  %5051 = vmatmul.f32.gmra.mxu3 %v9781_v55 }
 0x763   :  { %4862 = vmatmul.f32.gmra.mxu0 %v9784_v46  ;;  %4992 = vmatmul.f32.gmra.mxu2 %v9784_v46 }
 0x768   :  { %4924 = vmatmul.f32.gmra.mxu1 %v9791_v7  ;;  %5054 = vmatmul.f32.gmra.mxu3 %v9791_v7 }
 0x76b   :  { %4865 = vmatmul.f32.gmra.mxu0 %v9794_v57  ;;  %4995 = vmatmul.f32.gmra.mxu2 %v9794_v57 }
 0x770   :  { %4927 = vmatmul.f32.gmra.mxu1 %v9801_v51  ;;  %5057 = vmatmul.f32.gmra.mxu3 %v9801_v51 }
 0x773   :  { %4868 = vmatmul.f32.gmra.mxu0 %v9804_v59  ;;  %4998 = vmatmul.f32.gmra.mxu2 %v9804_v59 }
 0x778   :  { %4930 = vmatmul.f32.gmra.mxu1 %v9811_v0  ;;  %5060 = vmatmul.f32.gmra.mxu3 %v9811_v0 }
 0x77b   :  { %4871 = vmatmul.f32.gmra.mxu0 %v9814_v23  ;;  %5001 = vmatmul.f32.gmra.mxu2 %v9814_v23 }
 0x780   :  { %v9823_v30 = vpop.f32.mrf.mxu0  ;;  %4933 = vmatmul.f32.gmra.mxu1 %v9821_v4  ;;  %5063 = vmatmul.f32.gmra.mxu3 %v9821_v4 }
 0x781   :  { %11242 = vst [vmem:[#allocation120_spill] sm:$0xff] %v9823_v30 }
 0x783   :  { %5086 = vmatmul.f32.vlgmr.msrb.gmra.mxu0 %v11243_v18  ;;  %5216 = vmatmul.f32.vlgmr.msrb.gmra.mxu2 %v11243_v18 }
 0x786   :  { %v4957_v31 = vpop.f32.mrf.mxu2 }
 0x788   :  { %v9832_v54 = vpop.f32.mrf.mxu0  ;;  %4936 = vmatmul.f32.gmra.mxu1 %v9830_v13  ;;  %5066 = vmatmul.f32.gmra.mxu3 %v9830_v13 }
 0x789   :  { %11245 = vst [vmem:[#allocation33_spill] sm:$0xff] %v9832_v54 }
 0x78b   :  { %5089 = vmatmul.f32.gmra.mxu0 %v11243_v18  ;;  %5219 = vmatmul.f32.gmra.mxu2 %v11243_v18 }
 0x78d   :  { %v9838_v37 = vpop.f32.mrf.mxu1 }
 0x78e   :  { %v4960_v39 = vpop.f32.mrf.mxu2  ;;  %11246 = vst [vmem:[#allocation147_spill] sm:$0xff] %v9838_v37 }
 0x790   :  { %v9840_v61 = vpop.f32.mrf.mxu0  ;;  %5151 = vmatmul.f32.vlgmr.msrb.gmra.mxu1 %v11243_v18  ;;  %5281 = vmatmul.f32.vlgmr.msrb.gmra.mxu3 %v11243_v18 }
 0x791   :  { %11247 = vst [vmem:[#allocation148_spill] sm:$0xff] %v9840_v61  ;;  %v5395_v61 = vld [vmem:[#allocation7 + $0x508] sm:$0xff] }
 0x793   :  { %5092 = vmatmul.f32.gmra.mxu0 %v9521_v41  ;;  %5222 = vmatmul.f32.gmra.mxu2 %v9521_v41  ;;  %v5022_v62 = vpop.f32.mrf.mxu3  ;;  %v5415_v41 = vld [vmem:[#allocation7 + $0x5a8] sm:$0xff] }
 0x794   :  { %v9846_v38 = vadd.f32 %v5022_v62, %v4957_v31  ;;  %5626 = vmatpush.msra.mxu3 %v5415_v41  ;;  %v5409_v41 = vld [vmem:[#allocation7 + $0x578] sm:$0xff] }
 0x795   :  { %v9848_v12 = vpop.f32.mrf.mxu1 }
 0x796   :  { %v4963_v56 = vpop.f32.mrf.mxu2  ;;  %11248 = vst [vmem:[#allocation61_spill] sm:$0xff] %v9848_v12  ;;  %v5394_v12 = vld [vmem:[#allocation7 + $0x500] sm:$0xff] }
 0x798   :  { %v9850_v24 = vpop.f32.mrf.mxu0  ;;  %5154 = vmatmul.f32.gmra.mxu1 %v11243_v18  ;;  %5284 = vmatmul.f32.gmra.mxu3 %v11243_v18 }
 0x799   :  { %11249 = vst [vmem:[#allocation89_spill] sm:$0xff] %v9850_v24  ;;  %v5396_v24 = vld [vmem:[#allocation7 + $0x510] sm:$0xff] }
 0x79b   :  { %5095 = vmatmul.f32.gmra.mxu0 %v9567_v22  ;;  %5225 = vmatmul.f32.gmra.mxu2 %v9567_v22  ;;  %v5025_v14 = vpop.f32.mrf.mxu3  ;;  %v5413_v22 = vld [vmem:[#allocation7 + $0x598] sm:$0xff] }
 0x79c   :  { %v9856_v19 = vadd.f32 %v5025_v14, %v4960_v39  ;;  %5627 = vmatpush.msra.mxu3 %v5413_v22  ;;  %v5380_v39 = vld [vmem:[#allocation7 + $0x490] sm:$0xff] }
 0x79d   :  { %v9858_v34 = vpop.f32.mrf.mxu1  ;;  %5432 = vmatpush.msra.mxu0 %v5380_v39  ;;  %v5376_v22 = vld [vmem:[#allocation7 + $0x470] sm:$0xff]  ;;  %v5375_v39 = vld [vmem:[#allocation7 + $0x468] sm:$0xff] }
 0x79e   :  { %v4966_v5 = vpop.f32.mrf.mxu2  ;;  %11250 = vst [vmem:[#allocation90_spill] sm:$0xff] %v9858_v34  ;;  %5628 = vmatpush.msra.mxu3 %v5411_v11  ;;  %v5363_v34 = vld [vmem:[#allocation7 + $0x408] sm:$0xff] }
 0x79f   :  { %5433 = vmatpush.msra.mxu0 %v5378_v45 }
 0x7a0   :  { %v9860_v20 = vpop.f32.mrf.mxu0  ;;  %5157 = vmatmul.f32.gmra.mxu1 %v9594_v43  ;;  %5287 = vmatmul.f32.gmra.mxu3 %v9594_v43  ;;  %v5379_v43 = vld [vmem:[#allocation7 + $0x488] sm:$0xff] }
 0x7a1   :  { %11251 = vst [vmem:[#allocation62_spill] sm:$0xff] %v9860_v20  ;;  %5563 = vmatpush.msra.mxu2 %v5379_v43  ;;  %5629 = vmatpush.msra.mxu3 %v5409_v41  ;;  %v5373_v41 = vld [vmem:[#allocation7 + $0x458] sm:$0xff] }
 0x7a2   :  { %5434 = vmatpush.msra.mxu0 %v5376_v22  ;;  %v5365_v20 = vld [vmem:[#allocation7 + $0x418] sm:$0xff] }
 0x7a3   :  { %5098 = vmatmul.f32.gmra.mxu0 %v9597_v26  ;;  %5228 = vmatmul.f32.gmra.mxu2 %v9597_v26  ;;  %v5028_v31 = vpop.f32.mrf.mxu3 }
 0x7a4   :  { %v9866_v48 = vadd.f32 %v5028_v31, %v4963_v56  ;;  %v5408_v31 = vld [vmem:[#allocation7 + $0x570] sm:$0xff]  ;;  %5630 = vmatpush.msra.mxu3 %v5407_v21  ;;  %5435 = vmatpush.msra.mxu0 %v5374_v27 }
 0x7a5   :  { %v9868_v53 = vpop.f32.mrf.mxu1  ;;  %5499 = vmatpush.msra.mxu1 %v5408_v31  ;;  %v5404_v27 = vld [vmem:[#allocation7 + $0x550] sm:$0xff] }
 0x7a6   :  { %v4969_v58 = vpop.f32.mrf.mxu2  ;;  %11252 = vst [vmem:[#allocation121_spill] sm:$0xff] %v9868_v53  ;;  %v5397_v53 = vld [vmem:[#allocation7 + $0x518] sm:$0xff] }
 0x7a8   :  { %v9870_v29 = vpop.f32.mrf.mxu0  ;;  %5160 = vmatmul.f32.gmra.mxu1 %v9640_v32  ;;  %5290 = vmatmul.f32.gmra.mxu3 %v9640_v32  ;;  %v5377_v32 = vld [vmem:[#allocation7 + $0x478] sm:$0xff] }
 0x7a9   :  { %11253 = vst [vmem:[#allocation122_spill] sm:$0xff] %v9870_v29  ;;  %5564 = vmatpush.msra.mxu2 %v5377_v32  ;;  %v5406_v32 = vld [vmem:[#allocation7 + $0x560] sm:$0xff]  ;;  %v5399_v29 = vld [vmem:[#allocation7 + $0x528] sm:$0xff] }
 0x7aa   :  { %5500 = vmatpush.msra.mxu1 %v5406_v32  ;;  %v5371_v32 = vld [vmem:[#allocation7 + $0x448] sm:$0xff] }
 0x7ab   :  { %5101 = vmatmul.f32.gmra.mxu0 %v9650_v44  ;;  %5231 = vmatmul.f32.gmra.mxu2 %v9650_v44  ;;  %v5031_v6 = vpop.f32.mrf.mxu3 }
 0x7ac   :  { %v9876_v8 = vadd.f32 %v5031_v6, %v4966_v5  ;;  %5565 = vmatpush.msra.mxu2 %v5375_v39  ;;  %5501 = vmatpush.msra.mxu1 %v5404_v27  ;;  %v5370_v27 = vld [vmem:[#allocation7 + $0x440] sm:$0xff] }
 0x7ad   :  { %v9878_v56 = vpop.f32.mrf.mxu1 }
 0x7ae   :  { %v4972_v62 = vpop.f32.mrf.mxu2  ;;  %11254 = vst [vmem:[#allocation34_spill] sm:$0xff] %v9878_v56  ;;  %5566 = vmatpush.msra.mxu2 %v5373_v41  ;;  %v5398_v56 = vld [vmem:[#allocation7 + $0x520] sm:$0xff] }
 0x7b0   :  { %v9880_v10 = vpop.f32.mrf.mxu0  ;;  %5163 = vmatmul.f32.gmra.mxu1 %v9682_v1  ;;  %5293 = vmatmul.f32.gmra.mxu3 %v9682_v1 }
 0x7b1   :  { %11255 = vst [vmem:[#allocation35_spill] sm:$0xff] %v9880_v10  ;;  %5567 = vmatpush.msra.mxu2 %v5371_v32  ;;  %v5400_v10 = vld [vmem:[#allocation7 + $0x530] sm:$0xff] }
 0x7b3   :  { %5104 = vmatmul.f32.gmra.mxu0 %v9685_v50  ;;  %5234 = vmatmul.f32.gmra.mxu2 %v9685_v50  ;;  %v5034_v14 = vpop.f32.mrf.mxu3 }
 0x7b4   :  { %v9886_v5 = vadd.f32 %v5034_v14, %v4969_v58  ;;  %v5405_v14 = vld [vmem:[#allocation7 + $0x558] sm:$0xff] }
 0x7b5   :  { %v9888_v36 = vpop.f32.mrf.mxu1  ;;  %5631 = vmatpush.msra.mxu3 %v5405_v14 }
 0x7b6   :  { %v4975_v15 = vpop.f32.mrf.mxu2  ;;  %11256 = vst [vmem:[#allocation149_spill] sm:$0xff] %v9888_v36  ;;  %v5367_v36 = vld [vmem:[#allocation7 + $0x428] sm:$0xff] }
 0x7b7   :  { %5632 = vmatpush.msra.mxu3 %v5403_v28 }
 0x7b8   :  { %v9890_v63 = vpop.f32.mrf.mxu0  ;;  %5166 = vmatmul.f32.gmra.mxu1 %v9698_v17  ;;  %5296 = vmatmul.f32.gmra.mxu3 %v9698_v17 }
 0x7b9   :  { %11257 = vst [vmem:[#allocation150_spill] sm:$0xff] %v9890_v63  ;;  %v5369_v63 = vld [vmem:[#allocation7 + $0x438] sm:$0xff] }
 0x7ba   :  { %5568 = vmatpush.msra.mxu2 %v5369_v63 }
 0x7bb   :  { %5107 = vmatmul.f32.gmra.mxu0 %v9701_v35  ;;  %5237 = vmatmul.f32.gmra.mxu2 %v9701_v35  ;;  %v5037_v58 = vpop.f32.mrf.mxu3 }
 0x7bc   :  { %v9896_v43 = vadd.f32 %v5037_v58, %v4972_v62  ;;  %v5372_v58 = vld [vmem:[#allocation7 + $0x450] sm:$0xff]  ;;  %5569 = vmatpush.msra.mxu2 %v5367_v36 }
 0x7bd   :  { %v9898_v6 = vpop.f32.mrf.mxu1  ;;  %5436 = vmatpush.msra.mxu0 %v5372_v58 }
 0x7be   :  { %v4978_v11 = vpop.f32.mrf.mxu2  ;;  %11258 = vst [vmem:[#allocation63_spill] sm:$0xff] %v9898_v6  ;;  %v5401_v6 = vld [vmem:[#allocation7 + $0x538] sm:$0xff]  ;;  %5570 = vmatpush.msra.mxu2 %v5365_v20  ;;  %v5362_v20 = vld [vmem:[#allocation7 + $0x400] sm:$0xff] }
 0x7bf   :  { %5437 = vmatpush.msra.mxu0 %v5370_v27  ;;  %5633 = vmatpush.msra.mxu3 %v5401_v6 }
 0x7c0   :  { %v9900_v45 = vpop.f32.mrf.mxu0  ;;  %5169 = vmatmul.f32.gmra.mxu1 %v9714_v2  ;;  %5299 = vmatmul.f32.gmra.mxu3 %v9714_v2 }
 0x7c1   :  { %5634 = vmatpush.msra.mxu3 %v5399_v29  ;;  %5571 = vmatpush.msra.mxu2 %v5363_v34 }
 0x7c3   :  { %5110 = vmatmul.f32.gmra.mxu0 %v9717_v3  ;;  %5240 = vmatmul.f32.gmra.mxu2 %v9717_v3  ;;  %v5040_v62 = vpop.f32.mrf.mxu3 }
 0x7c4   :  { %v9906_v22 = vadd.f32 %v5040_v62, %v4975_v15  ;;  %5635 = vmatpush.msra.mxu3 %v5397_v53 }
 0x7c5   :  { %v9908_v39 = vpop.f32.mrf.mxu1 }
 0x7c6   :  { %v4981_v31 = vpop.f32.mrf.mxu2  ;;  %11259 = vst [vmem:[#allocation91_spill] sm:$0xff] %v9908_v39  ;;  %v5402_v39 = vld [vmem:[#allocation7 + $0x540] sm:$0xff]  ;;  %5636 = vmatpush.msra.mxu3 %v5395_v61 }
 0x7c7   :  { %5502 = vmatpush.msra.mxu1 %v5402_v39  ;;  %v5368_v39 = vld [vmem:[#allocation7 + $0x430] sm:$0xff] }
 0x7c8   :  { %v9910_v21 = vpop.f32.mrf.mxu0  ;;  %5172 = vmatmul.f32.gmra.mxu1 %v9728_v60  ;;  %5302 = vmatmul.f32.gmra.mxu3 %v9728_v60 }
 0x7c9   :  { %5438 = vmatpush.msra.mxu0 %v5368_v39  ;;  %5503 = vmatpush.msra.mxu1 %v5400_v10  ;;  %v5366_v10 = vld [vmem:[#allocation7 + $0x420] sm:$0xff] }
 0x7cb   :  { %5113 = vmatmul.f32.gmra.mxu0 %v9731_v52  ;;  %5243 = vmatmul.f32.gmra.mxu2 %v9731_v52  ;;  %v5043_v15 = vpop.f32.mrf.mxu3 }
 0x7cc   :  { %v9916_v41 = vadd.f32 %v5043_v15, %v4978_v11  ;;  %5439 = vmatpush.msra.mxu0 %v5366_v10  ;;  %5504 = vmatpush.msra.mxu1 %v5398_v56  ;;  %v5364_v56 = vld [vmem:[#allocation7 + $0x410] sm:$0xff] }
 0x7cd   :  { %v9918_v62 = vpop.f32.mrf.mxu1 }
 0x7ce   :  { %v4984_v14 = vpop.f32.mrf.mxu2  ;;  %5440 = vmatpush.msra.mxu0 %v5364_v56  ;;  %5505 = vmatpush.msra.mxu1 %v5396_v24 }
 0x7d0   :  { %v9920_v58 = vpop.f32.mrf.mxu0  ;;  %5175 = vmatmul.f32.gmra.mxu1 %v9740_v47  ;;  %5305 = vmatmul.f32.gmra.mxu3 %v9740_v47 }
 0x7d1   :  { %5441 = vmatpush.msra.mxu0 %v5362_v20  ;;  %5506 = vmatpush.msra.mxu1 %v5394_v12 }
 0x7d3   :  { %5116 = vmatmul.f32.gmra.mxu0 %v9744_v25  ;;  %5246 = vmatmul.f32.gmra.mxu2 %v9744_v25  ;;  %v5046_v28 = vpop.f32.mrf.mxu3 }
 0x7d4   :  { %v9926_v11 = vadd.f32 %v5046_v28, %v4981_v31 }
 0x7d5   :  { %v9928_v15 = vpop.f32.mrf.mxu1 }
 0x7d6   :  { %v4987_v32 = vpop.f32.mrf.mxu2 }
 0x7d8   :  { %v9930_v27 = vpop.f32.mrf.mxu0  ;;  %5178 = vmatmul.f32.gmra.mxu1 %v9751_v33  ;;  %5308 = vmatmul.f32.gmra.mxu3 %v9751_v33 }
 0x7db   :  { %5119 = vmatmul.f32.gmra.mxu0 %v9754_v42  ;;  %5249 = vmatmul.f32.gmra.mxu2 %v9754_v42  ;;  %v5049_v63 = vpop.f32.mrf.mxu3 }
 0x7dc   :  { %v9936_v6 = vadd.f32 %v5049_v63, %v4984_v14 }
 0x7dd   :  { %v9938_v28 = vpop.f32.mrf.mxu1 }
 0x7de   :  { %v4990_v31 = vpop.f32.mrf.mxu2 }
 0x7e0   :  { %v9940_v39 = vpop.f32.mrf.mxu0  ;;  %5181 = vmatmul.f32.gmra.mxu1 %v9761_v9  ;;  %5311 = vmatmul.f32.gmra.mxu3 %v9761_v9 }
 0x7e3   :  { %5122 = vmatmul.f32.gmra.mxu0 %v9764_v40  ;;  %5252 = vmatmul.f32.gmra.mxu2 %v9764_v40  ;;  %v5052_v29 = vpop.f32.mrf.mxu3 }
 0x7e4   :  { %v9946_v36 = vadd.f32 %v5052_v29, %v4987_v32 }
 0x7e5   :  { %v9948_v63 = vpop.f32.mrf.mxu1 }
 0x7e6   :  { %v4993_v14 = vpop.f32.mrf.mxu2 }
 0x7e8   :  { %v9950_v10 = vpop.f32.mrf.mxu0  ;;  %5184 = vmatmul.f32.gmra.mxu1 %v9771_v16  ;;  %5314 = vmatmul.f32.gmra.mxu3 %v9771_v16 }
 0x7eb   :  { %5125 = vmatmul.f32.gmra.mxu0 %v9774_v49  ;;  %5255 = vmatmul.f32.gmra.mxu2 %v9774_v49  ;;  %v5055_v53 = vpop.f32.mrf.mxu3 }
 0x7ec   :  { %v9956_v32 = vadd.f32 %v5055_v53, %v4990_v31 }
 0x7ed   :  { %v9958_v56 = vpop.f32.mrf.mxu1 }
 0x7ee   :  { %v4996_v29 = vpop.f32.mrf.mxu2 }
 0x7f0   :  { %v9960_v24 = vpop.f32.mrf.mxu0  ;;  %5187 = vmatmul.f32.gmra.mxu1 %v9781_v55  ;;  %5317 = vmatmul.f32.gmra.mxu3 %v9781_v55 }
 0x7f3   :  { %5128 = vmatmul.f32.gmra.mxu0 %v9784_v46  ;;  %5258 = vmatmul.f32.gmra.mxu2 %v9784_v46  ;;  %v5058_v61 = vpop.f32.mrf.mxu3 }
 0x7f4   :  { %v9966_v34 = vadd.f32 %v5058_v61, %v4993_v14 }
 0x7f5   :  { %v9968_v20 = vpop.f32.mrf.mxu1 }
 0x7f6   :  { %v4999_v31 = vpop.f32.mrf.mxu2 }
 0x7f8   :  { %v9970_v53 = vpop.f32.mrf.mxu0  ;;  %5190 = vmatmul.f32.gmra.mxu1 %v9791_v7  ;;  %5320 = vmatmul.f32.gmra.mxu3 %v9791_v7 }
 0x7f9   :  { %11260 = vst [vmem:[#allocation92_spill] sm:$0xff] %v9970_v53 }
 0x7fb   :  { %5131 = vmatmul.f32.gmra.mxu0 %v9794_v57  ;;  %5261 = vmatmul.f32.gmra.mxu2 %v9794_v57  ;;  %v5061_v12 = vpop.f32.mrf.mxu3 }
 0x7fc   :  { %v9976_v54 = vadd.f32 %v5061_v12, %v4996_v29 }
 0x7fd   :  { %v9978_v30 = vpop.f32.mrf.mxu1 }
 0x7fe   :  { %v5002_v37 = vpop.f32.mrf.mxu2 }
 0x800   :  { %v9980_v14 = vpop.f32.mrf.mxu0  ;;  %5193 = vmatmul.f32.gmra.mxu1 %v9801_v51  ;;  %5323 = vmatmul.f32.gmra.mxu3 %v9801_v51 }
 0x801   :  { %11261 = vst [vmem:[#allocation64_spill] sm:$0xff] %v9980_v14 }
 0x803   :  { %5442 = vmatmul.f32.vlgmr.msra.gmra.mxu0 %v9597_v26  ;;  %5572 = vmatmul.f32.vlgmr.msra.gmra.mxu2 %v9597_v26  ;;  %v5064_v61 = vpop.f32.mrf.mxu3 }
 0x804   :  { %v9986_v13 = vadd.f32 %v5064_v61, %v4999_v31 }
 0x805   :  { %v9988_v18 = vpop.f32.mrf.mxu1 }
 0x806   :  { %11262 = vst [vmem:[#allocation123_spill] sm:$0xff] %v9986_v13  ;;  %v5217_v53 = vpop.f32.mrf.mxu2 }
 0x807   :  { %11263 = vst [vmem:[#allocation124_spill] sm:$0xff] %v9988_v18  ;;  %v5218_v29 = vadd.f32 %v5217_v53, %v9846_v38 }
 0x808   :  { %v9991_v12 = vpop.f32.mrf.mxu0  ;;  %5196 = vmatmul.f32.gmra.mxu1 %v9811_v0  ;;  %5326 = vmatmul.f32.gmra.mxu3 %v9811_v0 }
 0x809   :  { %11264 = vst [vmem:[#allocation36_spill] sm:$0xff] %v9991_v12 }
 0x80b   :  { %5445 = vmatmul.f32.gmra.mxu0 %v9650_v44  ;;  %5575 = vmatmul.f32.gmra.mxu2 %v9650_v44  ;;  %v5067_v14 = vpop.f32.mrf.mxu3 }
 0x80c   :  { %v9997_v26 = vadd.f32 %v5067_v14, %v5002_v37 }
 0x80d   :  { %v9999_v61 = vpop.f32.mrf.mxu1 }
 0x80e   :  { %v5220_v31 = vpop.f32.mrf.mxu2 }
 0x80f   :  { %v5221_v13 = vadd.f32 %v5220_v31, %v9856_v19 }
 0x810   :  { %v10002_v18 = vpop.f32.mrf.mxu0  ;;  %5507 = vmatmul.f32.vlgmr.msra.gmra.mxu1 %v9682_v1  ;;  %5637 = vmatmul.f32.vlgmr.msra.gmra.mxu3 %v9682_v1 }
 0x813   :  { %5448 = vmatmul.f32.gmra.mxu0 %v9685_v50  ;;  %5578 = vmatmul.f32.gmra.mxu2 %v9685_v50  ;;  %v5282_v38 = vpop.f32.mrf.mxu3 }
 0x814   :  { %v10008_v44 = vadd.f32 %v5282_v38, %v5218_v29 }
 0x815   :  { %v10010_v53 = vpop.f32.mrf.mxu1 }
 0x816   :  { %v5223_v37 = vpop.f32.mrf.mxu2 }
 0x817   :  { %v5224_v14 = vadd.f32 %v5223_v37, %v9866_v48 }
 0x818   :  { %v10013_v12 = vpop.f32.mrf.mxu0  ;;  %5510 = vmatmul.f32.gmra.mxu1 %v9698_v17  ;;  %5640 = vmatmul.f32.gmra.mxu3 %v9698_v17 }
 0x81b   :  { %5451 = vmatmul.f32.gmra.mxu0 %v9701_v35  ;;  %5581 = vmatmul.f32.gmra.mxu2 %v9701_v35  ;;  %v5285_v1 = vpop.f32.mrf.mxu3 }
 0x81c   :  { %v10019_v50 = vadd.f32 %v5285_v1, %v5221_v13 }
 0x81d   :  { %v10021_v29 = vpop.f32.mrf.mxu1 }
 0x81e   :  { %v5226_v19 = vpop.f32.mrf.mxu2 }
 0x81f   :  { %v5227_v31 = vadd.f32 %v5226_v19, %v9876_v8 }
 0x820   :  { %v10024_v38 = vpop.f32.mrf.mxu0  ;;  %5513 = vmatmul.f32.gmra.mxu1 %v9714_v2  ;;  %5643 = vmatmul.f32.gmra.mxu3 %v9714_v2 }
 0x823   :  { %5454 = vmatmul.f32.gmra.mxu0 %v9717_v3  ;;  %5584 = vmatmul.f32.gmra.mxu2 %v9717_v3  ;;  %v5288_v17 = vpop.f32.mrf.mxu3 }
 0x824   :  { %v10030_v35 = vadd.f32 %v5288_v17, %v5224_v14 }
 0x825   :  { %v10032_v48 = vpop.f32.mrf.mxu1 }
 0x826   :  { %v5229_v13 = vpop.f32.mrf.mxu2 }
 0x827   :  { %v5230_v37 = vadd.f32 %v5229_v13, %v9886_v5 }
 0x828   :  { %v10035_v1 = vpop.f32.mrf.mxu0  ;;  %5516 = vmatmul.f32.gmra.mxu1 %v9728_v60  ;;  %5646 = vmatmul.f32.gmra.mxu3 %v9728_v60 }
 0x82b   :  { %5457 = vmatmul.f32.gmra.mxu0 %v9731_v52  ;;  %5587 = vmatmul.f32.gmra.mxu2 %v9731_v52  ;;  %v5291_v2 = vpop.f32.mrf.mxu3 }
 0x82c   :  { %v10041_v3 = vadd.f32 %v5291_v2, %v5227_v31 }
 0x82d   :  { %v10043_v14 = vpop.f32.mrf.mxu1 }
 0x82e   :  { %v5232_v8 = vpop.f32.mrf.mxu2 }
 0x82f   :  { %v5233_v19 = vadd.f32 %v5232_v8, %v9896_v43 }
 0x830   :  { %v10046_v17 = vpop.f32.mrf.mxu0  ;;  %5519 = vmatmul.f32.gmra.mxu1 %v9740_v47  ;;  %5649 = vmatmul.f32.gmra.mxu3 %v9740_v47 }
 0x833   :  { %5460 = vmatmul.f32.gmra.mxu0 %v9744_v25  ;;  %5590 = vmatmul.f32.gmra.mxu2 %v9744_v25  ;;  %v5294_v60 = vpop.f32.mrf.mxu3 }
 0x834   :  { %v10052_v52 = vadd.f32 %v5294_v60, %v5230_v37  ;;  %v4917_v37 = vadd.f32 %v9918_v62, %v9900_v45  ;;  %v4920_v45 = vadd.f32 %v9928_v15, %v9910_v21  ;;  %v4923_v21 = vadd.f32 %v9938_v28, %v9920_v58 }
 0x835   :  { %v10054_v31 = vpop.f32.mrf.mxu1  ;;  %v4926_v58 = vadd.f32 %v9948_v63, %v9930_v27  ;;  %v4929_v27 = vadd.f32 %v9958_v56, %v9940_v39  ;;  %v4932_v39 = vadd.f32 %v9968_v20, %v9950_v10  ;;  %v4935_v10 = vadd.f32 %v9978_v30, %v9960_v24  ;;  %v11266_v30 = vld [vmem:[#allocation92_spill] sm:$0xff] }
 0x836   :  { %v5235_v5 = vpop.f32.mrf.mxu2  ;;  %v11267_v24 = vld [vmem:[#allocation124_spill] sm:$0xff] }
 0x837   :  { %v5236_v13 = vadd.f32 %v5235_v5, %v9906_v22 }
 0x838   :  { %v10057_v2 = vpop.f32.mrf.mxu0  ;;  %5522 = vmatmul.f32.gmra.mxu1 %v9751_v33  ;;  %5652 = vmatmul.f32.gmra.mxu3 %v9751_v33 }
 0x83b   :  { %5463 = vmatmul.f32.gmra.mxu0 %v9754_v42  ;;  %5593 = vmatmul.f32.gmra.mxu2 %v9754_v42  ;;  %v5297_v47 = vpop.f32.mrf.mxu3 }
 0x83c   :  { %v10063_v25 = vadd.f32 %v5297_v47, %v5233_v19 }
 0x83d   :  { %v10067_v8 = vpop.f32.mrf.mxu1 }
 0x83e   :  { %v5238_v43 = vpop.f32.mrf.mxu2 }
 0x83f   :  { %v5239_v22 = vadd.f32 %v5238_v43, %v9916_v41 }
 0x840   :  { %v5111_v60 = vpop.f32.mrf.mxu0  ;;  %5525 = vmatmul.f32.gmra.mxu1 %v9761_v9  ;;  %5655 = vmatmul.f32.gmra.mxu3 %v9761_v9 }
 0x841   :  { %v5112_v5 = vadd.f32 %v5111_v60, %v4917_v37 }
 0x843   :  { %5466 = vmatmul.f32.gmra.mxu0 %v9764_v40  ;;  %5596 = vmatmul.f32.gmra.mxu2 %v9764_v40  ;;  %v5300_v33 = vpop.f32.mrf.mxu3 }
 0x844   :  { %v10074_v42 = vadd.f32 %v5300_v33, %v5236_v13 }
 0x845   :  { %v10078_v62 = vpop.f32.mrf.mxu1 }
 0x846   :  { %v5241_v19 = vpop.f32.mrf.mxu2 }
 0x847   :  { %v5242_v41 = vadd.f32 %v5241_v19, %v9926_v11 }
 0x848   :  { %v5114_v47 = vpop.f32.mrf.mxu0  ;;  %5528 = vmatmul.f32.gmra.mxu1 %v9771_v16  ;;  %5658 = vmatmul.f32.gmra.mxu3 %v9771_v16 }
 0x849   :  { %v5115_v43 = vadd.f32 %v5114_v47, %v4920_v45 }
 0x84b   :  { %5469 = vmatmul.f32.gmra.mxu0 %v9774_v49  ;;  %5599 = vmatmul.f32.gmra.mxu2 %v9774_v49  ;;  %v5303_v9 = vpop.f32.mrf.mxu3 }
 0x84c   :  { %v10085_v40 = vadd.f32 %v5303_v9, %v5239_v22 }
 0x84d   :  { %v5176_v15 = vpop.f32.mrf.mxu1 }
 0x84e   :  { %v5244_v13 = vpop.f32.mrf.mxu2  ;;  %v10090_v37 = vadd.f32 %v5176_v15, %v5112_v5 }
 0x84f   :  { %v5245_v11 = vadd.f32 %v5244_v13, %v9936_v6 }
 0x850   :  { %v5117_v60 = vpop.f32.mrf.mxu0  ;;  %5531 = vmatmul.f32.gmra.mxu1 %v9781_v55  ;;  %5661 = vmatmul.f32.gmra.mxu3 %v9781_v55 }
 0x851   :  { %v5118_v33 = vadd.f32 %v5117_v60, %v4923_v21 }
 0x853   :  { %5472 = vmatmul.f32.gmra.mxu0 %v9784_v46  ;;  %5602 = vmatmul.f32.gmra.mxu2 %v9784_v46  ;;  %v5306_v16 = vpop.f32.mrf.mxu3 }
 0x854   :  { %v10096_v49 = vadd.f32 %v5306_v16, %v5242_v41 }
 0x855   :  { %v5179_v6 = vpop.f32.mrf.mxu1 }
 0x856   :  { %v5247_v22 = vpop.f32.mrf.mxu2  ;;  %v10101_v5 = vadd.f32 %v5179_v6, %v5115_v43 }
 0x857   :  { %v5248_v28 = vadd.f32 %v5247_v22, %v9946_v36 }
 0x858   :  { %v5120_v19 = vpop.f32.mrf.mxu0  ;;  %5534 = vmatmul.f32.gmra.mxu1 %v9791_v7  ;;  %5664 = vmatmul.f32.gmra.mxu3 %v9791_v7 }
 0x859   :  { %v5121_v45 = vadd.f32 %v5120_v19, %v4926_v58  ;;  %v11268_v19 = vld [vmem:[#allocation123_spill] sm:$0xff] }
 0x85b   :  { %5475 = vmatmul.f32.gmra.mxu0 %v9794_v57  ;;  %5605 = vmatmul.f32.gmra.mxu2 %v9794_v57  ;;  %v5309_v55 = vpop.f32.mrf.mxu3 }
 0x85c   :  { %v10107_v46 = vadd.f32 %v5309_v55, %v5245_v11 }
 0x85d   :  { %v5182_v36 = vpop.f32.mrf.mxu1 }
 0x85e   :  { %v5250_v41 = vpop.f32.mrf.mxu2  ;;  %v10112_v47 = vadd.f32 %v5182_v36, %v5118_v33  ;;  %v11269_v36 = vld [vmem:[#allocation32_spill] sm:$0xff] }
 0x85f   :  { %v5251_v63 = vadd.f32 %v5250_v41, %v9956_v32 }
 0x860   :  { %v5123_v43 = vpop.f32.mrf.mxu0  ;;  %5537 = vmatmul.f32.gmra.mxu1 %v9801_v51  ;;  %5667 = vmatmul.f32.gmra.mxu3 %v9801_v51 }
 0x861   :  { %v5124_v9 = vadd.f32 %v5123_v43, %v4929_v27 }
 0x863   :  { %5478 = vmatmul.f32.gmra.mxu0 %v9804_v59  ;;  %5608 = vmatmul.f32.gmra.mxu2 %v9804_v59  ;;  %v5312_v7 = vpop.f32.mrf.mxu3 }
 0x864   :  { %v10118_v57 = vadd.f32 %v5312_v7, %v5248_v28  ;;  %v4938_v28 = vadd.f32 %v11267_v24, %v11266_v30 }
 0x865   :  { %v5185_v32 = vpop.f32.mrf.mxu1 }
 0x866   :  { %v5253_v13 = vpop.f32.mrf.mxu2  ;;  %v10123_v21 = vadd.f32 %v5185_v32, %v5121_v45 }
 0x867   :  { %v5254_v56 = vadd.f32 %v5253_v13, %v9966_v34 }
 0x868   :  { %v5126_v15 = vpop.f32.mrf.mxu0  ;;  %5540 = vmatmul.f32.gmra.mxu1 %v9811_v0  ;;  %5670 = vmatmul.f32.gmra.mxu3 %v9811_v0  ;;  %v11265_v0 = vmov 0.0  }
 0x869   :  { %v5127_v11 = vadd.f32 %v5126_v15, %v4932_v39 }
 0x86b   :  { %5481 = vmatmul.f32.gmra.mxu0 %v9814_v23  ;;  %5611 = vmatmul.f32.gmra.mxu2 %v9814_v23  ;;  %v5315_v51 = vpop.f32.mrf.mxu3 }
 0x86c   :  { %v10129_v59 = vadd.f32 %v5315_v51, %v5251_v63 }
 0x86d   :  { %v5188_v34 = vpop.f32.mrf.mxu1 }
 0x86e   :  { %v5256_v60 = vpop.f32.mrf.mxu2  ;;  %v10134_v33 = vadd.f32 %v5188_v34, %v5124_v9 }
 0x86f   :  { %v5257_v20 = vadd.f32 %v5256_v60, %v9976_v54 }
 0x870   :  { %v5129_v16 = vpop.f32.mrf.mxu0  ;;  %5543 = vmatmul.f32.gmra.mxu1 %v9821_v4  ;;  %5673 = vmatmul.f32.gmra.mxu3 %v9821_v4 }
 0x871   :  { %v5130_v22 = vadd.f32 %v5129_v16, %v4935_v10  ;;  %v11271_v10 = vld [vmem:[#allocation147_spill] sm:$0xff]  ;;  %v11272_v16 = vld [vmem:[#allocation64_spill] sm:$0xff] }
 0x873   :  { %5484 = vmatmul.f32.gmra.mxu0 %v11265_v0  ;;  %5614 = vmatmul.f32.gmra.mxu2 %v11265_v0  ;;  %v5318_v23 = vpop.f32.mrf.mxu3 }
 0x874   :  { %v10140_v58 = vadd.f32 %v5318_v23, %v5254_v56 }
 0x875   :  { %v5191_v54 = vpop.f32.mrf.mxu1 }
 0x876   :  { %v5259_v6 = vpop.f32.mrf.mxu2  ;;  %v10145_v55 = vadd.f32 %v5191_v54, %v5127_v11 }
 0x877   :  { %v5260_v45 = vadd.f32 %v5259_v6, %v11268_v19 }
 0x878   :  { %v5132_v41 = vpop.f32.mrf.mxu0  ;;  %5546 = vmatmul.f32.gmra.mxu1 %v11269_v36  ;;  %5676 = vmatmul.f32.gmra.mxu3 %v11269_v36  ;;  %v11275_v36 = vld [vmem:[#allocation36_spill] sm:$0xff] }
 0x879   :  { %v5133_v27 = vadd.f32 %v5132_v41, %v4938_v28  ;;  %v11274_v41 = vld [vmem:[#allocation61_spill] sm:$0xff] }
 0x87b   :  { %5487 = vmatmul.f32.gmra.mxu0 %v11265_v0  ;;  %5617 = vmatmul.f32.gmra.mxu2 %v11265_v0  ;;  %v5321_v4 = vpop.f32.mrf.mxu3 }
 0x87c   :  { %v10151_v63 = vadd.f32 %v5321_v4, %v5257_v20 }
 0x87d   :  { %v5194_v9 = vpop.f32.mrf.mxu1 }
 0x87e   :  { %v5262_v43 = vpop.f32.mrf.mxu2  ;;  %v10154_v13 = vadd.f32 %v5194_v9, %v5130_v22 }
 0x87f   :  { %v5263_v7 = vadd.f32 %v5262_v43, %v9997_v26  ;;  %v11270_v26 = vld [vmem:[#allocation120_spill] sm:$0xff] }
 0x880   :  { %v5443_v39 = vpop.f32.mrf.mxu0  ;;  %5549 = vmatmul.f32.gmra.mxu1 %v11265_v0  ;;  %5679 = vmatmul.f32.gmra.mxu3 %v11265_v0  ;;  %v4893_v34 = vadd.f32 %v11271_v10, %v11270_v26  ;;  %v11276_v10 = vld [vmem:[#allocation148_spill] sm:$0xff] }
 0x882   :  { %v5088_v22 = vadd.f32 %v11272_v16, %v4893_v34  ;;  %v11277_v34 = vld [vmem:[#allocation90_spill] sm:$0xff] }
 0x883   :  { %v5324_v32 = vpop.f32.mrf.mxu3 }
 0x884   :  { %v10158_v56 = vadd.f32 %v5324_v32, %v5260_v45  ;;  %v5153_v24 = vadd.f32 %v9999_v61, %v5088_v22  ;;  %v11273_v45 = vld [vmem:[#allocation33_spill] sm:$0xff] }
 0x885   :  { %v5197_v11 = vpop.f32.mrf.mxu1 }
 0x886   :  { %v5573_v15 = vpop.f32.mrf.mxu2  ;;  %v10160_v51 = vadd.f32 %v5197_v11, %v5133_v27  ;;  %v4896_v27 = vadd.f32 %v11274_v41, %v11273_v45 }
 0x888   :  { %v5446_v60 = vpop.f32.mrf.mxu0  ;;  %5552 = vmatmul.f32.gmra.mxu1 %v11265_v0  ;;  %5682 = vmatmul.f32.gmra.mxu3 %v11265_v0  ;;  %v5091_v4 = vadd.f32 %v11275_v36, %v4896_v27  ;;  %v11279_v36 = vld [vmem:[#allocation121_spill] sm:$0xff] }
 0x88b   :  { %v5327_v20 = vpop.f32.mrf.mxu3 }
 0x88c   :  { %v10167_v23 = vadd.f32 %v5327_v20, %v5263_v7  ;;  %v5156_v7 = vadd.f32 %v10010_v53, %v5091_v4  ;;  %v4899_v20 = vadd.f32 %v11277_v34, %v11276_v10 }
 0x88d   :  { %v5508_v30 = vpop.f32.mrf.mxu1 }
 0x88e   :  { %v5576_v6 = vpop.f32.mrf.mxu2  ;;  %v5509_v28 = vadd.f32 %v5508_v30, %v5443_v39 }
 0x890   :  { %v5449_v54 = vpop.f32.mrf.mxu0  ;;  %v10170_v19 = vadd.f32 %v5509_v28, %v5153_v24 }
 0x893   :  { %v5638_v0 = vpop.f32.mrf.mxu3 }
 0x894   :  { %v5639_v43 = vadd.f32 %v5638_v0, %v5573_v15  ;;  %v5094_v15 = vadd.f32 %v10002_v18, %v4899_v20  ;;  %v11278_v0 = vld [vmem:[#allocation89_spill] sm:$0xff] }
 0x895   :  { %v5511_v32 = vpop.f32.mrf.mxu1  ;;  %v4902_v4 = vadd.f32 %v11279_v36, %v11278_v0 }
 0x896   :  { %v5579_v9 = vpop.f32.mrf.mxu2  ;;  %v10177_v11 = vadd.f32 %v5639_v43, %v10008_v44  ;;  %v5512_v26 = vadd.f32 %v5511_v32, %v5446_v60  ;;  %v5159_v53 = vadd.f32 %v10021_v29, %v5094_v15  ;;  %v11281_v15 = vld [vmem:[#allocation34_spill] sm:$0xff] }
 0x897   :  { %v5097_v43 = vadd.f32 %v10013_v12, %v4902_v4  ;;  %v11282_v4 = vld [vmem:[#allocation122_spill] sm:$0xff] }
 0x898   :  { %v5452_v61 = vpop.f32.mrf.mxu0  ;;  %v10179_v39 = vadd.f32 %v5512_v26, %v5156_v7 }
 0x89a   :  { %v5718_v16 = vadd.f32 %v10179_v39, %v10170_v19 }
 0x89b   :  { %v5641_v22 = vpop.f32.mrf.mxu3 }
 0x89c   :  { %v5642_v30 = vadd.f32 %v5641_v22, %v5576_v6  ;;  %v11280_v22 = vld [vmem:[#allocation62_spill] sm:$0xff] }
 0x89d   :  { %v5514_v28 = vpop.f32.mrf.mxu1 }
 0x89e   :  { %v5582_v24 = vpop.f32.mrf.mxu2  ;;  %v10188_v44 = vadd.f32 %v5642_v30, %v10019_v50  ;;  %v5515_v60 = vadd.f32 %v5514_v28, %v5449_v54  ;;  %v5162_v50 = vadd.f32 %v10032_v48, %v5097_v43 }
 0x8a0   :  { %v5455_v45 = vpop.f32.mrf.mxu0  ;;  %v5739_v41 = vadd.f32 %v10188_v44, %v10177_v11  ;;  %v10192_v27 = vadd.f32 %v5515_v60, %v5159_v53 }
 0x8a2   :  { %v5719_v18 = vadd.f32 %v5718_v16, %v10192_v27  ;;  %v4905_v16 = vadd.f32 %v11281_v15, %v11280_v22  ;;  %v11284_v15 = vld [vmem:[#allocation35_spill] sm:$0xff] }
 0x8a3   :  { %v5644_v6 = vpop.f32.mrf.mxu3 }
 0x8a4   :  { %v5645_v32 = vadd.f32 %v5644_v6, %v5579_v9  ;;  %v5100_v9 = vadd.f32 %v10024_v38, %v4905_v16  ;;  %v11283_v6 = vld [vmem:[#allocation149_spill] sm:$0xff]  ;;  %v11285_v16 = vld [vmem:[#allocation63_spill] sm:$0xff] }
 0x8a5   :  { %v5517_v7 = vpop.f32.mrf.mxu1 }
 0x8a6   :  { %v5585_v29 = vpop.f32.mrf.mxu2  ;;  %v10200_v54 = vadd.f32 %v5645_v32, %v10030_v35  ;;  %v5518_v26 = vadd.f32 %v5517_v7, %v5452_v61  ;;  %v5165_v35 = vadd.f32 %v10043_v14, %v5100_v9 }
 0x8a8   :  { %v5458_v10 = vpop.f32.mrf.mxu0  ;;  %v5740_v34 = vadd.f32 %v5739_v41, %v10200_v54  ;;  %v10203_v20 = vadd.f32 %v5518_v26, %v5162_v50 }
 0x8aa   :  { %v5720_v30 = vadd.f32 %v5719_v18, %v10203_v20  ;;  %v4908_v18 = vadd.f32 %v11283_v6, %v11282_v4  ;;  %v11286_v4 = vld [vmem:[#allocation150_spill] sm:$0xff]  ;;  %v11287_v6 = vld [vmem:[#allocation91_spill] sm:$0xff] }
 0x8ab   :  { %v5647_v12 = vpop.f32.mrf.mxu3 }
 0x8ac   :  { %v5648_v28 = vadd.f32 %v5647_v12, %v5582_v24  ;;  %v5103_v24 = vadd.f32 %v10035_v1, %v4908_v18  ;;  %v4914_v18 = vadd.f32 %v11287_v6, %v11286_v4 }
 0x8ad   :  { %v5520_v48 = vpop.f32.mrf.mxu1 }
 0x8ae   :  { %v5588_v53 = vpop.f32.mrf.mxu2  ;;  %v10211_v61 = vadd.f32 %v5648_v28, %v10041_v3  ;;  %v5521_v60 = vadd.f32 %v5520_v48, %v5455_v45  ;;  %v5168_v3 = vadd.f32 %v10054_v31, %v5103_v24 }
 0x8b0   :  { %v5461_v41 = vpop.f32.mrf.mxu0  ;;  %v5741_v0 = vadd.f32 %v5740_v34, %v10211_v61  ;;  %v10214_v36 = vadd.f32 %v5521_v60, %v5165_v35 }
 0x8b2   :  { %v5721_v43 = vadd.f32 %v5720_v30, %v10214_v36  ;;  %v4911_v30 = vadd.f32 %v11285_v16, %v11284_v15 }
 0x8b3   :  { %v5650_v38 = vpop.f32.mrf.mxu3 }
 0x8b4   :  { %v5651_v32 = vadd.f32 %v5650_v38, %v5585_v29  ;;  %v5106_v29 = vadd.f32 %v10046_v17, %v4911_v30 }
 0x8b5   :  { %v5523_v14 = vpop.f32.mrf.mxu1 }
 0x8b6   :  { %v5591_v7 = vpop.f32.mrf.mxu2  ;;  %v10222_v45 = vadd.f32 %v5651_v32, %v10052_v52  ;;  %v5524_v50 = vadd.f32 %v5523_v14, %v5458_v10  ;;  %v5171_v52 = vadd.f32 %v10067_v8, %v5106_v29 }
 0x8b8   :  { %v5464_v26 = vpop.f32.mrf.mxu0  ;;  %v5742_v34 = vadd.f32 %v5741_v0, %v10222_v45  ;;  %v10225_v22 = vadd.f32 %v5524_v50, %v5168_v3 }
 0x8ba   :  { %v5722_v12 = vadd.f32 %v5721_v43, %v10225_v22 }
 0x8bb   :  { %v5653_v1 = vpop.f32.mrf.mxu3 }
 0x8bc   :  { %v5654_v9 = vadd.f32 %v5653_v1, %v5588_v53  ;;  %v5109_v53 = vadd.f32 %v10057_v2, %v4914_v18 }
 0x8bd   :  { %v5526_v31 = vpop.f32.mrf.mxu1 }
 0x8be   :  { %v5594_v28 = vpop.f32.mrf.mxu2  ;;  %v10233_v10 = vadd.f32 %v5654_v9, %v10063_v25  ;;  %v5527_v48 = vadd.f32 %v5526_v31, %v5461_v41  ;;  %v5174_v25 = vadd.f32 %v10078_v62, %v5109_v53 }
 0x8c0   :  { %v5467_v35 = vpop.f32.mrf.mxu0  ;;  %v5743_v60 = vadd.f32 %v5742_v34, %v10233_v10  ;;  %v10236_v0 = vadd.f32 %v5527_v48, %v5171_v52 }
 0x8c2   :  { %v5723_v43 = vadd.f32 %v5722_v12, %v10236_v0 }
 0x8c3   :  { %v5656_v17 = vpop.f32.mrf.mxu3 }
 0x8c4   :  { %v5657_v38 = vadd.f32 %v5656_v17, %v5591_v7 }
 0x8c5   :  { %v5529_v24 = vpop.f32.mrf.mxu1 }
 0x8c6   :  { %v5597_v8 = vpop.f32.mrf.mxu2  ;;  %v10244_v41 = vadd.f32 %v5657_v38, %v10074_v42  ;;  %v5530_v32 = vadd.f32 %v5529_v24, %v5464_v26 }
 0x8c8   :  { %v5744_v14 = vadd.f32 %v5743_v60, %v10244_v41  ;;  %v10247_v3 = vadd.f32 %v5530_v32, %v5174_v25  ;;  %v5470_v50 = vpop.f32.mrf.mxu0 }
 0x8ca   :  { %v5724_v34 = vadd.f32 %v5723_v43, %v10247_v3 }
 0x8cb   :  { %v5659_v15 = vpop.f32.mrf.mxu3 }
 0x8cc   :  { %v5660_v16 = vadd.f32 %v5659_v15, %v5594_v28 }
 0x8cd   :  { %v5532_v30 = vpop.f32.mrf.mxu1 }
 0x8ce   :  { %v10251_v2 = vadd.f32 %v5660_v16, %v10085_v40  ;;  %v5533_v7 = vadd.f32 %v5532_v30, %v5467_v35  ;;  %v5600_v12 = vpop.f32.mrf.mxu2 }
 0x8d0   :  { %v5745_v62 = vadd.f32 %v5744_v14, %v10251_v2  ;;  %v10255_v42 = vadd.f32 %v5533_v7, %v10090_v37  ;;  %v5473_v29 = vpop.f32.mrf.mxu0 }
 0x8d2   :  { %v5725_v26 = vadd.f32 %v5724_v34, %v10255_v42 }
 0x8d3   :  { %v5662_v1 = vpop.f32.mrf.mxu3 }
 0x8d4   :  { %v5663_v9 = vadd.f32 %v5662_v1, %v5597_v8 }
 0x8d5   :  { %v5535_v31 = vpop.f32.mrf.mxu1 }
 0x8d6   :  { %v10259_v52 = vadd.f32 %v5663_v9, %v10096_v49  ;;  %v5536_v28 = vadd.f32 %v5535_v31, %v5470_v50  ;;  %v5603_v35 = vpop.f32.mrf.mxu2 }
 0x8d8   :  { %v5746_v40 = vadd.f32 %v5745_v62, %v10259_v52  ;;  %v10263_v48 = vadd.f32 %v5536_v28, %v10101_v5  ;;  %v5476_v18 = vpop.f32.mrf.mxu0 }
 0x8da   :  { %v5726_v60 = vadd.f32 %v5725_v26, %v10263_v48 }
 0x8db   :  { %v5665_v37 = vpop.f32.mrf.mxu3 }
 0x8dc   :  { %v5666_v4 = vadd.f32 %v5665_v37, %v5600_v12 }
 0x8dd   :  { %v5538_v6 = vpop.f32.mrf.mxu1 }
 0x8de   :  { %v10267_v43 = vadd.f32 %v5666_v4, %v10107_v46  ;;  %v5539_v17 = vadd.f32 %v5538_v6, %v5473_v29  ;;  %v5606_v24 = vpop.f32.mrf.mxu2 }
 0x8e0   :  { %v5747_v49 = vadd.f32 %v5746_v40, %v10267_v43  ;;  %v10271_v53 = vadd.f32 %v5539_v17, %v10112_v47  ;;  %v5479_v50 = vpop.f32.mrf.mxu0 }
 0x8e2   :  { %v5727_v38 = vadd.f32 %v5726_v60, %v10271_v53 }
 0x8e3   :  { %v5668_v5 = vpop.f32.mrf.mxu3 }
 0x8e4   :  { %v5669_v8 = vadd.f32 %v5668_v5, %v5603_v35 }
 0x8e5   :  { %v5541_v25 = vpop.f32.mrf.mxu1 }
 0x8e6   :  { %v10275_v32 = vadd.f32 %v5669_v8, %v10118_v57  ;;  %v5542_v14 = vadd.f32 %v5541_v25, %v5476_v18  ;;  %v5609_v7 = vpop.f32.mrf.mxu2 }
 0x8e8   :  { %v5748_v46 = vadd.f32 %v5747_v49, %v10275_v32  ;;  %v10279_v34 = vadd.f32 %v5542_v14, %v10123_v21  ;;  %v5482_v1 = vpop.f32.mrf.mxu0 }
 0x8ea   :  { %v5728_v15 = vadd.f32 %v5727_v38, %v10279_v34 }
 0x8eb   :  { %v5671_v47 = vpop.f32.mrf.mxu3 }
 0x8ec   :  { %v5672_v16 = vadd.f32 %v5671_v47, %v5606_v24 }
 0x8ed   :  { %v5544_v30 = vpop.f32.mrf.mxu1 }
 0x8ee   :  { %v10283_v12 = vadd.f32 %v5672_v16, %v10129_v59  ;;  %v5545_v62 = vadd.f32 %v5544_v30, %v5479_v50  ;;  %v5612_v35 = vpop.f32.mrf.mxu2 }
 0x8f0   :  { %v5749_v57 = vadd.f32 %v5748_v46, %v10283_v12  ;;  %v5710_v26 = vadd.f32 %v5545_v62, %v10134_v33  ;;  %v5485_v37 = vpop.f32.mrf.mxu0 }
 0x8f2   :  { %v5729_v29 = vadd.f32 %v5728_v15, %v5710_v26 }
 0x8f3   :  { %v5674_v9 = vpop.f32.mrf.mxu3 }
 0x8f4   :  { %v5675_v31 = vadd.f32 %v5674_v9, %v5609_v7 }
 0x8f5   :  { %v5547_v21 = vpop.f32.mrf.mxu1 }
 0x8f6   :  { %v10288_v28 = vadd.f32 %v5675_v31, %v10140_v58  ;;  %v5548_v40 = vadd.f32 %v5547_v21, %v5482_v1  ;;  %v5615_v38 = vpop.f32.mrf.mxu2 }
 0x8f8   :  { %v5750_v60 = vadd.f32 %v5749_v57, %v10288_v28  ;;  %v5712_v59 = vadd.f32 %v5548_v40, %v10145_v55  ;;  %v5488_v25 = vpop.f32.mrf.mxu0 }
 0x8fa   :  { %v5730_v4 = vadd.f32 %v5729_v29, %v5712_v59 }
 0x8fb   :  { %v5677_v6 = vpop.f32.mrf.mxu3 }
 0x8fc   :  { %v5678_v18 = vadd.f32 %v5677_v6, %v5612_v35  ;;  %v11288_v35 = vld [vmem:[#allocation50_spill] sm:$0xff] }
 0x8fd   :  { %v5550_v17 = vpop.f32.mrf.mxu1 }
 0x8fe   :  { %v10293_v33 = vadd.f32 %v5678_v18, %v10151_v63  ;;  %v5551_v49 = vadd.f32 %v5550_v17, %v5485_v37  ;;  %v5618_v47 = vpop.f32.mrf.mxu2 }
 0x900   :  { %v5751_v5 = vadd.f32 %v5750_v60, %v10293_v33  ;;  %v5714_v58 = vadd.f32 %v5551_v49, %v10154_v13 }
 0x902   :  { %v5731_v24 = vadd.f32 %v5730_v4, %v5714_v58 }
 0x903   :  { %v5680_v8 = vpop.f32.mrf.mxu3 }
 0x904   :  { %v5681_v14 = vadd.f32 %v5680_v8, %v5615_v38 }
 0x905   :  { %v5553_v50 = vpop.f32.mrf.mxu1 }
 0x906   :  { %v10298_v55 = vadd.f32 %v5681_v14, %v10158_v56  ;;  %v5554_v46 = vadd.f32 %v5553_v50, %v5488_v25 }
 0x908   :  { %v5752_v15 = vadd.f32 %v5751_v5, %v10298_v55  ;;  %v5716_v63 = vadd.f32 %v5554_v46, %v10160_v51 }
 0x90a   :  { %v5732_v16 = vadd.f32 %v5731_v24, %v5716_v63 }
 0x90b   :  { %v5683_v30 = vpop.f32.mrf.mxu3 }
 0x90c   :  { %v5733_v7 = vrot.slane %v5732_v16, 4  ;;  %v5684_v62 = vadd.f32 %v5683_v30, %v5618_v47 }
 0x90e   :  { %v5734_v57 = vadd.f32 %v5733_v7, %v5732_v16  ;;  %v5717_v13 = vadd.f32 %v5684_v62, %v10167_v23 }
 0x910   :  { %v5735_v1 = vrot.slane %v5734_v57, 2  ;;  %v5753_v29 = vadd.f32 %v5752_v15, %v5717_v13 }
 0x912   :  { %v5736_v9 = vadd.f32 %v5735_v1, %v5734_v57  ;;  %v5754_v31 = vrot.slane %v5753_v29, 4 }
 0x914   :  { %v5737_v21 = vrot.slane %v5736_v9, 1  ;;  %v5755_v56 = vadd.f32 %v5754_v31, %v5753_v29 }
 0x916   :  { %v5738_v40 = vadd.f32 %v5737_v21, %v5736_v9  ;;  %v5756_v37 = vrot.slane %v5755_v56, 2 }
 0x918   :  { %v5760_v60 = vmul.f32 %v5738_v40, %v11288_v35  ;;  %v5757_v5 = vadd.f32 %v5756_v37, %v5755_v56 }
 0x91a   :  { %v10305_v51 = vsub.f32 %v10170_v19, %v5760_v60  ;;  %v10308_v4 = vsub.f32 %v10179_v39, %v5760_v60  ;;  %v10311_v6 = vsub.f32 %v10192_v27, %v5760_v60  ;;  %v10314_v23 = vsub.f32 %v10203_v20, %v5760_v60 }
 0x91b   :  { %v10317_v18 = vsub.f32 %v10214_v36, %v5760_v60  ;;  %v10320_v17 = vsub.f32 %v10225_v22, %v5760_v60  ;;  %v10323_v49 = vsub.f32 %v10236_v0, %v5760_v60  ;;  %v10326_v19 = vsub.f32 %v10247_v3, %v5760_v60 }
 0x91c   :  { %v10329_v39 = vsub.f32 %v10255_v42, %v5760_v60  ;;  %v10332_v27 = vsub.f32 %v10263_v48, %v5760_v60  ;;  %v10335_v20 = vsub.f32 %v10271_v53, %v5760_v60  ;;  %v10338_v36 = vsub.f32 %v10279_v34, %v5760_v60 }
 0x91d   :  { %v10340_v22 = vsub.f32 %v5710_v26, %v5760_v60  ;;  %v10342_v38 = vsub.f32 %v5712_v59, %v5760_v60  ;;  %v10344_v0 = vsub.f32 %v5714_v58, %v5760_v60  ;;  %v10346_v3 = vsub.f32 %v5716_v63, %v5760_v60 }
 0x91e   :  { %v5794_v42 = vmul.f32 %v10305_v51, %v10305_v51  ;;  %v5796_v48 = vmul.f32 %v10308_v4, %v10308_v4  ;;  %v5798_v53 = vmul.f32 %v10311_v6, %v10311_v6  ;;  %v5758_v24 = vrot.slane %v5757_v5, 1 }
 0x91f   :  { %v5800_v26 = vmul.f32 %v10314_v23, %v10314_v23  ;;  %v5802_v8 = vmul.f32 %v10317_v18, %v10317_v18  ;;  %v5804_v50 = vmul.f32 %v10320_v17, %v10320_v17  ;;  %v5806_v46 = vmul.f32 %v10323_v49, %v10323_v49 }
 0x920   :  { %v5826_v34 = vadd.f32 %v5796_v48, %v5794_v42  ;;  %v5759_v58 = vadd.f32 %v5758_v24, %v5757_v5  ;;  %v5812_v9 = vmul.f32 %v10332_v27, %v10332_v27  ;;  %v5816_v37 = vmul.f32 %v10338_v36, %v10338_v36 }
 0x922   :  { %v5827_v59 = vadd.f32 %v5826_v34, %v5798_v53  ;;  %v5761_v14 = vmul.f32 %v5759_v58, %v11288_v35  ;;  %v5818_v53 = vmul.f32 %v10340_v22, %v10340_v22 }
 0x924   :  { %v5828_v25 = vadd.f32 %v5827_v59, %v5800_v26  ;;  %v10364_v63 = vsub.f32 %v10177_v11, %v5761_v14  ;;  %v10367_v47 = vsub.f32 %v10188_v44, %v5761_v14  ;;  %v10370_v16 = vsub.f32 %v10200_v54, %v5761_v14 }
 0x925   :  { %v10373_v30 = vsub.f32 %v10211_v61, %v5761_v14  ;;  %v10376_v7 = vsub.f32 %v10222_v45, %v5761_v14  ;;  %v10379_v62 = vsub.f32 %v10233_v10, %v5761_v14  ;;  %v10382_v57 = vsub.f32 %v10244_v41, %v5761_v14 }
 0x926   :  { %v5829_v15 = vadd.f32 %v5828_v25, %v5802_v8  ;;  %v10385_v1 = vsub.f32 %v10251_v2, %v5761_v14  ;;  %v10388_v44 = vsub.f32 %v10259_v52, %v5761_v14  ;;  %v10391_v54 = vsub.f32 %v10267_v43, %v5761_v14 }
 0x927   :  { %v10394_v61 = vsub.f32 %v10275_v32, %v5761_v14  ;;  %v10397_v45 = vsub.f32 %v10283_v12, %v5761_v14  ;;  %v10400_v10 = vsub.f32 %v10288_v28, %v5761_v14  ;;  %v10403_v41 = vsub.f32 %v10293_v33, %v5761_v14 }
 0x928   :  { %v5830_v11 = vadd.f32 %v5829_v15, %v5804_v50  ;;  %v5808_v2 = vmul.f32 %v10326_v19, %v10326_v19  ;;  %v10408_v29 = vsub.f32 %v10298_v55, %v5761_v14  ;;  %v10410_v43 = vsub.f32 %v5717_v13, %v5761_v14 }
 0x929   :  { %v5795_v32 = vmul.f32 %v10364_v63, %v10364_v63  ;;  %v5797_v12 = vmul.f32 %v10367_v47, %v10367_v47  ;;  %v5810_v28 = vmul.f32 %v10329_v39, %v10329_v39  ;;  %v5799_v55 = vmul.f32 %v10370_v16, %v10370_v16 }
 0x92a   :  { %v5831_v52 = vadd.f32 %v5830_v11, %v5806_v46  ;;  %v5814_v13 = vmul.f32 %v10335_v20, %v10335_v20  ;;  %v5801_v40 = vmul.f32 %v10373_v30, %v10373_v30  ;;  %v5803_v48 = vmul.f32 %v10376_v7, %v10376_v7 }
 0x92b   :  { %v5847_v21 = vadd.f32 %v5797_v12, %v5795_v32  ;;  %v5805_v24 = vmul.f32 %v10379_v62, %v10379_v62  ;;  %v5820_v59 = vmul.f32 %v10342_v38, %v10342_v38  ;;  %v5807_v8 = vmul.f32 %v10382_v57, %v10382_v57 }
 0x92c   :  { %v5832_v33 = vadd.f32 %v5831_v52, %v5808_v2  ;;  %v5822_v14 = vmul.f32 %v10344_v0, %v10344_v0  ;;  %v5809_v46 = vmul.f32 %v10385_v1, %v10385_v1  ;;  %v5824_v11 = vmul.f32 %v10346_v3, %v10346_v3 }
 0x92d   :  { %v5848_v60 = vadd.f32 %v5847_v21, %v5799_v55  ;;  %v5811_v52 = vmul.f32 %v10388_v44, %v10388_v44 }
 0x92e   :  { %v5833_v31 = vadd.f32 %v5832_v33, %v5810_v28  ;;  %v5813_v28 = vmul.f32 %v10391_v54, %v10391_v54 }
 0x92f   :  { %v5849_v5 = vadd.f32 %v5848_v60, %v5801_v40  ;;  %v5819_v60 = vmul.f32 %v10400_v10, %v10400_v10 }
 0x930   :  { %v5834_v56 = vadd.f32 %v5833_v31, %v5812_v9  ;;  %v5815_v31 = vmul.f32 %v10394_v61, %v10394_v61 }
 0x931   :  { %v5850_v26 = vadd.f32 %v5849_v5, %v5803_v48  ;;  %v5821_v48 = vmul.f32 %v10403_v41, %v10403_v41 }
 0x932   :  { %v5835_v42 = vadd.f32 %v5834_v56, %v5814_v13  ;;  %v5817_v13 = vmul.f32 %v10397_v45, %v10397_v45 }
 0x933   :  { %v5851_v25 = vadd.f32 %v5850_v26, %v5805_v24 }
 0x934   :  { %v5836_v34 = vadd.f32 %v5835_v42, %v5816_v37 }
 0x935   :  { %v5852_v15 = vadd.f32 %v5851_v25, %v5807_v8 }
 0x936   :  { %v5837_v58 = vadd.f32 %v5836_v34, %v5818_v53  ;;  %v5823_v34 = vmul.f32 %v10408_v29, %v10408_v29 }
 0x937   :  { %v5853_v32 = vadd.f32 %v5852_v15, %v5809_v46 }
 0x938   :  { %v5838_v50 = vadd.f32 %v5837_v58, %v5820_v59  ;;  %v5825_v59 = vmul.f32 %v10410_v43, %v10410_v43 }
 0x939   :  { %v5854_v33 = vadd.f32 %v5853_v32, %v5811_v52 }
 0x93a   :  { %v5839_v2 = vadd.f32 %v5838_v50, %v5822_v14 }
 0x93b   :  { %v5855_v55 = vadd.f32 %v5854_v33, %v5813_v28 }
 0x93c   :  { %v5840_v12 = vadd.f32 %v5839_v2, %v5824_v11 }
 0x93d   :  { %v5856_v56 = vadd.f32 %v5855_v55, %v5815_v31  ;;  %v10461_v31 = vld [vmem:[#allocation14] sm:$0x3] }
 0x93e   :  { %v5841_v9 = vrot.slane %v5840_v12, 4 }
 0x93f   :  { %v5857_v37 = vadd.f32 %v5856_v56, %v5817_v13  ;;  %v10464_v13 = vperm.slane %v10461_v31, 0 }
 0x940   :  { %v5842_v21 = vadd.f32 %v5841_v9, %v5840_v12 }
 0x941   :  { %v5858_v5 = vadd.f32 %v5857_v37, %v5819_v60 }
 0x942   :  { %v5843_v40 = vrot.slane %v5842_v21, 2 }
 0x943   :  { %v5859_v24 = vadd.f32 %v5858_v5, %v5821_v48 }
 0x944   :  { %v5844_v42 = vadd.f32 %v5843_v40, %v5842_v21 }
 0x945   :  { %v5860_v58 = vadd.f32 %v5859_v24, %v5823_v34  ;;  %v10475_v24 = vld [vmem:[#allocation16] sm:$0x3] }
 0x946   :  { %v5845_v53 = vrot.slane %v5844_v42, 1 }
 0x947   :  { %v5861_v25 = vadd.f32 %v5860_v58, %v5825_v59 }
 0x948   :  { %v5846_v26 = vadd.f32 %v5845_v53, %v5844_v42 }
 0x949   :  { %v5862_v50 = vrot.slane %v5861_v25, 4 }
 0x94a   :  { %v5868_v8 = vmul.f32 %v5846_v26, %v11288_v35 }
 0x94b   :  { %v5863_v46 = vadd.f32 %v5862_v50, %v5861_v25  ;;  %v6002_v50 = vld [vmem:[%s10771_s0 + $0x10] sm:$0xff] }
 0x94c   :  { %v5870_v14 = vadd.f32 1e-05, %v5868_v8 }
 0x94d   :  { %v5864_v15 = vrot.slane %v5863_v46, 2 }
 0x94e   :  { %6160 = vrsqrt.f32 %v5870_v14  ;;  %vm5878_vm14 = vweird.f32 %v5870_v14 }
 0x94f   :  { %v5865_v11 = vadd.f32 %v5864_v15, %v5863_v46  ;;  %v6004_v46 = vld [vmem:[%s10771_s0 + $0x20] sm:$0xff] }
 0x951   :  { %v5866_v12 = vrot.slane %v5865_v11, 1 }
 0x953   :  { %v5867_v9 = vadd.f32 %v5866_v12, %v5865_v11 }
 0x954   :  { %v6161_v2 = vpop.eup %6160 }
 0x955   :  { %v5873_v52 = vmul.f32 %v6161_v2, %v5870_v14  ;;  %vm5879_vm13 = vweird.f32 %v6161_v2  ;;  %v5869_v56 = vmul.f32 %v5867_v9, %v11288_v35  ;;  %v6000_v14 = vld [vmem:[%s10771_s0] sm:$0xff]  ;;  %v6010_v9 = vld [vmem:[%s10771_s0 + $0x50] sm:$0xff] }
 0x956   :  { %vm5880_vm15 = vmor %vm5878_vm14, %vm5879_vm13 }
 0x957   :  { %v5874_v32 = vmul.f32 %v6161_v2, %v5873_v52 }
 0x959   :  { %v5875_v28 = vmul.f32 0.5, %v5874_v32 }
 0x95b   :  { %v5876_v33 = vsub.f32 1.5, %v5875_v28  ;;  %v6008_v28 = vld [vmem:[%s10771_s0 + $0x40] sm:$0xff] }
 0x95d   :  { %v5877_v55 = vmul.f32 %v6161_v2, %v5876_v33 }
 0x95f   :  { %v5881_v21 = vsel %vm5880_vm15, %v6161_v2, %v5877_v55  ;;  %v6006_v2 = vld [vmem:[%s10771_s0 + $0x30] sm:$0xff] }
 0x960   :  { %v5892_v40 = vmul.f32 %v5881_v21, %v10305_v51  ;;  %v5894_v60 = vmul.f32 %v5881_v21, %v10308_v4  ;;  %v5896_v37 = vmul.f32 %v5881_v21, %v10311_v6  ;;  %v5898_v42 = vmul.f32 %v5881_v21, %v10314_v23 }
 0x961   :  { %v5900_v48 = vmul.f32 %v5881_v21, %v10317_v18  ;;  %v5902_v5 = vmul.f32 %v5881_v21, %v10320_v17  ;;  %v5904_v53 = vmul.f32 %v5881_v21, %v10323_v49  ;;  %v5906_v34 = vmul.f32 %v5881_v21, %v10326_v19 }
 0x962   :  { %v5908_v35 = vmul.f32 %v5881_v21, %v10329_v39  ;;  %v5910_v51 = vmul.f32 %v5881_v21, %v10332_v27  ;;  %v5912_v4 = vmul.f32 %v5881_v21, %v10335_v20  ;;  %v5914_v6 = vmul.f32 %v5881_v21, %v10338_v36 }
 0x963   :  { %v5916_v23 = vmul.f32 %v5881_v21, %v10340_v22  ;;  %v5918_v18 = vmul.f32 %v5881_v21, %v10342_v38  ;;  %v5920_v17 = vmul.f32 %v5881_v21, %v10344_v0  ;;  %v5922_v49 = vmul.f32 %v5881_v21, %v10346_v3 }
 0x964   :  { %v5930_v19 = vmul.f32 %v10464_v13, %v5892_v40  ;;  %v5932_v26 = vmul.f32 %v10464_v13, %v5894_v60  ;;  %v5934_v39 = vmul.f32 %v10464_v13, %v5896_v37  ;;  %v10489_v27 = vperm.slane %v10475_v24, 0  ;;  %v6012_v37 = vld [vmem:[%s10771_s0 + $0x60] sm:$0xff] }
 0x965   :  { %v5936_v20 = vmul.f32 %v10464_v13, %v5898_v42  ;;  %v5938_v36 = vmul.f32 %v10464_v13, %v5900_v48  ;;  %v5940_v22 = vmul.f32 %v10464_v13, %v5902_v5  ;;  %v10494_v38 = vadd.f32 1e-05, %v5869_v56 }
 0x966   :  { %v5942_v0 = vmul.f32 %v10464_v13, %v5904_v53  ;;  %v5968_v3 = vadd.f32 %v10489_v27, %v5930_v19  ;;  %v5970_v59 = vadd.f32 %v10489_v27, %v5932_v26  ;;  %v5972_v58 = vadd.f32 %v10489_v27, %v5934_v39  ;;  %v6016_v19 = vld [vmem:[%s10771_s0 + $0x80] sm:$0xff] }
 0x967   :  { %v5944_v8 = vmul.f32 %v10464_v13, %v5906_v34  ;;  %v5974_v25 = vadd.f32 %v10489_v27, %v5936_v20  ;;  %v5946_v15 = vmul.f32 %v10464_v13, %v5908_v35  ;;  %v5976_v11 = vadd.f32 %v10489_v27, %v5938_v36  ;;  %v6014_v34 = vld [vmem:[%s10771_s0 + $0x70] sm:$0xff] }
 0x968   :  { %v5948_v52 = vmul.f32 %v10464_v13, %v5910_v51  ;;  %v5950_v32 = vmul.f32 %v10464_v13, %v5912_v4  ;;  %v5978_v12 = vadd.f32 %v10489_v27, %v5940_v22  ;;  %6162 = vrsqrt.f32 %v10494_v38 }
 0x969   :  { %v5980_v33 = vadd.f32 %v10489_v27, %v5942_v0  ;;  %v6032_v55 = vadd.f32 %v6000_v14, %v5968_v3  ;;  %v6034_v21 = vadd.f32 %v6002_v50, %v5970_v59  ;;  %v6036_v56 = vadd.f32 %v6004_v46, %v5972_v58  ;;  %v6020_v3 = vld [vmem:[%s10771_s0 + $0xa0] sm:$0xff] }
 0x96a   :  { %v5952_v40 = vmul.f32 %v10464_v13, %v5914_v6  ;;  %v5982_v60 = vadd.f32 %v10489_v27, %v5944_v8  ;;  %v6038_v42 = vadd.f32 %v6006_v2, %v5974_v25  ;;  %v5954_v48 = vmul.f32 %v10464_v13, %v5916_v23  ;;  %v6022_v25 = vld [vmem:[%s10771_s0 + $0xb0] sm:$0xff] }
 0x96b   :  { %v5956_v5 = vmul.f32 %v10464_v13, %v5918_v18  ;;  %v5984_v53 = vadd.f32 %v10489_v27, %v5946_v15  ;;  %v6040_v35 = vadd.f32 %v6008_v28, %v5976_v11  ;;  %v5958_v51 = vmul.f32 %v10464_v13, %v5920_v17  ;;  %v6018_v18 = vld [vmem:[%s10771_s0 + $0x90] sm:$0xff] }
 0x96c   :  { %v5986_v4 = vadd.f32 %v10489_v27, %v5948_v52  ;;  %v5988_v6 = vadd.f32 %v10489_v27, %v5950_v32  ;;  %v6042_v23 = vadd.f32 %v6010_v9, %v5978_v12  ;;  %v6044_v26 = vadd.f32 %v6012_v37, %v5980_v33  ;;  %v6026_v2 = vld [vmem:[%s10771_s0 + $0xd0] sm:$0xff]  ;;  %v6028_v33 = vld [vmem:[%s10771_s0 + $0xe0] sm:$0xff] }
 0x96d   :  { %v6064_v39 = vmax.f32 %v6032_v55, 0.0  ;;  %v6066_v20 = vmax.f32 %v6034_v21, 0.0  ;;  %v6068_v36 = vmax.f32 %v6036_v56, 0.0  ;;  %v5960_v17 = vmul.f32 %v10464_v13, %v5922_v49  ;;  %v6024_v49 = vld [vmem:[%s10771_s0 + $0xc0] sm:$0xff]  ;;  %v6030_v21 = vld [vmem:[%s10771_s0 + $0xf0] sm:$0xff] }
 0x96e   :  { %v6163_v22 = vpop.eup %6162  ;;  %v5990_v0 = vadd.f32 %v10489_v27, %v5952_v40  ;;  %v6046_v59 = vadd.f32 %v6014_v34, %v5982_v60  ;;  %v6070_v58 = vmax.f32 %v6038_v42, 0.0  ;;  %v5992_v8 = vadd.f32 %v10489_v27, %v5954_v48 }
 0x96f   :  { %v6048_v14 = vadd.f32 %v6016_v19, %v5984_v53  ;;  %v6072_v50 = vmax.f32 %v6040_v35, 0.0  ;;  %6096 = vst [vmem:[%s10781_s10] sm:$0xff] %v6064_v39  ;;  %v5994_v13 = vadd.f32 %v10489_v27, %v5956_v5  ;;  %v6050_v46 = vadd.f32 %v6018_v18, %v5986_v4 }
 0x970   :  { %v6074_v15 = vmax.f32 %v6042_v23, 0.0  ;;  %6098 = vst [vmem:[%s10781_s10 + $0x10] sm:$0xff] %v6066_v20  ;;  %v5996_v11 = vadd.f32 %v10489_v27, %v5958_v51  ;;  %v6052_v52 = vadd.f32 %v6020_v3, %v5988_v6  ;;  %v6076_v32 = vmax.f32 %v6044_v26, 0.0 }
 0x971   :  { %6100 = vst [vmem:[%s10781_s10 + $0x20] sm:$0xff] %v6068_v36  ;;  %v5883_v12 = vmul.f32 %v6163_v22, %v10494_v38  ;;  %v5998_v28 = vadd.f32 %v10489_v27, %v5960_v17  ;;  %v6054_v9 = vadd.f32 %v6022_v25, %v5990_v0  ;;  %v6078_v55 = vmax.f32 %v6046_v59, 0.0 }
 0x972   :  { %6102 = vst [vmem:[%s10781_s10 + $0x30] sm:$0xff] %v6070_v58  ;;  %v6056_v56 = vadd.f32 %v6024_v49, %v5992_v8  ;;  %v6080_v40 = vmax.f32 %v6048_v14, 0.0  ;;  %v6058_v60 = vadd.f32 %v6026_v2, %v5994_v13  ;;  %v6082_v37 = vmax.f32 %v6050_v46, 0.0  ;;  %v6003_v14 = vld [vmem:[%s10771_s0 + $0x18] sm:$0xff] }
 0x973   :  { %6104 = vst [vmem:[%s10781_s10 + $0x40] sm:$0xff] %v6072_v50  ;;  %v5884_v27 = vmul.f32 %v6163_v22, %v5883_v12  ;;  %v6060_v42 = vadd.f32 %v6028_v33, %v5996_v11  ;;  %v6084_v48 = vmax.f32 %v6052_v52, 0.0  ;;  %v6062_v53 = vadd.f32 %v6030_v21, %v5998_v28  ;;  %v6005_v50 = vld [vmem:[%s10771_s0 + $0x28] sm:$0xff]  ;;  %v6007_v46 = vld [vmem:[%s10771_s0 + $0x38] sm:$0xff] }
 0x974   :  { %6106 = vst [vmem:[%s10781_s10 + $0x50] sm:$0xff] %v6074_v15  ;;  %v6086_v34 = vmax.f32 %v6054_v9, 0.0  ;;  %v6088_v35 = vmax.f32 %v6056_v56, 0.0  ;;  %vm5889_vm0 = vweird.f32 %v6163_v22  ;;  %v6090_v4 = vmax.f32 %v6058_v60, 0.0  ;;  %v6009_v52 = vld [vmem:[%s10771_s0 + $0x48] sm:$0xff]  ;;  %v6011_v12 = vld [vmem:[%s10771_s0 + $0x58] sm:$0xff] }
 0x975   :  { %6108 = vst [vmem:[%s10781_s10 + $0x60] sm:$0xff] %v6076_v32  ;;  %v5885_v5 = vmul.f32 0.5, %v5884_v27  ;;  %v6092_v6 = vmax.f32 %v6060_v42, 0.0  ;;  %vm5888_vm1 = vweird.f32 %v10494_v38  ;;  %v6094_v23 = vmax.f32 %v6062_v53, 0.0  ;;  %v6013_v56 = vld [vmem:[%s10771_s0 + $0x68] sm:$0xff]  ;;  %v6015_v42 = vld [vmem:[%s10771_s0 + $0x78] sm:$0xff] }
 0x976   :  { %6110 = vst [vmem:[%s10781_s10 + $0x70] sm:$0xff] %v6078_v55  ;;  %vm5890_vm2 = vmor %vm5888_vm1, %vm5889_vm0  ;;  %v10613_v26 = vperm.slane %v10461_v31, 1 }
 0x977   :  { %6112 = vst [vmem:[%s10781_s10 + $0x80] sm:$0xff] %v6080_v40  ;;  %v5886_v51 = vsub.f32 1.5, %v5885_v5 }
 0x978   :  { %6114 = vst [vmem:[%s10781_s10 + $0x90] sm:$0xff] %v6082_v37 }
 0x979   :  { %6116 = vst [vmem:[%s10781_s10 + $0xa0] sm:$0xff] %v6084_v48  ;;  %v5887_v19 = vmul.f32 %v6163_v22, %v5886_v51 }
 0x97a   :  { %6118 = vst [vmem:[%s10781_s10 + $0xb0] sm:$0xff] %v6086_v34 }
 0x97b   :  { %6120 = vst [vmem:[%s10781_s10 + $0xc0] sm:$0xff] %v6088_v35  ;;  %v5891_v18 = vsel %vm5890_vm2, %v6163_v22, %v5887_v19  ;;  %v6017_v35 = vld [vmem:[%s10771_s0 + $0x88] sm:$0xff] }
 0x97c   :  { %6122 = vst [vmem:[%s10781_s10 + $0xd0] sm:$0xff] %v6090_v4  ;;  %v5893_v38 = vmul.f32 %v5891_v18, %v10364_v63  ;;  %v5895_v39 = vmul.f32 %v5891_v18, %v10367_v47  ;;  %v5897_v20 = vmul.f32 %v5891_v18, %v10370_v16  ;;  %v5899_v36 = vmul.f32 %v5891_v18, %v10373_v30  ;;  %v6019_v4 = vld [vmem:[%s10771_s0 + $0x98] sm:$0xff] }
 0x97d   :  { %6124 = vst [vmem:[%s10781_s10 + $0xe0] sm:$0xff] %v6092_v6  ;;  %v5901_v22 = vmul.f32 %v5891_v18, %v10376_v7  ;;  %v5903_v31 = vmul.f32 %v5891_v18, %v10379_v62  ;;  %v5905_v17 = vmul.f32 %v5891_v18, %v10382_v57  ;;  %v5907_v0 = vmul.f32 %v5891_v18, %v10385_v1 }
 0x97e   :  { %6126 = vst [vmem:[%s10781_s10 + $0xf0] sm:$0xff] %v6094_v23  ;;  %v5909_v63 = vmul.f32 %v5891_v18, %v10388_v44  ;;  %v5911_v47 = vmul.f32 %v5891_v18, %v10391_v54  ;;  %v5913_v16 = vmul.f32 %v5891_v18, %v10394_v61  ;;  %v5915_v30 = vmul.f32 %v5891_v18, %v10397_v45 }
 0x97f   :  { %v5917_v7 = vmul.f32 %v5891_v18, %v10400_v10  ;;  %v5919_v62 = vmul.f32 %v5891_v18, %v10403_v41  ;;  %v5921_v57 = vmul.f32 %v5891_v18, %v10408_v29  ;;  %v5923_v1 = vmul.f32 %v5891_v18, %v10410_v43 }
 0x980   :  { %v5931_v3 = vmul.f32 %v10613_v26, %v5893_v38  ;;  %v5933_v59 = vmul.f32 %v10613_v26, %v5895_v39  ;;  %v5935_v44 = vmul.f32 %v10613_v26, %v5897_v20  ;;  %v10644_v54 = vperm.slane %v10475_v24, 1  ;;  %v6001_v24 = vld [vmem:[%s10771_s0 + $0x8] sm:$0xff] }
 0x981   :  { %v5937_v61 = vmul.f32 %v10613_v26, %v5899_v36  ;;  %v5939_v45 = vmul.f32 %v10613_v26, %v5901_v22  ;;  %v5941_v10 = vmul.f32 %v10613_v26, %v5903_v31  ;;  %v5943_v41 = vmul.f32 %v10613_v26, %v5905_v17  ;;  %v6021_v20 = vld [vmem:[%s10771_s0 + $0xa8] sm:$0xff]  ;;  %v6023_v17 = vld [vmem:[%s10771_s0 + $0xb8] sm:$0xff] }
 0x982   :  { %v5969_v29 = vadd.f32 %v10644_v54, %v5931_v3  ;;  %v5971_v43 = vadd.f32 %v10644_v54, %v5933_v59  ;;  %v5973_v58 = vadd.f32 %v10644_v54, %v5935_v44  ;;  %v5945_v8 = vmul.f32 %v10613_v26, %v5907_v0  ;;  %v6029_v59 = vld [vmem:[%s10771_s0 + $0xe8] sm:$0xff] }
 0x983   :  { %v5975_v25 = vadd.f32 %v10644_v54, %v5937_v61  ;;  %v5947_v13 = vmul.f32 %v10613_v26, %v5909_v63  ;;  %v5977_v49 = vadd.f32 %v10644_v54, %v5939_v45  ;;  %v5949_v15 = vmul.f32 %v10613_v26, %v5911_v47  ;;  %v6025_v47 = vld [vmem:[%s10771_s0 + $0xc8] sm:$0xff]  ;;  %v6031_v45 = vld [vmem:[%s10771_s0 + $0xf8] sm:$0xff] }
 0x984   :  { %v5951_v11 = vmul.f32 %v10613_v26, %v5913_v16  ;;  %v5979_v2 = vadd.f32 %v10644_v54, %v5941_v10  ;;  %v5981_v32 = vadd.f32 %v10644_v54, %v5943_v41  ;;  %v6033_v28 = vadd.f32 %v6001_v24, %v5969_v29 }
 0x985   :  { %v6035_v33 = vadd.f32 %v6003_v14, %v5971_v43  ;;  %v6037_v9 = vadd.f32 %v6005_v50, %v5973_v58  ;;  %v5953_v55 = vmul.f32 %v10613_v26, %v5915_v30  ;;  %v5983_v21 = vadd.f32 %v10644_v54, %v5945_v8 }
 0x986   :  { %v6039_v40 = vadd.f32 %v6007_v46, %v5975_v25  ;;  %v5955_v27 = vmul.f32 %v10613_v26, %v5917_v7  ;;  %v5957_v60 = vmul.f32 %v10613_v26, %v5919_v62  ;;  %v5985_v37 = vadd.f32 %v10644_v54, %v5947_v13  ;;  %v6027_v62 = vld [vmem:[%s10771_s0 + $0xd8] sm:$0xff] }
 0x987   :  { %v6041_v48 = vadd.f32 %v6009_v52, %v5977_v49  ;;  %v5959_v5 = vmul.f32 %v10613_v26, %v5921_v57  ;;  %v5987_v53 = vadd.f32 %v10644_v54, %v5949_v15  ;;  %v5989_v34 = vadd.f32 %v10644_v54, %v5951_v11 }
 0x988   :  { %v6043_v51 = vadd.f32 %v6011_v12, %v5979_v2  ;;  %v6045_v6 = vadd.f32 %v6013_v56, %v5981_v32  ;;  %v6065_v19 = vmax.f32 %v6033_v28, 0.0  ;;  %v6067_v23 = vmax.f32 %v6035_v33, 0.0 }
 0x989   :  { %v6069_v18 = vmax.f32 %v6037_v9, 0.0  ;;  %v5961_v38 = vmul.f32 %v10613_v26, %v5923_v1  ;;  %v5991_v39 = vadd.f32 %v10644_v54, %v5953_v55  ;;  %v6047_v36 = vadd.f32 %v6015_v42, %v5983_v21 }
 0x98a   :  { %v6071_v22 = vmax.f32 %v6039_v40, 0.0  ;;  %v5993_v31 = vadd.f32 %v10644_v54, %v5955_v27  ;;  %v6049_v0 = vadd.f32 %v6017_v35, %v5985_v37  ;;  %v6073_v63 = vmax.f32 %v6041_v48, 0.0  ;;  %6097 = vst [vmem:[%s10781_s10 + $0x8] sm:$0xff] %v6065_v19 }
 0x98b   :  { %v5995_v26 = vadd.f32 %v10644_v54, %v5957_v60  ;;  %v6051_v16 = vadd.f32 %v6019_v4, %v5987_v53  ;;  %v6075_v30 = vmax.f32 %v6043_v51, 0.0  ;;  %6099 = vst [vmem:[%s10781_s10 + $0x18] sm:$0xff] %v6067_v23  ;;  %v5997_v7 = vadd.f32 %v10644_v54, %v5959_v5 }
 0x98c   :  { %v6053_v57 = vadd.f32 %v6021_v20, %v5989_v34  ;;  %v6077_v1 = vmax.f32 %v6045_v6, 0.0  ;;  %6101 = vst [vmem:[%s10781_s10 + $0x28] sm:$0xff] %v6069_v18  ;;  %v5999_v3 = vadd.f32 %v10644_v54, %v5961_v38  ;;  %v6055_v44 = vadd.f32 %v6023_v17, %v5991_v39 }
 0x98d   :  { %v6079_v61 = vmax.f32 %v6047_v36, 0.0  ;;  %6103 = vst [vmem:[%s10781_s10 + $0x38] sm:$0xff] %v6071_v22  ;;  %v6057_v10 = vadd.f32 %v6025_v47, %v5993_v31  ;;  %v6081_v41 = vmax.f32 %v6049_v0, 0.0  ;;  %v6059_v54 = vadd.f32 %v6027_v62, %v5995_v26 }
 0x98e   :  { %6105 = vst [vmem:[%s10781_s10 + $0x48] sm:$0xff] %v6073_v63  ;;  %v6083_v29 = vmax.f32 %v6051_v16, 0.0  ;;  %v6061_v43 = vadd.f32 %v6029_v59, %v5997_v7  ;;  %v6085_v58 = vmax.f32 %v6053_v57, 0.0  ;;  %v6063_v8 = vadd.f32 %v6031_v45, %v5999_v3 }
 0x98f   :  { %6107 = vst [vmem:[%s10781_s10 + $0x58] sm:$0xff] %v6075_v30  ;;  %v6087_v25 = vmax.f32 %v6055_v44, 0.0  ;;  %v6089_v24 = vmax.f32 %v6057_v10, 0.0  ;;  %v6091_v14 = vmax.f32 %v6059_v54, 0.0 }
 0x990   :  { %6109 = vst [vmem:[%s10781_s10 + $0x68] sm:$0xff] %v6077_v1  ;;  %v6093_v50 = vmax.f32 %v6061_v43, 0.0  ;;  %v6095_v13 = vmax.f32 %v6063_v8, 0.0 }
 0x991   :  { %6111 = vst [vmem:[%s10781_s10 + $0x78] sm:$0xff] %v6079_v61 }
 0x992   :  { %6113 = vst [vmem:[%s10781_s10 + $0x88] sm:$0xff] %v6081_v41 }
 0x993   :  { %6115 = vst [vmem:[%s10781_s10 + $0x98] sm:$0xff] %v6083_v29 }
 0x994   :  { %6117 = vst [vmem:[%s10781_s10 + $0xa8] sm:$0xff] %v6085_v58 }
 0x995   :  { %6119 = vst [vmem:[%s10781_s10 + $0xb8] sm:$0xff] %v6087_v25 }
 0x996   :  { %6121 = vst [vmem:[%s10781_s10 + $0xc8] sm:$0xff] %v6089_v24 }
 0x997   :  { %6123 = vst [vmem:[%s10781_s10 + $0xd8] sm:$0xff] %v6091_v14 }
 0x998   :  { %6125 = vst [vmem:[%s10781_s10 + $0xe8] sm:$0xff] %v6093_v50 }
 0x999   :  { %6127 = vst [vmem:[%s10781_s10 + $0xf8] sm:$0xff] %v6095_v13 }
 0x99a   :  { %6132 = vsyncpa [#allocation4], 1 }
 0x99b   :  { %6133 = vsyncpa [#allocation6], 1 }
 0x99c   :  { %6134 = vsyncpa [#allocation9], 1 }
 0x99d   :  { %6135 = vsyncpa [#allocation12], 1 }
 0x99e   :  { %6136 = vsyncpa [#allocation15], 1 }

</bundles_post_ra>
